<compile_context>
chip_gen: v7x
topology: tpu7x:2x2x1
jax: 0.10.0
libtpu: 0.0.40
codegen_flags: <defaults>
</compile_context>

<pallas_src>
import math
from functools import partial

import jax
import jax.numpy as jnp
from jax import lax
from jax.experimental import pallas as pl
from jax.experimental.pallas import tpu as pltpu


def _make_divisible(v, divisor, min_value=None):
    if min_value is None:
        min_value = divisor
    new_v = max(min_value, int(v + divisor / 2) // divisor * divisor)
    if new_v < 0.9 * v:
        new_v += divisor
    return new_v


# ---------------------------------------------------------------------------
# In-kernel helper: depthwise 3x3 (stride 1, zero pad 1) on a lane-dense slab
# of stacked image rows.
# ---------------------------------------------------------------------------
def _dw3x3_flat(v, w_ref, b_ref, C, masks):
    """v: (R, W*C) f32 stacked rows of Bt images (R = Bt*H);
    w_ref: (9, W*C) per-tap weights ref (BN scale folded, tiled over W);
    b_ref: (1, W*C) bias ref;
    masks: (top, bottom, left, right) broadcastable edge masks
           (row masks (R,1), lane masks (1,W*C))."""
    R, WC = v.shape
    m_top, m_bot, m_left, m_right = masks
    # H-axis (sublane) shifts: XLU roll + per-image edge mask (zero padding).
    rows = (
        jnp.where(m_top, pltpu.roll(v, 1, axis=0), 0.0),          # reads h-1
        v,                                                        # reads h
        jnp.where(m_bot, pltpu.roll(v, R - 1, axis=0), 0.0),      # reads h+1
    )
    acc = None
    for di in range(3):
        r = rows[di]
        # W-axis shifts: lane roll by C (XLU) + edge mask.
        cols = (
            jnp.where(m_left, pltpu.roll(r, C, axis=1), 0.0),        # reads w-1
            r,                                                       # reads w
            jnp.where(m_right, pltpu.roll(r, WC - C, axis=1), 0.0),  # reads w+1
        )
        for dj in range(3):
            tap = di * 3 + dj
            term = cols[dj] * w_ref[pl.ds(tap, 1), :]             # (R,WC)*(1,WC)
            acc = term if acc is None else acc + term
    return acc + b_ref[...]


# ---------------------------------------------------------------------------
# Pallas kernel: Bt images (stacked rows) per grid step.
# ---------------------------------------------------------------------------
def sandglass_kernel(x_ref,                  # (R, W*C)   f32 input, R = Bt*H
                     w1_ref, b1_ref,         # (9, W*C), (1, W*C)  DW1 (BN folded)
                     wf_ref, bf_ref,         # (G, G) bf16, (1, W*C) fused PW
                     w2_ref, b4_ref,         # (9, W*C), (1, W*C)  DW2 (BN folded)
                     out_ref,                # (R, W*C)
                     *, C, H, G):
    R, WC = out_ref.shape
    x = x_ref[...]                                          # (R, W*C) f32

    # Small broadcastable edge masks: per-image row masks (R,1) and lane masks
    # (1,WC); jnp.where broadcasts them against the full (R,WC) operands.
    rowi = lax.broadcasted_iota(jnp.int32, (R, 1), 0) % H
    lane = lax.broadcasted_iota(jnp.int32, (1, WC), 1)
    masks = (rowi >= 1, rowi < H - 1, lane >= C, lane < WC - C)

    # ---- depthwise 3x3 + folded BN + ReLU6 ----------------------------------
    t1 = jnp.clip(_dw3x3_flat(x, w1_ref, b1_ref, C, masks), 0.0, 6.0)

    # ---- fused (PW reduce + BN) o (PW expand + BN) + ReLU6 ------------------
    # One (G,G)=(128,128) bf16 weight tile shared by all lane groups.  WC//G
    # dots over static 128-lane slices (slices at vreg boundaries are free),
    # f32 accumulation on the MXU.
    t1_bf = t1.astype(jnp.bfloat16)
    wf = wf_ref[...]
    parts = [
        jnp.dot(t1_bf[:, g * G:(g + 1) * G], wf,
                preferred_element_type=jnp.float32)
        for g in range(WC // G)
    ]
    t3 = jnp.clip(jnp.concatenate(parts, axis=1) + bf_ref[...], 0.0, 6.0)

    # ---- depthwise 3x3 + folded BN, then residual ---------------------------
    out = _dw3x3_flat(t3, w2_ref, b4_ref, C, masks) + x
    out_ref[...] = out.astype(out_ref.dtype)


# ---------------------------------------------------------------------------
# Wrapper: parameter folding / fusion / tiling + pallas_call glue.
# ---------------------------------------------------------------------------
def _prepare_params(params, W, G=128):
    dw1, s1, b1 = params["dw1"], params["s1"], params["b1"]
    wr, s2, b2 = params["wr"], params["s2"], params["b2"]
    we, s3, b3 = params["we"], params["s3"], params["b3"]
    dw2, s4, b4 = params["dw2"], params["s4"], params["b4"]
    C = dw1.shape[-1]
    assert G % C == 0, "channel count must divide the 128-lane group"
    assert wr.shape[0] == C and we.shape[1] == C, "PW shapes must be C->hid->C"

    tile = lambda a: jnp.tile(a, (1, W))                       # (k, C) -> (k, W*C)

    # Fold BN scales into the depthwise weights; tile per-tap rows over W.
    w1 = tile((dw1 * s1.reshape(1, 1, C)).reshape(9, C))
    b1t = tile(b1)
    w2 = tile((dw2 * s4.reshape(1, 1, C)).reshape(9, C))
    b4t = tile(b4)

    # Fuse the two 1x1 convs + BNs.  NOTE: only valid because this SandGlass
    # config has NO activation between the reduce and expand pointwise convs
    # (the reduce PW is Conv+BN only); other configs must not use this path.
    #   ((x @ wr) * s2 + b2) @ we * s3 + b3 == x @ Wf + bf
    we_s = we * s3                                             # (Hd, C)
    wf = (wr * s2) @ we_s                                      # (C, C)
    bf = b2 @ we_s + b3                                        # (1, C)
    # Per-128-lane-group block-diagonal weight: a single (128,128) MXU weight
    # tile shared by every lane group and every grid step (previously a
    # (W*C, W*C) matrix that was 15/16 zeros).
    wf_grp = jnp.kron(jnp.eye(G // C, dtype=jnp.float32), wf).astype(jnp.bfloat16)
    bft = tile(bf)
    return w1, b1t, wf_grp, bft, w2, b4t


def sandglass_pallas(x_nhwc, params, block_batch=None):
    """SandGlass forward for the stride=1, inp==oup, expand_ratio==2,
    identity_tensor_multiplier==1.0 configuration."""
    B, H, W, C = x_nhwc.shape
    WC = W * C
    G = 128
    assert WC % G == 0, "W*C must be a multiple of 128 (lane width)"
    assert H % 8 == 0, "H must be a multiple of 8 (sublane tile)"

    # All image rows stacked into one lane-dense (B*H, W*C) slab.
    x_flat = x_nhwc.reshape(B * H, WC)
    w1, b1t, wf_grp, bft, w2, b4t = _prepare_params(params, W, G)

    # Batch-block size: several images per grid step (amortize per-step
    # overhead, feed the MXU with M = Bt*H rows) while keeping grid >= 2 so the
    # "parallel" batch axis can shard across both TensorCores on v7x.
    if block_batch is None:
        upper = max(1, B // 2)
        block_batch = max(d for d in (1, 2, 4, 8) if d <= upper and B % d == 0)
    Bt = block_batch
    assert B % Bt == 0
    R = Bt * H
    n_steps = B // Bt

    const = lambda shape: pl.BlockSpec(shape, lambda b: (0,) * len(shape))

    grid_spec = pltpu.PrefetchScalarGridSpec(
        num_scalar_prefetch=0,
        grid=(n_steps,),
        in_specs=[
            pl.BlockSpec((R, WC), lambda b: (b, 0)),
            const((9, WC)), const((1, WC)),
            const((G, G)), const((1, WC)),
            const((9, WC)), const((1, WC)),
        ],
        out_specs=pl.BlockSpec((R, WC), lambda b: (b, 0)),
    )

    # Advisory cost estimate (helps XLA schedule this small custom call).
    flops = 2 * 9 * 2 * B * H * WC + 2 * B * H * WC * G
    bytes_accessed = (2 * B * H * WC * 4                        # x in + out
                      + (2 * 9 * WC + 3 * WC) * 4 + G * G * 2)  # weights/biases

    out_flat = pl.pallas_call(
        partial(sandglass_kernel, C=C, H=H, G=G),
        out_shape=jax.ShapeDtypeStruct((B * H, WC), x_nhwc.dtype),
        grid_spec=grid_spec,
        compiler_params=pltpu.CompilerParams(
            dimension_semantics=("parallel",),   # batch axis -> both TCs on v7x
            vmem_limit_bytes=32 * 1024 * 1024),
        cost_estimate=pl.CostEstimate(flops=flops, transcendentals=0,
                                      bytes_accessed=bytes_accessed),
    )(x_flat, w1, b1t, wf_grp, bft, w2, b4t)

    return out_flat.reshape(B, H, W, C)


# ---------------------------------------------------------------------------
# Pure-JAX f32 reference (exact module semantics, unfused) for correctness.
# ---------------------------------------------------------------------------
def sandglass_ref(x_nhwc, params):
    B, H, W, C = x_nhwc.shape

    def dw3x3(x, w):  # x: (B,H,W,C), w: (3,3,C), stride 1, pad 1
        xp = jnp.pad(x, ((0, 0), (1, 1), (1, 1), (0, 0)))
        acc = jnp.zeros_like(x)
        for di in range(3):
            for dj in range(3):
                acc = acc + xp[:, di:di + H, dj:dj + W, :] * w[di, dj][None, None, None, :]
        return acc

    t1 = jnp.clip(dw3x3(x_nhwc, params["dw1"]) * params["s1"] + params["b1"], 0.0, 6.0)
    t2 = jnp.einsum("bhwc,cd->bhwd", t1, params["wr"]) * params["s2"] + params["b2"]
    t3 = jnp.clip(jnp.einsum("bhwd,dc->bhwc", t2, params["we"]) * params["s3"] + params["b3"],
                  0.0, 6.0)
    out = dw3x3(t3, params["dw2"]) * params["s4"] + params["b4"]
    return out + x_nhwc


# ---------------------------------------------------------------------------
def fold_bn(gamma, beta, mean, var, eps=1e-5):
    scale = gamma / jnp.sqrt(var + eps)
    bias = beta - mean * scale
    return scale[None, :], bias[None, :]


def make_params(key, inp, oup, expand_ratio):
    hidden_dim = inp // expand_ratio
    if hidden_dim < oup / 6.0:
        hidden_dim = math.ceil(oup / 6.0)
        hidden_dim = _make_divisible(hidden_dim, 16)

    ks = jax.random.split(key, 20)
    ki = iter(range(20))
    nrm = lambda shape, scale=0.1: (scale * jax.random.normal(ks[next(ki)], shape)).astype(jnp.float32)
    uni = lambda shape: jax.random.uniform(ks[next(ki)], shape, jnp.float32, 0.5, 1.5)

    params = {}
    params["dw1"] = nrm((3, 3, inp))
    params["s1"], params["b1"] = fold_bn(uni((inp,)), nrm((inp,)), nrm((inp,)), uni((inp,)))
    params["wr"] = nrm((inp, hidden_dim))
    params["s2"], params["b2"] = fold_bn(uni((hidden_dim,)), nrm((hidden_dim,)),
                                         nrm((hidden_dim,)), uni((hidden_dim,)))
    params["we"] = nrm((hidden_dim, oup))
    params["s3"], params["b3"] = fold_bn(uni((oup,)), nrm((oup,)), nrm((oup,)), uni((oup,)))
    params["dw2"] = nrm((3, 3, oup))
    params["s4"], params["b4"] = fold_bn(uni((oup,)), nrm((oup,)), nrm((oup,)), uni((oup,)))
    return params


if __name__ == "__main__":
    # SandGlass(inp=32, oup=32, stride=1, expand_ratio=2)
    B, C, H, W = 8, 32, 16, 16
    key = jax.random.PRNGKey(0)
    kx, kp = jax.random.split(key)

    x_nchw = jax.random.normal(kx, (B, C, H, W), jnp.float32)   # PyTorch layout
    x_nhwc = jnp.transpose(x_nchw, (0, 2, 3, 1))                # kernel layout

    params = make_params(kp, inp=C, oup=C, expand_ratio=2)

    out = sandglass_pallas(x_nhwc, params)
    out = jax.block_until_ready(out)

    ref = sandglass_ref(x_nhwc, params)
    assert out.shape == (B, H, W, C)
    # bf16 MXU inputs (f32 accumulation) for the fused pointwise matmul ->
    # slightly looser tolerance than pure f32.
    assert jnp.allclose(out, ref, atol=1e-2, rtol=1e-2), "mismatch vs reference"

    # back to NCHW if the PyTorch layout is desired downstream
    _ = jnp.transpose(out, (0, 3, 1, 2))

    print("KERNEL_OK")
</pallas_src>

<mosaic_0001>
module attributes {stable_mosaic.version = 11 : i64} {
  func.func @sandglass_kernel(%arg0: i32, %arg1: memref<64x512xf32, #tpu.memory_space<vmem>>, %arg2: memref<9x512xf32, #tpu.memory_space<vmem>>, %arg3: memref<1x512xf32, #tpu.memory_space<vmem>>, %arg4: memref<128x128xbf16, #tpu.memory_space<vmem>>, %arg5: memref<1x512xf32, #tpu.memory_space<vmem>>, %arg6: memref<9x512xf32, #tpu.memory_space<vmem>>, %arg7: memref<1x512xf32, #tpu.memory_space<vmem>>, %arg8: memref<64x512xf32, #tpu.memory_space<vmem>>) attributes {dimension_semantics = [#tpu.dimension_semantics<parallel>], iteration_bounds = array<i64: 2>, scalar_prefetch = 0 : i64, scratch_operands = 0 : i64, tpu.core_type = #tpu.core_type<tc>, window_params = [{transform_indices = @transform_0, window_bounds = array<i64: 64, 512>}, {pipeline_mode = #tpu.pipeline_mode<synchronous>, transform_indices = @transform_1, window_bounds = array<i64: 9, 512>}, {pipeline_mode = #tpu.pipeline_mode<synchronous>, transform_indices = @transform_2, window_bounds = array<i64: 1, 512>}, {pipeline_mode = #tpu.pipeline_mode<synchronous>, transform_indices = @transform_3, window_bounds = array<i64: 128, 128>}, {pipeline_mode = #tpu.pipeline_mode<synchronous>, transform_indices = @transform_4, window_bounds = array<i64: 1, 512>}, {pipeline_mode = #tpu.pipeline_mode<synchronous>, transform_indices = @transform_5, window_bounds = array<i64: 9, 512>}, {pipeline_mode = #tpu.pipeline_mode<synchronous>, transform_indices = @transform_6, window_bounds = array<i64: 1, 512>}, {transform_indices = @transform_7, window_bounds = array<i64: 64, 512>}]} {
    %c0 = arith.constant 0 : index
    %c0_0 = arith.constant 0 : index
    %0 = vector.load %arg1[%c0, %c0_0] : memref<64x512xf32, #tpu.memory_space<vmem>>, vector<64x512xf32>
    %1 = tpu.iota {dimensions = array<i32: 0>} : vector<64x1xi32>
    %c16_i32 = arith.constant 16 : i32
    %c0_i32 = arith.constant 0 : i32
    %2 = arith.cmpi eq, %c16_i32, %c0_i32 : i32
    %c1_i32 = arith.constant 1 : i32
    %3 = arith.select %2, %c1_i32, %c16_i32 : i32
    %4 = vector.broadcast %3 : i32 to vector<64x1xi32>
    %5 = arith.remsi %1, %4 : vector<64x1xi32>
    %c0_i32_1 = arith.constant 0 : i32
    %6 = vector.broadcast %c0_i32_1 : i32 to vector<64x1xi32>
    %7 = arith.cmpi ne, %5, %6 : vector<64x1xi32>
    %c0_i32_2 = arith.constant 0 : i32
    %8 = vector.broadcast %c0_i32_2 : i32 to vector<64x1xi32>
    %9 = arith.cmpi slt, %5, %8 : vector<64x1xi32>
    %c0_i32_3 = arith.constant 0 : i32
    %10 = arith.cmpi slt, %3, %c0_i32_3 : i32
    %11 = vector.broadcast %10 : i1 to vector<64x1xi1>
    %12 = vector.broadcast %11 : vector<64x1xi1> to vector<64x1xi1>
    %13 = arith.xori %9, %12 : vector<64x1xi1>
    %14 = arith.andi %13, %7 : vector<64x1xi1>
    %15 = vector.broadcast %3 : i32 to vector<64x1xi32>
    %16 = arith.addi %5, %15 : vector<64x1xi32>
    %17 = arith.select %14, %16, %5 : vector<64x1xi1>, vector<64x1xi32>
    %18 = tpu.iota {dimensions = array<i32: 1>} : vector<1x512xi32>
    %c1_i32_4 = arith.constant 1 : i32
    %19 = vector.broadcast %c1_i32_4 : i32 to vector<64x1xi32>
    %20 = arith.cmpi sge, %17, %19 : vector<64x1xi32>
    %c15_i32 = arith.constant 15 : i32
    %21 = vector.broadcast %c15_i32 : i32 to vector<64x1xi32>
    %22 = arith.cmpi slt, %17, %21 : vector<64x1xi32>
    %c32_i32 = arith.constant 32 : i32
    %23 = vector.broadcast %c32_i32 : i32 to vector<1x512xi32>
    %24 = arith.cmpi sge, %18, %23 : vector<1x512xi32>
    %c480_i32 = arith.constant 480 : i32
    %25 = vector.broadcast %c480_i32 : i32 to vector<1x512xi32>
    %26 = arith.cmpi slt, %18, %25 : vector<1x512xi32>
    %c1_i32_5 = arith.constant 1 : i32
    %27 = tpu.dynamic_rotate %0 by %c1_i32_5 dim 0 : vector<64x512xf32>, i32 -> vector<64x512xf32>
    %cst = arith.constant 0.000000e+00 : f32
    %28 = vector.shape_cast %20 : vector<64x1xi1> to vector<64x1xi1>
    %29 = vector.broadcast %28 : vector<64x1xi1> to vector<64x512xi1>
    %30 = vector.broadcast %cst : f32 to vector<64x512xf32>
    %31 = arith.select %29, %27, %30 : vector<64x512xi1>, vector<64x512xf32>
    %c63_i32 = arith.constant 63 : i32
    %32 = tpu.dynamic_rotate %0 by %c63_i32 dim 0 : vector<64x512xf32>, i32 -> vector<64x512xf32>
    %cst_6 = arith.constant 0.000000e+00 : f32
    %33 = vector.shape_cast %22 : vector<64x1xi1> to vector<64x1xi1>
    %34 = vector.broadcast %33 : vector<64x1xi1> to vector<64x512xi1>
    %35 = vector.broadcast %cst_6 : f32 to vector<64x512xf32>
    %36 = arith.select %34, %32, %35 : vector<64x512xi1>, vector<64x512xf32>
    %c32_i32_7 = arith.constant 32 : i32
    %37 = tpu.dynamic_rotate %31 by %c32_i32_7 dim 1 : vector<64x512xf32>, i32 -> vector<64x512xf32>
    %cst_8 = arith.constant 0.000000e+00 : f32
    %38 = vector.shape_cast %24 : vector<1x512xi1> to vector<1x512xi1>
    %39 = vector.broadcast %38 : vector<1x512xi1> to vector<64x512xi1>
    %40 = vector.broadcast %cst_8 : f32 to vector<64x512xf32>
    %41 = arith.select %39, %37, %40 : vector<64x512xi1>, vector<64x512xf32>
    %c480_i32_9 = arith.constant 480 : i32
    %42 = tpu.dynamic_rotate %31 by %c480_i32_9 dim 1 : vector<64x512xf32>, i32 -> vector<64x512xf32>
    %cst_10 = arith.constant 0.000000e+00 : f32
    %43 = vector.shape_cast %26 : vector<1x512xi1> to vector<1x512xi1>
    %44 = vector.broadcast %43 : vector<1x512xi1> to vector<64x512xi1>
    %45 = vector.broadcast %cst_10 : f32 to vector<64x512xf32>
    %46 = arith.select %44, %42, %45 : vector<64x512xi1>, vector<64x512xf32>
    %c0_11 = arith.constant 0 : index
    %c0_12 = arith.constant 0 : index
    %47 = vector.load %arg2[%c0_11, %c0_12] : memref<9x512xf32, #tpu.memory_space<vmem>>, vector<1x512xf32>
    %48 = vector.broadcast %47 : vector<1x512xf32> to vector<64x512xf32>
    %49 = arith.mulf %41, %48 : vector<64x512xf32>
    %c1 = arith.constant 1 : index
    %c0_13 = arith.constant 0 : index
    %50 = vector.load %arg2[%c1, %c0_13] : memref<9x512xf32, #tpu.memory_space<vmem>>, vector<1x512xf32>
    %51 = vector.broadcast %50 : vector<1x512xf32> to vector<64x512xf32>
    %52 = arith.mulf %31, %51 : vector<64x512xf32>
    %53 = arith.addf %49, %52 : vector<64x512xf32>
    %c2 = arith.constant 2 : index
    %c0_14 = arith.constant 0 : index
    %54 = vector.load %arg2[%c2, %c0_14] : memref<9x512xf32, #tpu.memory_space<vmem>>, vector<1x512xf32>
    %55 = vector.broadcast %54 : vector<1x512xf32> to vector<64x512xf32>
    %56 = arith.mulf %46, %55 : vector<64x512xf32>
    %57 = arith.addf %53, %56 : vector<64x512xf32>
    %c32_i32_15 = arith.constant 32 : i32
    %58 = tpu.dynamic_rotate %0 by %c32_i32_15 dim 1 : vector<64x512xf32>, i32 -> vector<64x512xf32>
    %cst_16 = arith.constant 0.000000e+00 : f32
    %59 = vector.shape_cast %24 : vector<1x512xi1> to vector<1x512xi1>
    %60 = vector.broadcast %59 : vector<1x512xi1> to vector<64x512xi1>
    %61 = vector.broadcast %cst_16 : f32 to vector<64x512xf32>
    %62 = arith.select %60, %58, %61 : vector<64x512xi1>, vector<64x512xf32>
    %c480_i32_17 = arith.constant 480 : i32
    %63 = tpu.dynamic_rotate %0 by %c480_i32_17 dim 1 : vector<64x512xf32>, i32 -> vector<64x512xf32>
    %cst_18 = arith.constant 0.000000e+00 : f32
    %64 = vector.shape_cast %26 : vector<1x512xi1> to vector<1x512xi1>
    %65 = vector.broadcast %64 : vector<1x512xi1> to vector<64x512xi1>
    %66 = vector.broadcast %cst_18 : f32 to vector<64x512xf32>
    %67 = arith.select %65, %63, %66 : vector<64x512xi1>, vector<64x512xf32>
    %c3 = arith.constant 3 : index
    %c0_19 = arith.constant 0 : index
    %68 = vector.load %arg2[%c3, %c0_19] : memref<9x512xf32, #tpu.memory_space<vmem>>, vector<1x512xf32>
    %69 = vector.broadcast %68 : vector<1x512xf32> to vector<64x512xf32>
    %70 = arith.mulf %62, %69 : vector<64x512xf32>
    %71 = arith.addf %57, %70 : vector<64x512xf32>
    %c4 = arith.constant 4 : index
    %c0_20 = arith.constant 0 : index
    %72 = vector.load %arg2[%c4, %c0_20] : memref<9x512xf32, #tpu.memory_space<vmem>>, vector<1x512xf32>
    %73 = vector.broadcast %72 : vector<1x512xf32> to vector<64x512xf32>
    %74 = arith.mulf %0, %73 : vector<64x512xf32>
    %75 = arith.addf %71, %74 : vector<64x512xf32>
    %c5 = arith.constant 5 : index
    %c0_21 = arith.constant 0 : index
    %76 = vector.load %arg2[%c5, %c0_21] : memref<9x512xf32, #tpu.memory_space<vmem>>, vector<1x512xf32>
    %77 = vector.broadcast %76 : vector<1x512xf32> to vector<64x512xf32>
    %78 = arith.mulf %67, %77 : vector<64x512xf32>
    %79 = arith.addf %75, %78 : vector<64x512xf32>
    %c32_i32_22 = arith.constant 32 : i32
    %80 = tpu.dynamic_rotate %36 by %c32_i32_22 dim 1 : vector<64x512xf32>, i32 -> vector<64x512xf32>
    %cst_23 = arith.constant 0.000000e+00 : f32
    %81 = vector.shape_cast %24 : vector<1x512xi1> to vector<1x512xi1>
    %82 = vector.broadcast %81 : vector<1x512xi1> to vector<64x512xi1>
    %83 = vector.broadcast %cst_23 : f32 to vector<64x512xf32>
    %84 = arith.select %82, %80, %83 : vector<64x512xi1>, vector<64x512xf32>
    %c480_i32_24 = arith.constant 480 : i32
    %85 = tpu.dynamic_rotate %36 by %c480_i32_24 dim 1 : vector<64x512xf32>, i32 -> vector<64x512xf32>
    %cst_25 = arith.constant 0.000000e+00 : f32
    %86 = vector.shape_cast %26 : vector<1x512xi1> to vector<1x512xi1>
    %87 = vector.broadcast %86 : vector<1x512xi1> to vector<64x512xi1>
    %88 = vector.broadcast %cst_25 : f32 to vector<64x512xf32>
    %89 = arith.select %87, %85, %88 : vector<64x512xi1>, vector<64x512xf32>
    %c6 = arith.constant 6 : index
    %c0_26 = arith.constant 0 : index
    %90 = vector.load %arg2[%c6, %c0_26] : memref<9x512xf32, #tpu.memory_space<vmem>>, vector<1x512xf32>
    %91 = vector.broadcast %90 : vector<1x512xf32> to vector<64x512xf32>
    %92 = arith.mulf %84, %91 : vector<64x512xf32>
    %93 = arith.addf %79, %92 : vector<64x512xf32>
    %c7 = arith.constant 7 : index
    %c0_27 = arith.constant 0 : index
    %94 = vector.load %arg2[%c7, %c0_27] : memref<9x512xf32, #tpu.memory_space<vmem>>, vector<1x512xf32>
    %95 = vector.broadcast %94 : vector<1x512xf32> to vector<64x512xf32>
    %96 = arith.mulf %36, %95 : vector<64x512xf32>
    %97 = arith.addf %93, %96 : vector<64x512xf32>
    %c8 = arith.constant 8 : index
    %c0_28 = arith.constant 0 : index
    %98 = vector.load %arg2[%c8, %c0_28] : memref<9x512xf32, #tpu.memory_space<vmem>>, vector<1x512xf32>
    %99 = vector.broadcast %98 : vector<1x512xf32> to vector<64x512xf32>
    %100 = arith.mulf %89, %99 : vector<64x512xf32>
    %101 = arith.addf %97, %100 : vector<64x512xf32>
    %c0_29 = arith.constant 0 : index
    %c0_30 = arith.constant 0 : index
    %102 = vector.load %arg3[%c0_29, %c0_30] : memref<1x512xf32, #tpu.memory_space<vmem>>, vector<1x512xf32>
    %103 = vector.broadcast %102 : vector<1x512xf32> to vector<64x512xf32>
    %104 = arith.addf %101, %103 : vector<64x512xf32>
    %cst_31 = arith.constant 0.000000e+00 : f32
    %cst_32 = arith.constant 6.000000e+00 : f32
    %105 = vector.broadcast %cst_31 : f32 to vector<64x512xf32>
    %106 = arith.maximumf %105, %104 : vector<64x512xf32>
    %107 = vector.broadcast %cst_32 : f32 to vector<64x512xf32>
    %108 = arith.minimumf %107, %106 : vector<64x512xf32>
    %109 = arith.truncf %108 : vector<64x512xf32> to vector<64x512xbf16>
    %c0_33 = arith.constant 0 : index
    %c0_34 = arith.constant 0 : index
    %110 = vector.load %arg4[%c0_33, %c0_34] : memref<128x128xbf16, #tpu.memory_space<vmem>>, vector<128x128xbf16>
    %111 = vector.extract_strided_slice %109 {offsets = [0, 0], sizes = [64, 128], strides = [1, 1]} : vector<64x512xbf16> to vector<64x128xbf16>
    %cst_35 = arith.constant dense<0.000000e+00> : vector<64x128xf32>
    %112 = tpu.matmul %111, %110, %cst_35 {dimension_numbers = #tpu.dot_dimension_numbers<[1], [0], [0], [1], [0, 0, 1, 1], [], []>} : vector<64x128xbf16>, vector<128x128xbf16>, vector<64x128xf32> -> vector<64x128xf32>
    %113 = vector.extract_strided_slice %109 {offsets = [0, 128], sizes = [64, 128], strides = [1, 1]} : vector<64x512xbf16> to vector<64x128xbf16>
    %cst_36 = arith.constant dense<0.000000e+00> : vector<64x128xf32>
    %114 = tpu.matmul %113, %110, %cst_36 {dimension_numbers = #tpu.dot_dimension_numbers<[1], [0], [0], [1], [0, 0, 1, 1], [], []>} : vector<64x128xbf16>, vector<128x128xbf16>, vector<64x128xf32> -> vector<64x128xf32>
    %115 = vector.extract_strided_slice %109 {offsets = [0, 256], sizes = [64, 128], strides = [1, 1]} : vector<64x512xbf16> to vector<64x128xbf16>
    %cst_37 = arith.constant dense<0.000000e+00> : vector<64x128xf32>
    %116 = tpu.matmul %115, %110, %cst_37 {dimension_numbers = #tpu.dot_dimension_numbers<[1], [0], [0], [1], [0, 0, 1, 1], [], []>} : vector<64x128xbf16>, vector<128x128xbf16>, vector<64x128xf32> -> vector<64x128xf32>
    %117 = vector.extract_strided_slice %109 {offsets = [0, 384], sizes = [64, 128], strides = [1, 1]} : vector<64x512xbf16> to vector<64x128xbf16>
    %cst_38 = arith.constant dense<0.000000e+00> : vector<64x128xf32>
    %118 = tpu.matmul %117, %110, %cst_38 {dimension_numbers = #tpu.dot_dimension_numbers<[1], [0], [0], [1], [0, 0, 1, 1], [], []>} : vector<64x128xbf16>, vector<128x128xbf16>, vector<64x128xf32> -> vector<64x128xf32>
    %119 = tpu.concatenate %112, %114, %116, %118 in 1 : vector<64x128xf32>, vector<64x128xf32>, vector<64x128xf32>, vector<64x128xf32> -> vector<64x512xf32>
    %c0_39 = arith.constant 0 : index
    %c0_40 = arith.constant 0 : index
    %120 = vector.load %arg5[%c0_39, %c0_40] : memref<1x512xf32, #tpu.memory_space<vmem>>, vector<1x512xf32>
    %121 = vector.broadcast %120 : vector<1x512xf32> to vector<64x512xf32>
    %122 = arith.addf %119, %121 : vector<64x512xf32>
    %cst_41 = arith.constant 0.000000e+00 : f32
    %cst_42 = arith.constant 6.000000e+00 : f32
    %123 = vector.broadcast %cst_41 : f32 to vector<64x512xf32>
    %124 = arith.maximumf %123, %122 : vector<64x512xf32>
    %125 = vector.broadcast %cst_42 : f32 to vector<64x512xf32>
    %126 = arith.minimumf %125, %124 : vector<64x512xf32>
    %c1_i32_43 = arith.constant 1 : i32
    %127 = tpu.dynamic_rotate %126 by %c1_i32_43 dim 0 : vector<64x512xf32>, i32 -> vector<64x512xf32>
    %cst_44 = arith.constant 0.000000e+00 : f32
    %128 = vector.shape_cast %20 : vector<64x1xi1> to vector<64x1xi1>
    %129 = vector.broadcast %128 : vector<64x1xi1> to vector<64x512xi1>
    %130 = vector.broadcast %cst_44 : f32 to vector<64x512xf32>
    %131 = arith.select %129, %127, %130 : vector<64x512xi1>, vector<64x512xf32>
    %c63_i32_45 = arith.constant 63 : i32
    %132 = tpu.dynamic_rotate %126 by %c63_i32_45 dim 0 : vector<64x512xf32>, i32 -> vector<64x512xf32>
    %cst_46 = arith.constant 0.000000e+00 : f32
    %133 = vector.shape_cast %22 : vector<64x1xi1> to vector<64x1xi1>
    %134 = vector.broadcast %133 : vector<64x1xi1> to vector<64x512xi1>
    %135 = vector.broadcast %cst_46 : f32 to vector<64x512xf32>
    %136 = arith.select %134, %132, %135 : vector<64x512xi1>, vector<64x512xf32>
    %c32_i32_47 = arith.constant 32 : i32
    %137 = tpu.dynamic_rotate %131 by %c32_i32_47 dim 1 : vector<64x512xf32>, i32 -> vector<64x512xf32>
    %cst_48 = arith.constant 0.000000e+00 : f32
    %138 = vector.shape_cast %24 : vector<1x512xi1> to vector<1x512xi1>
    %139 = vector.broadcast %138 : vector<1x512xi1> to vector<64x512xi1>
    %140 = vector.broadcast %cst_48 : f32 to vector<64x512xf32>
    %141 = arith.select %139, %137, %140 : vector<64x512xi1>, vector<64x512xf32>
    %c480_i32_49 = arith.constant 480 : i32
    %142 = tpu.dynamic_rotate %131 by %c480_i32_49 dim 1 : vector<64x512xf32>, i32 -> vector<64x512xf32>
    %cst_50 = arith.constant 0.000000e+00 : f32
    %143 = vector.shape_cast %26 : vector<1x512xi1> to vector<1x512xi1>
    %144 = vector.broadcast %143 : vector<1x512xi1> to vector<64x512xi1>
    %145 = vector.broadcast %cst_50 : f32 to vector<64x512xf32>
    %146 = arith.select %144, %142, %145 : vector<64x512xi1>, vector<64x512xf32>
    %c0_51 = arith.constant 0 : index
    %c0_52 = arith.constant 0 : index
    %147 = vector.load %arg6[%c0_51, %c0_52] : memref<9x512xf32, #tpu.memory_space<vmem>>, vector<1x512xf32>
    %148 = vector.broadcast %147 : vector<1x512xf32> to vector<64x512xf32>
    %149 = arith.mulf %141, %148 : vector<64x512xf32>
    %c1_53 = arith.constant 1 : index
    %c0_54 = arith.constant 0 : index
    %150 = vector.load %arg6[%c1_53, %c0_54] : memref<9x512xf32, #tpu.memory_space<vmem>>, vector<1x512xf32>
    %151 = vector.broadcast %150 : vector<1x512xf32> to vector<64x512xf32>
    %152 = arith.mulf %131, %151 : vector<64x512xf32>
    %153 = arith.addf %149, %152 : vector<64x512xf32>
    %c2_55 = arith.constant 2 : index
    %c0_56 = arith.constant 0 : index
    %154 = vector.load %arg6[%c2_55, %c0_56] : memref<9x512xf32, #tpu.memory_space<vmem>>, vector<1x512xf32>
    %155 = vector.broadcast %154 : vector<1x512xf32> to vector<64x512xf32>
    %156 = arith.mulf %146, %155 : vector<64x512xf32>
    %157 = arith.addf %153, %156 : vector<64x512xf32>
    %c32_i32_57 = arith.constant 32 : i32
    %158 = tpu.dynamic_rotate %126 by %c32_i32_57 dim 1 : vector<64x512xf32>, i32 -> vector<64x512xf32>
    %cst_58 = arith.constant 0.000000e+00 : f32
    %159 = vector.shape_cast %24 : vector<1x512xi1> to vector<1x512xi1>
    %160 = vector.broadcast %159 : vector<1x512xi1> to vector<64x512xi1>
    %161 = vector.broadcast %cst_58 : f32 to vector<64x512xf32>
    %162 = arith.select %160, %158, %161 : vector<64x512xi1>, vector<64x512xf32>
    %c480_i32_59 = arith.constant 480 : i32
    %163 = tpu.dynamic_rotate %126 by %c480_i32_59 dim 1 : vector<64x512xf32>, i32 -> vector<64x512xf32>
    %cst_60 = arith.constant 0.000000e+00 : f32
    %164 = vector.shape_cast %26 : vector<1x512xi1> to vector<1x512xi1>
    %165 = vector.broadcast %164 : vector<1x512xi1> to vector<64x512xi1>
    %166 = vector.broadcast %cst_60 : f32 to vector<64x512xf32>
    %167 = arith.select %165, %163, %166 : vector<64x512xi1>, vector<64x512xf32>
    %c3_61 = arith.constant 3 : index
    %c0_62 = arith.constant 0 : index
    %168 = vector.load %arg6[%c3_61, %c0_62] : memref<9x512xf32, #tpu.memory_space<vmem>>, vector<1x512xf32>
    %169 = vector.broadcast %168 : vector<1x512xf32> to vector<64x512xf32>
    %170 = arith.mulf %162, %169 : vector<64x512xf32>
    %171 = arith.addf %157, %170 : vector<64x512xf32>
    %c4_63 = arith.constant 4 : index
    %c0_64 = arith.constant 0 : index
    %172 = vector.load %arg6[%c4_63, %c0_64] : memref<9x512xf32, #tpu.memory_space<vmem>>, vector<1x512xf32>
    %173 = vector.broadcast %172 : vector<1x512xf32> to vector<64x512xf32>
    %174 = arith.mulf %126, %173 : vector<64x512xf32>
    %175 = arith.addf %171, %174 : vector<64x512xf32>
    %c5_65 = arith.constant 5 : index
    %c0_66 = arith.constant 0 : index
    %176 = vector.load %arg6[%c5_65, %c0_66] : memref<9x512xf32, #tpu.memory_space<vmem>>, vector<1x512xf32>
    %177 = vector.broadcast %176 : vector<1x512xf32> to vector<64x512xf32>
    %178 = arith.mulf %167, %177 : vector<64x512xf32>
    %179 = arith.addf %175, %178 : vector<64x512xf32>
    %c32_i32_67 = arith.constant 32 : i32
    %180 = tpu.dynamic_rotate %136 by %c32_i32_67 dim 1 : vector<64x512xf32>, i32 -> vector<64x512xf32>
    %cst_68 = arith.constant 0.000000e+00 : f32
    %181 = vector.shape_cast %24 : vector<1x512xi1> to vector<1x512xi1>
    %182 = vector.broadcast %181 : vector<1x512xi1> to vector<64x512xi1>
    %183 = vector.broadcast %cst_68 : f32 to vector<64x512xf32>
    %184 = arith.select %182, %180, %183 : vector<64x512xi1>, vector<64x512xf32>
    %c480_i32_69 = arith.constant 480 : i32
    %185 = tpu.dynamic_rotate %136 by %c480_i32_69 dim 1 : vector<64x512xf32>, i32 -> vector<64x512xf32>
    %cst_70 = arith.constant 0.000000e+00 : f32
    %186 = vector.shape_cast %26 : vector<1x512xi1> to vector<1x512xi1>
    %187 = vector.broadcast %186 : vector<1x512xi1> to vector<64x512xi1>
    %188 = vector.broadcast %cst_70 : f32 to vector<64x512xf32>
    %189 = arith.select %187, %185, %188 : vector<64x512xi1>, vector<64x512xf32>
    %c6_71 = arith.constant 6 : index
    %c0_72 = arith.constant 0 : index
    %190 = vector.load %arg6[%c6_71, %c0_72] : memref<9x512xf32, #tpu.memory_space<vmem>>, vector<1x512xf32>
    %191 = vector.broadcast %190 : vector<1x512xf32> to vector<64x512xf32>
    %192 = arith.mulf %184, %191 : vector<64x512xf32>
    %193 = arith.addf %179, %192 : vector<64x512xf32>
    %c7_73 = arith.constant 7 : index
    %c0_74 = arith.constant 0 : index
    %194 = vector.load %arg6[%c7_73, %c0_74] : memref<9x512xf32, #tpu.memory_space<vmem>>, vector<1x512xf32>
    %195 = vector.broadcast %194 : vector<1x512xf32> to vector<64x512xf32>
    %196 = arith.mulf %136, %195 : vector<64x512xf32>
    %197 = arith.addf %193, %196 : vector<64x512xf32>
    %c8_75 = arith.constant 8 : index
    %c0_76 = arith.constant 0 : index
    %198 = vector.load %arg6[%c8_75, %c0_76] : memref<9x512xf32, #tpu.memory_space<vmem>>, vector<1x512xf32>
    %199 = vector.broadcast %198 : vector<1x512xf32> to vector<64x512xf32>
    %200 = arith.mulf %189, %199 : vector<64x512xf32>
    %201 = arith.addf %197, %200 : vector<64x512xf32>
    %c0_77 = arith.constant 0 : index
    %c0_78 = arith.constant 0 : index
    %202 = vector.load %arg7[%c0_77, %c0_78] : memref<1x512xf32, #tpu.memory_space<vmem>>, vector<1x512xf32>
    %203 = vector.broadcast %202 : vector<1x512xf32> to vector<64x512xf32>
    %204 = arith.addf %201, %203 : vector<64x512xf32>
    %205 = arith.addf %204, %0 : vector<64x512xf32>
    %c0_79 = arith.constant 0 : index
    %c0_80 = arith.constant 0 : index
    %206 = vector.load %arg8[%c0_79, %c0_80] : memref<64x512xf32, #tpu.memory_space<vmem>>, vector<64x512xf32>
    tpu.vector_store %arg8[%c0_79, %c0_80], %205 {strides = array<i32>} : memref<64x512xf32, #tpu.memory_space<vmem>>, vector<64x512xf32>,
    return
  }
  func.func @transform_0(%arg0: i32) -> (i32, i32) {
    %c0_i32 = arith.constant 0 : i32
    %c0_i32_0 = arith.constant 0 : i32
    return %arg0, %c0_i32 : i32, i32
  }
  func.func @transform_1(%arg0: i32) -> (i32, i32) {
    %c0_i32 = arith.constant 0 : i32
    %c0_i32_0 = arith.constant 0 : i32
    %c0_i32_1 = arith.constant 0 : i32
    return %c0_i32, %c0_i32_0 : i32, i32
  }
  func.func @transform_2(%arg0: i32) -> (i32, i32) {
    %c0_i32 = arith.constant 0 : i32
    %c0_i32_0 = arith.constant 0 : i32
    %c0_i32_1 = arith.constant 0 : i32
    return %c0_i32, %c0_i32_0 : i32, i32
  }
  func.func @transform_3(%arg0: i32) -> (i32, i32) {
    %c0_i32 = arith.constant 0 : i32
    %c0_i32_0 = arith.constant 0 : i32
    %c0_i32_1 = arith.constant 0 : i32
    return %c0_i32, %c0_i32_0 : i32, i32
  }
  func.func @transform_4(%arg0: i32) -> (i32, i32) {
    %c0_i32 = arith.constant 0 : i32
    %c0_i32_0 = arith.constant 0 : i32
    %c0_i32_1 = arith.constant 0 : i32
    return %c0_i32, %c0_i32_0 : i32, i32
  }
  func.func @transform_5(%arg0: i32) -> (i32, i32) {
    %c0_i32 = arith.constant 0 : i32
    %c0_i32_0 = arith.constant 0 : i32
    %c0_i32_1 = arith.constant 0 : i32
    return %c0_i32, %c0_i32_0 : i32, i32
  }
  func.func @transform_6(%arg0: i32) -> (i32, i32) {
    %c0_i32 = arith.constant 0 : i32
    %c0_i32_0 = arith.constant 0 : i32
    %c0_i32_1 = arith.constant 0 : i32
    return %c0_i32, %c0_i32_0 : i32, i32
  }
  func.func @transform_7(%arg0: i32) -> (i32, i32) {
    %c0_i32 = arith.constant 0 : i32
    %c0_i32_0 = arith.constant 0 : i32
    return %arg0, %c0_i32 : i32, i32
  }
}

</mosaic_0001>

<bundles_post_ra>
// kernel: tpu_custom_call.1
= control target key start
LH: loop header
LB: loop body
LE: loop exit
PB: predicated region body
PF: predicated region fallthrough
CT: control target
= control target key end

     0   :  { %s12410_s0 = inlined_call_operand.hbm [shape: f32[128,512], index: 0, kind: input, shape index: {}]   ;;  %s12411_s1 = inlined_call_operand.hbm [shape: f32[9,512], index: 1, kind: input, shape index: {}]   ;;  %s12412_s2 = inlined_call_operand.vmem [shape: f32[1,512], index: 2, kind: input, shape index: {}]   ;;  %s12413_s3 = inlined_call_operand.hbm [shape: bf16[128,128], index: 3, kind: input, shape index: {}]   ;;  %s12414_s4 = inlined_call_operand.vmem [shape: f32[1,512], index: 4, kind: input, shape index: {}]   ;;  %s12415_s5 = inlined_call_operand.hbm [shape: f32[9,512], index: 5, kind: input, shape index: {}]   ;;  %s12416_s6 = inlined_call_operand.vmem [shape: f32[1,512], index: 6, kind: input, shape index: {}]   ;;  %s12417_s7 = inlined_call_operand.hbm [shape: f32[128,512], index: 7, kind: output, shape index: {}]  }
   0x1   :  { %12920 = sst [smem:[#allocation231_spill]] %s12411_s1 }
   0x2   :  { %12 = vsyncpa [#allocation3], 0 }
   0x3   :  { %14 = vsyncpa [#allocation3 + $0x1], 0 }
   0x4   :  { %15 = vsyncpa [#allocation6], 0 }
   0x5   :  { %16 = vsyncpa [#allocation9], 0 }
   0x6   :  { %17 = vsyncpa [#allocation4], 0 }
   0x7   :  { %19 = vsyncpa [#allocation4 + $0x1], 0  ;;  %s5377_s24 = smov 0   ;;  %s5379_s25 = smov 0  }
   0x8   :  { %s5381_s26 = smov 0   ;;  %s5383_s27 = smov 0  }
   0x9 LB: > { %s5398_s28 = sadd.s32 4294967295, %s5323_s27   ;;  %s4794_s29 = sadd.s32 4294967294, %s5323_s27   ;;  %s5323_s27 = sphi %s5383_s27, %s14468_s27   ;;  %s5319_s26 = sphi %s5381_s26, %s14467_s26   ;;  %s5315_s25 = sphi %s5379_s25, %s14466_s25   ;;  %s5311_s24 = sphi %s5377_s24, %s14465_s24  }
   0xa   : > { %p45_p0 = scmp.ne.s32.totalorder %s5315_s25, %s5311_s24  ;;  %p12418_p1 = scmp.eq.s32.totalorder %s5398_s28, 0 }
   0xb   : > { %p201_p3 = scmp.eq.s32.totalorder %s4794_s29, 1  ;;  %p4795_p5 = scmp.ge.s32.totalorder %s5323_s27, 1 }
   0xc   : > { %p5407_p4 = por %p12418_p1, %p45_p0  ;;  %p208_p7 = scmp.lt.s32.totalorder %s5323_s27, 3 }
   0xd   : > { %p5412_p6 = por %p201_p3, %p45_p0  ;;  %s5325_s10 = smov [#allocation5]  }
   0xe   : > { %s12921_s30 = scalar_select %p5407_p4, 1, 0 }
   0xf   : > { %s12922_s8 = scalar_select %p5412_p6, 1, 0 }
  0x10   : > { %p5417_p8 = pnand %p4795_p5, %p208_p7  ;;  %s220_s11 = sshll.u32 %s5325_s10, 4  ;;  %s5421_s11 = int_to_ptr.vmem [resolvable:$true] %s220_s11 }
  0x11   : > { %12923 = sst [smem:[#allocation15_spill]] %s12922_s8  ;;  %s5326_s13 = smov [#allocation7]  }
  0x12   : > { %s12924_s9 = scalar_select %p5417_p8, 1, 0 }
  0x13   : > { %p4988_p9 = pneg %p5417_p8  ;;  %s236_s14 = sshll.u32 %s5326_s13, 4  ;;  %s5432_s14 = int_to_ptr.vmem [resolvable:$true] %s236_s14 }
  0x14   : > { %s12926_s1 = sld [smem:[#allocation231_spill]] }
  0x15   : > { %p5428_p11 = pnand %p4988_p9, %p12418_p1 }
  0x17   : > { %p5442_p13 = pneg %p5428_p11 }
  0x1a   : > { %s5135_s17 = scalar_lea.hbm %s12926_s1, 1024 }
  0x1b   : > { %p5136_p12 = scmp.ne.s32.totalorder %s12926_s1, %s5135_s17  ;;  %p5142_p5 = scmp.lt.u32.totalorder %s5135_s17, %s12926_s1 }
  0x1d   : > { %p5138_p0 = pnand %p5442_p13, %p5136_p12 }
  0x1f   : > { %p5139_p3 = pneg %p5138_p0 }
  0x21   : > { %p5144_p7 = pnand %p5142_p5, %p5139_p3 }
  0x23   : > { %5147 = shalt.err (!%p5144_p7)
}
  0x24   : > { %s5148_s23 = scalar_lea.vmem %s5421_s11, 1024  ;;  %p5156_p2 = scmp.lt.s32.totalorder %s5421_s11, %s5421_s11 }
  0x25   : > { %p5149_p9 = scmp.ne.s32.totalorder %s5421_s11, %s5148_s23  ;;  %p5157_p6 = scmp.lt.s32.totalorder %s5148_s23, %s5148_s23 }
  0x27   : > { %p5151_p10 = pnand %p5149_p9, %p5442_p13  ;;  %p5158_p12 = por %p5157_p6, %p5156_p2 }
  0x29   : > { %p5152_p1 = pneg %p5151_p10 }
  0x2b   : > { %p5159_p0 = pnand %p5158_p12, %p5152_p1 }
  0x2d   : > { %5162 = shalt.err (!%p5159_p0)
}
  0x2e   : > { %s12419_s29 = smov 512   ;;  %s12421_s10 = smov 32  }
  0x2f   : > { %4991 = dma.hbm_to_vmem [thread:$0]  (!%p5428_p11), %s12926_s1, 1024, %s5421_s11, [#allocation6], %s12419_s29, %s12419_s29, %s12421_s10  }
  0x30   : > { %s5163_s18 = scalar_lea.hbm %s12413_s3, 1024 }
  0x31   : > { %p5164_p1 = scmp.ne.s32.totalorder %s12413_s3, %s5163_s18  ;;  %p5170_p10 = scmp.lt.u32.totalorder %s5163_s18, %s12413_s3 }
  0x33   : > { %p5166_p2 = pnand %p5164_p1, %p5442_p13 }
  0x35   : > { %p5167_p6 = pneg %p5166_p2 }
  0x37   : > { %p5172_p3 = pnand %p5170_p10, %p5167_p6 }
  0x39   : > { %5175 = shalt.err (!%p5172_p3)
}
  0x3a   : > { %s5176_s11 = scalar_lea.vmem %s5432_s14, 1024  ;;  %p5184_p12 = scmp.lt.s32.totalorder %s5432_s14, %s5432_s14 }
  0x3b   : > { %p5177_p5 = scmp.ne.s32.totalorder %s5432_s14, %s5176_s11  ;;  %p5185_p0 = scmp.lt.s32.totalorder %s5176_s11, %s5176_s11 }
  0x3d   : > { %p5179_p7 = pnand %p5177_p5, %p5442_p13  ;;  %p5186_p1 = por %p5185_p0, %p5184_p12 }
  0x3f   : > { %p5180_p9 = pneg %p5179_p7 }
  0x41   : > { %p5187_p2 = pnand %p5186_p1, %p5180_p9 }
  0x43   : > { %5190 = shalt.err (!%p5187_p2)
}
  0x44   : > { %s5329_s13 = smov 64   ;;  %s5330_s15 = smov 4  }
  0x45   : > { %4994 = dma.hbm_to_vmem [thread:$0]  (!%p5428_p11), %s12413_s3, 1024, %s5432_s14, [#allocation6], %s5329_s13, %s5329_s13, %s5330_s15  }
  0x46   : > { %s5331_s18 = smov [#allocation8]   ;;  %s5490_s21 = sadd.s32 1, %s5323_s27  }
  0x47   : > { %s252_s19 = sshll.u32 %s5331_s18, 4  ;;  %s5191_s11 = scalar_lea.hbm %s12415_s5, 1024  ;;  %s253_s19 = int_to_ptr.vmem [resolvable:$true] %s252_s19 }
  0x48   : > { %p5192_p6 = scmp.ne.s32.totalorder %s12415_s5, %s5191_s11  ;;  %p5198_p5 = scmp.lt.u32.totalorder %s5191_s11, %s12415_s5 }
  0x4a   : > { %p5194_p10 = pnand %p5192_p6, %p5442_p13 }
  0x4c   : > { %p5195_p3 = pneg %p5194_p10 }
  0x4e   : > { %p5200_p7 = pnand %p5198_p5, %p5195_p3 }
  0x50   : > { %5203 = shalt.err (!%p5200_p7)
}
  0x51   : > { %s5204_s14 = scalar_lea.vmem %s253_s19, 1024  ;;  %p5212_p1 = scmp.lt.s32.totalorder %s253_s19, %s253_s19 }
  0x52   : > { %p5205_p9 = scmp.ne.s32.totalorder %s253_s19, %s5204_s14  ;;  %p5213_p2 = scmp.lt.s32.totalorder %s5204_s14, %s5204_s14 }
  0x54   : > { %p5207_p12 = pnand %p5205_p9, %p5442_p13  ;;  %p5214_p4 = por %p5213_p2, %p5212_p1 }
  0x56   : > { %p5208_p0 = pneg %p5207_p12 }
  0x58   : > { %p5215_p8 = pnand %p5214_p4, %p5208_p0 }
  0x5a   : > { %5218 = shalt.err (!%p5215_p8)
}
  0x5b   : > { %s12928_s29 = smov 32   ;;  %s12929_s10 = smov 512  }
  0x5c   : > { %4997 = dma.hbm_to_vmem [thread:$0]  (!%p5428_p11), %s12415_s5, 1024, %s253_s19, [#allocation9], %s12929_s10, %s12929_s10, %s12928_s29  }
  0x5d   : > { %s29_s20 = ssub.s32 %s5323_s27, %s5490_s21  ;;  %s32_s12 = sadd.s32 1, %s5319_s26 }
  0x5e   : > { %p30_p4 = scmp.eq.s32.totalorder %s29_s20, 0  ;;  %p39_p8 = scmp.ne.s32.totalorder %s5319_s26, %s5315_s25 }
  0x5f   : > { %p40_p13 = scmp.eq.s32.totalorder %s5323_s27, 0  ;;  %p5009_p6 = scmp.lt.s32.totalorder %s5323_s27, 2 }
  0x60   : > { %s5521_s13 = scalar_select %p30_p4, %s5319_s26, %s32_s12  }
  0x61   : > { %p41_p10 = por %p40_p13, %p39_p8  ;;  %p12930_p3 = scmp.eq.s32.totalorder %s5398_s28, 1 }
  0x62   : > { %s269_s16 = sand.u32 1, %s5319_s26   ;;  %s4825_s17 = sshll.u32 %s5323_s27, 12 }
  0x63   : > { %p5525_p5 = por %p12930_p3, %p39_p8  ;;  %s4800_s18 = sshll.u32 %s269_s16, 8 }
  0x64   : > { %s5534_s19 = scalar_lea.hbm %s12410_s0, %s4825_s17  ;;  %s273_s11 = scalar_lea.vmem [#allocation2], %s4800_s18 }
  0x65   : > { %s281_s14 = sshll.u32 %s273_s11, 4  ;;  %p5536_p11 = pnand %p5009_p6, %p41_p10  ;;  %s5540_s14 = int_to_ptr.vmem [resolvable:$true] %s281_s14 }
  0x66   : > { %s5542_s8 = scalar_lea.sflag [#allocation3], %s269_s16  ;;  %s5219_s20 = scalar_lea.hbm %s5534_s19, 4096 }
  0x67   : > { %p5220_p7 = scmp.ne.s32.totalorder %s5534_s19, %s5219_s20  ;;  %p5221_p9 = pneg %p5536_p11 }
  0x68   : > { %s5224_s18 = scalar_lea.hbm %s12410_s0, 8192  ;;  %p5225_p1 = scmp.lt.u32.totalorder %s5534_s19, %s12410_s0 }
  0x69   : > { %p5222_p12 = pnand %p5221_p9, %p5220_p7  ;;  %p5226_p2 = scmp.lt.u32.totalorder %s5224_s18, %s5219_s20 }
  0x6a   : > { %p5228_p8 = scmp.lt.u32.totalorder %s5219_s20, %s5534_s19 }
  0x6b   : > { %p5223_p0 = pneg %p5222_p12  ;;  %p5227_p4 = por %p5226_p2, %p5225_p1 }
  0x6d   : > { %p5229_p13 = por %p5228_p8, %p5227_p4 }
  0x6f   : > { %p5230_p6 = pnand %p5229_p13, %p5223_p0 }
  0x71   : > { %5233 = shalt.err (!%p5230_p6)
}
  0x72   : > { %s5234_s16 = scalar_lea.vmem %s5540_s14, 4096  ;;  %s5332_s11 = smov [#allocation2]  }
  0x73   : > { %p5235_p10 = scmp.ne.s32.totalorder %s5540_s14, %s5234_s16  ;;  %s5239_s12 = sshll.u32 %s5332_s11, 4  ;;  %s5240_s12 = int_to_ptr.vmem [resolvable:$false] %s5239_s12 }
  0x74   : > { %s5241_s17 = scalar_lea.vmem %s5240_s12, 8192  ;;  %p5242_p12 = scmp.lt.s32.totalorder %s5540_s14, %s5240_s12 }
  0x75   : > { %p5237_p3 = pnand %p5235_p10, %p5221_p9  ;;  %p5243_p1 = scmp.lt.s32.totalorder %s5241_s17, %s5234_s16 }
  0x77   : > { %p5238_p7 = pneg %p5237_p3  ;;  %p5244_p2 = por %p5243_p1, %p5242_p12 }
  0x79   : > { %p5245_p4 = pnand %p5244_p2, %p5238_p7 }
  0x7b   : > { %5248 = shalt.err (!%p5245_p4)
}
  0x7c   : > { %5001 = dma.hbm_to_vmem [thread:$0]  (!%p5536_p11), %s5534_s19, 4096, %s5540_s14, %s5542_s8, %s12929_s10, %s12929_s10, %s12928_s29  }
  0x7d   : > { %p12933_p9 = scmp.ne.s32.totalorder %s12924_s9, 0 }
  0x7f   : > { %293 = sbr.rel (%p12933_p9) target bundleno = 1433 (0x599), region = 48 }
  0x86   : > { %s5576_s20 = sand.u32 1, %s5315_s25   ;;  %p12934_p0 = scmp.ne.s32.totalorder %s12921_s30, 0 }
  0x87   : > { %s4805_s18 = sshll.u32 %s5576_s20, 8  ;;  %s296_s22 = scalar_lea.sflag [#allocation3], %s5576_s20 }
  0x88   : > { %s5582_s1 = scalar_lea.vmem [#allocation2], %s4805_s18 }
  0x89   : > { %5294 = dma.done.wait (%p12934_p0), %s296_s22, 4096  }
  0x8a   : > { %5296 = vsyncadd (%p12934_p0), %s296_s22, 4294963200  ;;  %p12935_p11 = scmp.eq.s32.totalorder %s5398_s28, 0 }
  0x8c   : > { %5298 = dma.done.wait (%p12935_p11), [#allocation6], 2048   ;;  %p12936_p8 = pmov %p12935_p11 }
  0x8e   : > { %5300 = vsyncadd (%p12936_p8), [#allocation6], 4294965248  ;;  %p12937_p13 = pmov %p12936_p8 }
  0x8f   : > { %p12938_p6 = pmov %p12936_p8 }
  0x90   : > { %5302 = dma.done.wait (%p12937_p13), [#allocation9], 1024  }
  0x91   : > { %5304 = vsyncadd (%p12938_p6), [#allocation9], 4294966272  ;;  %v12426_v0 = vlaneseq  ;;  %v5602_v4 = vld [vmem:[%s5582_s1 + $0x40] sm:$0xff]  ;;  %v12940_v13 = vmov 0  ;;  %s5333_s30 = smov 32   ;;  %v12943_v30 = vmov 0 }
  0x92   : > { %v5605_v5 = vld [vmem:[%s5582_s1 + $0x60] sm:$0xff]  ;;  %v519_v8 = vrot.slane %v5602_v4, 7  ;;  %v5669_v33 = vld [vmem:[%s5582_s1 + $0x8] sm:$0xff]  ;;  %v12946_v36 = vmov 0  ;;  %v12949_v42 = vmov 0  ;;  %s5334_s9 = smov 96  }
  0x93   : > { %v5597_v1 = vshrl.u32 %v12426_v0, 7  ;;  %v523_v9 = vrot.slane %v5605_v5, 7  ;;  %v5613_v10 = vld [vmem:[%s5582_s1] sm:$0xff]  ;;  %v5672_v34 = vld [vmem:[%s5582_s1 + $0xe8] sm:$0xff]  ;;  %v512_v40 = vrot.slane %v5669_v33, 7  ;;  %v5896_v0 = vld [vmem:[%s5582_s1 + $0x78] sm:$0xff] }
  0x94   : > { %v5616_v11 = vld [vmem:[%s5582_s1 + $0x20] sm:$0xff]  ;;  %v511_v14 = vrot.slane %v5613_v10, 7  ;;  %v5689_v38 = vld [vmem:[%s5582_s1 + $0x28] sm:$0xff]  ;;  %v540_v41 = vrot.slane %v5672_v34, 7  ;;  %12962 = vst [vmem:[#allocation31_spill] sm:$0xff] %v5896_v0  ;;  %s12005_s16 = scalar_lea.vmem [#allocation10], %s4805_s18 }
  0x95   : > { %12939 = vst [vmem:[#allocation16_spill] sm:$0xff] %v5597_v1  ;;  %v390_v2 = vand.u32 15, %v5597_v1  ;;  %v382_v3 = vadd.s32 32, %v5597_v1  ;;  %vm543_vm0 = vcmp.lt.s32.totalorder %v5597_v1, 1  ;;  %v380_v6 = vadd.s32 16, %v5597_v1  ;;  %v5619_v12 = vld [vmem:[%s5582_s1 + $0x80] sm:$0xff] }
  0x96   : > { %v384_v7 = vadd.s32 48, %v5597_v1  ;;  %v515_v15 = vrot.slane %v5616_v11, 7  ;;  %v5628_v16 = vld [vmem:[%s5582_s1 + $0xa0] sm:$0xff]  ;;  %v527_v17 = vrot.slane %v5619_v12, 7  ;;  %v5639_v20 = vsel %vm543_vm0, %v519_v8, %v523_v9  ;;  %v5711_v46 = vld [vmem:[%s5582_s1 + $0x48] sm:$0xff]  ;;  %s4827_s11 = sshll.u32 %s5398_s28, 12 }
  0x97   : > { %vm5621_vm1 = vcmp.ge.s32.totalorder %v390_v2, 1  ;;  %v5632_v18 = vld [vmem:[%s5582_s1 + $0xe0] sm:$0xff]  ;;  %v531_v21 = vrot.slane %v5628_v16, 7  ;;  %v418_v23 = vand.u32 15, %v382_v3  ;;  %743 = vrot.lane.b32.xlu1 %v5639_v20, %s5333_s30  ;;  %v404_v28 = vand.u32 15, %v380_v6  ;;  %v5722_v49 = vld [vmem:[%s5582_s1 + $0x68] sm:$0xff]  ;;  %s12357_s22 = scalar_lea.hbm %s12417_s7, %s4827_s11 }
  0x98   : > { %v12941_v13 = vsel %vm5621_vm1, 4294967295, %v12940_v13  ;;  %v5635_v19 = vld [vmem:[%s5582_s1 + $0xc0] sm:$0xff]  ;;  %v539_v22 = vrot.slane %v5632_v18, 7  ;;  %v5647_v24 = vsel %vm543_vm0, %v511_v14, %v515_v15  ;;  %v556_v31 = vsel %vm543_vm0, %v523_v9, %v527_v17  ;;  %v5726_v51 = vld [vmem:[%s5582_s1 + $0x88] sm:$0xff]  ;;  %v5769_v2 = vld [vmem:[%s5582_s1 + $0x10] sm:$0xff]  ;;  %s4692_s12 = sshll.u32 %s12005_s16, 4  ;;  %s12363_s12 = int_to_ptr.vmem [resolvable:$true] %s4692_s12 }
  0x99   : > { %12942 = vst [vmem:[#allocation17_spill] sm:$0xff] %v12941_v13  ;;  %739 = vrot.lane.b32.xlu0 %v5647_v24, %s5333_s30  ;;  %v5653_v25 = vsel %vm543_vm0, %v527_v17, %v531_v21  ;;  %v535_v27 = vrot.slane %v5635_v19, 7  ;;  %vm5662_vm2 = vcmp.ge.s32.totalorder %v418_v23, 1  ;;  %v432_v32 = vand.u32 15, %v384_v7  ;;  %v5731_v52 = vld [vmem:[%s5582_s1 + $0xa8] sm:$0xff]  ;;  %12952 = vst [vmem:[#allocation21_spill] sm:$0xff] %v5769_v2 }
  0x9a   : > { %v572_v26 = vsel %vm543_vm0, %v539_v22, %v511_v14  ;;  %v12944_v30 = vsel %vm5662_vm2, 4294967295, %v12943_v30  ;;  %vm5682_vm3 = vcmp.ge.s32.totalorder %v404_v28, 1  ;;  %v564_v37 = vsel %vm543_vm0, %v515_v15, %v519_v8  ;;  %v5750_v58 = vld [vmem:[%s5582_s1 + $0xc8] sm:$0xff]  ;;  %v5772_v3 = vld [vmem:[%s5582_s1 + $0xf0] sm:$0xff]  ;;  %s4678_s28 = scalar_lea.sflag [#allocation4], %s5576_s20  ;;  %s5335_s29 = smov [#allocation10]  }
  0x9b   : > { %v5660_v29 = vsel %vm5621_vm1, %v572_v26, 0.0  ;;  %12945 = vst [vmem:[#allocation18_spill] sm:$0xff] %v12944_v30  ;;  %747 = vrot.lane.b32.xlu1 %v5653_v25, %s5333_s30  ;;  %v5680_v35 = vsel %vm543_vm0, %v535_v27, %v539_v22  ;;  %v12947_v36 = vsel %vm5682_vm3, 4294967295, %v12946_v36  ;;  %v5693_v39 = vsel %vm5662_vm2, %v556_v31, 0.0  ;;  %12953 = vst [vmem:[#allocation22_spill] sm:$0xff] %v5772_v3  ;;  %v5785_v8 = vld [vmem:[%s5582_s1 + $0x30] sm:$0xff] }
  0x9c   : > { %12948 = vst [vmem:[#allocation19_spill] sm:$0xff] %v12947_v36  ;;  %vm5697_vm4 = vcmp.ge.s32.totalorder %v432_v32, 1  ;;  %v548_v43 = vsel %vm543_vm0, %v531_v21, %v535_v27  ;;  %v5707_v44 = vsel %vm5682_vm3, %v564_v37, 0.0  ;;  %v516_v45 = vrot.slane %v5689_v38, 7  ;;  %v5794_v17 = vld [vmem:[%s5582_s1 + $0x50] sm:$0xff]  ;;  %s5253_s10 = sshll.u32 %s5335_s29, 4  ;;  %s5254_s10 = int_to_ptr.vmem [resolvable:$false] %s5253_s10 }
  0x9d   : > { %737 = vrot.lane.b32.xlu0 %v5660_v29, %s5333_s30  ;;  %v12950_v42 = vsel %vm5697_vm4, 4294967295, %v12949_v42  ;;  %v5717_v47 = vsel %vm5697_vm4, %v548_v43, 0.0  ;;  %v573_v48 = vsel %vm543_vm0, %v540_v41, %v512_v40  ;;  %v520_v50 = vrot.slane %v5711_v46, 7  ;;  %v5808_v26 = vld [vmem:[%s5582_s1 + $0x70] sm:$0xff]  ;;  %s5255_s19 = scalar_lea.vmem %s5254_s10, 8192  ;;  %p5256_p12 = scmp.lt.s32.totalorder %s12363_s12, %s5254_s10 }
  0x9e   : > { %12951 = vst [vmem:[#allocation20_spill] sm:$0xff] %v12950_v42  ;;  %v5737_v53 = vsel %vm543_vm0, %v512_v40, %v516_v45  ;;  %v5741_v54 = vsel %vm5621_vm1, %v573_v48, 0.0  ;;  %v524_v55 = vrot.slane %v5722_v49, 7  ;;  %v528_v57 = vrot.slane %v5726_v51, 7  ;;  %12954 = vst [vmem:[#allocation23_spill] sm:$0xff] %v5808_v26  ;;  %v5816_v31 = vld [vmem:[%s5582_s1 + $0x90] sm:$0xff] }
  0x9f   : > { %751 = vrot.lane.b32.xlu1 %v5680_v35, %s5333_s30  ;;  %v565_v56 = vsel %vm543_vm0, %v516_v45, %v520_v50  ;;  %v532_v60 = vrot.slane %v5731_v52, 7  ;;  %v536_v63 = vrot.slane %v5750_v58, 7  ;;  %v513_v14 = vrot.slane %v5769_v2, 7  ;;  %12955 = vst [vmem:[#allocation24_spill] sm:$0xff] %v5816_v31  ;;  %v5838_v48 = vld [vmem:[%s5582_s1 + $0xd0] sm:$0xff] }
  0xa0   : > { %v5756_v59 = vsel %vm543_vm0, %v520_v50, %v524_v55  ;;  %v5761_v61 = vsel %vm5682_vm3, %v565_v56, 0.0  ;;  %v557_v62 = vsel %vm543_vm0, %v524_v55, %v528_v57  ;;  %v541_v15 = vrot.slane %v5772_v3, 7  ;;  %12957 = vst [vmem:[#allocation26_spill] sm:$0xff] %v5838_v48 }
  0xa1   : > { %745 = vrot.lane.b32.xlu0 %v5693_v39, %s5333_s30  ;;  %v5778_v6 = vsel %vm543_vm0, %v528_v57, %v532_v60  ;;  %v5782_v7 = vsel %vm5662_vm2, %v557_v62, 0.0  ;;  %v549_v9 = vsel %vm543_vm0, %v532_v60, %v536_v63  ;;  %v5800_v21 = vsel %vm543_vm0, %v536_v63, %v540_v41  ;;  %v5830_v41 = vld [vmem:[%s5582_s1 + $0xb0] sm:$0xff]  ;;  %v5857_v62 = vld [vmem:[%s5582_s1 + $0x18] sm:$0xff] }
  0xa2   : > { %v517_v22 = vrot.slane %v5785_v8, 7  ;;  %v5805_v23 = vsel %vm5697_vm4, %v549_v9, 0.0  ;;  %v574_v27 = vsel %vm543_vm0, %v541_v15, %v513_v14  ;;  %v521_v28 = vrot.slane %v5794_v17, 7  ;;  %12956 = vst [vmem:[#allocation25_spill] sm:$0xff] %v5830_v41  ;;  %12958 = vst [vmem:[#allocation27_spill] sm:$0xff] %v5857_v62  ;;  %v5860_v63 = vld [vmem:[%s5582_s1 + $0xf8] sm:$0xff] }
  0xa3   : > { %741 = vrot.lane.b32.xlu1 %v5707_v44, %s5333_s30  ;;  %v525_v37 = vrot.slane %v5808_v26, 7  ;;  %v5827_v40 = vsel %vm5621_vm1, %v574_v27, 0.0  ;;  %v529_v45 = vrot.slane %v5816_v31, 7  ;;  %v533_v55 = vrot.slane %v5830_v41, 7  ;;  %12959 = vst [vmem:[#allocation28_spill] sm:$0xff] %v5860_v63  ;;  %v5926_v31 = vld [vmem:[%s5582_s1 + $0xd8] sm:$0xff] }
  0xa4   : > { %v5822_v32 = vsel %vm543_vm0, %v513_v14, %v517_v22  ;;  %v566_v43 = vsel %vm543_vm0, %v517_v22, %v521_v28  ;;  %v537_v60 = vrot.slane %v5838_v48, 7  ;;  %v5873_v22 = vld [vmem:[%s5582_s1 + $0x38] sm:$0xff]  ;;  %12965 = vst [vmem:[#allocation34_spill] sm:$0xff] %v5926_v31  ;;  %vm656_vm5 = vcmp.lt.s32.totalorder %v5597_v1, 7 }
  0xa5   : > { %749 = vrot.lane.b32.xlu0 %v5717_v47, %s5333_s30  ;;  %v5844_v50 = vsel %vm543_vm0, %v521_v28, %v525_v37  ;;  %v5849_v56 = vsel %vm5682_vm3, %v566_v43, 0.0  ;;  %v558_v57 = vsel %vm543_vm0, %v525_v37, %v529_v45  ;;  %v5866_v9 = vsel %vm543_vm0, %v529_v45, %v533_v55  ;;  %12960 = vst [vmem:[#allocation29_spill] sm:$0xff] %v5873_v22  ;;  %v5882_v43 = vld [vmem:[%s5582_s1 + $0x58] sm:$0xff] }
  0xa6   : > { %v5870_v14 = vsel %vm5662_vm2, %v558_v57, 0.0  ;;  %v550_v27 = vsel %vm543_vm0, %v533_v55, %v537_v60  ;;  %v514_v28 = vrot.slane %v5857_v62, 7  ;;  %v542_v37 = vrot.slane %v5860_v63, 7  ;;  %12961 = vst [vmem:[#allocation30_spill] sm:$0xff] %v5882_v43  ;;  %v5904_v48 = vld [vmem:[%s5582_s1 + $0x98] sm:$0xff] }
  0xa7   : > { %755 = vrot.lane.b32.xlu1 %v5737_v53, %s5333_s30  ;;  %v5888_v45 = vsel %vm543_vm0, %v537_v60, %v541_v15  ;;  %v518_v55 = vrot.slane %v5873_v22, 7  ;;  %v5893_v57 = vsel %vm5697_vm4, %v550_v27, 0.0  ;;  %v522_v62 = vrot.slane %v5882_v43, 7  ;;  %12963 = vst [vmem:[#allocation32_spill] sm:$0xff] %v5904_v48  ;;  %v5918_v22 = vld [vmem:[%s5582_s1 + $0xb8] sm:$0xff] }
  0xa8   : > { %v575_v63 = vsel %vm543_vm0, %v542_v37, %v514_v28  ;;  %v526_v60 = vrot.slane %v5896_v0, 7  ;;  %12964 = vst [vmem:[#allocation33_spill] sm:$0xff] %v5918_v22  ;;  %v530_v3 = vrot.slane %v5904_v48, 7  ;;  %v538_v48 = vrot.slane %v5926_v31, 7 }
  0xa9   : > { %753 = vrot.lane.b32.xlu0 %v5741_v54, %s5333_s30  ;;  %v5910_v15 = vsel %vm543_vm0, %v514_v28, %v518_v55  ;;  %v5915_v27 = vsel %vm5621_vm1, %v575_v63, 0.0  ;;  %v567_v43 = vsel %vm543_vm0, %v518_v55, %v522_v62  ;;  %v534_v63 = vrot.slane %v5918_v22, 7 }
  0xaa   : > { %v5932_v28 = vsel %vm543_vm0, %v522_v62, %v526_v60  ;;  %v5937_v13 = vsel %vm5682_vm3, %v567_v43, 0.0  ;;  %v559_v55 = vsel %vm543_vm0, %v526_v60, %v530_v3  ;;  %v5962_v60 = vsel %vm543_vm0, %v538_v48, %v542_v37 }
  0xab   : > { %759 = vrot.lane.b32.xlu1 %v5756_v59, %s5333_s30  ;;  %12966 = vst [vmem:[#allocation35_spill] sm:$0xff] %v5932_v28  ;;  %12967 = vst [vmem:[#allocation36_spill] sm:$0xff] %v5937_v13  ;;  %v5948_v62 = vsel %vm543_vm0, %v530_v3, %v534_v63  ;;  %v5952_v36 = vsel %vm5662_vm2, %v559_v55, 0.0  ;;  %v551_v43 = vsel %vm543_vm0, %v534_v63, %v538_v48 }
  0xac   : > { %12968 = vst [vmem:[#allocation37_spill] sm:$0xff] %v5948_v62  ;;  %12969 = vst [vmem:[#allocation38_spill] sm:$0xff] %v5952_v36  ;;  %v5966_v3 = vsel %vm5697_vm4, %v551_v43, 0.0 }
  0xad   : > { %757 = vrot.lane.b32.xlu0 %v5761_v61, %s5333_s30  ;;  %12970 = vst [vmem:[#allocation39_spill] sm:$0xff] %v5962_v60  ;;  %12971 = vst [vmem:[#allocation40_spill] sm:$0xff] %v5966_v3 }
  0xaf   : > { %763 = vrot.lane.b32.xlu1 %v5778_v6, %s5333_s30 }
  0xb1   : > { %761 = vrot.lane.b32.xlu0 %v5782_v7, %s5333_s30 }
  0xb3   : > { %767 = vrot.lane.b32.xlu1 %v5800_v21, %s5333_s30 }
  0xb5   : > { %765 = vrot.lane.b32.xlu0 %v5805_v23, %s5333_s30 }
  0xb7   : > { %771 = vrot.lane.b32.xlu1 %v5822_v32, %s5333_s30 }
  0xb9   : > { %769 = vrot.lane.b32.xlu0 %v5827_v40, %s5333_s30 }
  0xbb   : > { %775 = vrot.lane.b32.xlu1 %v5844_v50, %s5333_s30 }
  0xbd   : > { %773 = vrot.lane.b32.xlu0 %v5849_v56, %s5333_s30 }
  0xbf   : > { %779 = vrot.lane.b32.xlu1 %v5866_v9, %s5333_s30 }
  0xc1   : > { %777 = vrot.lane.b32.xlu0 %v5870_v14, %s5333_s30 }
  0xc3   : > { %783 = vrot.lane.b32.xlu1 %v5888_v45, %s5333_s30 }
  0xc5   : > { %781 = vrot.lane.b32.xlu0 %v5893_v57, %s5333_s30 }
  0xc7   : > { %787 = vrot.lane.b32.xlu1 %v5910_v15, %s5333_s30 }
  0xc9   : > { %785 = vrot.lane.b32.xlu0 %v5915_v27, %s5333_s30 }
  0xcb   : > { %791 = vrot.lane.b32.xlu1 %v5932_v28, %s5333_s30 }
  0xcd   : > { %789 = vrot.lane.b32.xlu0 %v5937_v13, %s5333_s30 }
  0xcf   : > { %795 = vrot.lane.b32.xlu1 %v5948_v62, %s5333_s30 }
  0xd1   : > { %793 = vrot.lane.b32.xlu0 %v5952_v36, %s5333_s30 }
  0xd3   : > { %799 = vrot.lane.b32.xlu1 %v5962_v60, %s5333_s30 }
  0xd5   : > { %797 = vrot.lane.b32.xlu0 %v5966_v3, %s5333_s30 }
  0xd7   : > { %876 = vrot.lane.b32.xlu1 %v5647_v24, %s5334_s9 }
  0xd9   : > { %874 = vrot.lane.b32.xlu0 %v5660_v29, %s5334_s9 }
  0xdb   : > { %880 = vrot.lane.b32.xlu1 %v5639_v20, %s5334_s9 }
  0xdd   : > { %878 = vrot.lane.b32.xlu0 %v5707_v44, %s5334_s9 }
  0xdf   : > { %884 = vrot.lane.b32.xlu1 %v5653_v25, %s5334_s9 }
  0xe1   : > { %882 = vrot.lane.b32.xlu0 %v5693_v39, %s5334_s9 }
  0xe3   : > { %888 = vrot.lane.b32.xlu1 %v5680_v35, %s5334_s9 }
  0xe5   : > { %886 = vrot.lane.b32.xlu0 %v5717_v47, %s5334_s9 }
  0xe7   : > { %892 = vrot.lane.b32.xlu1 %v5737_v53, %s5334_s9 }
  0xe9   : > { %890 = vrot.lane.b32.xlu0 %v5741_v54, %s5334_s9 }
  0xeb   : > { %896 = vrot.lane.b32.xlu1 %v5756_v59, %s5334_s9 }
  0xed   : > { %894 = vrot.lane.b32.xlu0 %v5761_v61, %s5334_s9 }
  0xef   : > { %900 = vrot.lane.b32.xlu1 %v5778_v6, %s5334_s9 }
  0xf1   : > { %898 = vrot.lane.b32.xlu0 %v5782_v7, %s5334_s9 }
  0xf3   : > { %904 = vrot.lane.b32.xlu1 %v5800_v21, %s5334_s9 }
  0xf5   : > { %902 = vrot.lane.b32.xlu0 %v5805_v23, %s5334_s9 }
  0xf7   : > { %908 = vrot.lane.b32.xlu1 %v5822_v32, %s5334_s9 }
  0xf9   : > { %906 = vrot.lane.b32.xlu0 %v5827_v40, %s5334_s9 }
  0xfb   : > { %912 = vrot.lane.b32.xlu1 %v5844_v50, %s5334_s9 }
  0xfd   : > { %910 = vrot.lane.b32.xlu0 %v5849_v56, %s5334_s9 }
  0xff   : > { %916 = vrot.lane.b32.xlu1 %v5866_v9, %s5334_s9 }
 0x101   : > { %914 = vrot.lane.b32.xlu0 %v5870_v14, %s5334_s9 }
 0x103   : > { %920 = vrot.lane.b32.xlu1 %v5888_v45, %s5334_s9 }
 0x105   : > { %918 = vrot.lane.b32.xlu0 %v5893_v57, %s5334_s9 }
 0x107   : > { %924 = vrot.lane.b32.xlu1 %v5910_v15, %s5334_s9 }
 0x109   : > { %922 = vrot.lane.b32.xlu0 %v5915_v27, %s5334_s9  ;;  %v6024_v48 = vpop.permute.xlu1 %743 }
 0x10a   : > { %12972 = vst [vmem:[#allocation41_spill] sm:$0xff] %v6024_v48 }
 0x10b   : > { %v6026_v37 = vpop.permute.xlu0 %739  ;;  %928 = vrot.lane.b32.xlu1 %v5932_v28, %s5334_s9 }
 0x10c   : > { %12973 = vst [vmem:[#allocation42_spill] sm:$0xff] %v6026_v37  ;;  %v13004_v37 = vld [vmem:[#allocation26_spill] sm:$0xff] }
 0x10d   : > { %926 = vrot.lane.b32.xlu0 %v5937_v13, %s5334_s9  ;;  %v6032_v63 = vpop.permute.xlu1 %747 }
 0x10e   : > { %12974 = vst [vmem:[#allocation43_spill] sm:$0xff] %v6032_v63 }
 0x10f   : > { %v6034_v55 = vpop.permute.xlu0 %737  ;;  %932 = vrot.lane.b32.xlu1 %v5948_v62, %s5334_s9 }
 0x110   : > { %12975 = vst [vmem:[#allocation44_spill] sm:$0xff] %v6034_v55 }
 0x111   : > { %930 = vrot.lane.b32.xlu0 %v5952_v36, %s5334_s9  ;;  %v6040_v43 = vpop.permute.xlu1 %751 }
 0x112   : > { %12976 = vst [vmem:[#allocation45_spill] sm:$0xff] %v6040_v43 }
 0x113   : > { %v6042_v42 = vpop.permute.xlu0 %745  ;;  %936 = vrot.lane.b32.xlu1 %v5962_v60, %s5334_s9  ;;  %v13008_v60 = vld [vmem:[#allocation27_spill] sm:$0xff] }
 0x114   : > { %12977 = vst [vmem:[#allocation46_spill] sm:$0xff] %v6042_v42 }
 0x115   : > { %934 = vrot.lane.b32.xlu0 %v5966_v3, %s5334_s9  ;;  %v6048_v30 = vpop.permute.xlu1 %741 }
 0x116   : > { %12978 = vst [vmem:[#allocation47_spill] sm:$0xff] %v6048_v30 }
 0x117   : > { %v6050_v63 = vpop.permute.xlu0 %749  ;;  %1241 = vrot.lane.b32.xlu1 %v5616_v11, %s5333_s30 }
 0x118   : > { %12979 = vst [vmem:[#allocation48_spill] sm:$0xff] %v6050_v63 }
 0x119   : > { %1239 = vrot.lane.b32.xlu0 %v5613_v10, %s5333_s30  ;;  %v6056_v48 = vpop.permute.xlu1 %755 }
 0x11a   : > { %12980 = vst [vmem:[#allocation49_spill] sm:$0xff] %v6056_v48 }
 0x11b   : > { %v6058_v43 = vpop.permute.xlu0 %753  ;;  %1245 = vrot.lane.b32.xlu1 %v5605_v5, %s5333_s30 }
 0x11c   : > { %12981 = vst [vmem:[#allocation50_spill] sm:$0xff] %v6058_v43 }
 0x11d   : > { %1243 = vrot.lane.b32.xlu0 %v5602_v4, %s5333_s30  ;;  %v6064_v42 = vpop.permute.xlu1 %759 }
 0x11e   : > { %12982 = vst [vmem:[#allocation51_spill] sm:$0xff] %v6064_v42 }
 0x11f   : > { %v6066_v30 = vpop.permute.xlu0 %757  ;;  %1249 = vrot.lane.b32.xlu1 %v5628_v16, %s5333_s30 }
 0x120   : > { %12983 = vst [vmem:[#allocation52_spill] sm:$0xff] %v6066_v30 }
 0x121   : > { %1247 = vrot.lane.b32.xlu0 %v5619_v12, %s5333_s30  ;;  %v6072_v63 = vpop.permute.xlu1 %763 }
 0x122   : > { %12984 = vst [vmem:[#allocation53_spill] sm:$0xff] %v6072_v63 }
 0x123   : > { %v6074_v3 = vpop.permute.xlu0 %761  ;;  %1253 = vrot.lane.b32.xlu1 %v5632_v18, %s5333_s30 }
 0x124   : > { %12985 = vst [vmem:[#allocation54_spill] sm:$0xff] %v6074_v3 }
 0x125   : > { %1251 = vrot.lane.b32.xlu0 %v5635_v19, %s5333_s30  ;;  %v6080_v55 = vpop.permute.xlu1 %767 }
 0x126   : > { %12986 = vst [vmem:[#allocation55_spill] sm:$0xff] %v6080_v55 }
 0x127   : > { %v6082_v42 = vpop.permute.xlu0 %765  ;;  %1257 = vrot.lane.b32.xlu1 %v5689_v38, %s5333_s30 }
 0x128   : > { %12987 = vst [vmem:[#allocation56_spill] sm:$0xff] %v6082_v42 }
 0x129   : > { %1255 = vrot.lane.b32.xlu0 %v5669_v33, %s5333_s30  ;;  %v6088_v30 = vpop.permute.xlu1 %771 }
 0x12a   : > { %12988 = vst [vmem:[#allocation57_spill] sm:$0xff] %v6088_v30 }
 0x12b   : > { %v6090_v63 = vpop.permute.xlu0 %769  ;;  %1261 = vrot.lane.b32.xlu1 %v5722_v49, %s5333_s30 }
 0x12c   : > { %12989 = vst [vmem:[#allocation58_spill] sm:$0xff] %v6090_v63 }
 0x12d   : > { %1259 = vrot.lane.b32.xlu0 %v5711_v46, %s5333_s30  ;;  %v6096_v3 = vpop.permute.xlu1 %775 }
 0x12e   : > { %12990 = vst [vmem:[#allocation59_spill] sm:$0xff] %v6096_v3 }
 0x12f   : > { %v6098_v55 = vpop.permute.xlu0 %773  ;;  %1265 = vrot.lane.b32.xlu1 %v5731_v52, %s5333_s30 }
 0x130   : > { %12991 = vst [vmem:[#allocation60_spill] sm:$0xff] %v6098_v55 }
 0x131   : > { %1263 = vrot.lane.b32.xlu0 %v5726_v51, %s5333_s30  ;;  %v6104_v42 = vpop.permute.xlu1 %779 }
 0x132   : > { %12992 = vst [vmem:[#allocation61_spill] sm:$0xff] %v6104_v42 }
 0x133   : > { %v6106_v30 = vpop.permute.xlu0 %777  ;;  %1269 = vrot.lane.b32.xlu1 %v5672_v34, %s5333_s30 }
 0x134   : > { %12993 = vst [vmem:[#allocation62_spill] sm:$0xff] %v6106_v30 }
 0x135   : > { %1267 = vrot.lane.b32.xlu0 %v5750_v58, %s5333_s30  ;;  %v6112_v63 = vpop.permute.xlu1 %783 }
 0x136   : > { %12994 = vst [vmem:[#allocation63_spill] sm:$0xff] %v6112_v63 }
 0x137   : > { %v6114_v3 = vpop.permute.xlu0 %781  ;;  %1273 = vrot.lane.b32.xlu1 %v5785_v8, %s5333_s30 }
 0x138   : > { %12995 = vst [vmem:[#allocation64_spill] sm:$0xff] %v6114_v3  ;;  %v13000_v3 = vld [vmem:[#allocation24_spill] sm:$0xff] }
 0x139   : > { %1271 = vrot.lane.b32.xlu0 %v5769_v2, %s5333_s30  ;;  %v6120_v55 = vpop.permute.xlu1 %787 }
 0x13a   : > { %12996 = vst [vmem:[#allocation65_spill] sm:$0xff] %v6120_v55 }
 0x13b   : > { %v6122_v42 = vpop.permute.xlu0 %785  ;;  %1277 = vrot.lane.b32.xlu1 %v5808_v26, %s5333_s30 }
 0x13c   : > { %12997 = vst [vmem:[#allocation66_spill] sm:$0xff] %v6122_v42  ;;  %v13003_v42 = vld [vmem:[#allocation22_spill] sm:$0xff] }
 0x13d   : > { %1275 = vrot.lane.b32.xlu0 %v5794_v17, %s5333_s30  ;;  %v6128_v30 = vpop.permute.xlu1 %791 }
 0x13e   : > { %12998 = vst [vmem:[#allocation67_spill] sm:$0xff] %v6128_v30 }
 0x13f   : > { %v6130_v63 = vpop.permute.xlu0 %789  ;;  %1281 = vrot.lane.b32.xlu1 %v5830_v41, %s5333_s30 }
 0x140   : > { %12999 = vst [vmem:[#allocation68_spill] sm:$0xff] %v6130_v63  ;;  %v13007_v63 = vld [vmem:[#allocation29_spill] sm:$0xff] }
 0x141   : > { %1279 = vrot.lane.b32.xlu0 %v13000_v3, %s5333_s30  ;;  %v6136_v43 = vpop.permute.xlu1 %795 }
 0x142   : > { %13001 = vst [vmem:[#allocation69_spill] sm:$0xff] %v6136_v43 }
 0x143   : > { %v6138_v55 = vpop.permute.xlu0 %793  ;;  %1285 = vrot.lane.b32.xlu1 %v13003_v42, %s5333_s30 }
 0x144   : > { %13002 = vst [vmem:[#allocation70_spill] sm:$0xff] %v6138_v55  ;;  %v13011_v55 = vld [vmem:[#allocation30_spill] sm:$0xff] }
 0x145   : > { %1283 = vrot.lane.b32.xlu0 %v13004_v37, %s5333_s30  ;;  %v6144_v48 = vpop.permute.xlu1 %799 }
 0x146   : > { %13005 = vst [vmem:[#allocation71_spill] sm:$0xff] %v6144_v48 }
 0x147   : > { %v6146_v30 = vpop.permute.xlu0 %797  ;;  %1289 = vrot.lane.b32.xlu1 %v13007_v63, %s5333_s30 }
 0x148   : > { %13006 = vst [vmem:[#allocation72_spill] sm:$0xff] %v6146_v30  ;;  %v13014_v30 = vld [vmem:[#allocation32_spill] sm:$0xff] }
 0x149   : > { %1287 = vrot.lane.b32.xlu0 %v13008_v60, %s5333_s30  ;;  %v6152_v36 = vpop.permute.xlu1 %876 }
 0x14a   : > { %13009 = vst [vmem:[#allocation73_spill] sm:$0xff] %v6152_v36 }
 0x14b   : > { %v6154_v43 = vpop.permute.xlu0 %874  ;;  %1293 = vrot.lane.b32.xlu1 %v5896_v0, %s5333_s30 }
 0x14c   : > { %13010 = vst [vmem:[#allocation74_spill] sm:$0xff] %v6154_v43  ;;  %v13017_v43 = vld [vmem:[#allocation28_spill] sm:$0xff] }
 0x14d   : > { %1291 = vrot.lane.b32.xlu0 %v13011_v55, %s5333_s30  ;;  %v6160_v62 = vpop.permute.xlu1 %880 }
 0x14e   : > { %13012 = vst [vmem:[#allocation75_spill] sm:$0xff] %v6160_v62 }
 0x14f   : > { %v6162_v48 = vpop.permute.xlu0 %878  ;;  %1297 = vrot.lane.b32.xlu1 %v5918_v22, %s5333_s30 }
 0x150   : > { %13013 = vst [vmem:[#allocation76_spill] sm:$0xff] %v6162_v48 }
 0x151   : > { %1295 = vrot.lane.b32.xlu0 %v13014_v30, %s5333_s30  ;;  %v6168_v13 = vpop.permute.xlu1 %884 }
 0x152   : > { %13015 = vst [vmem:[#allocation77_spill] sm:$0xff] %v6168_v13 }
 0x153   : > { %v6170_v36 = vpop.permute.xlu0 %882  ;;  %1301 = vrot.lane.b32.xlu1 %v13017_v43, %s5333_s30 }
 0x154   : > { %13016 = vst [vmem:[#allocation78_spill] sm:$0xff] %v6170_v36 }
 0x155   : > { %1299 = vrot.lane.b32.xlu0 %v5926_v31, %s5333_s30  ;;  %v6176_v28 = vpop.permute.xlu1 %888 }
 0x156   : > { %13018 = vst [vmem:[#allocation79_spill] sm:$0xff] %v6176_v28 }
 0x157   : > { %v6178_v62 = vpop.permute.xlu0 %886  ;;  %1369 = vrot.lane.b32.xlu1 %v5616_v11, %s5334_s9 }
 0x158   : > { %13019 = vst [vmem:[#allocation80_spill] sm:$0xff] %v6178_v62 }
 0x159   : > { %1367 = vrot.lane.b32.xlu0 %v5613_v10, %s5334_s9  ;;  %v6184_v48 = vpop.permute.xlu1 %892 }
 0x15a   : > { %13020 = vst [vmem:[#allocation81_spill] sm:$0xff] %v6184_v48 }
 0x15b   : > { %v6186_v13 = vpop.permute.xlu0 %890  ;;  %1373 = vrot.lane.b32.xlu1 %v5605_v5, %s5334_s9 }
 0x15c   : > { %13021 = vst [vmem:[#allocation82_spill] sm:$0xff] %v6186_v13 }
 0x15d   : > { %1371 = vrot.lane.b32.xlu0 %v5602_v4, %s5334_s9  ;;  %v6192_v36 = vpop.permute.xlu1 %896 }
 0x15e   : > { %13022 = vst [vmem:[#allocation83_spill] sm:$0xff] %v6192_v36 }
 0x15f   : > { %v6194_v28 = vpop.permute.xlu0 %894  ;;  %1377 = vrot.lane.b32.xlu1 %v5628_v16, %s5334_s9 }
 0x160   : > { %13023 = vst [vmem:[#allocation84_spill] sm:$0xff] %v6194_v28 }
 0x161   : > { %1375 = vrot.lane.b32.xlu0 %v5619_v12, %s5334_s9  ;;  %v6200_v62 = vpop.permute.xlu1 %900 }
 0x162   : > { %13024 = vst [vmem:[#allocation85_spill] sm:$0xff] %v6200_v62 }
 0x163   : > { %v6202_v48 = vpop.permute.xlu0 %898  ;;  %1381 = vrot.lane.b32.xlu1 %v5632_v18, %s5334_s9 }
 0x164   : > { %13025 = vst [vmem:[#allocation86_spill] sm:$0xff] %v6202_v48 }
 0x165   : > { %1379 = vrot.lane.b32.xlu0 %v5635_v19, %s5334_s9  ;;  %v6208_v13 = vpop.permute.xlu1 %904 }
 0x166   : > { %13026 = vst [vmem:[#allocation87_spill] sm:$0xff] %v6208_v13 }
 0x167   : > { %v6210_v36 = vpop.permute.xlu0 %902  ;;  %1385 = vrot.lane.b32.xlu1 %v5689_v38, %s5334_s9 }
 0x168   : > { %13027 = vst [vmem:[#allocation88_spill] sm:$0xff] %v6210_v36 }
 0x169   : > { %1383 = vrot.lane.b32.xlu0 %v5669_v33, %s5334_s9  ;;  %v6216_v28 = vpop.permute.xlu1 %908 }
 0x16a   : > { %13028 = vst [vmem:[#allocation89_spill] sm:$0xff] %v6216_v28 }
 0x16b   : > { %v6218_v62 = vpop.permute.xlu0 %906  ;;  %1389 = vrot.lane.b32.xlu1 %v5722_v49, %s5334_s9 }
 0x16c   : > { %13029 = vst [vmem:[#allocation90_spill] sm:$0xff] %v6218_v62 }
 0x16d   : > { %1387 = vrot.lane.b32.xlu0 %v5711_v46, %s5334_s9  ;;  %v6224_v48 = vpop.permute.xlu1 %912 }
 0x16e   : > { %13030 = vst [vmem:[#allocation91_spill] sm:$0xff] %v6224_v48 }
 0x16f   : > { %v6226_v13 = vpop.permute.xlu0 %910  ;;  %1393 = vrot.lane.b32.xlu1 %v5731_v52, %s5334_s9 }
 0x170   : > { %13031 = vst [vmem:[#allocation92_spill] sm:$0xff] %v6226_v13 }
 0x171   : > { %1391 = vrot.lane.b32.xlu0 %v5726_v51, %s5334_s9  ;;  %v6232_v36 = vpop.permute.xlu1 %916 }
 0x172   : > { %13032 = vst [vmem:[#allocation93_spill] sm:$0xff] %v6232_v36 }
 0x173   : > { %v6234_v28 = vpop.permute.xlu0 %914  ;;  %1397 = vrot.lane.b32.xlu1 %v5672_v34, %s5334_s9 }
 0x174   : > { %13033 = vst [vmem:[#allocation94_spill] sm:$0xff] %v6234_v28 }
 0x175   : > { %1395 = vrot.lane.b32.xlu0 %v5750_v58, %s5334_s9  ;;  %v6240_v62 = vpop.permute.xlu1 %920 }
 0x176   : > { %13034 = vst [vmem:[#allocation95_spill] sm:$0xff] %v6240_v62 }
 0x177   : > { %v6242_v48 = vpop.permute.xlu0 %918  ;;  %1401 = vrot.lane.b32.xlu1 %v5785_v8, %s5334_s9 }
 0x178   : > { %13035 = vst [vmem:[#allocation96_spill] sm:$0xff] %v6242_v48 }
 0x179   : > { %1399 = vrot.lane.b32.xlu0 %v5769_v2, %s5334_s9  ;;  %v6248_v13 = vpop.permute.xlu1 %924 }
 0x17a   : > { %13036 = vst [vmem:[#allocation97_spill] sm:$0xff] %v6248_v13 }
 0x17b   : > { %v6250_v36 = vpop.permute.xlu0 %922  ;;  %1405 = vrot.lane.b32.xlu1 %v5808_v26, %s5334_s9  ;;  %v652_v26 = vrot.slane %v5632_v18, 1 }
 0x17c   : > { %13037 = vst [vmem:[#allocation98_spill] sm:$0xff] %v6250_v36 }
 0x17d   : > { %1403 = vrot.lane.b32.xlu0 %v5794_v17, %s5334_s9  ;;  %v6256_v28 = vpop.permute.xlu1 %928 }
 0x17e   : > { %13038 = vst [vmem:[#allocation99_spill] sm:$0xff] %v6256_v28 }
 0x17f   : > { %v6258_v62 = vpop.permute.xlu0 %926  ;;  %1409 = vrot.lane.b32.xlu1 %v5830_v41, %s5334_s9  ;;  %v6350_v41 = vsub.s32 2, %v5597_v1 }
 0x180   : > { %13039 = vst [vmem:[#allocation100_spill] sm:$0xff] %v6258_v62 }
 0x181   : > { %1407 = vrot.lane.b32.xlu0 %v13000_v3, %s5334_s9  ;;  %v6264_v48 = vpop.permute.xlu1 %932  ;;  %13062 = vst [vmem:[#allocation119_spill] sm:$0xff] %v6350_v41 }
 0x182   : > { %13040 = vst [vmem:[#allocation101_spill] sm:$0xff] %v6264_v48 }
 0x183   : > { %v6266_v13 = vpop.permute.xlu0 %930  ;;  %1413 = vrot.lane.b32.xlu1 %v13003_v42, %s5334_s9  ;;  %v628_v42 = vrot.slane %v5616_v11, 1 }
 0x184   : > { %13041 = vst [vmem:[#allocation102_spill] sm:$0xff] %v6266_v13  ;;  %v379_v13 = vadd.s32 8, %v5597_v1 }
 0x185   : > { %1411 = vrot.lane.b32.xlu0 %v13004_v37, %s5334_s9  ;;  %v6272_v36 = vpop.permute.xlu1 %936 }
 0x186   : > { %13042 = vst [vmem:[#allocation103_spill] sm:$0xff] %v6272_v36 }
 0x187   : > { %v6274_v28 = vpop.permute.xlu0 %934  ;;  %1417 = vrot.lane.b32.xlu1 %v13007_v63, %s5334_s9  ;;  %v397_v63 = vand.u32 15, %v379_v13  ;;  %v640_v13 = vrot.slane %v5619_v12, 1 }
 0x188   : > { %13043 = vst [vmem:[#allocation104_spill] sm:$0xff] %v6274_v28  ;;  %v381_v28 = vadd.s32 24, %v5597_v1 }
 0x189   : > { %1415 = vrot.lane.b32.xlu0 %v13008_v60, %s5334_s9  ;;  %v6280_v62 = vpop.permute.xlu1 %1241  ;;  %v632_v60 = vrot.slane %v5602_v4, 1  ;;  %vm6306_vm6 = vcmp.lt.s32.totalorder %v397_v63, 15  ;;  %v13049_v4 = vmov 0  ;;  %v13056_v63 = vmov 0 }
 0x18a   : > { %13044 = vst [vmem:[#allocation105_spill] sm:$0xff] %v6280_v62  ;;  %v13050_v4 = vsel %vm6306_vm6, 4294967295, %v13049_v4 }
 0x18b   : > { %v6283_v48 = vpop.permute.xlu0 %1239  ;;  %1421 = vrot.lane.b32.xlu1 %v5896_v0, %s5334_s9  ;;  %v411_v0 = vand.u32 15, %v381_v28  ;;  %13051 = vst [vmem:[#allocation110_spill] sm:$0xff] %v13050_v4  ;;  %v13231_v4 = vld [vmem:[#allocation41_spill] sm:$0xff] }
 0x18c   : > { %13045 = vst [vmem:[#allocation106_spill] sm:$0xff] %v6283_v48  ;;  %v624_v48 = vrot.slane %v5613_v10, 1 }
 0x18d   : > { %1419 = vrot.lane.b32.xlu0 %v13011_v55, %s5334_s9  ;;  %v6290_v36 = vpop.permute.xlu1 %1245  ;;  %vm6330_vm7 = vcmp.lt.s32.totalorder %v411_v0, 15  ;;  %v648_v55 = vrot.slane %v5635_v19, 1 }
 0x18e   : > { %13046 = vst [vmem:[#allocation107_spill] sm:$0xff] %v6290_v36  ;;  %v636_v36 = vrot.slane %v5605_v5, 1  ;;  %v1066_v5 = vld [vmem:[#allocation5 + $0x1] ss:$8 sm:$0xf]  ;;  %v6328_v28 = vsel %vm656_vm5, %v624_v48, %v628_v42  ;;  %v13057_v63 = vsel %vm6330_vm7, 4294967295, %v13056_v63 }
 0x18f   : > { %v6294_v62 = vpop.permute.xlu0 %1243  ;;  %1425 = vrot.lane.b32.xlu1 %v5918_v22, %s5334_s9  ;;  %v383_v22 = vadd.s32 40, %v5597_v1  ;;  %13055 = vst [vmem:[#allocation114_spill] sm:$0xff] %v6328_v28  ;;  %13058 = vst [vmem:[#allocation115_spill] sm:$0xff] %v13057_v63 }
 0x190   : > { %13047 = vst [vmem:[#allocation108_spill] sm:$0xff] %v6294_v62  ;;  %v677_v62 = vsel %vm656_vm5, %v628_v42, %v632_v60  ;;  %v6343_v42 = vsub.s32 1, %v5597_v1  ;;  %v6360_v19 = vsel %vm656_vm5, %v632_v60, %v636_v36  ;;  %v6379_v60 = vsub.s32 3, %v5597_v1 }
 0x191   : > { %1423 = vrot.lane.b32.xlu0 %v13014_v30, %s5334_s9  ;;  %v6304_v11 = vpop.permute.xlu1 %1249  ;;  %v6314_v30 = vsub.s32 0, %v5597_v1  ;;  %v6324_v12 = vsel %vm6306_vm6, %v677_v62, 0.0  ;;  %v385_v62 = vadd.s32 56, %v5597_v1  ;;  %13064 = vst [vmem:[#allocation121_spill] sm:$0xff] %v6360_v19 }
 0x192   : > { %13048 = vst [vmem:[#allocation109_spill] sm:$0xff] %v6304_v11  ;;  %13054 = vst [vmem:[#allocation113_spill] sm:$0xff] %v6324_v12 }
 0x193   : > { %13052 = vst [vmem:[#allocation111_spill] sm:$0xff] %v6314_v30  ;;  %v6316_v10 = vpop.permute.xlu0 %1247  ;;  %1429 = vrot.lane.b32.xlu1 %v13017_v43, %s5334_s9  ;;  %v425_v43 = vand.u32 15, %v383_v22  ;;  %v1071_v37 = vrot.slane %v1066_v5, %v6314_v30  ;;  %13060 = vst [vmem:[#allocation117_spill] sm:$0xff] %v6343_v42  ;;  %v439_v3 = vand.u32 15, %v385_v62 }
 0x194   : > { %13053 = vst [vmem:[#allocation112_spill] sm:$0xff] %v6316_v10  ;;  %v669_v10 = vsel %vm656_vm5, %v636_v36, %v640_v13  ;;  %v1075_v36 = vrot.slane %v1066_v5, %v6343_v42  ;;  %13071 = vst [vmem:[#allocation126_spill] sm:$0xff] %v6379_v60 }
 0x195   : > { %1427 = vrot.lane.b32.xlu0 %v5926_v31, %s5334_s9  ;;  %v6336_v11 = vpop.permute.xlu1 %1253  ;;  %v644_v31 = vrot.slane %v5628_v16, 1  ;;  %v6356_v16 = vsel %vm6330_vm7, %v669_v10, 0.0  ;;  %vm6364_vm8 = vcmp.lt.s32.totalorder %v425_v43, 15  ;;  %v6372_v2 = vmul.f32 %v1071_v37, %v5639_v20 }
 0x196   : > { %13059 = vst [vmem:[#allocation116_spill] sm:$0xff] %v6336_v11  ;;  %13063 = vst [vmem:[#allocation120_spill] sm:$0xff] %v6356_v16  ;;  %v6375_v10 = vmul.f32 %v1071_v37, %v5647_v24  ;;  %v6387_v62 = vmul.f32 %v1071_v37, %v5660_v29  ;;  %v6390_v18 = vmul.f32 %v1071_v37, %v5680_v35  ;;  %vm6415_vm9 = vcmp.lt.s32.totalorder %v439_v3, 15 }
 0x197   : > { %v6345_v0 = vpop.permute.xlu0 %1251  ;;  %1758 = vrot.lane.b32.xlu1 %v6324_v12, %s5333_s30  ;;  %v661_v11 = vsel %vm656_vm5, %v644_v31, %v648_v55  ;;  %13069 = vst [vmem:[#allocation124_spill] sm:$0xff] %v6372_v2  ;;  %v6393_v20 = vmul.f32 %v1071_v37, %v5693_v39  ;;  %v6398_v24 = vmul.f32 %v1071_v37, %v5707_v44  ;;  %v13082_v39 = vmov 0 }
 0x198   : > { %13061 = vst [vmem:[#allocation118_spill] sm:$0xff] %v6345_v0  ;;  %v13066_v0 = vmov 0  ;;  %13070 = vst [vmem:[#allocation125_spill] sm:$0xff] %v6375_v10  ;;  %v6411_v29 = vsel %vm656_vm5, %v640_v13, %v644_v31  ;;  %v13083_v39 = vsel %vm6415_vm9, 4294967295, %v13082_v39  ;;  %v685_v44 = vsel %vm656_vm5, %v652_v26, %v624_v48 }
 0x199   : > { %1756 = vrot.lane.b32.xlu0 %v6328_v28, %s5333_s30  ;;  %v6362_v22 = vpop.permute.xlu1 %1257  ;;  %v13067_v0 = vsel %vm6364_vm8, 4294967295, %v13066_v0  ;;  %13074 = vst [vmem:[#allocation129_spill] sm:$0xff] %v6387_v62  ;;  %13075 = vst [vmem:[#allocation130_spill] sm:$0xff] %v6390_v18  ;;  %v6430_v31 = vmul.f32 %v1075_v36, %v5756_v59  ;;  %v1079_v3 = vrot.slane %v1066_v5, %v6350_v41  ;;  %v13086_v59 = vlaneseq }
 0x19a   : > { %13065 = vst [vmem:[#allocation122_spill] sm:$0xff] %v6362_v22  ;;  %13068 = vst [vmem:[#allocation123_spill] sm:$0xff] %v13067_v0  ;;  %v6384_v22 = vmul.f32 %v1071_v37, %v5653_v25  ;;  %v6407_v25 = vsel %vm6364_vm8, %v661_v11, 0.0  ;;  %v6424_v11 = vmul.f32 %v1075_v36, %v5737_v53  ;;  %v6445_v53 = vmul.f32 %v1075_v36, %v5800_v21 }
 0x19b   : > { %v6381_v43 = vpop.permute.xlu0 %1255  ;;  %13076 = vst [vmem:[#allocation131_spill] sm:$0xff] %v6393_v20  ;;  %1762 = vrot.lane.b32.xlu1 %v6356_v16, %s5333_s30  ;;  %13077 = vst [vmem:[#allocation132_spill] sm:$0xff] %v6398_v24  ;;  %v6451_v48 = vand.u32 127, %v13086_v59  ;;  %v637_v59 = vrot.slane %v5722_v49, 1  ;;  %v6471_v18 = vmul.f32 %v1075_v36, %v5805_v23  ;;  %v6488_v20 = vmul.f32 %v1079_v3, %v5866_v9 }
 0x19c   : > { %13072 = vst [vmem:[#allocation127_spill] sm:$0xff] %v6381_v43  ;;  %13073 = vst [vmem:[#allocation128_spill] sm:$0xff] %v6384_v22  ;;  %v6401_v43 = vmul.f32 %v1071_v37, %v5717_v47  ;;  %v629_v47 = vrot.slane %v5689_v38, 1  ;;  %v633_v37 = vrot.slane %v5711_v46, 1  ;;  %v6439_v38 = vmul.f32 %v1075_v36, %v5778_v6 }
 0x19d   : > { %1760 = vrot.lane.b32.xlu0 %v6360_v19, %s5333_s30  ;;  %13079 = vst [vmem:[#allocation134_spill] sm:$0xff] %v6407_v25  ;;  %13080 = vst [vmem:[#allocation135_spill] sm:$0xff] %v6411_v29  ;;  %v6413_v35 = vpop.permute.xlu1 %1261  ;;  %v6442_v46 = vmul.f32 %v1075_v36, %v5782_v7  ;;  %v6461_v6 = vsel %vm656_vm5, %v648_v55, %v652_v26  ;;  %v6477_v26 = vmul.f32 %v1079_v3, %v5827_v40 }
 0x19e   : > { %13078 = vst [vmem:[#allocation133_spill] sm:$0xff] %v6401_v43  ;;  %13081 = vst [vmem:[#allocation136_spill] sm:$0xff] %v6413_v35  ;;  %v6427_v43 = vmul.f32 %v1075_v36, %v5741_v54  ;;  %v6436_v35 = vmul.f32 %v1075_v36, %v5761_v61  ;;  %v1083_v54 = vrot.slane %v1066_v5, %v6379_v60  ;;  %v6457_v61 = vsel %vm6415_vm9, %v685_v44, 0.0 }
 0x19f   : > { %13084 = vst [vmem:[#allocation137_spill] sm:$0xff] %v13083_v39  ;;  %v6433_v13 = vpop.permute.xlu0 %1259  ;;  %1766 = vrot.lane.b32.xlu1 %v6407_v25, %s5333_s30  ;;  %13087 = vst [vmem:[#allocation139_spill] sm:$0xff] %v6451_v48  ;;  %v678_v21 = vsel %vm656_vm5, %v629_v47, %v633_v37  ;;  %v6474_v44 = vmul.f32 %v1079_v3, %v5822_v32  ;;  %v6480_v55 = vmul.f32 %v1079_v3, %v5844_v50  ;;  %v1011_v32 = vld [vmem:[#allocation5] ss:$8 sm:$0xf] }
 0x1a0   : > { %13085 = vst [vmem:[#allocation138_spill] sm:$0xff] %v6433_v13  ;;  %v641_v13 = vrot.slane %v5726_v51, 1  ;;  %v6485_v5 = vmul.f32 %v1079_v3, %v5849_v56  ;;  %13090 = vst [vmem:[#allocation142_spill] sm:$0xff] %v6488_v20  ;;  %v6491_v51 = vmul.f32 %v1079_v3, %v5870_v14  ;;  %v6494_v23 = vmul.f32 %v1079_v3, %v5888_v45  ;;  %v5058_v39 = vld [vmem:[#allocation7 + $0x10] sm:$0xff]  }
 0x1a1   : > { %1764 = vrot.lane.b32.xlu0 %v6411_v29, %s5333_s30  ;;  %v6463_v7 = vpop.permute.xlu1 %1265  ;;  %v6499_v40 = vmul.f32 %v1079_v3, %v5893_v57  ;;  %v6502_v50 = vmul.f32 %v1083_v54, %v5910_v15  ;;  %vm801_vm10 = vcmp.lt.s32.totalorder %v6451_v48, 32  ;;  %v6509_v56 = vsel %vm6306_vm6, %v678_v21, 0.0  ;;  %v13098_v21 = vld [vmem:[#allocation35_spill] sm:$0xff] }
 0x1a2   : > { %13088 = vst [vmem:[#allocation140_spill] sm:$0xff] %v6463_v7  ;;  %13091 = vst [vmem:[#allocation143_spill] sm:$0xff] %v6491_v51  ;;  %v13096_v14 = vrot.slane %v5669_v33, 1  ;;  %v670_v57 = vsel %vm656_vm5, %v637_v59, %v641_v13  ;;  %v645_v15 = vrot.slane %v5731_v52, 1  ;;  %v649_v36 = vrot.slane %v5750_v58, 1  ;;  %v13105_v52 = vld [vmem:[#allocation38_spill] sm:$0xff] }
 0x1a3   : > { %v6482_v7 = vpop.permute.xlu0 %1263  ;;  %13092 = vst [vmem:[#allocation144_spill] sm:$0xff] %v6494_v23  ;;  %1770 = vrot.lane.b32.xlu1 %v6457_v61, %s5333_s30  ;;  %13093 = vst [vmem:[#allocation145_spill] sm:$0xff] %v6499_v40  ;;  %v6524_v3 = vmul.f32 %v1083_v54, %v5915_v27  ;;  %v6533_v24 = vrot.slane %v1011_v32, %v6343_v42  ;;  %v6541_v62 = vmul.f32 %v1083_v54, %v13105_v52  ;;  %v13107_v58 = vld [vmem:[#allocation39_spill] sm:$0xff] }
 0x1a4   : > { %13089 = vst [vmem:[#allocation141_spill] sm:$0xff] %v6482_v7  ;;  %13094 = vst [vmem:[#allocation146_spill] sm:$0xff] %v6502_v50  ;;  %v6517_v45 = vsel %vm656_vm5, %v13096_v14, %v629_v47  ;;  %v6527_v7 = vmul.f32 %v1083_v54, %v13098_v21  ;;  %v13103_v14 = vld [vmem:[#allocation37_spill] sm:$0xff]  ;;  %v6544_v27 = vmul.f32 %v1083_v54, %v13107_v58  ;;  %v13110_v21 = vld [vmem:[#allocation42_spill] sm:$0xff]  ;;  %v653_v51 = vrot.slane %v5672_v34, 1 }
 0x1a5   : > { %1768 = vrot.lane.b32.xlu0 %v6461_v6, %s5333_s30  ;;  %v6511_v9 = vpop.permute.xlu1 %1269  ;;  %13097 = vst [vmem:[#allocation148_spill] sm:$0xff] %v6524_v3  ;;  %v6538_v2 = vmul.f32 %v1083_v54, %v13103_v14  ;;  %13106 = vst [vmem:[#allocation38_spill] sm:$0xff] %v6541_v62  ;;  %v13109_v3 = vld [vmem:[#allocation49_spill] sm:$0xff]  ;;  %v13112_v14 = vld [vmem:[#allocation44_spill] sm:$0xff]  ;;  %v6559_v62 = vrot.slane %v1011_v32, %v6350_v41  ;;  %v6578_v40 = vsel %vm656_vm5, %v633_v37, %v637_v59 }
 0x1a6   : > { %13095 = vst [vmem:[#allocation147_spill] sm:$0xff] %v6511_v9  ;;  %13099 = vst [vmem:[#allocation35_spill] sm:$0xff] %v6527_v7  ;;  %v13100_v9 = vld [vmem:[#allocation36_spill] sm:$0xff]  ;;  %v662_v23 = vsel %vm656_vm5, %v645_v15, %v649_v36  ;;  %v6585_v20 = vrot.slane %v1011_v32, %v6314_v30  ;;  %v13120_v59 = vld [vmem:[#allocation51_spill] sm:$0xff]  ;;  %vm503_vm11 = vcmp.ge.s32.totalorder %v6451_v48, 32  ;;  %vm938_vm12 = vcmp.lt.s32.totalorder %v6451_v48, 96 }
 0x1a7   : > { %v6530_v22 = vmul.f32 %v1083_v54, %v13100_v9  ;;  %v6535_v47 = vpop.permute.xlu0 %1267  ;;  %13104 = vst [vmem:[#allocation37_spill] sm:$0xff] %v6538_v2  ;;  %13108 = vst [vmem:[#allocation39_spill] sm:$0xff] %v6544_v27  ;;  %v819_v9 = vsel %vm801_vm10, %v13110_v21, %v13109_v3  ;;  %v6550_v7 = vld [vmem:[#allocation5 + $0x7] ss:$8 sm:$0xf]  ;;  %1774 = vrot.lane.b32.xlu1 %v6509_v56, %s5333_s30  ;;  %v6569_v27 = vsel %vm6330_vm7, %v670_v57, 0.0 }
 0x1a8   : > { %13102 = vst [vmem:[#allocation149_spill] sm:$0xff] %v6535_v47  ;;  %v13111_v47 = vld [vmem:[#allocation50_spill] sm:$0xff]  ;;  %v6563_v58 = vrot.slane %v6550_v7, %v6314_v30  ;;  %v13113_v2 = vld [vmem:[#allocation40_spill] sm:$0xff]  ;;  %v6588_v57 = vrot.slane %v1011_v32, %v6379_v60 }
 0x1a9   : > { %13101 = vst [vmem:[#allocation36_spill] sm:$0xff] %v6530_v22  ;;  %v1153_v22 = vld [vmem:[#allocation5 + $0x2] ss:$8 sm:$0xf]  ;;  %v818_v52 = vsel %vm801_vm10, %v13112_v14, %v13111_v47  ;;  %1772 = vrot.lane.b32.xlu0 %v6517_v45, %s5333_s30  ;;  %v6572_v10 = vmul.f32 %v1083_v54, %v13113_v2  ;;  %v6574_v50 = vpop.permute.xlu1 %1273  ;;  %v1038_v14 = vmul.f32 %v6533_v24, %v819_v9  ;;  %13116 = vst [vmem:[#allocation50_spill] sm:$0xff] %v6585_v20 }
 0x1aa   : > { %13115 = vst [vmem:[#allocation42_spill] sm:$0xff] %v6574_v50  ;;  %13117 = vst [vmem:[#allocation40_spill] sm:$0xff] %v6588_v57  ;;  %v6591_v2 = vrot.slane %v1153_v22, %v6314_v30  ;;  %v1034_v37 = vmul.f32 %v6533_v24, %v818_v52  ;;  %v13121_v50 = vld [vmem:[#allocation41_spill] sm:$0xff]  ;;  %v6601_v9 = vrot.slane %v1153_v22, %v6343_v42 }
 0x1ab   : > { %13114 = vst [vmem:[#allocation49_spill] sm:$0xff] %v6572_v10  ;;  %v6593_v54 = vpop.permute.xlu0 %1271  ;;  %v821_v34 = vsel %vm801_vm10, %v13121_v50, %v13120_v59  ;;  %v6604_v10 = vrot.slane %v1153_v22, %v6350_v41  ;;  %v6606_v32 = vld [vmem:[#allocation5 + $0x3] ss:$8 sm:$0xf]  ;;  %1778 = vrot.lane.b32.xlu1 %v6569_v27, %s5333_s30  ;;  %v6615_v30 = vrot.slane %v1153_v22, %v6379_v60  ;;  %v13129_v22 = vrot.slane %v5669_v33, 1 }
 0x1ac   : > { %13118 = vst [vmem:[#allocation150_spill] sm:$0xff] %v6591_v2  ;;  %13119 = vst [vmem:[#allocation151_spill] sm:$0xff] %v6593_v54  ;;  %v13124_v2 = vld [vmem:[#allocation52_spill] sm:$0xff]  ;;  %v13125_v54 = vld [vmem:[#allocation47_spill] sm:$0xff]  ;;  %v6619_v50 = vmul.f32 %v6563_v58, %v6324_v12  ;;  %v6631_v20 = vsel %vm656_vm5, %v641_v13, %v645_v15  ;;  %v634_v12 = vrot.slane %v5794_v17, 1  ;;  %v6640_v60 = vadd.f32 %v6424_v11, %v1038_v14 }
 0x1ad   : > { %13122 = vst [vmem:[#allocation51_spill] sm:$0xff] %v6601_v9  ;;  %13123 = vst [vmem:[#allocation152_spill] sm:$0xff] %v6604_v10  ;;  %v820_v52 = vsel %vm801_vm10, %v13125_v54, %v13124_v2  ;;  %1776 = vrot.lane.b32.xlu0 %v6578_v40, %s5333_s30  ;;  %v6625_v10 = vsel %vm6364_vm8, %v662_v23, 0.0  ;;  %v6627_v9 = vpop.permute.xlu1 %1277  ;;  %v1046_v23 = vmul.f32 %v6533_v24, %v821_v34  ;;  %v13135_v17 = vld [vmem:[#allocation53_spill] sm:$0xff]  ;;  %v13136_v11 = vld [vmem:[#allocation43_spill] sm:$0xff] }
 0x1ae   : > { %13126 = vst [vmem:[#allocation52_spill] sm:$0xff] %v6615_v30  ;;  %13127 = vst [vmem:[#allocation153_spill] sm:$0xff] %v6619_v50  ;;  %v686_v30 = vsel %vm656_vm5, %v653_v51, %v13129_v22  ;;  %v630_v50 = vrot.slane %v5785_v8, 1  ;;  %v6649_v13 = vrot.slane %v6606_v32, %v6343_v42  ;;  %v6654_v15 = vadd.f32 %v6427_v43, %v1034_v37  ;;  %v13137_v34 = vld [vmem:[#allocation54_spill] sm:$0xff] }
 0x1af   : > { %13128 = vst [vmem:[#allocation154_spill] sm:$0xff] %v6627_v9  ;;  %13130 = vst [vmem:[#allocation155_spill] sm:$0xff] %v6640_v60  ;;  %v6645_v9 = vmul.f32 %v6563_v58, %v6328_v28  ;;  %v6651_v33 = vpop.permute.xlu0 %1275  ;;  %v1042_v8 = vmul.f32 %v6533_v24, %v820_v52  ;;  %v823_v14 = vsel %vm801_vm10, %v13136_v11, %v13135_v17  ;;  %v13138_v22 = vld [vmem:[#allocation46_spill] sm:$0xff]  ;;  %1782 = vrot.lane.b32.xlu1 %v6625_v10, %s5333_s30  ;;  %v13147_v11 = vld [vmem:[#allocation24_spill] sm:$0xff] }
 0x1b0   : > { %13132 = vst [vmem:[#allocation157_spill] sm:$0xff] %v6649_v13  ;;  %13133 = vst [vmem:[#allocation158_spill] sm:$0xff] %v6651_v33  ;;  %v13139_v13 = vld [vmem:[#allocation55_spill] sm:$0xff]  ;;  %v13140_v33 = vld [vmem:[#allocation45_spill] sm:$0xff]  ;;  %v6673_v37 = vmul.f32 %v6563_v58, %v6356_v16  ;;  %v6679_v52 = vsel %vm6415_vm9, %v686_v30, 0.0  ;;  %v679_v28 = vsel %vm656_vm5, %v630_v50, %v634_v12  ;;  %v642_v54 = vrot.slane %v13147_v11, 1 }
 0x1b1   : > { %13131 = vst [vmem:[#allocation156_spill] sm:$0xff] %v6645_v9  ;;  %13134 = vst [vmem:[#allocation159_spill] sm:$0xff] %v6654_v15  ;;  %v822_v9 = vsel %vm801_vm10, %v13138_v22, %v13137_v34  ;;  %v825_v43 = vsel %vm801_vm10, %v13140_v33, %v13139_v13  ;;  %1780 = vrot.lane.b32.xlu0 %v6631_v20, %s5333_s30  ;;  %v6683_v15 = vsel %vm656_vm5, %v649_v36, %v653_v51  ;;  %v6685_v60 = vpop.permute.xlu1 %1281  ;;  %v13145_v33 = vld [vmem:[#allocation21_spill] sm:$0xff]  ;;  %v13146_v16 = vld [vmem:[#allocation23_spill] sm:$0xff] }
 0x1b2   : > { %13141 = vst [vmem:[#allocation53_spill] sm:$0xff] %v6673_v37  ;;  %13142 = vst [vmem:[#allocation54_spill] sm:$0xff] %v6679_v52  ;;  %v638_v37 = vrot.slane %v13146_v16, 1  ;;  %v6693_v57 = vadd.f32 %v6430_v31, %v1046_v23  ;;  %v1054_v30 = vmul.f32 %v6533_v24, %v823_v14  ;;  %v1050_v13 = vmul.f32 %v6533_v24, %v822_v9  ;;  %v13152_v22 = vld [vmem:[#allocation56_spill] sm:$0xff]  ;;  %v13157_v14 = vld [vmem:[#allocation58_spill] sm:$0xff] }
 0x1b3   : > { %13143 = vst [vmem:[#allocation160_spill] sm:$0xff] %v6683_v15  ;;  %13144 = vst [vmem:[#allocation161_spill] sm:$0xff] %v6685_v60  ;;  %v6699_v51 = vmul.f32 %v6563_v58, %v6360_v19  ;;  %v6701_v36 = vpop.permute.xlu0 %1279  ;;  %v6704_v60 = vadd.f32 %v6436_v35, %v1042_v8  ;;  %v13153_v16 = vld [vmem:[#allocation48_spill] sm:$0xff]  ;;  %v6712_v31 = vmul.f32 %v6563_v58, %v6407_v25  ;;  %1786 = vrot.lane.b32.xlu1 %v6679_v52, %s5333_s30  ;;  %v13156_v35 = vld [vmem:[#allocation57_spill] sm:$0xff] }
 0x1b4   : > { %13148 = vst [vmem:[#allocation21_spill] sm:$0xff] %v6693_v57  ;;  %13150 = vst [vmem:[#allocation24_spill] sm:$0xff] %v6701_v36  ;;  %v824_v11 = vsel %vm801_vm10, %v13153_v16, %v13152_v22  ;;  %v6716_v9 = vmul.f32 %v6563_v58, %v6411_v29  ;;  %v1062_v23 = vmul.f32 %v6533_v24, %v825_v43  ;;  %v13160_v43 = vrot.slane %v13145_v33, 1  ;;  %v13162_v29 = vld [vmem:[#allocation26_spill] sm:$0xff] }
 0x1b5   : > { %13149 = vst [vmem:[#allocation23_spill] sm:$0xff] %v6699_v51  ;;  %13151 = vst [vmem:[#allocation162_spill] sm:$0xff] %v6704_v60  ;;  %v811_v8 = vsel %vm801_vm10, %v13109_v3, %v13156_v35  ;;  %v810_v51 = vsel %vm801_vm10, %v13111_v47, %v13157_v14  ;;  %1784 = vrot.lane.b32.xlu0 %v6683_v15, %s5333_s30  ;;  %v6743_v3 = vld [vmem:[#allocation5 + $0x4] ss:$8 sm:$0xf]  ;;  %v671_v47 = vsel %vm656_vm5, %v638_v37, %v642_v54 }
 0x1b6   : > { %13154 = vst [vmem:[#allocation56_spill] sm:$0xff] %v6712_v31  ;;  %13155 = vst [vmem:[#allocation163_spill] sm:$0xff] %v6716_v9  ;;  %v6733_v9 = vsel %vm6306_vm6, %v679_v28, 0.0  ;;  %v6735_v31 = vpop.permute.xlu1 %1285  ;;  %v6741_v36 = vsel %vm656_vm5, %v13160_v43, %v630_v50  ;;  %v13161_v60 = vld [vmem:[#allocation25_spill] sm:$0xff]  ;;  %v650_v25 = vrot.slane %v13162_v29, 1  ;;  %v6750_v28 = vadd.f32 %v6439_v38, %v1054_v30  ;;  %v13165_v15 = vld [vmem:[#allocation59_spill] sm:$0xff] }
 0x1b7   : > { %13158 = vst [vmem:[#allocation57_spill] sm:$0xff] %v6733_v9  ;;  %13159 = vst [vmem:[#allocation58_spill] sm:$0xff] %v6735_v31  ;;  %v646_v57 = vrot.slane %v13161_v60, 1  ;;  %v6753_v31 = vadd.f32 %v6442_v46, %v1050_v13  ;;  %v1058_v19 = vmul.f32 %v6533_v24, %v824_v11  ;;  %v6758_v50 = vrot.slane %v6550_v7, %v6343_v42  ;;  %v6760_v43 = vpop.permute.xlu0 %1283  ;;  %v13167_v24 = vld [vmem:[#allocation60_spill] sm:$0xff] }
 0x1b8   : > { %13164 = vst [vmem:[#allocation26_spill] sm:$0xff] %v6760_v43  ;;  %v1039_v16 = vmul.f32 %v6559_v62, %v811_v8  ;;  %v1035_v60 = vmul.f32 %v6559_v62, %v810_v51  ;;  %v813_v29 = vsel %vm801_vm10, %v13120_v59, %v13165_v15  ;;  %v6770_v38 = vmul.f32 %v6563_v58, %v6461_v6  ;;  %v13171_v8 = vld [vmem:[#allocation22_spill] sm:$0xff] }
 0x1b9   : > { %13163 = vst [vmem:[#allocation25_spill] sm:$0xff] %v6753_v31  ;;  %1790 = vrot.lane.b32.xlu1 %v6733_v9, %s5333_s30  ;;  %v812_v46 = vsel %vm801_vm10, %v13124_v2, %v13167_v24  ;;  %v6780_v13 = vmul.f32 %v6563_v58, %v6457_v61  ;;  %1788 = vrot.lane.b32.xlu0 %v6741_v36, %s5333_s30  ;;  %v6786_v59 = vsel %vm6330_vm7, %v671_v47, 0.0  ;;  %v654_v47 = vrot.slane %v13171_v8, 1  ;;  %v13225_v31 = vld [vmem:[#allocation40_spill] sm:$0xff] }
 0x1ba   : > { %13166 = vst [vmem:[#allocation59_spill] sm:$0xff] %v6770_v38  ;;  %v6790_v30 = vrot.slane %v6743_v3, %v6343_v42  ;;  %v6793_v51 = vadd.f32 %v6445_v53, %v1062_v23  ;;  %v6796_v2 = vpop.permute.xlu1 %1289  ;;  %v6800_v58 = vsel %vm656_vm5, %v634_v12, %v638_v37  ;;  %v663_v11 = vsel %vm656_vm5, %v646_v57, %v650_v25 }
 0x1bb   : > { %13168 = vst [vmem:[#allocation60_spill] sm:$0xff] %v6780_v13  ;;  %13170 = vst [vmem:[#allocation165_spill] sm:$0xff] %v6796_v2  ;;  %v6806_v13 = vadd.f32 %v6471_v18, %v1058_v19  ;;  %v1047_v38 = vmul.f32 %v6559_v62, %v813_v29  ;;  %v6811_v53 = vmul.f32 %v6758_v50, %v6509_v56  ;;  %v6817_v12 = vpop.permute.xlu0 %1287  ;;  %v13179_v29 = vld [vmem:[#allocation61_spill] sm:$0xff] }
 0x1bc   : > { %13169 = vst [vmem:[#allocation164_spill] sm:$0xff] %v6793_v51  ;;  %v6815_v23 = vrot.slane %v6606_v32, %v6350_v41  ;;  %13175 = vst [vmem:[#allocation168_spill] sm:$0xff] %v6817_v12  ;;  %v6820_v37 = vadd.f32 %v6474_v44, %v1039_v16  ;;  %v6823_v8 = vadd.f32 %v6477_v26, %v1035_v60  ;;  %v6848_v60 = vsel %vm6364_vm8, %v663_v11, 0.0  ;;  %v13185_v12 = vld [vmem:[#allocation30_spill] sm:$0xff] }
 0x1bd   : > { %13172 = vst [vmem:[#allocation22_spill] sm:$0xff] %v6806_v13  ;;  %13173 = vst [vmem:[#allocation166_spill] sm:$0xff] %v6811_v53  ;;  %v1043_v19 = vmul.f32 %v6559_v62, %v812_v46  ;;  %v6828_v18 = vmul.f32 %v6758_v50, %v6517_v45  ;;  %1794 = vrot.lane.b32.xlu1 %v6786_v59, %s5333_s30  ;;  %v815_v44 = vsel %vm801_vm10, %v13135_v17, %v13179_v29 }
 0x1be   : > { %13174 = vst [vmem:[#allocation167_spill] sm:$0xff] %v6815_v23  ;;  %13176 = vst [vmem:[#allocation169_spill] sm:$0xff] %v6820_v37  ;;  %v6838_v26 = vmul.f32 %v6758_v50, %v6569_v27  ;;  %v6842_v16 = vmul.f32 %v6758_v50, %v6578_v40  ;;  %1792 = vrot.lane.b32.xlu0 %v6800_v58, %s5333_s30  ;;  %v6850_v46 = vpop.permute.xlu1 %1293  ;;  %v6854_v17 = vsel %vm656_vm5, %v642_v54, %v646_v57  ;;  %v5065_v57 = vld [vmem:[%s5582_s1 + $0x8] sm:$0xff]  ;;  %v13210_v37 = vld [vmem:[#allocation64_spill] sm:$0xff] }
 0x1bf   : > { %13177 = vst [vmem:[#allocation170_spill] sm:$0xff] %v6823_v8  ;;  %13178 = vst [vmem:[#allocation171_spill] sm:$0xff] %v6828_v18  ;;  %v13183_v18 = vrot.slane %v13145_v33, 1  ;;  %v12586_v2 = vrot.slane %v13185_v12, 1  ;;  %v6863_v43 = vadd.f32 %v6480_v55, %v1047_v38  ;;  %v6865_v11 = vpop.permute.xlu0 %1291  ;;  %v6873_v54 = vmul.f32 %v5065_v57, %v6790_v30  ;;  %v13192_v38 = vld [vmem:[#allocation62_spill] sm:$0xff]  ;;  %v13209_v8 = vld [vmem:[#allocation55_spill] sm:$0xff] }
 0x1c0   : > { %13180 = vst [vmem:[#allocation61_spill] sm:$0xff] %v6838_v26  ;;  %13181 = vst [vmem:[#allocation172_spill] sm:$0xff] %v6842_v16  ;;  %v13184_v16 = vld [vmem:[#allocation29_spill] sm:$0xff]  ;;  %v6877_v33 = vmul.f32 %v6790_v30, %v5722_v49  ;;  %v1055_v55 = vmul.f32 %v6559_v62, %v815_v44  ;;  %v6909_v44 = vsel %vm656_vm5, %v650_v25, %v654_v47 }
 0x1c1   : > { %13182 = vst [vmem:[#allocation173_spill] sm:$0xff] %v6850_v46  ;;  %v687_v26 = vsel %vm656_vm5, %v654_v47, %v13183_v18  ;;  %v631_v53 = vrot.slane %v13184_v16, 1  ;;  %13186 = vst [vmem:[#allocation29_spill] sm:$0xff] %v6863_v43  ;;  %v5064_v46 = vld [vmem:[%s5582_s1 + $0x28] sm:$0xff]  ;;  %v6880_v18 = vadd.f32 %v6485_v5, %v1043_v19  ;;  %v814_v16 = vsel %vm801_vm10, %v13137_v34, %v13192_v38 }
 0x1c2   : > { %13187 = vst [vmem:[#allocation30_spill] sm:$0xff] %v6865_v11  ;;  %v6869_v23 = vmul.f32 %v5064_v46, %v6790_v30  ;;  %13189 = vst [vmem:[#allocation175_spill] sm:$0xff] %v6873_v54  ;;  %1798 = vrot.lane.b32.xlu1 %v6848_v60, %s5333_s30  ;;  %v5066_v46 = vld [vmem:[%s5582_s1 + $0x48] sm:$0xff]  ;;  %v6899_v19 = vmul.f32 %v6758_v50, %v6625_v10  ;;  %1796 = vrot.lane.b32.xlu0 %v6854_v17, %s5333_s30  ;;  %v6905_v34 = vsel %vm6415_vm9, %v687_v26, 0.0  ;;  %v13201_v54 = vld [vmem:[#allocation32_spill] sm:$0xff] }
 0x1c3   : > { %13190 = vst [vmem:[#allocation176_spill] sm:$0xff] %v6877_v33  ;;  %13191 = vst [vmem:[#allocation177_spill] sm:$0xff] %v6880_v18  ;;  %v6891_v57 = vmul.f32 %v5066_v46, %v6790_v30  ;;  %v13194_v49 = vld [vmem:[#allocation65_spill] sm:$0xff]  ;;  %v6911_v46 = vpop.permute.xlu1 %1297  ;;  %v1051_v26 = vmul.f32 %v6559_v62, %v814_v16  ;;  %v6923_v25 = vmul.f32 %v6758_v50, %v6631_v20  ;;  %v6925_v47 = vpop.permute.xlu0 %1295  ;;  %v13206_v11 = vld [vmem:[#allocation142_spill] sm:$0xff] }
 0x1c4   : > { %13188 = vst [vmem:[#allocation174_spill] sm:$0xff] %v6869_v23  ;;  %v827_v5 = vsel %vm801_vm10, %v13194_v49, %v13110_v21  ;;  %13195 = vst [vmem:[#allocation65_spill] sm:$0xff] %v6899_v19  ;;  %v680_v21 = vsel %vm656_vm5, %v631_v53, %v12586_v2  ;;  %v13199_v19 = vld [vmem:[#allocation27_spill] sm:$0xff]  ;;  %v5068_v43 = vld [vmem:[%s5582_s1 + $0x88] sm:$0xff] }
 0x1c5   : > { %13193 = vst [vmem:[#allocation62_spill] sm:$0xff] %v6891_v57  ;;  %13196 = vst [vmem:[#allocation178_spill] sm:$0xff] %v6905_v34  ;;  %v13200_v57 = vld [vmem:[#allocation31_spill] sm:$0xff]  ;;  %v6933_v2 = vmul.f32 %v5068_v43, %v6790_v30  ;;  %v13256_v0 = vrot.slane %v13199_v19, 1 }
 0x1c6   : > { %13197 = vst [vmem:[#allocation179_spill] sm:$0xff] %v6909_v44  ;;  %13198 = vst [vmem:[#allocation180_spill] sm:$0xff] %v6911_v46  ;;  %v639_v33 = vrot.slane %v13200_v57, 1  ;;  %v5067_v46 = vld [vmem:[%s5582_s1 + $0xa8] sm:$0xff]  ;;  %v6936_v57 = vadd.f32 %v13206_v11, %v1055_v55  ;;  %v13208_v23 = vld [vmem:[#allocation63_spill] sm:$0xff]  ;;  %1802 = vrot.lane.b32.xlu1 %v6905_v34, %s5333_s30  ;;  %v803_v11 = vsel %vm801_vm10, %v13156_v35, %v13194_v49  ;;  %1800 = vrot.lane.b32.xlu0 %v6909_v44, %s5333_s30 }
 0x1c7   : > { %13202 = vst [vmem:[#allocation27_spill] sm:$0xff] %v6923_v25  ;;  %13203 = vst [vmem:[#allocation31_spill] sm:$0xff] %v6925_v47  ;;  %v6929_v18 = vmul.f32 %v5067_v46, %v6790_v30  ;;  %v817_v16 = vsel %vm801_vm10, %v13209_v8, %v13208_v23  ;;  %v816_v25 = vsel %vm801_vm10, %v13152_v22, %v13210_v37  ;;  %v5069_v46 = vld [vmem:[%s5582_s1 + $0xe8] sm:$0xff]  ;;  %v846_v8 = vsel %vm503_vm11, %v827_v5, 0.0  ;;  %v13212_v55 = vld [vmem:[#allocation44_spill] sm:$0xff] }
 0x1c8   : > { %13205 = vst [vmem:[#allocation181_spill] sm:$0xff] %v6933_v2  ;;  %13207 = vst [vmem:[#allocation142_spill] sm:$0xff] %v6936_v57  ;;  %v6950_v43 = vmul.f32 %v5069_v46, %v6790_v30  ;;  %v13213_v47 = vld [vmem:[#allocation66_spill] sm:$0xff]  ;;  %v6966_v46 = vsel %vm6306_vm6, %v680_v21, 0.0  ;;  %v13216_v2 = vrot.slane %v13199_v19, 1  ;;  %v13218_v49 = vrot.slane %v13201_v54, 1 }
 0x1c9   : > { %13204 = vst [vmem:[#allocation32_spill] sm:$0xff] %v6929_v18  ;;  %v826_v22 = vsel %vm801_vm10, %v13213_v47, %v13212_v55  ;;  %13214 = vst [vmem:[#allocation55_spill] sm:$0xff] %v6966_v46  ;;  %v13219_v55 = vld [vmem:[#allocation33_spill] sm:$0xff]  ;;  %v13220_v57 = vld [vmem:[#allocation34_spill] sm:$0xff]  ;;  %v1059_v51 = vmul.f32 %v6559_v62, %v816_v25 }
 0x1ca   : > { %13211 = vst [vmem:[#allocation63_spill] sm:$0xff] %v6950_v43  ;;  %v6968_v43 = vpop.permute.xlu1 %1301  ;;  %v6974_v35 = vsel %vm656_vm5, %v13216_v2, %v631_v53  ;;  %v672_v5 = vsel %vm656_vm5, %v639_v33, %v13218_v49  ;;  %v647_v18 = vrot.slane %v13219_v55, 1  ;;  %v13221_v21 = vld [vmem:[#allocation143_spill] sm:$0xff]  ;;  %v6989_v2 = vmul.f32 %v6758_v50, %v6679_v52  ;;  %v6991_v53 = vpop.permute.xlu0 %1299  ;;  %1806 = vrot.lane.b32.xlu1 %v6966_v46, %s5333_s30  ;;  %v5057_v19 = vld [vmem:[#allocation7 + $0x8] sm:$0xff]  }
 0x1cb   : > { %13215 = vst [vmem:[#allocation64_spill] sm:$0xff] %v6968_v43  ;;  %13217 = vst [vmem:[#allocation44_spill] sm:$0xff] %v6974_v35  ;;  %v6983_v13 = vadd.f32 %v13221_v21, %v1051_v26  ;;  %v1063_v43 = vmul.f32 %v6559_v62, %v817_v16  ;;  %v1040_v49 = vmul.f32 %v13225_v31, %v803_v11  ;;  %v842_v26 = vsel %vm503_vm11, %v826_v22, 0.0  ;;  %v13226_v62 = vld [vmem:[#allocation50_spill] sm:$0xff]  ;;  %v13227_v21 = vld [vmem:[#allocation160_spill] sm:$0xff] }
 0x1cc   : > { %13223 = vst [vmem:[#allocation33_spill] sm:$0xff] %v6989_v2  ;;  %13224 = vst [vmem:[#allocation34_spill] sm:$0xff] %v6991_v53  ;;  %v802_v55 = vsel %vm801_vm10, %v13157_v14, %v13213_v47  ;;  %v7002_v16 = vrot.slane %v6550_v7, %v6350_v41  ;;  %v1037_v25 = vmul.f32 %v13226_v62, %v846_v8  ;;  %1804 = vrot.lane.b32.xlu0 %v6974_v35, %s5333_s30  ;;  %v5070_v47 = vld [vmem:[%s5582_s1 + $0xc8] sm:$0xff]  ;;  %v13232_v2 = vld [vmem:[#allocation67_spill] sm:$0xff] }
 0x1cd   : > { %13222 = vst [vmem:[#allocation66_spill] sm:$0xff] %v6983_v13  ;;  %v7009_v11 = vmul.f32 %v6758_v50, %v13227_v21  ;;  %v7015_v14 = vsel %vm6330_vm7, %v672_v5, 0.0  ;;  %v7019_v22 = vmul.f32 %v5070_v47, %v6790_v30  ;;  %v829_v8 = vsel %vm801_vm10, %v13232_v2, %v13231_v4  ;;  %v13237_v30 = vld [vmem:[#allocation28_spill] sm:$0xff]  ;;  %v13243_v21 = vld [vmem:[#allocation146_spill] sm:$0xff] }
 0x1ce   : > { %13229 = vst [vmem:[#allocation40_spill] sm:$0xff] %v7015_v14  ;;  %v7025_v53 = vpop.permute.xlu1 %1369  ;;  %v13234_v50 = vrot.slane %v13185_v12, 1  ;;  %v13236_v5 = vrot.slane %v13220_v57, 1  ;;  %v655_v47 = vrot.slane %v13237_v30, 1  ;;  %v1033_v4 = vmul.f32 %v13226_v62, %v842_v26  ;;  %v7043_v52 = vpop.permute.xlu0 %1367  ;;  %1810 = vrot.lane.b32.xlu1 %v7015_v14, %s5333_s30  ;;  %v13251_v30 = vld [vmem:[#allocation47_spill] sm:$0xff] }
 0x1cf   : > { %13228 = vst [vmem:[#allocation143_spill] sm:$0xff] %v7009_v11  ;;  %13230 = vst [vmem:[#allocation50_spill] sm:$0xff] %v7019_v22  ;;  %v13238_v22 = vld [vmem:[#allocation144_spill] sm:$0xff]  ;;  %v7047_v12 = vrot.slane %v6743_v3, %v6350_v41  ;;  %v854_v26 = vsel %vm503_vm11, %v829_v8, 0.0 }
 0x1d0   : > { %13233 = vst [vmem:[#allocation41_spill] sm:$0xff] %v7025_v53  ;;  %v7031_v11 = vsel %vm656_vm5, %v13234_v50, %v639_v33  ;;  %v664_v63 = vsel %vm656_vm5, %v647_v18, %v13236_v5  ;;  %v7039_v13 = vadd.f32 %v13238_v22, %v1063_v43  ;;  %v1036_v53 = vmul.f32 %v13225_v31, %v802_v55  ;;  %v13241_v33 = vld [vmem:[#allocation145_spill] sm:$0xff]  ;;  %v13252_v8 = vld [vmem:[#allocation68_spill] sm:$0xff] }
 0x1d1   : > { %13235 = vst [vmem:[#allocation67_spill] sm:$0xff] %v7031_v11  ;;  %13240 = vst [vmem:[#allocation144_spill] sm:$0xff] %v7043_v52  ;;  %v7050_v50 = vadd.f32 %v13241_v33, %v1059_v51  ;;  %v7053_v5 = vadd.f32 %v13243_v21, %v1040_v49  ;;  %v805_v43 = vsel %vm801_vm10, %v13165_v15, %v13232_v2  ;;  %v13247_v49 = vld [vmem:[#allocation111_spill] sm:$0xff]  ;;  %1808 = vrot.lane.b32.xlu0 %v7031_v11, %s5333_s30  ;;  %v13250_v2 = vld [vmem:[#allocation125_spill] sm:$0xff] }
 0x1d2   : > { %13239 = vst [vmem:[#allocation28_spill] sm:$0xff] %v7039_v13  ;;  %v7061_v55 = vmul.f32 %v7002_v16, %v6733_v9  ;;  %v7069_v51 = vmul.f32 %v7002_v16, %v6741_v36  ;;  %v7073_v21 = vrot.slane %v6606_v32, %v13247_v49  ;;  %v7079_v15 = vsel %vm6364_vm8, %v664_v63, 0.0  ;;  %v13262_v13 = vld [vmem:[#allocation69_spill] sm:$0xff] }
 0x1d3   : > { %13242 = vst [vmem:[#allocation145_spill] sm:$0xff] %v7050_v50  ;;  %13244 = vst [vmem:[#allocation146_spill] sm:$0xff] %v7053_v5  ;;  %v7082_v22 = vadd.f32 %v13250_v2, %v1037_v25  ;;  %v828_v33 = vsel %vm801_vm10, %v13252_v8, %v13251_v30  ;;  %v688_v63 = vsel %vm656_vm5, %v655_v47, %v13256_v0  ;;  %v7100_v25 = vld [vmem:[#allocation7] sm:$0xff]   ;;  %v13257_v2 = vld [vmem:[#allocation129_spill] sm:$0xff]  ;;  %1814 = vrot.lane.b32.xlu1 %v7079_v15, %s5333_s30 }
 0x1d4   : > { %13245 = vst [vmem:[#allocation182_spill] sm:$0xff] %v7061_v55  ;;  %13246 = vst [vmem:[#allocation183_spill] sm:$0xff] %v7069_v51  ;;  %v7088_v51 = vpop.permute.xlu1 %1373  ;;  %v13254_v55 = vrot.slane %v13201_v54, 1  ;;  %v13258_v50 = vld [vmem:[#allocation148_spill] sm:$0xff]  ;;  %v804_v54 = vsel %vm801_vm10, %v13167_v24, %v13252_v8  ;;  %v1045_v0 = vmul.f32 %v13226_v62, %v854_v26  ;;  %4876 = vmatprep.subr.bf16.mxu0 %v7100_v25  ;;  %v850_v24 = vsel %vm503_vm11, %v828_v33, 0.0  ;;  %v13265_v26 = vld [vmem:[#allocation45_spill] sm:$0xff] }
 0x1d5   : > { %13248 = vst [vmem:[#allocation184_spill] sm:$0xff] %v7073_v21  ;;  %13249 = vst [vmem:[#allocation185_spill] sm:$0xff] %v7079_v15  ;;  %v7103_v21 = vadd.f32 %v13257_v2, %v1033_v4  ;;  %v7106_v30 = vadd.f32 %v13258_v50, %v1036_v53  ;;  %v13263_v2 = vld [vmem:[#allocation46_spill] sm:$0xff]  ;;  %v13266_v8 = vld [vmem:[#allocation71_spill] sm:$0xff]  ;;  %4877 = vmatpush3.bf16.msra.mxu0 %v7100_v25  ;;  %v1044_v33 = vmul.f32 %v13225_v31, %v804_v54 }
 0x1d6   : > { %13253 = vst [vmem:[#allocation125_spill] sm:$0xff] %v7088_v51  ;;  %v7094_v52 = vsel %vm656_vm5, %v13254_v55, %v647_v18  ;;  %v1048_v51 = vmul.f32 %v13225_v31, %v805_v43  ;;  %v7113_v18 = vpop.permute.xlu0 %1371  ;;  %v13261_v55 = vld [vmem:[#allocation43_spill] sm:$0xff]  ;;  %v13264_v53 = vld [vmem:[#allocation70_spill] sm:$0xff]  ;;  %v807_v43 = vsel %vm801_vm10, %v13179_v29, %v13262_v13  ;;  %4878 = vmatprep.subr.bf16.mxu0 %v5057_v19 }
 0x1d7   : > { %13255 = vst [vmem:[#allocation47_spill] sm:$0xff] %v7094_v52  ;;  %13259 = vst [vmem:[#allocation68_spill] sm:$0xff] %v7106_v30  ;;  %v831_v4 = vsel %vm801_vm10, %v13262_v13, %v13261_v55  ;;  %v830_v50 = vsel %vm801_vm10, %v13264_v53, %v13263_v2  ;;  %v833_v55 = vsel %vm801_vm10, %v13266_v8, %v13265_v26  ;;  %1812 = vrot.lane.b32.xlu0 %v7094_v52, %s5333_s30 }
 0x1d8   : > { %13260 = vst [vmem:[#allocation129_spill] sm:$0xff] %v7113_v18  ;;  %v7141_v2 = vsel %vm6415_vm9, %v688_v63, 0.0  ;;  %v806_v13 = vsel %vm801_vm10, %v13192_v38, %v13264_v53  ;;  %v7149_v29 = vpop.permute.xlu1 %1377  ;;  %v13269_v26 = vrot.slane %v13220_v57, 1  ;;  %4900 = vmatprep.subr.bf16.mxu1 %v7100_v25  ;;  %v862_v63 = vsel %vm503_vm11, %v831_v4, 0.0  ;;  %v13271_v53 = vld [vmem:[#allocation48_spill] sm:$0xff] }
 0x1d9   : > { %13267 = vst [vmem:[#allocation148_spill] sm:$0xff] %v7141_v2  ;;  %13268 = vst [vmem:[#allocation43_spill] sm:$0xff] %v7149_v29  ;;  %v858_v54 = vsel %vm503_vm11, %v830_v50, 0.0  ;;  %v809_v38 = vsel %vm801_vm10, %v13208_v23, %v13266_v8  ;;  %v13272_v57 = vld [vmem:[#allocation72_spill] sm:$0xff]  ;;  %4901 = vmatpush3.bf16.msra.mxu1 %v7100_v25  ;;  %v1041_v4 = vmul.f32 %v13226_v62, %v850_v24  ;;  %v870_v50 = vsel %vm503_vm11, %v833_v55, 0.0 }
 0x1da   : > { %v7155_v18 = vsel %vm656_vm5, %v13269_v26, %v655_v47  ;;  %v832_v47 = vsel %vm801_vm10, %v13272_v57, %v13271_v53  ;;  %v7170_v26 = vpop.permute.xlu0 %1375  ;;  %v1056_v1 = vmul.f32 %v13225_v31, %v807_v43  ;;  %v808_v23 = vsel %vm801_vm10, %v13210_v37, %v13272_v57  ;;  %1818 = vrot.lane.b32.xlu1 %v7141_v2, %s5333_s30  ;;  %v13274_v53 = vld [vmem:[#allocation126_spill] sm:$0xff] }
 0x1db   : > { %13270 = vst [vmem:[#allocation69_spill] sm:$0xff] %v7155_v18  ;;  %13273 = vst [vmem:[#allocation46_spill] sm:$0xff] %v7170_v26  ;;  %4902 = vmatprep.subr.bf16.mxu1 %v5057_v19  ;;  %v1052_v8 = vmul.f32 %v13225_v31, %v806_v13  ;;  %v7186_v26 = vrot.slane %v6606_v32, %v13274_v53  ;;  %v1600_v24 = vrot.slane %v6743_v3, %v13274_v53  ;;  %v13277_v32 = vld [vmem:[#allocation124_spill] sm:$0xff] }
 0x1dc   : > { %1816 = vrot.lane.b32.xlu0 %v7155_v18, %s5333_s30  ;;  %4879 = vmatpush3.bf16.msra.mxu0 %v5057_v19  ;;  %v1053_v43 = vmul.f32 %v13226_v62, %v862_v63  ;;  %v1049_v37 = vmul.f32 %v13226_v62, %v858_v54  ;;  %v1064_v55 = vmul.f32 %v13225_v31, %v809_v38  ;;  %v866_v13 = vsel %vm503_vm11, %v832_v47, 0.0  ;;  %v7197_v57 = vpop.permute.xlu1 %1381  ;;  %v5059_v38 = vld [vmem:[#allocation7 + $0x18] sm:$0xff]   ;;  %v13280_v47 = vld [vmem:[#allocation132_spill] sm:$0xff] }
 0x1dd   : > { %13275 = vst [vmem:[#allocation70_spill] sm:$0xff] %v7186_v26  ;;  %13276 = vst [vmem:[#allocation45_spill] sm:$0xff] %v7197_v57  ;;  %4880 = vmatprep.subr.bf16.mxu0 %v5058_v39  ;;  %v7200_v29 = vadd.f32 %v13277_v32, %v1045_v0  ;;  %v13278_v26 = vld [vmem:[#allocation35_spill] sm:$0xff]  ;;  %v1061_v5 = vmul.f32 %v13226_v62, %v870_v50  ;;  %v1060_v63 = vmul.f32 %v13225_v31, %v808_v23  ;;  %v13281_v57 = vld [vmem:[#allocation36_spill] sm:$0xff] }
 0x1de   : > { %v7203_v30 = vadd.f32 %v13278_v26, %v1048_v51  ;;  %v7207_v54 = vpop.permute.xlu0 %1379  ;;  %4903 = vmatpush3.bf16.msra.mxu1 %v5057_v19  ;;  %v7210_v9 = vadd.f32 %v13280_v47, %v1041_v4  ;;  %v7213_v41 = vadd.f32 %v13281_v57, %v1044_v33  ;;  %v13282_v0 = vld [vmem:[#allocation37_spill] sm:$0xff]  ;;  %v13284_v26 = vld [vmem:[#allocation38_spill] sm:$0xff]  ;;  %v1057_v50 = vmul.f32 %v13226_v62, %v866_v13  ;;  %v5071_v19 = vld [vmem:[%s5582_s1 + $0x38] sm:$0xff] }
 0x1df   : > { %13279 = vst [vmem:[#allocation71_spill] sm:$0xff] %v7207_v54  ;;  %v7216_v32 = vadd.f32 %v13282_v0, %v1056_v1  ;;  %v13283_v51 = vld [vmem:[#allocation113_spill] sm:$0xff]  ;;  %4904 = vmatprep.subr.bf16.mxu1 %v5058_v39  ;;  %v7221_v31 = vadd.f32 %v13284_v26, %v1052_v8  ;;  %v7225_v23 = vmul.f32 %v5071_v19, %v1600_v24  ;;  %v13286_v4 = vld [vmem:[#allocation114_spill] sm:$0xff]  ;;  %v13287_v33 = vld [vmem:[#allocation128_spill] sm:$0xff] }
 0x1e0   : > { %1886 = vrot.lane.b32.xlu1 %v13283_v51, %s5334_s9  ;;  %1884 = vrot.lane.b32.xlu0 %v13286_v4, %s5334_s9  ;;  %v7230_v1 = vadd.f32 %v13287_v33, %v1053_v43  ;;  %v13288_v57 = vld [vmem:[#allocation131_spill] sm:$0xff]  ;;  %v7241_v62 = vpop.permute.xlu1 %1385  ;;  %v13293_v13 = vld [vmem:[#allocation130_spill] sm:$0xff]  ;;  %v13294_v4 = vld [vmem:[#allocation49_spill] sm:$0xff] }
 0x1e1   : > { %13285 = vst [vmem:[#allocation48_spill] sm:$0xff] %v7225_v23  ;;  %4881 = vmatpush3.bf16.msra.mxu0 %v5058_v39  ;;  %v7233_v47 = vadd.f32 %v13288_v57, %v1049_v37  ;;  %v13289_v0 = vld [vmem:[#allocation39_spill] sm:$0xff]  ;;  %13292 = vst [vmem:[#allocation35_spill] sm:$0xff] %v7241_v62  ;;  %v7244_v19 = vadd.f32 %v13293_v13, %v1061_v5  ;;  %v7247_v43 = vadd.f32 %v13294_v4, %v1060_v63  ;;  %v13301_v13 = vld [vmem:[#allocation120_spill] sm:$0xff] }
 0x1e2   : > { %v7236_v8 = vadd.f32 %v13289_v0, %v1064_v55  ;;  %v5072_v51 = vld [vmem:[%s5582_s1 + $0x18] sm:$0xff]  ;;  %4882 = vmatprep.subr.bf16.mxu0 %v5059_v38  ;;  %v7251_v37 = vmul.f32 %v7002_v16, %v6786_v59  ;;  %v7256_v57 = vpop.permute.xlu0 %1383  ;;  %4905 = vmatpush3.bf16.msra.mxu1 %v5058_v39  ;;  %v7260_v0 = vmul.f32 %v7002_v16, %v6800_v58  ;;  %v13302_v4 = vld [vmem:[#allocation133_spill] sm:$0xff] }
 0x1e3   : > { %v7239_v26 = vmul.f32 %v5072_v51, %v1600_v24  ;;  %13295 = vst [vmem:[#allocation132_spill] sm:$0xff] %v7247_v43  ;;  %v5073_v55 = vld [vmem:[%s5582_s1 + $0x78] sm:$0xff]  ;;  %13298 = vst [vmem:[#allocation113_spill] sm:$0xff] %v7256_v57  ;;  %v2117_v63 = vrot.slane %v6550_v7, %v13274_v53  ;;  %4906 = vmatprep.subr.bf16.mxu1 %v5059_v38  ;;  %v7282_v7 = vmul.f32 %v7002_v16, %v6854_v17 }
 0x1e4   : > { %13290 = vst [vmem:[#allocation72_spill] sm:$0xff] %v7236_v8  ;;  %13296 = vst [vmem:[#allocation36_spill] sm:$0xff] %v7251_v37  ;;  %v7254_v33 = vmul.f32 %v5073_v55, %v1600_v24  ;;  %v5074_v5 = vld [vmem:[%s5582_s1 + $0x58] sm:$0xff]  ;;  %1890 = vrot.lane.b32.xlu1 %v13301_v13, %s5334_s9  ;;  %v7270_v55 = vadd.f32 %v13302_v4, %v1057_v50 }
 0x1e5   : > { %13291 = vst [vmem:[#allocation124_spill] sm:$0xff] %v7239_v26  ;;  %13299 = vst [vmem:[#allocation38_spill] sm:$0xff] %v7260_v0  ;;  %v7263_v51 = vmul.f32 %v5074_v5, %v1600_v24  ;;  %v5075_v39 = vld [vmem:[%s5582_s1 + $0xb8] sm:$0xff]  ;;  %v13305_v0 = vld [vmem:[#allocation121_spill] sm:$0xff]  ;;  %4883 = vmatpush3.bf16.msra.mxu0 %v5059_v38 }
 0x1e6   : > { %13297 = vst [vmem:[#allocation37_spill] sm:$0xff] %v7254_v33  ;;  %v7273_v37 = vmul.f32 %v5075_v39, %v1600_v24  ;;  %v5076_v54 = vld [vmem:[%s5582_s1 + $0x98] sm:$0xff]  ;;  %1888 = vrot.lane.b32.xlu0 %v13305_v0, %s5334_s9  ;;  %v5060_v5 = vld [vmem:[#allocation7 + $0x20] sm:$0xff]   ;;  %13306 = vst [vmem:[#allocation39_spill] sm:$0xff] %v7282_v7  ;;  %v1588_v39 = vrot.slane %v6743_v3, %v13247_v49  ;;  %v7296_v0 = vmul.f32 %v7002_v16, %v6848_v60  ;;  %v7306_v7 = vpop.permute.xlu0 %1387 }
 0x1e7   : > { %13300 = vst [vmem:[#allocation114_spill] sm:$0xff] %v7263_v51  ;;  %v7276_v57 = vmul.f32 %v5076_v54, %v1600_v24  ;;  %v5077_v13 = vld [vmem:[%s5582_s1 + $0xf8] sm:$0xff]  ;;  %v7292_v54 = vpop.permute.xlu1 %1389  ;;  %13313 = vst [vmem:[#allocation187_spill] sm:$0xff] %v7306_v7  ;;  %4884 = vmatprep.subr.bf16.mxu0 %v5060_v5  ;;  %4907 = vmatpush3.bf16.msra.mxu1 %v5059_v38  ;;  %v7309_v3 = vmul.f32 %v2117_v63, %v6966_v46  ;;  %v13340_v51 = vld [vmem:[#allocation76_spill] sm:$0xff] }
 0x1e8   : > { %13303 = vst [vmem:[#allocation128_spill] sm:$0xff] %v7273_v37  ;;  %v7285_v62 = vmul.f32 %v5077_v13, %v1600_v24  ;;  %v5078_v50 = vld [vmem:[%s5582_s1 + $0xd8] sm:$0xff]  ;;  %13309 = vst [vmem:[#allocation120_spill] sm:$0xff] %v7292_v54  ;;  %v7304_v13 = vmul.f32 %v7002_v16, %v6909_v44  ;;  %4908 = vmatprep.subr.bf16.mxu1 %v5060_v5  ;;  %v7323_v38 = vmul.f32 %v2117_v63, %v7015_v14  ;;  %v13334_v37 = vld [vmem:[#allocation82_spill] sm:$0xff] }
 0x1e9   : > { %13304 = vst [vmem:[#allocation131_spill] sm:$0xff] %v7276_v57  ;;  %v7288_v4 = vmul.f32 %v5078_v50, %v1600_v24  ;;  %13310 = vst [vmem:[#allocation133_spill] sm:$0xff] %v7296_v0  ;;  %v7300_v57 = vmul.f32 %v7002_v16, %v6905_v34  ;;  %v7312_v24 = vmul.f32 %v2117_v63, %v6974_v35  ;;  %v13317_v16 = vld [vmem:[#allocation134_spill] sm:$0xff]  ;;  %4885 = vmatpush3.bf16.msra.mxu0 %v5060_v5  ;;  %v5079_v0 = vld [vmem:[%s5582_s1 + $0x20] sm:$0xff] }
 0x1ea   : > { %13307 = vst [vmem:[#allocation130_spill] sm:$0xff] %v7285_v62  ;;  %13312 = vst [vmem:[#allocation186_spill] sm:$0xff] %v7304_v13  ;;  %v7315_v50 = vmul.f32 %v2117_v63, %v7031_v11  ;;  %1894 = vrot.lane.b32.xlu1 %v13317_v16, %s5334_s9  ;;  %v7326_v13 = vmul.f32 %v2117_v63, %v7079_v15  ;;  %v7334_v16 = vmul.f32 %v2117_v63, %v7141_v2  ;;  %v13341_v33 = vld [vmem:[#allocation85_spill] sm:$0xff]  ;;  %v5087_v11 = vld [vmem:[%s5582_s1 + $0x30] sm:$0xff] }
 0x1eb   : > { %13308 = vst [vmem:[#allocation49_spill] sm:$0xff] %v7288_v4  ;;  %13311 = vst [vmem:[#allocation121_spill] sm:$0xff] %v7300_v57  ;;  %v7317_v57 = vld [vmem:[#allocation5 + $0x5] ss:$8 sm:$0xf]  ;;  %v7340_v4 = vmul.f32 %v5079_v0, %v1588_v39  ;;  %v7345_v62 = vpop.permute.xlu1 %1393  ;;  %4909 = vmatpush3.bf16.msra.mxu1 %v5060_v5  ;;  %v7403_v14 = vmul.f32 %v5087_v11, %v7047_v12 }
 0x1ec   : > { %13314 = vst [vmem:[#allocation188_spill] sm:$0xff] %v7309_v3  ;;  %13315 = vst [vmem:[#allocation189_spill] sm:$0xff] %v7312_v24  ;;  %v7329_v24 = vmul.f32 %v2117_v63, %v7094_v52  ;;  %v7337_v3 = vmul.f32 %v2117_v63, %v7155_v18  ;;  %v5083_v63 = vld [vmem:[%s5582_s1 + $0xa0] sm:$0xff]  ;;  %v13342_v26 = vld [vmem:[#allocation77_spill] sm:$0xff] }
 0x1ed   : > { %13316 = vst [vmem:[#allocation190_spill] sm:$0xff] %v7315_v50  ;;  %13318 = vst [vmem:[#allocation134_spill] sm:$0xff] %v7323_v38  ;;  %v13321_v50 = vld [vmem:[#allocation135_spill] sm:$0xff]  ;;  %v5080_v38 = vld [vmem:[%s5582_s1] sm:$0xff]  ;;  %v7358_v0 = vmul.f32 %v5083_v63, %v1588_v39  ;;  %v960_v23 = vsel %vm938_vm12, %v13342_v26, %v13341_v33 }
 0x1ee   : > { %13319 = vst [vmem:[#allocation191_spill] sm:$0xff] %v7326_v13  ;;  %13320 = vst [vmem:[#allocation192_spill] sm:$0xff] %v7329_v24  ;;  %1892 = vrot.lane.b32.xlu0 %v13321_v50, %s5334_s9  ;;  %v7343_v13 = vmul.f32 %v5080_v38, %v1588_v39  ;;  %v7349_v24 = vrot.slane %v7317_v57, %v13247_v49  ;;  %v5081_v50 = vld [vmem:[%s5582_s1 + $0x60] sm:$0xff]  ;;  %v5061_v38 = vld [vmem:[#allocation7 + $0x28] sm:$0xff]   ;;  %1898 = vrot.lane.b32.xlu1 %v6457_v61, %s5334_s9 }
 0x1ef   : > { %13322 = vst [vmem:[#allocation135_spill] sm:$0xff] %v7334_v16  ;;  %13323 = vst [vmem:[#allocation193_spill] sm:$0xff] %v7337_v3  ;;  %v7352_v7 = vmul.f32 %v5081_v50, %v1588_v39  ;;  %v5082_v16 = vld [vmem:[%s5582_s1 + $0x40] sm:$0xff]  ;;  %v7360_v3 = vpop.permute.xlu0 %1391  ;;  %v13335_v50 = vld [vmem:[#allocation74_spill] sm:$0xff]  ;;  %4886 = vmatprep.subr.bf16.mxu0 %v5061_v38  ;;  %4910 = vmatprep.subr.bf16.mxu1 %v5061_v38 }
 0x1f0   : > { %13324 = vst [vmem:[#allocation194_spill] sm:$0xff] %v7340_v4  ;;  %13325 = vst [vmem:[#allocation195_spill] sm:$0xff] %v7343_v13  ;;  %v7355_v54 = vmul.f32 %v5082_v16, %v1588_v39  ;;  %v13333_v13 = vld [vmem:[#allocation73_spill] sm:$0xff]  ;;  %v955_v16 = vsel %vm938_vm12, %v13335_v50, %v13334_v37  ;;  %v13339_v5 = vld [vmem:[#allocation84_spill] sm:$0xff]  ;;  %4887 = vmatpush3.bf16.msra.mxu0 %v5061_v38  ;;  %4911 = vmatpush3.bf16.msra.mxu1 %v5061_v38 }
 0x1f1   : > { %13326 = vst [vmem:[#allocation196_spill] sm:$0xff] %v7345_v62  ;;  %13327 = vst [vmem:[#allocation197_spill] sm:$0xff] %v7349_v24  ;;  %v13332_v62 = vld [vmem:[#allocation81_spill] sm:$0xff]  ;;  %v957_v4 = vsel %vm938_vm12, %v13340_v51, %v13339_v5  ;;  %v13343_v49 = vld [vmem:[#allocation86_spill] sm:$0xff] }
 0x1f2   : > { %13328 = vst [vmem:[#allocation198_spill] sm:$0xff] %v7352_v7  ;;  %13329 = vst [vmem:[#allocation199_spill] sm:$0xff] %v7355_v54  ;;  %v956_v24 = vsel %vm938_vm12, %v13333_v13, %v13332_v62  ;;  %v13336_v54 = vld [vmem:[#allocation83_spill] sm:$0xff]  ;;  %v13344_v18 = vld [vmem:[#allocation78_spill] sm:$0xff]  ;;  %1896 = vrot.lane.b32.xlu0 %v6461_v6, %s5334_s9  ;;  %1902 = vrot.lane.b32.xlu1 %v6509_v56, %s5334_s9 }
 0x1f3   : > { %13330 = vst [vmem:[#allocation200_spill] sm:$0xff] %v7358_v0  ;;  %13331 = vst [vmem:[#allocation201_spill] sm:$0xff] %v7360_v3  ;;  %v13337_v7 = vld [vmem:[#allocation75_spill] sm:$0xff]  ;;  %v5084_v3 = vld [vmem:[%s5582_s1 + $0x80] sm:$0xff]  ;;  %v959_v2 = vsel %vm938_vm12, %v13344_v18, %v13343_v49 }
 0x1f4   : > { %v958_v63 = vsel %vm938_vm12, %v13337_v7, %v13336_v54  ;;  %v7375_v0 = vmul.f32 %v5084_v3, %v1588_v39  ;;  %v5085_v61 = vld [vmem:[%s5582_s1 + $0xe0] sm:$0xff]  ;;  %13348 = vst [vmem:[#allocation83_spill] sm:$0xff] %v7403_v14  ;;  %v13349_v35 = vld [vmem:[#allocation150_spill] sm:$0xff]  ;;  %v13356_v56 = vld [vmem:[#allocation87_spill] sm:$0xff] }
 0x1f5   : > { %v7394_v3 = vmul.f32 %v5085_v61, %v1588_v39  ;;  %v5086_v52 = vld [vmem:[%s5582_s1 + $0xc0] sm:$0xff]  ;;  %v1179_v46 = vmul.f32 %v13349_v35, %v956_v24  ;;  %v1175_v6 = vmul.f32 %v13349_v35, %v955_v16  ;;  %v1187_v61 = vmul.f32 %v13349_v35, %v958_v63  ;;  %v5089_v16 = vld [vmem:[%s5582_s1 + $0x70] sm:$0xff]  ;;  %v5063_v8 = vld [vmem:[#allocation7 + $0x38] sm:$0xff]  }
 0x1f6   : > { %13338 = vst [vmem:[#allocation81_spill] sm:$0xff] %v7375_v0  ;;  %v7396_v0 = vpop.permute.xlu1 %1397  ;;  %v7399_v15 = vmul.f32 %v5086_v52, %v1588_v39  ;;  %v5088_v52 = vld [vmem:[%s5582_s1 + $0x10] sm:$0xff]  ;;  %v1183_v11 = vmul.f32 %v13349_v35, %v957_v4  ;;  %v1191_v24 = vmul.f32 %v13349_v35, %v959_v2  ;;  %v7421_v63 = vmul.f32 %v5089_v16, %v7047_v12  ;;  %v13357_v16 = vld [vmem:[#allocation79_spill] sm:$0xff] }
 0x1f7   : > { %13345 = vst [vmem:[#allocation73_spill] sm:$0xff] %v7394_v3  ;;  %13346 = vst [vmem:[#allocation82_spill] sm:$0xff] %v7396_v0  ;;  %v7408_v3 = vpop.permute.xlu0 %1395  ;;  %v7412_v39 = vmul.f32 %v5088_v52, %v7047_v12  ;;  %v1195_v0 = vmul.f32 %v13349_v35, %v960_v23  ;;  %1900 = vrot.lane.b32.xlu0 %v6517_v45, %s5334_s9  ;;  %v5090_v52 = vld [vmem:[%s5582_s1 + $0x50] sm:$0xff]  ;;  %v13358_v45 = vld [vmem:[#allocation88_spill] sm:$0xff]  ;;  %v7458_v14 = vadd.f32 %v1175_v6, %v7103_v21 }
 0x1f8   : > { %13347 = vst [vmem:[#allocation74_spill] sm:$0xff] %v7399_v15  ;;  %13350 = vst [vmem:[#allocation75_spill] sm:$0xff] %v7408_v3  ;;  %v5062_v15 = vld [vmem:[#allocation7 + $0x30] sm:$0xff]   ;;  %v7427_v38 = vmul.f32 %v5090_v52, %v7047_v12  ;;  %v7461_v44 = vadd.f32 %v1187_v61, %v7200_v29  ;;  %v7476_v21 = vadd.f32 %v1191_v24, %v7233_v47  ;;  %1906 = vrot.lane.b32.xlu1 %v6569_v27, %s5334_s9 }
 0x1f9   : > { %13351 = vst [vmem:[#allocation84_spill] sm:$0xff] %v7412_v39  ;;  %13352 = vst [vmem:[#allocation76_spill] sm:$0xff] %v7421_v63  ;;  %v5091_v4 = vld [vmem:[%s5582_s1 + $0xb0] sm:$0xff]  ;;  %4888 = vmatprep.subr.bf16.mxu0 %v5062_v15  ;;  %v962_v63 = vsel %vm938_vm12, %v13357_v16, %v13356_v56  ;;  %v13359_v39 = vld [vmem:[#allocation80_spill] sm:$0xff]  ;;  %4912 = vmatprep.subr.bf16.mxu1 %v5062_v15 }
 0x1fa   : > { %13353 = vst [vmem:[#allocation85_spill] sm:$0xff] %v7427_v38  ;;  %v7431_v23 = vmul.f32 %v5091_v4, %v7047_v12  ;;  %v5092_v2 = vld [vmem:[%s5582_s1 + $0x90] sm:$0xff]  ;;  %v961_v52 = vsel %vm938_vm12, %v13359_v39, %v13358_v45  ;;  %v7446_v38 = vadd.s32 384, %v6451_v48  ;;  %v7448_v4 = vpop.permute.xlu1 %1401  ;;  %4889 = vmatpush3.bf16.msra.mxu0 %v5062_v15  ;;  %13362 = vst [vmem:[#allocation87_spill] sm:$0xff] %v7458_v14  ;;  %4913 = vmatpush3.bf16.msra.mxu1 %v5062_v15 }
 0x1fb   : > { %v7435_v3 = vmul.f32 %v5092_v2, %v7047_v12  ;;  %13361 = vst [vmem:[#allocation150_spill] sm:$0xff] %v7448_v4  ;;  %13363 = vst [vmem:[#allocation79_spill] sm:$0xff] %v7461_v44  ;;  %v7463_v43 = vpop.permute.xlu0 %1399  ;;  %v5094_v34 = vld [vmem:[%s5582_s1 + $0xd0] sm:$0xff]  ;;  %1904 = vrot.lane.b32.xlu0 %v6578_v40, %s5334_s9  ;;  %4890 = vmatprep.subr.bf16.mxu0 %v5063_v8  ;;  %v13374_v40 = vld [vmem:[#allocation51_spill] sm:$0xff] }
 0x1fc   : > { %13354 = vst [vmem:[#allocation77_spill] sm:$0xff] %v7431_v23  ;;  %13360 = vst [vmem:[#allocation78_spill] sm:$0xff] %v7446_v38  ;;  %v5093_v23 = vld [vmem:[%s5582_s1 + $0xf0] sm:$0xff]  ;;  %v7467_v4 = vmul.f32 %v5094_v34, %v7047_v12  ;;  %v1203_v34 = vmul.f32 %v13349_v35, %v962_v63  ;;  %4914 = vmatprep.subr.bf16.mxu1 %v5063_v8  ;;  %v13378_v63 = vld [vmem:[#allocation96_spill] sm:$0xff]  ;;  %vm510_vm13 = vcmp.lt.s32.totalorder %v7446_v38, 480  ;;  %1910 = vrot.lane.b32.xlu1 %v6625_v10, %s5334_s9 }
 0x1fd   : > { %13355 = vst [vmem:[#allocation86_spill] sm:$0xff] %v7435_v3  ;;  %v7452_v2 = vmul.f32 %v5093_v23, %v7047_v12  ;;  %v7455_v3 = vadd.f32 %v1179_v46, %v7082_v22  ;;  %13364 = vst [vmem:[#allocation88_spill] sm:$0xff] %v7463_v43  ;;  %v7470_v23 = vadd.f32 %v1183_v11, %v7210_v9  ;;  %v13368_v22 = vld [vmem:[#allocation89_spill] sm:$0xff]  ;;  %v13369_v9 = vld [vmem:[#allocation90_spill] sm:$0xff] }
 0x1fe   : > { %v7473_v46 = vadd.f32 %v1195_v0, %v7230_v1  ;;  %13367 = vst [vmem:[#allocation203_spill] sm:$0xff] %v7476_v21  ;;  %v948_v29 = vsel %vm938_vm12, %v13332_v62, %v13368_v22  ;;  %v1199_v12 = vmul.f32 %v13349_v35, %v961_v52  ;;  %v947_v15 = vsel %vm938_vm12, %v13334_v37, %v13369_v9  ;;  %v13370_v1 = vld [vmem:[#allocation91_spill] sm:$0xff]  ;;  %v13371_v62 = vld [vmem:[#allocation92_spill] sm:$0xff]  ;;  %v13372_v35 = vld [vmem:[#allocation93_spill] sm:$0xff]  ;;  %v7504_v37 = vpop.permute.xlu1 %1405 }
 0x1ff   : > { %13365 = vst [vmem:[#allocation80_spill] sm:$0xff] %v7470_v23  ;;  %v950_v47 = vsel %vm938_vm12, %v13336_v54, %v13370_v1  ;;  %v949_v27 = vsel %vm938_vm12, %v13339_v5, %v13371_v62  ;;  %v952_v0 = vsel %vm938_vm12, %v13341_v33, %v13372_v35  ;;  %13373 = vst [vmem:[#allocation89_spill] sm:$0xff] %v7504_v37  ;;  %4891 = vmatpush3.bf16.msra.mxu0 %v5063_v8  ;;  %v13375_v61 = vld [vmem:[#allocation94_spill] sm:$0xff]  ;;  %v13376_v11 = vld [vmem:[#allocation95_spill] sm:$0xff]  ;;  %v7515_v24 = vpop.permute.xlu0 %1403 }
 0x200   : > { %13366 = vst [vmem:[#allocation202_spill] sm:$0xff] %v7473_v46  ;;  %v1180_v6 = vmul.f32 %v13374_v40, %v948_v29  ;;  %v951_v54 = vsel %vm938_vm12, %v13343_v49, %v13375_v61  ;;  %v954_v5 = vsel %vm938_vm12, %v13356_v56, %v13376_v11  ;;  %13377 = vst [vmem:[#allocation90_spill] sm:$0xff] %v7515_v24  ;;  %4924 = vmatprep.subr.bf16.mxu0 %v7100_v25  ;;  %v13379_v49 = vld [vmem:[#allocation97_spill] sm:$0xff]  ;;  %v13428_v43 = vld [vmem:[#allocation142_spill] sm:$0xff] }
 0x201   : > { %4915 = vmatpush3.bf16.msra.mxu1 %v5063_v8  ;;  %v1176_v33 = vmul.f32 %v13374_v40, %v947_v15  ;;  %v953_v52 = vsel %vm938_vm12, %v13358_v45, %v13378_v63  ;;  %v964_v29 = vsel %vm938_vm12, %v13379_v49, %v13333_v13  ;;  %v1188_v8 = vmul.f32 %v13374_v40, %v950_v47  ;;  %v13381_v47 = vld [vmem:[#allocation98_spill] sm:$0xff]  ;;  %v13456_v44 = vld [vmem:[#allocation151_spill] sm:$0xff] }
 0x202   : > { %4948 = vmatprep.subr.bf16.mxu1 %v7100_v25  ;;  %v1184_v56 = vmul.f32 %v13374_v40, %v949_v27  ;;  %v1196_v15 = vmul.f32 %v13374_v40, %v952_v0  ;;  %v940_v45 = vsel %vm938_vm12, %v13368_v22, %v13379_v49  ;;  %1908 = vrot.lane.b32.xlu0 %v6631_v20, %s5334_s9  ;;  %v7549_v0 = vpop.permute.xlu1 %1409  ;;  %v986_v20 = vsel %vm510_vm13, %v964_v29, 0.0  ;;  %v13390_v29 = vld [vmem:[#allocation162_spill] sm:$0xff] }
 0x203   : > { %v7541_v13 = vadd.f32 %v1203_v34, %v7244_v19  ;;  %v1192_v10 = vmul.f32 %v13374_v40, %v951_v54  ;;  %v1204_v25 = vmul.f32 %v13374_v40, %v954_v5  ;;  %v963_v27 = vsel %vm938_vm12, %v13381_v47, %v13335_v50  ;;  %13382 = vst [vmem:[#allocation92_spill] sm:$0xff] %v7549_v0  ;;  %v7561_v34 = vpop.permute.xlu0 %1407  ;;  %v13386_v54 = vld [vmem:[#allocation155_spill] sm:$0xff]  ;;  %v13388_v0 = vld [vmem:[#allocation152_spill] sm:$0xff] }
 0x204   : > { %v7552_v24 = vadd.f32 %v1199_v12, %v7270_v55  ;;  %v1200_v22 = vmul.f32 %v13374_v40, %v953_v52  ;;  %v7559_v19 = vrot.slane %v7317_v57, %v6343_v42  ;;  %13385 = vst [vmem:[#allocation94_spill] sm:$0xff] %v7561_v34  ;;  %v7564_v5 = vadd.f32 %v1180_v6, %v13386_v54  ;;  %v13387_v50 = vld [vmem:[#allocation159_spill] sm:$0xff]  ;;  %v13389_v40 = vld [vmem:[#allocation21_spill] sm:$0xff] }
 0x205   : > { %13380 = vst [vmem:[#allocation91_spill] sm:$0xff] %v7541_v13  ;;  %v7567_v49 = vadd.f32 %v1176_v33, %v13387_v50  ;;  %v1181_v55 = vmul.f32 %v13388_v0, %v940_v45  ;;  %v939_v12 = vsel %vm938_vm12, %v13369_v9, %v13381_v47  ;;  %1916 = vrot.lane.b32.xlu1 %v6741_v36, %s5334_s9  ;;  %v982_v33 = vsel %vm510_vm13, %v963_v27, 0.0  ;;  %v13391_v45 = vld [vmem:[#allocation160_spill] sm:$0xff]  ;;  %v13392_v54 = vld [vmem:[#allocation25_spill] sm:$0xff] }
 0x206   : > { %13383 = vst [vmem:[#allocation93_spill] sm:$0xff] %v7552_v24  ;;  %13384 = vst [vmem:[#allocation51_spill] sm:$0xff] %v7559_v19  ;;  %v7577_v52 = vadd.f32 %v1188_v8, %v13389_v40  ;;  %v7580_v34 = vadd.f32 %v1184_v56, %v13390_v29  ;;  %v7583_v6 = vadd.f32 %v1196_v15, %v6750_v28  ;;  %1912 = vrot.lane.b32.xlu0 %v13391_v45, %s5334_s9  ;;  %v13393_v47 = vld [vmem:[#allocation164_spill] sm:$0xff]  ;;  %v13395_v56 = vld [vmem:[#allocation99_spill] sm:$0xff]  ;;  %v7600_v15 = vpop.permute.xlu1 %1413 }
 0x207   : > { %v7590_v9 = vadd.f32 %v1192_v10, %v13392_v54  ;;  %v7593_v36 = vadd.f32 %v1204_v25, %v13393_v47  ;;  %v13394_v8 = vld [vmem:[#allocation52_spill] sm:$0xff]  ;;  %v966_v28 = vsel %vm938_vm12, %v13395_v56, %v13337_v7  ;;  %13396 = vst [vmem:[#allocation95_spill] sm:$0xff] %v7600_v15  ;;  %v13397_v40 = vld [vmem:[#allocation22_spill] sm:$0xff]  ;;  %v1177_v29 = vmul.f32 %v13388_v0, %v939_v12  ;;  %v7610_v45 = vpop.permute.xlu0 %1411  ;;  %v13402_v47 = vld [vmem:[#allocation169_spill] sm:$0xff] }
 0x208   : > { %v1182_v50 = vmul.f32 %v13394_v8, %v986_v20  ;;  %v7603_v27 = vadd.f32 %v1200_v22, %v13397_v40  ;;  %v13398_v10 = vld [vmem:[#allocation100_spill] sm:$0xff]  ;;  %13399 = vst [vmem:[#allocation96_spill] sm:$0xff] %v7610_v45  ;;  %v13400_v20 = vld [vmem:[#allocation119_spill] sm:$0xff]  ;;  %v7617_v7 = vadd.f32 %v1181_v55, %v13402_v47  ;;  %v1178_v15 = vmul.f32 %v13394_v8, %v982_v33  ;;  %v13404_v33 = vld [vmem:[#allocation101_spill] sm:$0xff] }
 0x209   : > { %v965_v25 = vsel %vm938_vm12, %v13398_v10, %v13340_v51  ;;  %v7614_v54 = vrot.slane %v7317_v57, %v13400_v20  ;;  %v942_v22 = vsel %vm938_vm12, %v13370_v1, %v13395_v56  ;;  %1920 = vrot.lane.b32.xlu1 %v6800_v58, %s5334_s9  ;;  %v7628_v51 = vrot.slane %v7317_v57, %v13274_v53  ;;  %v13405_v56 = vld [vmem:[#allocation102_spill] sm:$0xff]  ;;  %v13406_v57 = vld [vmem:[#allocation57_spill] sm:$0xff] }
 0x20a   : > { %v994_v12 = vsel %vm510_vm13, %v966_v28, 0.0  ;;  %v941_v55 = vsel %vm938_vm12, %v13371_v62, %v13398_v10  ;;  %v968_v1 = vsel %vm938_vm12, %v13404_v33, %v13342_v26  ;;  %v967_v58 = vsel %vm938_vm12, %v13405_v56, %v13344_v18  ;;  %1918 = vrot.lane.b32.xlu0 %v13406_v57, %s5334_s9  ;;  %v13407_v40 = vld [vmem:[#allocation146_spill] sm:$0xff]  ;;  %v13408_v26 = vld [vmem:[#allocation103_spill] sm:$0xff]  ;;  %v7659_v18 = vpop.permute.xlu1 %1417  ;;  %v13442_v13 = vld [vmem:[#allocation145_spill] sm:$0xff] }
 0x20b   : > { %13401 = vst [vmem:[#allocation97_spill] sm:$0xff] %v7614_v54  ;;  %13403 = vst [vmem:[#allocation98_spill] sm:$0xff] %v7628_v51  ;;  %v7647_v28 = vadd.f32 %v1182_v50, %v13407_v40  ;;  %v990_v47 = vsel %vm510_vm13, %v965_v25, 0.0  ;;  %v944_v62 = vsel %vm938_vm12, %v13372_v35, %v13404_v33  ;;  %v970_v10 = vsel %vm938_vm12, %v13408_v26, %v13357_v16  ;;  %v13410_v51 = vld [vmem:[#allocation170_spill] sm:$0xff]  ;;  %v13411_v40 = vld [vmem:[#allocation104_spill] sm:$0xff]  ;;  %v7673_v33 = vpop.permute.xlu0 %1415 }
 0x20c   : > { %13409 = vst [vmem:[#allocation155_spill] sm:$0xff] %v7659_v18  ;;  %v7662_v57 = vadd.f32 %v1177_v29, %v13410_v51  ;;  %v1189_v50 = vmul.f32 %v13388_v0, %v942_v22  ;;  %v943_v25 = vsel %vm938_vm12, %v13375_v61, %v13405_v56  ;;  %v969_v35 = vsel %vm938_vm12, %v13411_v40, %v13359_v39  ;;  %v13413_v51 = vld [vmem:[#allocation54_spill] sm:$0xff]  ;;  %v13420_v18 = vld [vmem:[#allocation127_spill] sm:$0xff] }
 0x20d   : > { %13412 = vst [vmem:[#allocation159_spill] sm:$0xff] %v7673_v33  ;;  %v1190_v16 = vmul.f32 %v13394_v8, %v994_v12  ;;  %v1185_v54 = vmul.f32 %v13388_v0, %v941_v55  ;;  %v1002_v29 = vsel %vm510_vm13, %v968_v1, 0.0  ;;  %v998_v22 = vsel %vm510_vm13, %v967_v58, 0.0  ;;  %1914 = vrot.lane.b32.xlu1 %v13413_v51, %s5334_s9  ;;  %v13421_v45 = vld [vmem:[#allocation106_spill] sm:$0xff] }
 0x20e   : > { %v1186_v61 = vmul.f32 %v13394_v8, %v990_v47  ;;  %v1197_v56 = vmul.f32 %v13388_v0, %v944_v62  ;;  %v946_v39 = vsel %vm938_vm12, %v13376_v11, %v13408_v26  ;;  %v1010_v12 = vsel %vm510_vm13, %v970_v10, 0.0  ;;  %1922 = vrot.lane.b32.xlu0 %v6786_v59, %s5334_s9  ;;  %v13414_v47 = vld [vmem:[#allocation122_spill] sm:$0xff]  ;;  %v13415_v62 = vld [vmem:[#allocation105_spill] sm:$0xff]  ;;  %v7704_v26 = vpop.permute.xlu1 %1421  ;;  %v13417_v10 = vld [vmem:[#allocation68_spill] sm:$0xff] }
 0x20f   : > { %v1193_v55 = vmul.f32 %v13388_v0, %v943_v25  ;;  %v945_v1 = vsel %vm938_vm12, %v13378_v63, %v13411_v40  ;;  %v1006_v58 = vsel %vm510_vm13, %v969_v35, 0.0  ;;  %v1320_v11 = vsel %vm801_vm10, %v13415_v62, %v13414_v47  ;;  %13416 = vst [vmem:[#allocation152_spill] sm:$0xff] %v7704_v26  ;;  %v13418_v59 = vld [vmem:[#allocation29_spill] sm:$0xff]  ;;  %v7714_v40 = vpop.permute.xlu0 %1419 }
 0x210   : > { %v7707_v51 = vadd.f32 %v1178_v15, %v13417_v10  ;;  %v7710_v25 = vadd.f32 %v1189_v50, %v13418_v59  ;;  %v1198_v33 = vmul.f32 %v13394_v8, %v1002_v29  ;;  %v1194_v63 = vmul.f32 %v13394_v8, %v998_v22  ;;  %13419 = vst [vmem:[#allocation21_spill] sm:$0xff] %v7714_v40  ;;  %v13422_v15 = vld [vmem:[#allocation136_spill] sm:$0xff]  ;;  %v13423_v10 = vld [vmem:[#allocation107_spill] sm:$0xff]  ;;  %v13426_v40 = vld [vmem:[#allocation177_spill] sm:$0xff] }
 0x211   : > { %v1205_v35 = vmul.f32 %v13388_v0, %v946_v39  ;;  %v1206_v38 = vmul.f32 %v13394_v8, %v1010_v12  ;;  %v1319_v26 = vsel %vm801_vm10, %v13421_v45, %v13420_v18  ;;  %v1322_v50 = vsel %vm801_vm10, %v13423_v10, %v13422_v15  ;;  %1926 = vrot.lane.b32.xlu1 %v6848_v60, %s5334_s9  ;;  %v13425_v12 = vld [vmem:[#allocation157_spill] sm:$0xff] }
 0x212   : > { %v7729_v29 = vadd.f32 %v1190_v16, %v7203_v30  ;;  %v1201_v22 = vmul.f32 %v13388_v0, %v945_v1  ;;  %v1202_v39 = vmul.f32 %v13394_v8, %v1006_v58  ;;  %v1523_v59 = vmul.f32 %v13425_v12, %v1320_v11  ;;  %1924 = vrot.lane.b32.xlu0 %v6854_v17, %s5334_s9  ;;  %v13429_v30 = vld [vmem:[#allocation66_spill] sm:$0xff]  ;;  %v7748_v0 = vpop.permute.xlu1 %1425  ;;  %v13432_v17 = vld [vmem:[#allocation108_spill] sm:$0xff] }
 0x213   : > { %v7737_v19 = vadd.f32 %v1185_v54, %v13426_v40  ;;  %v7740_v37 = vadd.f32 %v1186_v61, %v7213_v41  ;;  %v7743_v60 = vadd.f32 %v1197_v56, %v13428_v43  ;;  %v7746_v16 = vadd.f32 %v1193_v55, %v13429_v30  ;;  %13430 = vst [vmem:[#allocation25_spill] sm:$0xff] %v7748_v0  ;;  %v13431_v58 = vld [vmem:[#allocation138_spill] sm:$0xff]  ;;  %v13433_v11 = vld [vmem:[#allocation140_spill] sm:$0xff]  ;;  %v13434_v41 = vld [vmem:[#allocation109_spill] sm:$0xff]  ;;  %v7760_v61 = vpop.permute.xlu0 %1423 }
 0x214   : > { %13424 = vst [vmem:[#allocation162_spill] sm:$0xff] %v7729_v29  ;;  %v1519_v8 = vmul.f32 %v13425_v12, %v1319_v26  ;;  %v1531_v1 = vmul.f32 %v13425_v12, %v1322_v50  ;;  %v1321_v54 = vsel %vm801_vm10, %v13432_v17, %v13431_v58  ;;  %v1324_v43 = vsel %vm801_vm10, %v13434_v41, %v13433_v11  ;;  %v13438_v26 = vld [vmem:[#allocation28_spill] sm:$0xff]  ;;  %v13441_v0 = vld [vmem:[#allocation178_spill] sm:$0xff] }
 0x215   : > { %13427 = vst [vmem:[#allocation160_spill] sm:$0xff] %v7740_v37  ;;  %13435 = vst [vmem:[#allocation164_spill] sm:$0xff] %v7760_v61  ;;  %v7763_v56 = vadd.f32 %v1198_v33, %v7216_v32  ;;  %v7766_v55 = vadd.f32 %v1194_v63, %v7221_v31  ;;  %v7769_v40 = vadd.f32 %v1205_v35, %v13438_v26  ;;  %v13439_v50 = vld [vmem:[#allocation72_spill] sm:$0xff]  ;;  %1930 = vrot.lane.b32.xlu1 %v13441_v0, %s5334_s9  ;;  %v13445_v33 = vld [vmem:[#allocation141_spill] sm:$0xff] }
 0x216   : > { %v7772_v30 = vadd.f32 %v1206_v38, %v13439_v50  ;;  %v7776_v24 = vld [vmem:[#allocation5 + $0x6] ss:$8 sm:$0xf]  ;;  %v7779_v21 = vadd.f32 %v1201_v22, %v13442_v13  ;;  %v1555_v31 = vadd.f32 %v1523_v59, %v7564_v5  ;;  %v1527_v0 = vmul.f32 %v13425_v12, %v1321_v54  ;;  %v7801_v59 = vpop.permute.xlu1 %1429 }
 0x217   : > { %13436 = vst [vmem:[#allocation52_spill] sm:$0xff] %v7763_v56  ;;  %13437 = vst [vmem:[#allocation99_spill] sm:$0xff] %v7766_v55  ;;  %v13443_v61 = vld [vmem:[#allocation132_spill] sm:$0xff]  ;;  %v13447_v38 = vld [vmem:[#allocation179_spill] sm:$0xff]  ;;  %v1539_v26 = vmul.f32 %v13425_v12, %v1324_v43  ;;  %v7809_v43 = vpop.permute.xlu0 %1427  ;;  %v7813_v46 = vrot.slane %v7776_v24, %v6343_v42 }
 0x218   : > { %13440 = vst [vmem:[#allocation22_spill] sm:$0xff] %v7772_v30  ;;  %v7782_v32 = vadd.f32 %v1202_v39, %v13443_v61  ;;  %v13446_v63 = vld [vmem:[#allocation112_spill] sm:$0xff]  ;;  %1928 = vrot.lane.b32.xlu0 %v13447_v38, %s5334_s9  ;;  %v13448_v50 = vld [vmem:[#allocation147_spill] sm:$0xff]  ;;  %v13450_v39 = vld [vmem:[#allocation149_spill] sm:$0xff]  ;;  %v1563_v38 = vadd.f32 %v1531_v1, %v7577_v52 }
 0x219   : > { %v1323_v35 = vsel %vm801_vm10, %v13446_v63, %v13445_v33  ;;  %v13449_v13 = vld [vmem:[#allocation116_spill] sm:$0xff]  ;;  %v13451_v61 = vld [vmem:[#allocation118_spill] sm:$0xff]  ;;  %13452 = vst [vmem:[#allocation169_spill] sm:$0xff] %v7801_v59  ;;  %13454 = vst [vmem:[#allocation101_spill] sm:$0xff] %v7809_v43 }
 0x21a   : > { %13444 = vst [vmem:[#allocation100_spill] sm:$0xff] %v7782_v32  ;;  %v1326_v22 = vsel %vm801_vm10, %v13449_v13, %v13448_v50  ;;  %v1325_v5 = vsel %vm801_vm10, %v13451_v61, %v13450_v39  ;;  %v1551_v32 = vadd.f32 %v1519_v8, %v7567_v49  ;;  %v13453_v30 = vld [vmem:[#allocation42_spill] sm:$0xff]  ;;  %13455 = vst [vmem:[#allocation102_spill] sm:$0xff] %v7813_v46  ;;  %v13459_v43 = vld [vmem:[#allocation55_spill] sm:$0xff]  ;;  %v7848_v14 = vpop.permute.xlu1 %1758 }
 0x21b   : > { %v1312_v54 = vsel %vm801_vm10, %v13414_v47, %v13453_v30  ;;  %v1535_v23 = vmul.f32 %v13425_v12, %v1323_v35  ;;  %v1311_v49 = vsel %vm801_vm10, %v13420_v18, %v13456_v44  ;;  %v13457_v8 = vld [vmem:[#allocation154_spill] sm:$0xff]  ;;  %1934 = vrot.lane.b32.xlu1 %v13459_v43, %s5334_s9  ;;  %v1547_v35 = vmul.f32 %v13425_v12, %v1326_v22  ;;  %v13460_v59 = vld [vmem:[#allocation161_spill] sm:$0xff]  ;;  %v13461_v42 = vld [vmem:[#allocation24_spill] sm:$0xff] }
 0x21c   : > { %v1314_v52 = vsel %vm801_vm10, %v13422_v15, %v13457_v8  ;;  %v13458_v1 = vld [vmem:[#allocation158_spill] sm:$0xff]  ;;  %v1543_v46 = vmul.f32 %v13425_v12, %v1325_v5  ;;  %v1316_v18 = vsel %vm801_vm10, %v13433_v11, %v13460_v59  ;;  %v1315_v15 = vsel %vm801_vm10, %v13445_v33, %v13461_v42  ;;  %v13462_v55 = vld [vmem:[#allocation44_spill] sm:$0xff]  ;;  %v13463_v22 = vld [vmem:[#allocation167_spill] sm:$0xff]  ;;  %13465 = vst [vmem:[#allocation57_spill] sm:$0xff] %v7848_v14 }
 0x21d   : > { %v1313_v47 = vsel %vm801_vm10, %v13431_v58, %v13458_v1  ;;  %1932 = vrot.lane.b32.xlu0 %v13462_v55, %s5334_s9  ;;  %v1559_v58 = vadd.f32 %v1527_v0, %v7580_v34  ;;  %v1571_v43 = vadd.f32 %v1539_v26, %v7583_v6  ;;  %v1524_v56 = vmul.f32 %v13463_v22, %v1312_v54  ;;  %v13464_v12 = vld [vmem:[#allocation174_spill] sm:$0xff]  ;;  %v7857_v55 = vpop.permute.xlu0 %1756  ;;  %v13468_v0 = vld [vmem:[#allocation175_spill] sm:$0xff]  ;;  %v13469_v54 = vld [vmem:[#allocation176_spill] sm:$0xff] }
 0x21e   : > { %v7846_v5 = vadd.f32 %v13464_v12, %v1555_v31  ;;  %v1520_v11 = vmul.f32 %v13463_v22, %v1311_v49  ;;  %v1532_v37 = vmul.f32 %v13463_v22, %v1314_v52  ;;  %v1528_v33 = vmul.f32 %v13463_v22, %v1313_v47  ;;  %v13466_v29 = vld [vmem:[#allocation58_spill] sm:$0xff]  ;;  %13467 = vst [vmem:[#allocation146_spill] sm:$0xff] %v7857_v55  ;;  %v13470_v52 = vld [vmem:[#allocation40_spill] sm:$0xff] }
 0x21f   : > { %v1318_v34 = vsel %vm801_vm10, %v13448_v50, %v13466_v29  ;;  %v1540_v6 = vmul.f32 %v13463_v22, %v1316_v18  ;;  %v1536_v31 = vmul.f32 %v13463_v22, %v1315_v15  ;;  %v7862_v26 = vadd.f32 %v13468_v0, %v1551_v32  ;;  %1938 = vrot.lane.b32.xlu1 %v13470_v52, %s5334_s9  ;;  %v13471_v55 = vld [vmem:[#allocation26_spill] sm:$0xff]  ;;  %v13472_v32 = vld [vmem:[#allocation67_spill] sm:$0xff] }
 0x220   : > { %v7865_v49 = vadd.f32 %v13469_v54, %v1563_v38  ;;  %v1567_v47 = vadd.f32 %v1535_v23, %v7590_v9  ;;  %v1579_v12 = vadd.f32 %v1547_v35, %v7593_v36  ;;  %v1575_v50 = vadd.f32 %v1543_v46, %v7603_v27  ;;  %v13473_v0 = vld [vmem:[#allocation62_spill] sm:$0xff]  ;;  %v13474_v23 = vld [vmem:[#allocation32_spill] sm:$0xff]  ;;  %v7886_v36 = vpop.permute.xlu1 %1762  ;;  %v13476_v35 = vld [vmem:[#allocation165_spill] sm:$0xff] }
 0x221   : > { %v1317_v18 = vsel %vm801_vm10, %v13450_v39, %v13471_v55  ;;  %1936 = vrot.lane.b32.xlu0 %v13472_v32, %s5334_s9  ;;  %v1556_v38 = vadd.f32 %v1524_v56, %v7617_v7  ;;  %v1548_v15 = vmul.f32 %v13463_v22, %v1318_v34  ;;  %v7881_v54 = vadd.f32 %v13473_v0, %v1559_v58  ;;  %v7895_v56 = vpop.permute.xlu0 %1760  ;;  %v13487_v32 = vld [vmem:[#allocation83_spill] sm:$0xff] }
 0x222   : > { %v7884_v9 = vadd.f32 %v13474_v23, %v1571_v43  ;;  %13475 = vst [vmem:[#allocation103_spill] sm:$0xff] %v7886_v36  ;;  %v1552_v46 = vadd.f32 %v1520_v11, %v7662_v57  ;;  %v1564_v27 = vadd.f32 %v1532_v37, %v7710_v25  ;;  %v1560_v39 = vadd.f32 %v1528_v33, %v7737_v19  ;;  %v13478_v19 = vld [vmem:[#allocation185_spill] sm:$0xff]  ;;  %v13481_v33 = vld [vmem:[#allocation50_spill] sm:$0xff]  ;;  %v13489_v23 = vld [vmem:[#allocation76_spill] sm:$0xff] }
 0x223   : > { %v1328_v7 = vsel %vm801_vm10, %v13476_v35, %v13415_v62  ;;  %13477 = vst [vmem:[#allocation170_spill] sm:$0xff] %v7895_v56  ;;  %v1572_v58 = vadd.f32 %v1540_v6, %v7743_v60  ;;  %v1568_v43 = vadd.f32 %v1536_v31, %v7746_v16  ;;  %v1544_v34 = vmul.f32 %v13463_v22, %v1317_v18  ;;  %v13479_v57 = vld [vmem:[#allocation181_spill] sm:$0xff]  ;;  %v13480_v62 = vld [vmem:[#allocation63_spill] sm:$0xff]  ;;  %v13484_v31 = vld [vmem:[#allocation168_spill] sm:$0xff] }
 0x224   : > { %v1304_v37 = vsel %vm801_vm10, %v13453_v30, %v13476_v35  ;;  %1942 = vrot.lane.b32.xlu1 %v13478_v19, %s5334_s9  ;;  %v7907_v25 = vadd.f32 %v13479_v57, %v1567_v47  ;;  %v7910_v11 = vadd.f32 %v13480_v62, %v1579_v12  ;;  %v7913_v60 = vadd.f32 %v13481_v33, %v1575_v50  ;;  %v13482_v16 = vld [vmem:[#allocation47_spill] sm:$0xff]  ;;  %v7932_v12 = vpop.permute.xlu1 %1766  ;;  %v13486_v50 = vld [vmem:[#allocation70_spill] sm:$0xff]  ;;  %v13491_v19 = vld [vmem:[#allocation85_spill] sm:$0xff] }
 0x225   : > { %1940 = vrot.lane.b32.xlu0 %v13482_v16, %s5334_s9  ;;  %v7919_v22 = vrot.slane %v7776_v24, %v13400_v20  ;;  %v1580_v30 = vadd.f32 %v1548_v15, %v7769_v40  ;;  %v1339_v6 = vsel %vm503_vm11, %v1328_v7, 0.0  ;;  %v1303_v52 = vsel %vm801_vm10, %v13456_v44, %v13484_v31  ;;  %13485 = vst [vmem:[#allocation54_spill] sm:$0xff] %v7932_v12  ;;  %v13488_v40 = vld [vmem:[#allocation84_spill] sm:$0xff]  ;;  %v7944_v7 = vpop.permute.xlu0 %1764  ;;  %v13559_v12 = vld [vmem:[#allocation197_spill] sm:$0xff]  ;;  %v13561_v36 = vld [vmem:[#allocation46_spill] sm:$0xff] }
 0x226   : > { %v1327_v47 = vsel %vm801_vm10, %v13484_v31, %v13421_v45  ;;  %v1525_v18 = vmul.f32 %v13486_v50, %v1304_v37  ;;  %v7936_v0 = vadd.f32 %v13487_v32, %v1556_v38  ;;  %v7939_v15 = vadd.f32 %v13488_v40, %v1552_v46  ;;  %13490 = vst [vmem:[#allocation122_spill] sm:$0xff] %v7944_v7  ;;  %v13492_v45 = vld [vmem:[#allocation77_spill] sm:$0xff]  ;;  %v13494_v37 = vld [vmem:[#allocation86_spill] sm:$0xff]  ;;  %v13496_v38 = vld [vmem:[#allocation148_spill] sm:$0xff] }
 0x227   : > { %13483 = vst [vmem:[#allocation104_spill] sm:$0xff] %v7919_v22  ;;  %v7942_v35 = vadd.f32 %v13489_v23, %v1564_v27  ;;  %v1576_v44 = vadd.f32 %v1544_v34, %v7779_v21  ;;  %v7948_v57 = vadd.f32 %v13491_v19, %v1560_v39  ;;  %v7951_v62 = vadd.f32 %v13492_v45, %v1572_v58  ;;  %v13497_v46 = vld [vmem:[#allocation184_spill] sm:$0xff]  ;;  %v13498_v21 = vld [vmem:[#allocation69_spill] sm:$0xff]  ;;  %v13499_v39 = vld [vmem:[#allocation111_spill] sm:$0xff] }
 0x228   : > { %v7954_v33 = vadd.f32 %v13494_v37, %v1568_v43  ;;  %1946 = vrot.lane.b32.xlu1 %v13496_v38, %s5334_s9  ;;  %v1522_v16 = vmul.f32 %v13497_v46, %v1339_v6  ;;  %v1335_v27 = vsel %vm503_vm11, %v1327_v47, 0.0  ;;  %v1521_v31 = vmul.f32 %v13486_v50, %v1303_v52  ;;  %v13501_v34 = vld [vmem:[#allocation173_spill] sm:$0xff]  ;;  %v13502_v47 = vld [vmem:[#allocation30_spill] sm:$0xff]  ;;  %v7983_v40 = vpop.permute.xlu1 %1770  ;;  %v13505_v19 = vld [vmem:[#allocation180_spill] sm:$0xff] }
 0x229   : > { %13493 = vst [vmem:[#allocation105_spill] sm:$0xff] %v7951_v62  ;;  %1944 = vrot.lane.b32.xlu0 %v13498_v21, %s5334_s9  ;;  %v7966_v58 = vrot.slane %v7776_v24, %v13499_v39  ;;  %v1306_v43 = vsel %vm801_vm10, %v13457_v8, %v13501_v34  ;;  %v1330_v6 = vsel %vm801_vm10, %v13501_v34, %v13423_v10  ;;  %13504 = vst [vmem:[#allocation106_spill] sm:$0xff] %v7983_v40  ;;  %v13509_v38 = vld [vmem:[#allocation64_spill] sm:$0xff]  ;;  %v13557_v7 = vld [vmem:[#allocation81_spill] sm:$0xff] }
 0x22a   : > { %13495 = vst [vmem:[#allocation68_spill] sm:$0xff] %v7954_v33  ;;  %v1305_v52 = vsel %vm801_vm10, %v13458_v1, %v13502_v47  ;;  %v7981_v32 = vadd.f32 %v7452_v2, %v1580_v30  ;;  %v1557_v23 = vadd.f32 %v1525_v18, %v7647_v28  ;;  %v1329_v8 = vsel %vm801_vm10, %v13502_v47, %v13432_v17  ;;  %v7998_v1 = vpop.permute.xlu0 %1768  ;;  %v13507_v28 = vld [vmem:[#allocation31_spill] sm:$0xff]  ;;  %v13562_v62 = vld [vmem:[#allocation82_spill] sm:$0xff] }
 0x22b   : > { %13500 = vst [vmem:[#allocation29_spill] sm:$0xff] %v7966_v58  ;;  %v1308_v10 = vsel %vm801_vm10, %v13460_v59, %v13505_v19  ;;  %v1332_v2 = vsel %vm801_vm10, %v13505_v19, %v13434_v41  ;;  %13506 = vst [vmem:[#allocation136_spill] sm:$0xff] %v7998_v1  ;;  %v1518_v30 = vmul.f32 %v13497_v46, %v1335_v27  ;;  %v1347_v41 = vsel %vm503_vm11, %v1330_v6, 0.0  ;;  %v13512_v6 = vld [vmem:[#allocation34_spill] sm:$0xff]  ;;  %v13523_v58 = vld [vmem:[#allocation79_spill] sm:$0xff] }
 0x22c   : > { %13503 = vst [vmem:[#allocation127_spill] sm:$0xff] %v7981_v32  ;;  %v1307_v18 = vsel %vm801_vm10, %v13461_v42, %v13507_v28  ;;  %v1331_v17 = vsel %vm801_vm10, %v13507_v28, %v13446_v63  ;;  %v8010_v59 = vadd.f32 %v7467_v4, %v1576_v44  ;;  %v1533_v45 = vmul.f32 %v13486_v50, %v1306_v43  ;;  %v8025_v44 = vpop.permute.xlu1 %1774  ;;  %v13531_v32 = vld [vmem:[#allocation22_spill] sm:$0xff] }
 0x22d   : > { %v1529_v37 = vmul.f32 %v13486_v50, %v1305_v52  ;;  %v1334_v42 = vsel %vm801_vm10, %v13509_v38, %v13449_v13  ;;  %v1343_v27 = vsel %vm503_vm11, %v1329_v8, 0.0  ;;  %v1355_v63 = vsel %vm503_vm11, %v1332_v2, 0.0  ;;  %13510 = vst [vmem:[#allocation157_spill] sm:$0xff] %v8025_v44  ;;  %v13514_v2 = vld [vmem:[#allocation162_spill] sm:$0xff] }
 0x22e   : > { %13508 = vst [vmem:[#allocation107_spill] sm:$0xff] %v8010_v59  ;;  %v1541_v4 = vmul.f32 %v13486_v50, %v1308_v10  ;;  %v8029_v21 = vrot.slane %v7776_v24, %v13274_v53  ;;  %v1351_v34 = vsel %vm503_vm11, %v1331_v17, 0.0  ;;  %v1537_v43 = vmul.f32 %v13486_v50, %v1307_v18  ;;  %v8042_v52 = vpop.permute.xlu0 %1772  ;;  %v13515_v18 = vld [vmem:[#allocation160_spill] sm:$0xff]  ;;  %v13524_v59 = vld [vmem:[#allocation37_spill] sm:$0xff]  ;;  %v13570_v44 = vld [vmem:[#allocation74_spill] sm:$0xff] }
 0x22f   : > { %v1310_v13 = vsel %vm801_vm10, %v13466_v29, %v13509_v38  ;;  %v1333_v47 = vsel %vm801_vm10, %v13512_v6, %v13451_v61  ;;  %13513 = vst [vmem:[#allocation142_spill] sm:$0xff] %v8042_v52  ;;  %v1554_v24 = vadd.f32 %v1522_v16, %v7455_v3  ;;  %v1553_v8 = vadd.f32 %v1521_v31, %v7707_v51  ;;  %v13569_v52 = vld [vmem:[#allocation73_spill] sm:$0xff] }
 0x230   : > { %13511 = vst [vmem:[#allocation177_spill] sm:$0xff] %v8029_v21  ;;  %v1530_v19 = vmul.f32 %v13497_v46, %v1347_v41  ;;  %v1363_v10 = vsel %vm503_vm11, %v1334_v42, 0.0  ;;  %v1565_v28 = vadd.f32 %v1533_v45, %v13514_v2  ;;  %v1526_v29 = vmul.f32 %v13497_v46, %v1343_v27  ;;  %v8061_v41 = vpop.permute.xlu1 %1778  ;;  %v13517_v45 = vld [vmem:[#allocation87_spill] sm:$0xff]  ;;  %v13518_v42 = vld [vmem:[#allocation52_spill] sm:$0xff] }
 0x231   : > { %v1561_v17 = vadd.f32 %v1529_v37, %v13515_v18  ;;  %v1309_v61 = vsel %vm801_vm10, %v13471_v55, %v13512_v6  ;;  %v1538_v3 = vmul.f32 %v13497_v46, %v1355_v63  ;;  %v1534_v51 = vmul.f32 %v13497_v46, %v1351_v34  ;;  %13516 = vst [vmem:[#allocation66_spill] sm:$0xff] %v8061_v41  ;;  %v13519_v27 = vld [vmem:[#allocation99_spill] sm:$0xff]  ;;  %v13521_v63 = vld [vmem:[#allocation48_spill] sm:$0xff] }
 0x232   : > { %v1549_v16 = vmul.f32 %v13486_v50, %v1310_v13  ;;  %v1359_v31 = vsel %vm503_vm11, %v1333_v47, 0.0  ;;  %v1550_v38 = vadd.f32 %v1518_v30, %v13517_v45  ;;  %v1573_v37 = vadd.f32 %v1541_v4, %v13518_v42  ;;  %v8067_v55 = vpop.permute.xlu0 %1776  ;;  %v13522_v34 = vld [vmem:[#allocation124_spill] sm:$0xff] }
 0x233   : > { %v1569_v2 = vadd.f32 %v1537_v43, %v13519_v27  ;;  %v1546_v18 = vmul.f32 %v13497_v46, %v1363_v10  ;;  %13520 = vst [vmem:[#allocation138_spill] sm:$0xff] %v8067_v55  ;;  %v8070_v6 = vadd.f32 %v13521_v63, %v1557_v23  ;;  %v8073_v13 = vadd.f32 %v13522_v34, %v1553_v8  ;;  %v13525_v4 = vld [vmem:[#allocation80_spill] sm:$0xff]  ;;  %v13526_v10 = vld [vmem:[#allocation194_spill] sm:$0xff]  ;;  %v13530_v8 = vld [vmem:[#allocation203_spill] sm:$0xff] }
 0x234   : > { %v1562_v47 = vadd.f32 %v1530_v19, %v13523_v58  ;;  %v1545_v21 = vmul.f32 %v13486_v50, %v1309_v61  ;;  %v8078_v30 = vadd.f32 %v13524_v59, %v1565_v28  ;;  %v1558_v45 = vadd.f32 %v1526_v29, %v13525_v4  ;;  %v13527_v27 = vld [vmem:[#allocation114_spill] sm:$0xff]  ;;  %v8089_v19 = vpop.permute.xlu1 %1782  ;;  %v13533_v50 = vld [vmem:[#allocation128_spill] sm:$0xff]  ;;  %v13535_v28 = vld [vmem:[#allocation131_spill] sm:$0xff] }
 0x235   : > { %v1542_v43 = vmul.f32 %v13497_v46, %v1359_v31  ;;  %v1641_v42 = vadd.f32 %v13526_v10, %v1554_v24  ;;  %v8084_v22 = vadd.f32 %v13527_v27, %v1561_v17  ;;  %v13529_v23 = vld [vmem:[#allocation202_spill] sm:$0xff]  ;;  %v1566_v34 = vadd.f32 %v1534_v51, %v13530_v8  ;;  %13532 = vst [vmem:[#allocation140_spill] sm:$0xff] %v8089_v19  ;;  %v13537_v46 = vld [vmem:[#allocation91_spill] sm:$0xff]  ;;  %v13540_v4 = vld [vmem:[#allocation100_spill] sm:$0xff] }
 0x236   : > { %v1570_v63 = vadd.f32 %v1538_v3, %v13529_v23  ;;  %v1581_v58 = vadd.f32 %v1549_v16, %v13531_v32  ;;  %v8092_v59 = vadd.f32 %v13533_v50, %v1573_v37  ;;  %v8095_v29 = vadd.f32 %v13535_v28, %v1569_v2  ;;  %v13538_v24 = vld [vmem:[#allocation195_spill] sm:$0xff]  ;;  %v8099_v17 = vpop.permute.xlu0 %1780  ;;  %v13542_v51 = vld [vmem:[#allocation41_spill] sm:$0xff]  ;;  %v13544_v27 = vld [vmem:[#allocation144_spill] sm:$0xff] }
 0x237   : > { %13528 = vst [vmem:[#allocation108_spill] sm:$0xff] %v8084_v22  ;;  %v1578_v61 = vadd.f32 %v1546_v18, %v13537_v46  ;;  %v1637_v31 = vadd.f32 %v13538_v24, %v1550_v38  ;;  %13539 = vst [vmem:[#allocation72_spill] sm:$0xff] %v8099_v17  ;;  %v1577_v3 = vadd.f32 %v1545_v21, %v13540_v4  ;;  %v13541_v10 = vld [vmem:[#allocation35_spill] sm:$0xff]  ;;  %v13543_v16 = vld [vmem:[#allocation113_spill] sm:$0xff] }
 0x238   : > { %13534 = vst [vmem:[#allocation109_spill] sm:$0xff] %v8092_v59  ;;  %13536 = vst [vmem:[#allocation28_spill] sm:$0xff] %v8095_v29  ;;  %v1448_v32 = vsel %vm938_vm12, %v13542_v51, %v13541_v10  ;;  %v1447_v37 = vsel %vm938_vm12, %v13544_v27, %v13543_v16  ;;  %v13545_v2 = vld [vmem:[#allocation198_spill] sm:$0xff]  ;;  %v13546_v8 = vld [vmem:[#allocation93_spill] sm:$0xff]  ;;  %v1653_v17 = vadd.f32 %v13557_v7, %v1566_v34  ;;  %v8130_v33 = vpop.permute.xlu1 %1786 }
 0x239   : > { %v1649_v23 = vadd.f32 %v13545_v2, %v1562_v47  ;;  %v1574_v18 = vadd.f32 %v1542_v43, %v13546_v8  ;;  %v13547_v50 = vld [vmem:[#allocation120_spill] sm:$0xff]  ;;  %v13548_v38 = vld [vmem:[#allocation125_spill] sm:$0xff]  ;;  %v13549_v21 = vld [vmem:[#allocation187_spill] sm:$0xff]  ;;  %13558 = vst [vmem:[#allocation145_spill] sm:$0xff] %v8130_v33  ;;  %v1696_v19 = vmul.f32 %v13559_v12, %v1448_v32  ;;  %v1692_v56 = vmul.f32 %v13559_v12, %v1447_v37 }
 0x23a   : > { %v1450_v28 = vsel %vm938_vm12, %v13548_v38, %v13547_v50  ;;  %v13550_v46 = vld [vmem:[#allocation129_spill] sm:$0xff]  ;;  %v13551_v4 = vld [vmem:[#allocation196_spill] sm:$0xff]  ;;  %v13552_v29 = vld [vmem:[#allocation43_spill] sm:$0xff]  ;;  %v1665_v14 = vadd.f32 %v13569_v52, %v1578_v61 }
 0x23b   : > { %v1449_v24 = vsel %vm938_vm12, %v13550_v46, %v13549_v21  ;;  %v1452_v1 = vsel %vm938_vm12, %v13552_v29, %v13551_v4  ;;  %v13553_v59 = vld [vmem:[#allocation130_spill] sm:$0xff]  ;;  %v13555_v47 = vld [vmem:[#allocation199_spill] sm:$0xff]  ;;  %v13556_v2 = vld [vmem:[#allocation200_spill] sm:$0xff]  ;;  %v1704_v7 = vmul.f32 %v13559_v12, %v1450_v28  ;;  %v8174_v61 = vadd.f32 %v1696_v19, %v1641_v42 }
 0x23c   : > { %v8125_v40 = vadd.f32 %v13553_v59, %v1581_v58  ;;  %v1645_v43 = vadd.f32 %v13555_v47, %v1558_v45  ;;  %v1657_v8 = vadd.f32 %v13556_v2, %v1570_v63  ;;  %v13560_v55 = vld [vmem:[#allocation201_spill] sm:$0xff]  ;;  %v8142_v59 = vpop.permute.xlu0 %1784  ;;  %v1700_v63 = vmul.f32 %v13559_v12, %v1449_v24  ;;  %v13565_v32 = vld [vmem:[#allocation75_spill] sm:$0xff]  ;;  %v13572_v22 = vld [vmem:[#allocation88_spill] sm:$0xff] }
 0x23d   : > { %v1451_v41 = vsel %vm938_vm12, %v13561_v36, %v13560_v55  ;;  %v13563_v58 = vld [vmem:[#allocation45_spill] sm:$0xff]  ;;  %13564 = vst [vmem:[#allocation132_spill] sm:$0xff] %v8142_v59  ;;  %v1712_v34 = vmul.f32 %v13559_v12, %v1452_v1  ;;  %v13566_v37 = vld [vmem:[#allocation71_spill] sm:$0xff]  ;;  %v1661_v59 = vadd.f32 %v13570_v44, %v1574_v18  ;;  %v8172_v44 = vpop.permute.xlu1 %1790  ;;  %13575 = vst [vmem:[#allocation179_spill] sm:$0xff] %v8174_v61 }
 0x23e   : > { %13554 = vst [vmem:[#allocation178_spill] sm:$0xff] %v8125_v40  ;;  %v1454_v45 = vsel %vm938_vm12, %v13563_v58, %v13562_v62  ;;  %v1453_v47 = vsel %vm938_vm12, %v13566_v37, %v13565_v32  ;;  %v8151_v2 = vld [vmem:[#allocation5 + $0x20] ss:$8 sm:$0xf]  ;;  %v1708_v1 = vmul.f32 %v13559_v12, %v1451_v41  ;;  %v1439_v37 = vsel %vm938_vm12, %v13543_v16, %v13572_v22 }
 0x23f   : > { %v13567_v40 = vld [vmem:[#allocation49_spill] sm:$0xff]  ;;  %v13571_v58 = vld [vmem:[#allocation150_spill] sm:$0xff]  ;;  %v1720_v24 = vmul.f32 %v13559_v12, %v1454_v45  ;;  %13574 = vst [vmem:[#allocation112_spill] sm:$0xff] %v8172_v44  ;;  %v1716_v41 = vmul.f32 %v13559_v12, %v1453_v47  ;;  %v8183_v18 = vrot.slane %v8151_v2, %v13499_v39  ;;  %v8185_v16 = vadd.f32 %v1704_v7, %v1649_v23  ;;  %v13583_v23 = vld [vmem:[#allocation92_spill] sm:$0xff] }
 0x240   : > { %v8154_v33 = vadd.f32 %v13567_v40, %v1577_v3  ;;  %v1440_v28 = vsel %vm938_vm12, %v13541_v10, %v13571_v58  ;;  %v13573_v40 = vld [vmem:[#allocation89_spill] sm:$0xff]  ;;  %v8176_v3 = vadd.f32 %v1692_v56, %v1637_v31  ;;  %v8179_v10 = vpop.permute.xlu0 %1788  ;;  %v8187_v45 = vadd.f32 %v1700_v63, %v1645_v43  ;;  %v8195_v56 = vld [vmem:[%s12412_s2] sm:$0xf]  ;;  %v13582_v19 = vld [vmem:[#allocation90_spill] sm:$0xff] }
 0x241   : > { %v1442_v52 = vsel %vm938_vm12, %v13547_v50, %v13573_v40  ;;  %13577 = vst [vmem:[#allocation116_spill] sm:$0xff] %v8183_v18  ;;  %13578 = vst [vmem:[#allocation149_spill] sm:$0xff] %v8185_v16  ;;  %v13581_v50 = vld [vmem:[#allocation51_spill] sm:$0xff]  ;;  %v1441_v31 = vsel %vm938_vm12, %v13549_v21, %v13582_v19  ;;  %v1444_v43 = vsel %vm938_vm12, %v13551_v4, %v13583_v23  ;;  %v13586_v63 = vld [vmem:[#allocation94_spill] sm:$0xff] }
 0x242   : > { %13568 = vst [vmem:[#allocation141_spill] sm:$0xff] %v8154_v33  ;;  %13576 = vst [vmem:[#allocation147_spill] sm:$0xff] %v8176_v3  ;;  %v8189_v33 = vadd.f32 %v1712_v34, %v1657_v8  ;;  %v1697_v44 = vmul.f32 %v13581_v50, %v1440_v28  ;;  %v1693_v12 = vmul.f32 %v13581_v50, %v1439_v37  ;;  %v8215_v37 = vpop.permute.xlu1 %1794  ;;  %v13587_v47 = vld [vmem:[#allocation117_spill] sm:$0xff]  ;;  %v13633_v3 = vld [vmem:[#allocation106_spill] sm:$0xff] }
 0x243   : > { %13579 = vst [vmem:[#allocation118_spill] sm:$0xff] %v8187_v45  ;;  %v1705_v42 = vmul.f32 %v13581_v50, %v1442_v52  ;;  %v8207_v8 = vadd.f32 %v1708_v1, %v1653_v17  ;;  %v8209_v7 = vadd.f32 %v1720_v24, %v1665_v14  ;;  %v1443_v34 = vsel %vm938_vm12, %v13560_v55, %v13586_v63  ;;  %v13590_v52 = vld [vmem:[#allocation95_spill] sm:$0xff]  ;;  %v13591_v14 = vld [vmem:[#allocation96_spill] sm:$0xff] }
 0x244   : > { %13580 = vst [vmem:[#allocation42_spill] sm:$0xff] %v8189_v33  ;;  %v8219_v28 = vrot.slane %v8151_v2, %v13587_v47  ;;  %v8221_v21 = vadd.f32 %v1716_v41, %v1661_v59  ;;  %v1446_v17 = vsel %vm938_vm12, %v13562_v62, %v13590_v52  ;;  %v1445_v4 = vsel %vm938_vm12, %v13565_v32, %v13591_v14  ;;  %v8231_v1 = vpop.permute.xlu0 %1792  ;;  %v13593_v41 = vld [vmem:[#allocation155_spill] sm:$0xff] }
 0x245   : > { %13584 = vst [vmem:[#allocation151_spill] sm:$0xff] %v8207_v8  ;;  %13585 = vst [vmem:[#allocation154_spill] sm:$0xff] %v8209_v7  ;;  %v8235_v55 = vrot.slane %v8195_v56, %v13499_v39  ;;  %v1701_v24 = vmul.f32 %v13581_v50, %v1441_v31  ;;  %v1713_v59 = vmul.f32 %v13581_v50, %v1444_v43  ;;  %v13594_v7 = vld [vmem:[#allocation159_spill] sm:$0xff]  ;;  %v13628_v8 = vld [vmem:[#allocation54_spill] sm:$0xff] }
 0x246   : > { %13588 = vst [vmem:[#allocation158_spill] sm:$0xff] %v8219_v28  ;;  %13589 = vst [vmem:[#allocation55_spill] sm:$0xff] %v8221_v21  ;;  %v1456_v62 = vsel %vm938_vm12, %v13593_v41, %v13542_v51  ;;  %v1455_v32 = vsel %vm938_vm12, %v13594_v7, %v13544_v27  ;;  %v8248_v28 = vadd.f32 %v1697_v44, %v7846_v5  ;;  %v13595_v5 = vld [vmem:[#allocation152_spill] sm:$0xff]  ;;  %v8267_v44 = vpop.permute.xlu1 %1798 }
 0x247   : > { %13592 = vst [vmem:[#allocation161_spill] sm:$0xff] %v8235_v55  ;;  %v8251_v39 = vadd.f32 %v1693_v12, %v7862_v26  ;;  %v8254_v31 = vadd.f32 %v1705_v42, %v7865_v49  ;;  %v1709_v43 = vmul.f32 %v13581_v50, %v1443_v34  ;;  %v1721_v21 = vmul.f32 %v13581_v50, %v1446_v17  ;;  %v13627_v55 = vld [vmem:[#allocation140_spill] sm:$0xff] }
 0x248   : > { %v1717_v51 = vmul.f32 %v13581_v50, %v1445_v4  ;;  %v1432_v27 = vsel %vm938_vm12, %v13571_v58, %v13593_v41  ;;  %v1458_v26 = vsel %vm938_vm12, %v13595_v5, %v13548_v38  ;;  %v1470_v12 = vsel %vm510_vm13, %v1456_v62, 0.0  ;;  %v13597_v58 = vld [vmem:[#allocation21_spill] sm:$0xff]  ;;  %v8281_v17 = vpop.permute.xlu0 %1796 }
 0x249   : > { %v1431_v50 = vsel %vm938_vm12, %v13572_v22, %v13594_v7  ;;  %v1466_v42 = vsel %vm510_vm13, %v1455_v32, 0.0  ;;  %v1457_v34 = vsel %vm938_vm12, %v13597_v58, %v13550_v46  ;;  %v8284_v38 = vadd.f32 %v1701_v24, %v7881_v54  ;;  %v13599_v46 = vld [vmem:[#allocation97_spill] sm:$0xff]  ;;  %v13600_v24 = vld [vmem:[#allocation98_spill] sm:$0xff] }
 0x24a   : > { %v8287_v4 = vadd.f32 %v1713_v59, %v7884_v9  ;;  %v1434_v22 = vsel %vm938_vm12, %v13573_v40, %v13595_v5  ;;  %v8295_v7 = vrot.slane %v8195_v56, %v13587_v47  ;;  %v8298_v41 = vadd.f32 %v1709_v43, %v7907_v25  ;;  %v8312_v43 = vpop.permute.xlu1 %1802 }
 0x24b   : > { %v1698_v62 = vmul.f32 %v13599_v46, %v1432_v27  ;;  %v1478_v54 = vsel %vm510_vm13, %v1458_v26, 0.0  ;;  %v1433_v9 = vsel %vm938_vm12, %v13582_v19, %v13597_v58  ;;  %v1699_v59 = vmul.f32 %v13600_v24, %v1470_v12  ;;  %v13602_v58 = vld [vmem:[#allocation25_spill] sm:$0xff] }
 0x24c   : > { %13598 = vst [vmem:[#allocation24_spill] sm:$0xff] %v8295_v7  ;;  %v1694_v40 = vmul.f32 %v13599_v46, %v1431_v50  ;;  %v1695_v32 = vmul.f32 %v13600_v24, %v1466_v42  ;;  %v1474_v25 = vsel %vm510_vm13, %v1457_v34, 0.0  ;;  %v8315_v27 = vadd.f32 %v1721_v21, %v7910_v11  ;;  %v8321_v19 = vpop.permute.xlu0 %1800  ;;  %v13603_v34 = vld [vmem:[#allocation164_spill] sm:$0xff] }
 0x24d   : > { %v8318_v5 = vadd.f32 %v1717_v51, %v7913_v60  ;;  %v1706_v26 = vmul.f32 %v13599_v46, %v1434_v22  ;;  %v8325_v12 = vrot.slane %v8151_v2, %v13400_v20  ;;  %v1707_v50 = vmul.f32 %v13600_v24, %v1478_v54 }
 0x24e   : > { %v1702_v42 = vmul.f32 %v13599_v46, %v1433_v9  ;;  %v1436_v11 = vsel %vm938_vm12, %v13583_v23, %v13602_v58  ;;  %v1460_v60 = vsel %vm938_vm12, %v13602_v58, %v13552_v29  ;;  %v8338_v21 = vadd.f32 %v1698_v62, %v7936_v0  ;;  %v8362_v62 = vpop.permute.xlu1 %1806  ;;  %v13612_v58 = vld [vmem:[#allocation45_spill] sm:$0xff] }
 0x24f   : > { %13601 = vst [vmem:[#allocation44_spill] sm:$0xff] %v8325_v12  ;;  %v1703_v51 = vmul.f32 %v13600_v24, %v1474_v25  ;;  %v1459_v22 = vsel %vm938_vm12, %v13603_v34, %v13561_v36  ;;  %v8347_v54 = vrot.slane %v8151_v2, %v13274_v53  ;;  %v8350_v23 = vadd.f32 %v1699_v59, %v8070_v6 }
 0x250   : > { %v8353_v9 = vadd.f32 %v1694_v40, %v7939_v15  ;;  %v8356_v0 = vadd.f32 %v1695_v32, %v8073_v13  ;;  %v1435_v29 = vsel %vm938_vm12, %v13586_v63, %v13603_v34  ;;  %v8365_v36 = vadd.f32 %v1706_v26, %v7942_v35  ;;  %v8370_v15 = vpop.permute.xlu0 %1804  ;;  %v13610_v32 = vld [vmem:[#allocation108_spill] sm:$0xff]  ;;  %v13617_v34 = vld [vmem:[#allocation101_spill] sm:$0xff] }
 0x251   : > { %13604 = vst [vmem:[#allocation167_spill] sm:$0xff] %v8347_v54  ;;  %13605 = vst [vmem:[#allocation174_spill] sm:$0xff] %v8350_v23  ;;  %v1486_v6 = vsel %vm510_vm13, %v1460_v60, 0.0  ;;  %v1714_v2 = vmul.f32 %v13599_v46, %v1436_v11  ;;  %v8374_v13 = vrot.slane %v8195_v56, %v13400_v20  ;;  %v8377_v59 = vadd.f32 %v1707_v50, %v8078_v30  ;;  %v13613_v11 = vld [vmem:[#allocation169_spill] sm:$0xff]  ;;  %v13624_v54 = vld [vmem:[#allocation170_spill] sm:$0xff] }
 0x252   : > { %13606 = vst [vmem:[#allocation58_spill] sm:$0xff] %v8356_v0  ;;  %v8380_v63 = vadd.f32 %v1702_v42, %v7948_v57  ;;  %v1482_v35 = vsel %vm510_vm13, %v1459_v22, 0.0  ;;  %v8386_v40 = vrot.slane %v8195_v56, %v13274_v53  ;;  %v8389_v25 = vadd.f32 %v1703_v51, %v13610_v32  ;;  %v13614_v50 = vld [vmem:[#allocation157_spill] sm:$0xff]  ;;  %v13616_v51 = vld [vmem:[#allocation71_spill] sm:$0xff]  ;;  %v13619_v32 = vld [vmem:[#allocation146_spill] sm:$0xff]  ;;  %v8413_v53 = vpop.permute.xlu1 %1810 }
 0x253   : > { %13607 = vst [vmem:[#allocation175_spill] sm:$0xff] %v8374_v13  ;;  %13608 = vst [vmem:[#allocation176_spill] sm:$0xff] %v8377_v59  ;;  %v1710_v26 = vmul.f32 %v13599_v46, %v1435_v29  ;;  %v1462_v30 = vsel %vm938_vm12, %v13613_v11, %v13612_v58  ;;  %v13615_v57 = vld [vmem:[#allocation57_spill] sm:$0xff]  ;;  %v1715_v60 = vmul.f32 %v13600_v24, %v1486_v6  ;;  %v13618_v29 = vld [vmem:[#allocation142_spill] sm:$0xff] }
 0x254   : > { %13609 = vst [vmem:[#allocation40_spill] sm:$0xff] %v8386_v40  ;;  %13611 = vst [vmem:[#allocation26_spill] sm:$0xff] %v8389_v25  ;;  %v1837_v42 = vsel %vm801_vm10, %v13615_v57, %v13614_v50  ;;  %v1438_v56 = vsel %vm938_vm12, %v13590_v52, %v13613_v11  ;;  %v1461_v22 = vsel %vm938_vm12, %v13617_v34, %v13616_v51  ;;  %v13620_v20 = vld [vmem:[#allocation105_spill] sm:$0xff]  ;;  %v13621_v40 = vld [vmem:[#allocation66_spill] sm:$0xff]  ;;  %v8427_v12 = vpop.permute.xlu0 %1808  ;;  %v1494_v7 = vsel %vm510_vm13, %v1462_v30, 0.0 }
 0x255   : > { %v1836_v58 = vsel %vm801_vm10, %v13619_v32, %v13618_v29  ;;  %v8416_v47 = vadd.f32 %v1714_v2, %v13620_v20  ;;  %v1711_v6 = vmul.f32 %v13600_v24, %v1482_v35  ;;  %v13622_v13 = vld [vmem:[#allocation103_spill] sm:$0xff]  ;;  %v13623_v11 = vld [vmem:[#allocation138_spill] sm:$0xff]  ;;  %13625 = vst [vmem:[#allocation67_spill] sm:$0xff] %v8427_v12  ;;  %v1437_v20 = vsel %vm938_vm12, %v13591_v14, %v13617_v34  ;;  %v13629_v25 = vld [vmem:[#allocation68_spill] sm:$0xff] }
 0x256   : > { %v1839_v52 = vsel %vm801_vm10, %v13622_v13, %v13621_v40  ;;  %v1838_v51 = vsel %vm801_vm10, %v13624_v54, %v13623_v11  ;;  %v13626_v2 = vld [vmem:[#allocation102_spill] sm:$0xff]  ;;  %v1841_v33 = vsel %vm801_vm10, %v13628_v8, %v13627_v55  ;;  %v8441_v45 = vadd.f32 %v1710_v26, %v13629_v25  ;;  %v13632_v0 = vld [vmem:[#allocation145_spill] sm:$0xff]  ;;  %v8457_v26 = vpop.permute.xlu1 %1814  ;;  %v13636_v8 = vld [vmem:[#allocation132_spill] sm:$0xff] }
 0x257   : > { %v2040_v35 = vmul.f32 %v13626_v2, %v1837_v42  ;;  %v1722_v18 = vmul.f32 %v13599_v46, %v1438_v56  ;;  %v1490_v30 = vsel %vm510_vm13, %v1461_v22, 0.0  ;;  %v2036_v16 = vmul.f32 %v13626_v2, %v1836_v58  ;;  %v13630_v42 = vld [vmem:[#allocation72_spill] sm:$0xff]  ;;  %v13631_v34 = vld [vmem:[#allocation122_spill] sm:$0xff]  ;;  %13634 = vst [vmem:[#allocation62_spill] sm:$0xff] %v8457_v26  ;;  %v13635_v56 = vld [vmem:[#allocation109_spill] sm:$0xff] }
 0x258   : > { %v2048_v59 = vmul.f32 %v13626_v2, %v1839_v52  ;;  %v2044_v14 = vmul.f32 %v13626_v2, %v1838_v51  ;;  %v1840_v61 = vsel %vm801_vm10, %v13631_v34, %v13630_v42  ;;  %v1843_v25 = vsel %vm801_vm10, %v13633_v3, %v13632_v0  ;;  %v8465_v49 = vpop.permute.xlu0 %1812  ;;  %v13637_v12 = vld [vmem:[#allocation136_spill] sm:$0xff] }
 0x259   : > { %v8460_v22 = vadd.f32 %v1715_v60, %v13635_v56  ;;  %v1723_v58 = vmul.f32 %v13600_v24, %v1494_v7  ;;  %v1718_v52 = vmul.f32 %v13599_v46, %v1437_v20  ;;  %v2056_v51 = vmul.f32 %v13626_v2, %v1841_v33  ;;  %v13638_v26 = vld [vmem:[#allocation112_spill] sm:$0xff]  ;;  %v13640_v33 = vld [vmem:[#allocation127_spill] sm:$0xff] }
 0x25a   : > { %v1719_v34 = vmul.f32 %v13600_v24, %v1490_v30  ;;  %v2072_v23 = vadd.f32 %v2040_v35, %v8248_v28  ;;  %v1842_v3 = vsel %vm801_vm10, %v13637_v12, %v13636_v8  ;;  %v1829_v7 = vsel %vm801_vm10, %v13614_v50, %v13638_v26  ;;  %v13639_v60 = vld [vmem:[#allocation28_spill] sm:$0xff] }
 0x25b   : > { %v8478_v46 = vadd.f32 %v1711_v6, %v13639_v60  ;;  %v8481_v20 = vadd.f32 %v1722_v18, %v13640_v33  ;;  %v2052_v24 = vmul.f32 %v13626_v2, %v1840_v61  ;;  %v2064_v28 = vmul.f32 %v13626_v2, %v1843_v25  ;;  %v8492_v6 = vpop.permute.xlu1 %1818  ;;  %v13641_v61 = vld [vmem:[#allocation104_spill] sm:$0xff] }
 0x25c   : > { %v2068_v35 = vadd.f32 %v2036_v16, %v8251_v39  ;;  %v2080_v30 = vadd.f32 %v2048_v59, %v8254_v31  ;;  %v2076_v56 = vadd.f32 %v2044_v14, %v8284_v38  ;;  %v1828_v50 = vsel %vm801_vm10, %v13618_v29, %v8179_v10  ;;  %v8501_v16 = vpop.permute.xlu0 %1816  ;;  %v13642_v31 = vld [vmem:[#allocation178_spill] sm:$0xff]  ;;  %v13643_v59 = vld [vmem:[#allocation107_spill] sm:$0xff]  ;;  %v13644_v14 = vld [vmem:[#allocation141_spill] sm:$0xff] }
 0x25d   : > { %v2088_v18 = vadd.f32 %v2056_v51, %v8287_v4  ;;  %v2060_v60 = vmul.f32 %v13626_v2, %v1842_v3  ;;  %v2041_v33 = vmul.f32 %v13641_v61, %v1829_v7  ;;  %v1831_v39 = vsel %vm801_vm10, %v13621_v40, %v8215_v37  ;;  %v13645_v4 = vld [vmem:[#allocation166_spill] sm:$0xff] }
 0x25e   : > { %v8504_v38 = vadd.f32 %v1723_v58, %v13642_v31  ;;  %v1750_v29 = vadd.f32 %v1718_v52, %v13643_v59  ;;  %v8508_v25 = vadd.f32 %v1719_v34, %v13644_v14  ;;  %v8511_v51 = vadd.f32 %v13645_v4, %v2072_v23  ;;  %v13646_v34 = vld [vmem:[#allocation172_spill] sm:$0xff]  ;;  %v13647_v23 = vld [vmem:[#allocation61_spill] sm:$0xff] }
 0x25f   : > { %v2084_v3 = vadd.f32 %v2052_v24, %v8298_v41  ;;  %v2096_v2 = vadd.f32 %v2064_v28, %v8315_v27  ;;  %v2037_v7 = vmul.f32 %v13641_v61, %v1828_v50  ;;  %v1830_v40 = vsel %vm801_vm10, %v13623_v11, %v8231_v1  ;;  %v8521_v52 = vpop.permute.xlu1 %1886  ;;  %v13648_v41 = vld [vmem:[#allocation171_spill] sm:$0xff] }
 0x260   : > { %v2049_v58 = vmul.f32 %v13641_v61, %v1831_v39  ;;  %v8524_v31 = vadd.f32 %v13646_v34, %v2076_v56  ;;  %v8527_v59 = vadd.f32 %v13647_v23, %v2080_v30  ;;  %v8530_v24 = vadd.f32 %v13648_v41, %v2068_v35  ;;  %v8538_v50 = vpop.permute.xlu0 %1884  ;;  %v13649_v39 = vld [vmem:[#allocation65_spill] sm:$0xff]  ;;  %v13653_v34 = vld [vmem:[#allocation182_spill] sm:$0xff] }
 0x261   : > { %v2092_v27 = vadd.f32 %v2060_v60, %v8318_v5  ;;  %v2073_v28 = vadd.f32 %v2041_v33, %v8338_v21  ;;  %v1833_v11 = vsel %vm801_vm10, %v13627_v55, %v8267_v44  ;;  %v8541_v56 = vadd.f32 %v13649_v39, %v2088_v18  ;;  %v13650_v60 = vld [vmem:[#allocation27_spill] sm:$0xff] }
 0x262   : > { %v2045_v30 = vmul.f32 %v13641_v61, %v1830_v40  ;;  %v1832_v35 = vsel %vm801_vm10, %v13630_v42, %v8281_v17  ;;  %v1835_v5 = vsel %vm801_vm10, %v13632_v0, %v8312_v43  ;;  %v1844_v55 = vsel %vm801_vm10, %v8370_v15, %v13619_v32  ;;  %v13651_v42 = vld [vmem:[#allocation33_spill] sm:$0xff] }
 0x263   : > { %v2069_v21 = vadd.f32 %v2037_v7, %v8353_v9  ;;  %v1834_v18 = vsel %vm801_vm10, %v13636_v8, %v8321_v19  ;;  %v8562_v33 = vadd.f32 %v13650_v60, %v2084_v3  ;;  %v8565_v14 = vadd.f32 %v13651_v42, %v2096_v2  ;;  %v8577_v32 = vpop.permute.xlu1 %1890 }
 0x264   : > { %v2081_v0 = vadd.f32 %v2049_v58, %v8365_v36  ;;  %v2057_v4 = vmul.f32 %v13641_v61, %v1833_v11  ;;  %v1821_v9 = vsel %vm801_vm10, %v13638_v26, %v8362_v62  ;;  %v1845_v8 = vsel %vm801_vm10, %v8362_v62, %v13615_v57  ;;  %v8587_v26 = vpop.permute.xlu0 %1888  ;;  %v13652_v57 = vld [vmem:[#allocation143_spill] sm:$0xff]  ;;  %v13654_v11 = vld [vmem:[#allocation177_spill] sm:$0xff] }
 0x265   : > { %v2053_v3 = vmul.f32 %v13641_v61, %v1832_v35  ;;  %v2065_v2 = vmul.f32 %v13641_v61, %v1835_v5  ;;  %v1820_v36 = vsel %vm801_vm10, %v8179_v10, %v8370_v15  ;;  %v1852_v7 = vsel %vm503_vm11, %v1844_v55, 0.0  ;;  %v13659_v5 = vld [vmem:[#allocation36_spill] sm:$0xff] }
 0x266   : > { %v2077_v40 = vadd.f32 %v2045_v30, %v8380_v63  ;;  %v2061_v62 = vmul.f32 %v13641_v61, %v1834_v18  ;;  %v8592_v58 = vadd.f32 %v13652_v57, %v2092_v27  ;;  %v8595_v23 = vadd.f32 %v13653_v34, %v2073_v28  ;;  %v13655_v61 = vld [vmem:[#allocation29_spill] sm:$0xff]  ;;  %v13657_v30 = vld [vmem:[#allocation183_spill] sm:$0xff] }
 0x267   : > { %v1856_v41 = vsel %vm503_vm11, %v1845_v8, 0.0  ;;  %v2042_v10 = vmul.f32 %v13654_v11, %v1821_v9  ;;  %v1823_v15 = vsel %vm801_vm10, %v8215_v37, %v8413_v53  ;;  %v1847_v63 = vsel %vm801_vm10, %v8413_v53, %v13622_v13  ;;  %v8610_v39 = vpop.permute.xlu1 %1894  ;;  %v13660_v53 = vld [vmem:[#allocation67_spill] sm:$0xff]  ;;  %v13662_v8 = vld [vmem:[#allocation54_spill] sm:$0xff] }
 0x268   : > { %v2035_v27 = vmul.f32 %v13655_v61, %v1852_v7  ;;  %v2038_v28 = vmul.f32 %v13654_v11, %v1820_v36  ;;  %13656 = vst [vmem:[#allocation32_spill] sm:$0xff] %v8610_v39  ;;  %v8613_v35 = vadd.f32 %v13657_v30, %v2069_v21  ;;  %v8616_v55 = vadd.f32 %v13659_v5, %v2081_v0  ;;  %v8625_v42 = vpop.permute.xlu0 %1892  ;;  %v13666_v36 = vld [vmem:[#allocation38_spill] sm:$0xff]  ;;  %v13668_v57 = vld [vmem:[#allocation147_spill] sm:$0xff] }
 0x269   : > { %v2089_v18 = vadd.f32 %v2057_v4, %v8416_v47  ;;  %v2085_v37 = vadd.f32 %v2053_v3, %v8441_v45  ;;  %v2097_v60 = vadd.f32 %v2065_v2, %v8481_v20  ;;  %v1846_v13 = vsel %vm801_vm10, %v13660_v53, %v13624_v54  ;;  %13661 = vst [vmem:[#allocation185_spill] sm:$0xff] %v8625_v42  ;;  %v13663_v47 = vld [vmem:[#allocation62_spill] sm:$0xff] }
 0x26a   : > { %13658 = vst [vmem:[#allocation165_spill] sm:$0xff] %v8613_v35  ;;  %v2039_v9 = vmul.f32 %v13655_v61, %v1856_v41  ;;  %v1864_v21 = vsel %vm503_vm11, %v1847_v63, 0.0  ;;  %v2050_v0 = vmul.f32 %v13654_v11, %v1823_v15  ;;  %v1849_v45 = vsel %vm801_vm10, %v13663_v47, %v13662_v8  ;;  %v13664_v4 = vld [vmem:[#allocation174_spill] sm:$0xff] }
 0x26b   : > { %v2093_v20 = vadd.f32 %v2061_v62, %v1750_v29  ;;  %v2074_v3 = vadd.f32 %v2042_v10, %v13664_v4  ;;  %v13665_v2 = vld [vmem:[#allocation122_spill] sm:$0xff]  ;;  %v8641_v7 = vadd.f32 %v13666_v36, %v2077_v40  ;;  %v2067_v34 = vadd.f32 %v2035_v27, %v13668_v57  ;;  %v8651_v62 = vpop.permute.xlu1 %1898  ;;  %v13670_v27 = vld [vmem:[#allocation133_spill] sm:$0xff]  ;;  %v13674_v4 = vld [vmem:[#allocation179_spill] sm:$0xff] }
 0x26c   : > { %v1848_v54 = vsel %vm801_vm10, %v8465_v49, %v13665_v2  ;;  %v13669_v41 = vld [vmem:[#allocation58_spill] sm:$0xff]  ;;  %v1822_v63 = vsel %vm801_vm10, %v8231_v1, %v13660_v53  ;;  %v1860_v29 = vsel %vm503_vm11, %v1846_v13, 0.0  ;;  %v2047_v10 = vmul.f32 %v13655_v61, %v1864_v21  ;;  %v8656_v30 = vpop.permute.xlu0 %1896  ;;  %v13675_v53 = vld [vmem:[#allocation176_spill] sm:$0xff]  ;;  %v13676_v36 = vld [vmem:[#allocation121_spill] sm:$0xff] }
 0x26d   : > { %13667 = vst [vmem:[#allocation181_spill] sm:$0xff] %v8641_v7  ;;  %v2070_v15 = vadd.f32 %v2038_v28, %v13669_v41  ;;  %v1872_v40 = vsel %vm503_vm11, %v1849_v45, 0.0  ;;  %v8659_v5 = vadd.f32 %v13670_v27, %v2089_v18  ;;  %v13672_v28 = vld [vmem:[#allocation39_spill] sm:$0xff]  ;;  %v2071_v1 = vadd.f32 %v2039_v9, %v13674_v4  ;;  %v13678_v57 = vld [vmem:[#allocation188_spill] sm:$0xff]  ;;  %v13679_v27 = vld [vmem:[#allocation186_spill] sm:$0xff] }
 0x26e   : > { %v8662_v8 = vadd.f32 %v13672_v28, %v2085_v37  ;;  %v2082_v2 = vadd.f32 %v2050_v0, %v13675_v53  ;;  %v1868_v13 = vsel %vm503_vm11, %v1848_v54, 0.0  ;;  %v8669_v21 = vadd.f32 %v13676_v36, %v2097_v60  ;;  %v13681_v28 = vld [vmem:[#allocation189_spill] sm:$0xff]  ;;  %v13686_v36 = vld [vmem:[#allocation116_spill] sm:$0xff] }
 0x26f   : > { %13671 = vst [vmem:[#allocation63_spill] sm:$0xff] %v8659_v5  ;;  %v8672_v45 = vadd.f32 %v13678_v57, %v2074_v3  ;;  %v2043_v41 = vmul.f32 %v13655_v61, %v1860_v29  ;;  %v2046_v18 = vmul.f32 %v13654_v11, %v1822_v63  ;;  %v8677_v37 = vadd.f32 %v13679_v27, %v2093_v20  ;;  %v8687_v54 = vpop.permute.xlu1 %1902  ;;  %v13683_v3 = vld [vmem:[#allocation156_spill] sm:$0xff]  ;;  %v13684_v29 = vld [vmem:[#allocation149_spill] sm:$0xff]  ;;  %v13688_v27 = vld [vmem:[#allocation118_spill] sm:$0xff] }
 0x270   : > { %13673 = vst [vmem:[#allocation50_spill] sm:$0xff] %v8662_v8  ;;  %13677 = vst [vmem:[#allocation47_spill] sm:$0xff] %v8669_v21  ;;  %v8680_v9 = vadd.f32 %v13681_v28, %v2070_v15  ;;  %v1825_v0 = vsel %vm801_vm10, %v8267_v44, %v13663_v47  ;;  %v2055_v60 = vmul.f32 %v13655_v61, %v1872_v40  ;;  %v1901_v47 = vpop.permute.xlu0 %1900  ;;  %v13685_v15 = vld [vmem:[#allocation134_spill] sm:$0xff] }
 0x271   : > { %13680 = vst [vmem:[#allocation168_spill] sm:$0xff] %v8677_v37  ;;  %v2154_v4 = vadd.f32 %v13683_v3, %v2067_v34  ;;  %v2079_v53 = vadd.f32 %v2047_v10, %v13684_v29  ;;  %v2051_v63 = vmul.f32 %v13655_v61, %v1868_v13  ;;  %v1850_v20 = vsel %vm801_vm10, %v8501_v16, %v13637_v12  ;;  %v13687_v13 = vld [vmem:[#allocation153_spill] sm:$0xff]  ;;  %v13689_v12 = vld [vmem:[#allocation26_spill] sm:$0xff] }
 0x272   : > { %13682 = vst [vmem:[#allocation70_spill] sm:$0xff] %v8680_v9  ;;  %v1965_v44 = vsel %vm938_vm12, %v8521_v52, %v8687_v54  ;;  %v8701_v40 = vadd.f32 %v13685_v15, %v2082_v2  ;;  %v1964_v10 = vsel %vm938_vm12, %v8538_v50, %v1901_v47  ;;  %v2158_v57 = vadd.f32 %v13687_v13, %v2071_v1  ;;  %v13690_v21 = vld [vmem:[#allocation42_spill] sm:$0xff]  ;;  %v13691_v13 = vld [vmem:[#allocation151_spill] sm:$0xff] }
 0x273   : > { %v2213_v34 = vmul.f32 %v13686_v36, %v1965_v44  ;;  %v2075_v28 = vadd.f32 %v2043_v41, %v13688_v27  ;;  %v2078_v3 = vadd.f32 %v2046_v18, %v13689_v12  ;;  %v8711_v29 = vmul.f32 %v13654_v11, %v1825_v0  ;;  %v8721_v1 = vpop.permute.xlu1 %1906  ;;  %v13692_v27 = vld [vmem:[#allocation106_spill] sm:$0xff] }
 0x274   : > { %v2209_v37 = vmul.f32 %v13686_v36, %v1964_v10  ;;  %v2087_v2 = vadd.f32 %v2055_v60, %v13690_v21  ;;  %v1824_v44 = vsel %vm801_vm10, %v8281_v17, %v8465_v49  ;;  %v1876_v15 = vsel %vm503_vm11, %v1850_v20, 0.0  ;;  %v1905_v60 = vpop.permute.xlu0 %1904  ;;  %v13693_v17 = vld [vmem:[#allocation53_spill] sm:$0xff] }
 0x275   : > { %v2245_v41 = vadd.f32 %v2213_v34, %v2158_v57  ;;  %v2083_v18 = vadd.f32 %v2051_v63, %v13691_v13  ;;  %v1851_v0 = vsel %vm801_vm10, %v8492_v6, %v13692_v27  ;;  %v1967_v21 = vsel %vm938_vm12, %v8577_v32, %v8721_v1  ;;  %v13694_v34 = vld [vmem:[#allocation161_spill] sm:$0xff]  ;;  %v13695_v13 = vld [vmem:[#allocation23_spill] sm:$0xff] }
 0x276   : > { %v2241_v49 = vadd.f32 %v2209_v37, %v2154_v4  ;;  %v2166_v10 = vadd.f32 %v13693_v17, %v2079_v53  ;;  %v2221_v20 = vmul.f32 %v13686_v36, %v1967_v21  ;;  %v1966_v63 = vsel %vm938_vm12, %v8587_v26, %v1905_v60  ;;  %v13696_v53 = vld [vmem:[#allocation56_spill] sm:$0xff] }
 0x277   : > { %v2299_v57 = vadd.f32 %v13694_v34, %v2245_v41  ;;  %v2059_v12 = vmul.f32 %v13655_v61, %v1876_v15  ;;  %v2162_v27 = vadd.f32 %v13695_v13, %v2075_v28  ;;  %v2217_v8 = vmul.f32 %v13686_v36, %v1966_v63  ;;  %v8745_v17 = vpop.permute.xlu1 %1910  ;;  %v13697_v28 = vld [vmem:[#allocation163_spill] sm:$0xff] }
 0x278   : > { %v2295_v5 = vadd.f32 %v13694_v34, %v2241_v49  ;;  %v1880_v37 = vsel %vm503_vm11, %v1851_v0, 0.0  ;;  %v2253_v4 = vadd.f32 %v2221_v20, %v2166_v10  ;;  %v2174_v21 = vadd.f32 %v13696_v53, %v2087_v2  ;;  %v8752_v63 = vpop.permute.xlu0 %1908  ;;  %v13698_v10 = vld [vmem:[#allocation55_spill] sm:$0xff]  ;;  %v13699_v53 = vld [vmem:[#allocation190_spill] sm:$0xff] }
 0x279   : > { %v2331_v9 = vmax.f32 %v2299_v57, 0.0  ;;  %v2249_v35 = vadd.f32 %v2217_v8, %v2162_v27  ;;  %v1969_v15 = vsel %vm938_vm12, %v8610_v39, %v8745_v17  ;;  %v2170_v41 = vadd.f32 %v13697_v28, %v2083_v18 }
 0x27a   : > { %v2327_v49 = vmax.f32 %v2295_v5, 0.0  ;;  %v2229_v13 = vmul.f32 %v13686_v36, %v1969_v15  ;;  %v1968_v2 = vsel %vm938_vm12, %v8625_v42, %v8752_v63  ;;  %v2307_v8 = vadd.f32 %v13694_v34, %v2253_v4 }
 0x27b   : > { %v2363_v0 = vmin.f32 %v2331_v9, 6.0  ;;  %v2091_v20 = vadd.f32 %v2059_v12, %v13698_v10  ;;  %v2225_v57 = vmul.f32 %v13686_v36, %v1968_v2  ;;  %v2303_v18 = vadd.f32 %v13694_v34, %v2249_v35  ;;  %v8767_v39 = vpop.permute.xlu1 %1916  ;;  %v13700_v2 = vld [vmem:[#allocation158_spill] sm:$0xff] }
 0x27c   : > { %v2359_v27 = vmin.f32 %v2327_v49, 6.0  ;;  %v8764_v28 = vadd.f32 %v13699_v53, %v2078_v3  ;;  %v2063_v5 = vmul.f32 %v13655_v61, %v1880_v37  ;;  %v2261_v15 = vadd.f32 %v2229_v13, %v2174_v21  ;;  %v8772_v12 = vpop.permute.xlu0 %1912  ;;  %v13701_v21 = vld [vmem:[#allocation59_spill] sm:$0xff] }
 0x27d   : > { %v2339_v7 = vmax.f32 %v2307_v8, 0.0  ;;  %v2257_v42 = vadd.f32 %v2225_v57, %v2170_v41  ;;  %v1956_v9 = vsel %vm938_vm12, %v1901_v47, %v8767_v39  ;;  %v2335_v49 = vmax.f32 %v2303_v18, 0.0 }
 0x27e   : > { %v2391_v4 = vpack.c.bf16 %v2363_v0, %v2359_v27  ;;  %v2210_v35 = vmul.f32 %v13700_v2, %v1956_v9  ;;  %v1970_v61 = vsel %vm938_vm12, %v8656_v30, %v8772_v12  ;;  %v2315_v37 = vadd.f32 %v13694_v34, %v2261_v15 }
 0x27f   : > { %v2371_v3 = vmin.f32 %v2339_v7, 6.0  ;;  %v2178_v41 = vadd.f32 %v13701_v21, %v2091_v20  ;;  %v2233_v13 = vmul.f32 %v13686_v36, %v1970_v61  ;;  %v2367_v47 = vmin.f32 %v2335_v49, 6.0  ;;  %v8788_v57 = vpop.permute.xlu1 %1920  ;;  %v8809_v21 = vld [vmem:[#allocation7] sm:$0xff]  }
 0x280   : > { %4892 = vmatprep.mubr.bf16.mxu0 %v2391_v4  ;;  %v2311_v8 = vadd.f32 %v13694_v34, %v2257_v42  ;;  %v2054_v0 = vmul.f32 %v13654_v11, %v1824_v44  ;;  %v1827_v10 = vsel %vm801_vm10, %v8312_v43, %v8492_v6  ;;  %v2347_v7 = vmax.f32 %v2315_v37, 0.0  ;;  %v8794_v53 = vpop.permute.xlu0 %1918  ;;  %v13702_v44 = vld [vmem:[#allocation154_spill] sm:$0xff] }
 0x281   : > { %v2242_v27 = vadd.f32 %v2210_v35, %v8530_v24  ;;  %v2265_v18 = vadd.f32 %v2233_v13, %v2178_v41  ;;  %v1958_v20 = vsel %vm938_vm12, %v1905_v60, %v8788_v57  ;;  %v2395_v42 = vpack.c.bf16 %v2371_v3, %v2367_v47  ;;  %v13703_v35 = vld [vmem:[#allocation24_spill] sm:$0xff] }
 0x282   : > { %v2343_v15 = vmax.f32 %v2311_v8, 0.0  ;;  %v2095_v9 = vadd.f32 %v2063_v5, %v13702_v44  ;;  %v2218_v4 = vmul.f32 %v13700_v2, %v1958_v20  ;;  %v1957_v43 = vsel %vm938_vm12, %v8687_v54, %v8794_v53  ;;  %v13704_v8 = vld [vmem:[#allocation60_spill] sm:$0xff] }
 0x283   : > { %v2379_v6 = vmin.f32 %v2347_v7, 6.0  ;;  %v2090_v24 = vadd.f32 %v8711_v29, %v8460_v22  ;;  %v2214_v49 = vmul.f32 %v13700_v2, %v1957_v43  ;;  %4893 = vmatmul.mubr.bf16.vlgmr.msra.gmra.mrb[0].mxu0 %v2395_v42  ;;  %v2296_v61 = vadd.f32 %v13703_v35, %v2242_v27  ;;  %v1915_v54 = vpop.permute.xlu1 %1914  ;;  %v13705_v7 = vld [vmem:[#allocation191_spill] sm:$0xff]  ;;  %v13706_v42 = vld [vmem:[#allocation192_spill] sm:$0xff] }
 0x284   : > { %v2375_v60 = vmin.f32 %v2343_v15, 6.0  ;;  %v2086_v3 = vadd.f32 %v2054_v0, %v8478_v46  ;;  %v2066_v5 = vmul.f32 %v13654_v11, %v1827_v10  ;;  %v2250_v37 = vadd.f32 %v2218_v4, %v8524_v31  ;;  %4925 = vmatpush3.bf16.msra.mxu0 %v8809_v21  ;;  %v8820_v29 = vpop.permute.xlu0 %1922  ;;  %v8822_v31 = vld [vmem:[#allocation7 + $0x8] sm:$0xff]  }
 0x285   : > { %v2319_v41 = vadd.f32 %v13694_v34, %v2265_v18  ;;  %v1826_v22 = vsel %vm801_vm10, %v8321_v19, %v8501_v16  ;;  %v1971_v46 = vsel %vm938_vm12, %v8651_v62, %v1915_v54  ;;  %4926 = vmatprep.subr.bf16.mxu0 %v8822_v31  ;;  %v2246_v47 = vadd.f32 %v2214_v49, %v8511_v51  ;;  %v8853_v49 = vld [vmem:[#allocation7 + $0x10] sm:$0xff]  }
 0x286   : > { %v2399_v13 = vpack.c.bf16 %v2379_v6, %v2375_v60  ;;  %v2182_v0 = vadd.f32 %v13704_v8, %v2095_v9  ;;  %v2237_v10 = vmul.f32 %v13686_v36, %v1971_v46  ;;  %v1959_v19 = vsel %vm938_vm12, %v8721_v1, %v8820_v29 }
 0x287   : > { %v2304_v16 = vadd.f32 %v13703_v35, %v2250_v37  ;;  %v8834_v27 = vadd.f32 %v13705_v7, %v2090_v24  ;;  %v2222_v18 = vmul.f32 %v13700_v2, %v1959_v19  ;;  %v2300_v20 = vadd.f32 %v13703_v35, %v2246_v47  ;;  %v8843_v1 = vpop.permute.xlu1 %1926 }
 0x288   : > { %4896 = vmatprep.mubr.bf16.mxu0 %v2399_v13  ;;  %v2328_v51 = vmax.f32 %v2296_v61, 0.0  ;;  %v8839_v15 = vadd.f32 %v13706_v42, %v2086_v3  ;;  %v2062_v36 = vmul.f32 %v13654_v11, %v1826_v22  ;;  %v2269_v44 = vadd.f32 %v2237_v10, %v2182_v0  ;;  %4927 = vmatpush3.bf16.msra.mxu0 %v8822_v31  ;;  %v8851_v24 = vpop.permute.xlu0 %1924  ;;  %v8875_v10 = vld [vmem:[#allocation7 + $0x18] sm:$0xff]  }
 0x289   : > { %v2351_v9 = vmax.f32 %v2319_v41, 0.0  ;;  %v2098_v4 = vadd.f32 %v2066_v5, %v8504_v38  ;;  %v2254_v43 = vadd.f32 %v2222_v18, %v8527_v59  ;;  %v1961_v6 = vsel %vm938_vm12, %v8745_v17, %v8843_v1  ;;  %4928 = vmatprep.subr.bf16.mxu0 %v8853_v49 }
 0x28a   : > { %v2332_v11 = vmax.f32 %v2300_v20, 0.0  ;;  %v2230_v60 = vmul.f32 %v13700_v2, %v1961_v6  ;;  %v1960_v38 = vsel %vm938_vm12, %v8752_v63, %v8851_v24  ;;  %v2323_v59 = vadd.f32 %v13694_v34, %v2269_v44 }
 0x28b   : > { %v2336_v61 = vmax.f32 %v2304_v16, 0.0  ;;  %v2226_v3 = vmul.f32 %v13700_v2, %v1960_v38  ;;  %v2360_v17 = vmin.f32 %v2328_v51, 6.0  ;;  %v2308_v37 = vadd.f32 %v13703_v35, %v2254_v43  ;;  %v8867_v46 = vpop.permute.xlu1 %1930  ;;  %v13707_v51 = vld [vmem:[#allocation135_spill] sm:$0xff]  ;;  %v8900_v38 = vld [vmem:[#allocation7 + $0x20] sm:$0xff]  }
 0x28c   : > { %v2364_v5 = vmin.f32 %v2332_v11, 6.0  ;;  %v2094_v41 = vadd.f32 %v2062_v36, %v8508_v25  ;;  %v2262_v22 = vadd.f32 %v2230_v60, %v8541_v56  ;;  %4929 = vmatpush3.bf16.msra.mxu0 %v8853_v49  ;;  %v2355_v13 = vmax.f32 %v2323_v59, 0.0  ;;  %v8873_v8 = vpop.permute.xlu0 %1928  ;;  %v13708_v36 = vld [vmem:[#allocation193_spill] sm:$0xff] }
 0x28d   : > { %v2383_v47 = vmin.f32 %v2351_v9, 6.0  ;;  %v2258_v63 = vadd.f32 %v2226_v3, %v8562_v33  ;;  %v1963_v34 = vsel %vm938_vm12, %v1915_v54, %v8867_v46  ;;  %4930 = vmatprep.subr.bf16.mxu0 %v8875_v10  ;;  %v2340_v25 = vmax.f32 %v2308_v37, 0.0  ;;  %v13710_v3 = vld [vmem:[#allocation44_spill] sm:$0xff] }
 0x28e   : > { %v2392_v0 = vpack.c.bf16 %v2364_v5, %v2360_v17  ;;  %v1962_v56 = vsel %vm938_vm12, %v8772_v12, %v8873_v8  ;;  %v2387_v19 = vmin.f32 %v2355_v13, 6.0  ;;  %v2368_v16 = vmin.f32 %v2336_v61, 6.0  ;;  %v13711_v5 = vld [vmem:[#allocation167_spill] sm:$0xff] }
 0x28f   : > { %v2316_v33 = vadd.f32 %v13703_v35, %v2262_v22  ;;  %v2238_v7 = vmul.f32 %v13700_v2, %v1963_v34  ;;  %v2234_v54 = vmul.f32 %v13700_v2, %v1962_v56  ;;  %v2372_v18 = vmin.f32 %v2340_v25, 6.0  ;;  %v1935_v12 = vpop.permute.xlu1 %1934 }
 0x290   : > { %4916 = vmatprep.mubr.bf16.mxu1 %v2392_v0  ;;  %v2312_v20 = vadd.f32 %v13703_v35, %v2258_v63  ;;  %v8887_v42 = vadd.f32 %v13707_v51, %v2098_v4  ;;  %v8890_v44 = vadd.f32 %v13708_v36, %v2094_v41  ;;  %4931 = vmatpush3.bf16.msra.mxu0 %v8875_v10  ;;  %v1933_v4 = vpop.permute.xlu0 %1932  ;;  %v13712_v36 = vld [vmem:[#allocation181_spill] sm:$0xff] }
 0x291   : > { %v2403_v9 = vpack.c.bf16 %v2387_v19, %v2383_v47  ;;  %v2348_v43 = vmax.f32 %v2316_v33, 0.0  ;;  %v2266_v6 = vadd.f32 %v2234_v54, %v8592_v58  ;;  %v1949_v2 = vsel %vm938_vm12, %v8794_v53, %v1935_v12  ;;  %4932 = vmatprep.subr.bf16.mxu0 %v8900_v38  ;;  %v8942_v19 = vld [vmem:[#allocation7 + $0x28] sm:$0xff]  }
 0x292   : > { %v1973_v11 = vsel %vm938_vm12, %v1935_v12, %v8521_v52  ;;  %v2396_v60 = vpack.c.bf16 %v2372_v18, %v2368_v16  ;;  %v2215_v17 = vmul.f32 %v13710_v3, %v1949_v2  ;;  %v1948_v58 = vsel %vm938_vm12, %v8767_v39, %v1933_v4  ;;  %v13714_v2 = vld [vmem:[#allocation32_spill] sm:$0xff] }
 0x293   : > { %v1987_v61 = vsel %vm510_vm13, %v1973_v11, 0.0  ;;  %v1972_v53 = vsel %vm938_vm12, %v1933_v4, %v8538_v50  ;;  %4897 = vmatmul.mubr.bf16.gmra.mrb[4].mxu0 %v2403_v9  ;;  %v2270_v52 = vadd.f32 %v2238_v7, %v8565_v14  ;;  %v2344_v22 = vmax.f32 %v2312_v20, 0.0  ;;  %v1939_v50 = vpop.permute.xlu1 %1938  ;;  %v8971_v11 = vld [vmem:[#allocation7 + $0x30] sm:$0xff]   ;;  %v13715_v4 = vld [vmem:[#allocation40_spill] sm:$0xff] }
 0x294   : > { %v2216_v37 = vmul.f32 %v13711_v5, %v1987_v61  ;;  %v1983_v41 = vsel %vm510_vm13, %v1972_v53, 0.0  ;;  %4917 = vmatmul.mubr.bf16.vlgmr.msra.gmra.mrb[0].mxu1 %v2396_v60  ;;  %v8917_v13 = vadd.f32 %v2215_v17, %v8595_v23  ;;  %v2211_v47 = vmul.f32 %v13710_v3, %v1948_v58  ;;  %4933 = vmatpush3.bf16.msra.mxu0 %v8900_v38  ;;  %v1937_v34 = vpop.permute.xlu0 %1936 }
 0x295   : > { %4949 = vmatpush3.bf16.msra.mxu1 %v8809_v21  ;;  %v8923_v39 = vadd.f32 %v13703_v35, %v2266_v6  ;;  %v2212_v14 = vmul.f32 %v13711_v5, %v1983_v41  ;;  %v1951_v63 = vsel %vm938_vm12, %v8820_v29, %v1939_v50  ;;  %v1975_v23 = vsel %vm938_vm12, %v1939_v50, %v8577_v32 }
 0x296   : > { %4950 = vmatprep.subr.bf16.mxu1 %v8822_v31  ;;  %v2380_v21 = vmin.f32 %v2348_v43, 6.0  ;;  %v8934_v0 = vadd.f32 %v2216_v37, %v8672_v45  ;;  %v1995_v25 = vsel %vm510_vm13, %v1975_v23, 0.0  ;;  %v2223_v56 = vmul.f32 %v13710_v3, %v1951_v63  ;;  %4934 = vmatprep.subr.bf16.mxu0 %v8942_v19  ;;  %v13713_v43 = vld [vmem:[#allocation175_spill] sm:$0xff]  ;;  %v13717_v23 = vld [vmem:[#allocation165_spill] sm:$0xff] }
 0x297   : > { %v1950_v29 = vsel %vm938_vm12, %v8788_v57, %v1937_v34  ;;  %v2224_v32 = vmul.f32 %v13711_v5, %v1995_v25  ;;  %v1974_v45 = vsel %vm938_vm12, %v1937_v34, %v8587_v26  ;;  %v2376_v33 = vmin.f32 %v2344_v22, 6.0  ;;  %v1943_v57 = vpop.permute.xlu1 %1942  ;;  %v8992_v63 = vld [vmem:[#allocation7 + $0x38] sm:$0xff]  }
 0x298   : > { %v2219_v16 = vmul.f32 %v13710_v3, %v1950_v29  ;;  %v2255_v7 = vadd.f32 %v2223_v56, %v8616_v55  ;;  %v1991_v54 = vsel %vm510_vm13, %v1974_v45, 0.0  ;;  %4935 = vmatpush3.bf16.msra.mxu0 %v8942_v19  ;;  %v2324_v18 = vadd.f32 %v13703_v35, %v2270_v52  ;;  %v1941_v55 = vpop.permute.xlu0 %1940 }
 0x299   : > { %4951 = vmatpush3.bf16.msra.mxu1 %v8822_v31  ;;  %v2352_v20 = vmax.f32 %v8923_v39, 0.0  ;;  %v2256_v51 = vadd.f32 %v2224_v32, %v8701_v40  ;;  %v2220_v26 = vmul.f32 %v13711_v5, %v1991_v54  ;;  %v2400_v9 = vpack.c.bf16 %v2380_v21, %v2376_v33  ;;  %4936 = vmatprep.subr.bf16.mxu0 %v8971_v11  ;;  %v13719_v32 = vld [vmem:[#allocation63_spill] sm:$0xff] }
 0x29a   : > { %v2251_v12 = vadd.f32 %v2219_v16, %v13712_v36  ;;  %4952 = vmatprep.subr.bf16.mxu1 %v8853_v49  ;;  %v2309_v6 = vadd.f32 %v13713_v43, %v2255_v7  ;;  %v1953_v31 = vsel %vm938_vm12, %v8843_v1, %v1943_v57  ;;  %v1977_v35 = vsel %vm938_vm12, %v1943_v57, %v13714_v2 }
 0x29b   : > { %v1952_v40 = vsel %vm938_vm12, %v8851_v24, %v1941_v55  ;;  %v2310_v60 = vadd.f32 %v13715_v4, %v2256_v51  ;;  %v2252_v61 = vadd.f32 %v2220_v26, %v8764_v28  ;;  %4920 = vmatprep.mubr.bf16.mxu1 %v2400_v9  ;;  %v2003_v1 = vsel %vm510_vm13, %v1977_v35, 0.0  ;;  %v13716_v24 = vld [vmem:[#allocation185_spill] sm:$0xff]  ;;  %v1947_v39 = vpop.permute.xlu1 %1946  ;;  %v13720_v26 = vld [vmem:[#allocation50_spill] sm:$0xff] }
 0x29c   : > { %v2305_v17 = vadd.f32 %v13713_v43, %v2251_v12  ;;  %v2341_v58 = vmax.f32 %v2309_v6, 0.0  ;;  %v2231_v53 = vmul.f32 %v13710_v3, %v1953_v31  ;;  %v2232_v52 = vmul.f32 %v13711_v5, %v2003_v1  ;;  %4937 = vmatpush3.bf16.msra.mxu0 %v8971_v11  ;;  %v1945_v7 = vpop.permute.xlu0 %1944 }
 0x29d   : > { %v1976_v37 = vsel %vm938_vm12, %v1941_v55, %v13716_v24  ;;  %4953 = vmatpush3.bf16.msra.mxu1 %v8853_v49  ;;  %v2342_v28 = vmax.f32 %v2310_v60, 0.0  ;;  %v8987_v41 = vadd.f32 %v13715_v4, %v2252_v61  ;;  %4938 = vmatprep.subr.bf16.mxu0 %v8992_v63  ;;  %v2243_v34 = vadd.f32 %v2211_v47, %v13717_v23  ;;  %v13718_v49 = vld [vmem:[#allocation70_spill] sm:$0xff] }
 0x29e   : > { %v2337_v22 = vmax.f32 %v2305_v17, 0.0  ;;  %v1999_v50 = vsel %vm510_vm13, %v1976_v37, 0.0  ;;  %4954 = vmatprep.subr.bf16.mxu1 %v8875_v10  ;;  %v2244_v21 = vadd.f32 %v2212_v14, %v13718_v49  ;;  %v8997_v25 = vmin.f32 %v2341_v58, 6.0 }
 0x29f   : > { %v2227_v56 = vmul.f32 %v13710_v3, %v1952_v40  ;;  %v2263_v45 = vadd.f32 %v2231_v53, %v13719_v32  ;;  %v9004_v16 = vadd.f32 %v2232_v52, %v8834_v27  ;;  %v2228_v33 = vmul.f32 %v13711_v5, %v1999_v50 }
 0x2a0   : > { %v9000_v29 = vmin.f32 %v2337_v22, 6.0  ;;  %v9007_v54 = vmin.f32 %v2342_v28, 6.0  ;;  %v2356_v57 = vmax.f32 %v2324_v18, 0.0  ;;  %v2384_v47 = vmin.f32 %v2352_v20, 6.0  ;;  %4939 = vmatpush3.bf16.msra.mxu0 %v8992_v63 }
 0x2a1   : > { %v1955_v14 = vsel %vm938_vm12, %v8867_v46, %v1947_v39  ;;  %4955 = vmatpush3.bf16.msra.mxu1 %v8875_v10  ;;  %v2338_v51 = vmax.f32 %v8987_v41, 0.0  ;;  %v2259_v36 = vadd.f32 %v2227_v56, %v13720_v26  ;;  %v1979_v18 = vsel %vm938_vm12, %v1947_v39, %v8651_v62 }
 0x2a2   : > { %v2397_v27 = vpack.c.bf16 %v8997_v25, %v9000_v29  ;;  %4956 = vmatprep.subr.bf16.mxu1 %v8900_v38  ;;  %v2388_v20 = vmin.f32 %v2356_v57, 6.0  ;;  %v2011_v46 = vsel %vm510_vm13, %v1979_v18, 0.0  ;;  %v2239_v10 = vmul.f32 %v13710_v3, %v1955_v14 }
 0x2a3   : > { %v1954_v12 = vsel %vm938_vm12, %v8873_v8, %v1945_v7  ;;  %v2260_v9 = vadd.f32 %v2228_v33, %v8839_v15  ;;  %v1978_v55 = vsel %vm938_vm12, %v1945_v7, %v8656_v30  ;;  %v2297_v6 = vadd.f32 %v13713_v43, %v2243_v34  ;;  %v13721_v15 = vld [vmem:[#allocation47_spill] sm:$0xff]  ;;  %v13722_v30 = vld [vmem:[#allocation168_spill] sm:$0xff] }
 0x2a4   : > { %v2235_v62 = vmul.f32 %v13710_v3, %v1954_v12  ;;  %v2404_v31 = vpack.c.bf16 %v2388_v20, %v2384_v47  ;;  %v2240_v2 = vmul.f32 %v13711_v5, %v2011_v46  ;;  %v2007_v35 = vsel %vm510_vm13, %v1978_v55, 0.0 }
 0x2a5   : > { %v2301_v40 = vadd.f32 %v13713_v43, %v8917_v13  ;;  %4957 = vmatpush3.bf16.msra.mxu1 %v8900_v38  ;;  %v2271_v8 = vadd.f32 %v2239_v10, %v13721_v15  ;;  %v2236_v60 = vmul.f32 %v13711_v5, %v2007_v35  ;;  %v2329_v3 = vmax.f32 %v2297_v6, 0.0 }
 0x2a6   : > { %v2267_v61 = vadd.f32 %v2235_v62, %v13722_v30  ;;  %4958 = vmatprep.subr.bf16.mxu1 %v8942_v19  ;;  %4921 = vmatmul.mubr.bf16.gmra.mrb[4].mxu1 %v2404_v31  ;;  %v2298_v1 = vadd.f32 %v13715_v4, %v2244_v21  ;;  %v2302_v58 = vadd.f32 %v13715_v4, %v8934_v0  ;;  %v2370_v21 = vmin.f32 %v2338_v51, 6.0 }
 0x2a7   : > { %v2333_v17 = vmax.f32 %v2301_v40, 0.0  ;;  %v2313_v13 = vadd.f32 %v13713_v43, %v2259_v36  ;;  %v2268_v38 = vadd.f32 %v2236_v60, %v8890_v44  ;;  %v2361_v53 = vmin.f32 %v2329_v3, 6.0 }
 0x2a8   : > { %v2317_v52 = vadd.f32 %v13713_v43, %v2263_v45  ;;  %v2321_v5 = vadd.f32 %v13713_v43, %v2267_v61  ;;  %v2330_v37 = vmax.f32 %v2298_v1, 0.0  ;;  %v2334_v28 = vmax.f32 %v2302_v58, 0.0 }
 0x2a9   : > { %v2365_v24 = vmin.f32 %v2333_v17, 6.0  ;;  %v2345_v41 = vmax.f32 %v2313_v13, 0.0  ;;  %4959 = vmatpush3.bf16.msra.mxu1 %v8942_v19  ;;  %v2272_v22 = vadd.f32 %v2240_v2, %v8887_v42  ;;  %v2325_v0 = vadd.f32 %v13713_v43, %v2271_v8 }
 0x2aa   : > { %v2349_v50 = vmax.f32 %v2317_v52, 0.0  ;;  %4960 = vmatprep.subr.bf16.mxu1 %v8971_v11  ;;  %v2353_v39 = vmax.f32 %v2321_v5, 0.0  ;;  %v2362_v23 = vmin.f32 %v2330_v37, 6.0  ;;  %v2366_v34 = vmin.f32 %v2334_v28, 6.0 }
 0x2ab   : > { %v2393_v44 = vpack.c.bf16 %v2365_v24, %v2361_v53  ;;  %v2377_v49 = vmin.f32 %v2345_v41, 6.0  ;;  %v2357_v56 = vmax.f32 %v2325_v0, 0.0  ;;  %v2314_v29 = vadd.f32 %v13715_v4, %v2260_v9  ;;  %v13726_v0 = vld [vmem:[#allocation117_spill] sm:$0xff] }
 0x2ac   : > { %v2381_v25 = vmin.f32 %v2349_v50, 6.0  ;;  %v2394_v32 = vpack.c.bf16 %v2366_v34, %v2362_v23  ;;  %v2385_v19 = vmin.f32 %v2353_v39, 6.0  ;;  %v2318_v42 = vadd.f32 %v13715_v4, %v9004_v16 }
 0x2ad   : > { %4940 = vmatprep.mubr.bf16.mxu0 %v2393_v44  ;;  %4961 = vmatpush3.bf16.msra.mxu1 %v8971_v11  ;;  %v2322_v43 = vadd.f32 %v13715_v4, %v2268_v38  ;;  %v2389_v33 = vmin.f32 %v2357_v56, 6.0  ;;  %v2346_v7 = vmax.f32 %v2314_v29, 0.0  ;;  %v2326_v57 = vadd.f32 %v13715_v4, %v2272_v22  ;;  %v9067_v4 = vld [vmem:[%s12414_s4] sm:$0xf] }
 0x2ae   : > { %4941 = vmatmul.mubr.bf16.vlgmr.msra.gmra.mrb[8].mxu0 %v2397_v27  ;;  %v2401_v45 = vpack.c.bf16 %v2381_v25, %v2377_v49  ;;  %4962 = vmatprep.subr.bf16.mxu1 %v8992_v63  ;;  %v2350_v47 = vmax.f32 %v2318_v42, 0.0  ;;  %v2398_v16 = vpack.c.bf16 %v9007_v54, %v2370_v21  ;;  %v2740_v39 = vrot.slane %v9067_v4, %v13726_v0 }
 0x2af   : > { %4964 = vmatprep.mubr.bf16.mxu1 %v2394_v32  ;;  %v2378_v14 = vmin.f32 %v2346_v7, 6.0  ;;  %v2405_v51 = vpack.c.bf16 %v2389_v33, %v2385_v19  ;;  %v2354_v26 = vmax.f32 %v2322_v43, 0.0  ;;  %v2358_v36 = vmax.f32 %v2326_v57, 0.0 }
 0x2b0   : > { %4944 = vmatprep.mubr.bf16.mxu0 %v2401_v45  ;;  %v2382_v11 = vmin.f32 %v2350_v47, 6.0 }
 0x2b1   : > { %4963 = vmatpush3.bf16.msra.mxu1 %v8992_v63  ;;  %v2386_v18 = vmin.f32 %v2354_v26, 6.0  ;;  %v2390_v20 = vmin.f32 %v2358_v36, 6.0  ;;  %v13723_v63 = vld [vmem:[#allocation111_spill] sm:$0xff] }
 0x2b2   : > { %v2402_v27 = vpack.c.bf16 %v2382_v11, %v2378_v14  ;;  %v2736_v10 = vrot.slane %v9067_v4, %v13723_v63 }
 0x2b3   : > { %v2406_v46 = vpack.c.bf16 %v2390_v20, %v2386_v18 }
 0x2b4   : > { %4965 = vmatmul.mubr.bf16.vlgmr.msra.gmra.mrb[8].mxu1 %v2398_v16 }
 0x2b5   : > { %4968 = vmatprep.mubr.bf16.mxu1 %v2402_v27 }
 0x2b6   : > { %4945 = vmatmul.mubr.bf16.gmra.mrb[12].mxu0 %v2405_v51 }
 0x2bc   : > { %4969 = vmatmul.mubr.bf16.gmra.mrb[12].mxu1 %v2406_v46 }
 0x356   : > { %v4894_v12 = vpop.f32.mrb[0].mxu0 }
 0x357   : > { %v2761_v54 = vadd.f32 %v4894_v12, %v2736_v10  ;;  %v2505_v9 = vpop.f32.mrb[1].mxu0 }
 0x358   : > { %v2753_v55 = vadd.f32 %v2736_v10, %v2505_v9  ;;  %v4895_v62 = vpop.f32.mrb[2].mxu0 }
 0x359   : > { %v2793_v6 = vmax.f32 %v2761_v54, 0.0  ;;  %v2765_v31 = vadd.f32 %v4895_v62, %v2736_v10  ;;  %v2508_v2 = vpop.f32.mrb[3].mxu0 }
 0x35a   : > { %v2785_v35 = vmax.f32 %v2753_v55, 0.0  ;;  %v2757_v40 = vadd.f32 %v2736_v10, %v2508_v2 }
 0x35b   : > { %v2797_v15 = vmax.f32 %v2765_v31, 0.0  ;;  %v9071_v8 = vmin.f32 %v2793_v6, 6.0 }
 0x35c   : > { %v9073_v60 = vmin.f32 %v2785_v35, 6.0  ;;  %v2789_v30 = vmax.f32 %v2757_v40, 0.0 }
 0x35d   : > { %v9075_v61 = vmin.f32 %v2797_v15, 6.0  ;;  %v2857_v58 = vrot.slane %v9071_v8, 7 }
 0x35e   : > { %v9077_v3 = vmin.f32 %v2789_v30, 6.0  ;;  %v2849_v17 = vrot.slane %v9073_v60, 7 }
 0x35f   : > { %v2861_v52 = vrot.slane %v9075_v61, 7 }
 0x360   : > { %v2853_v1 = vrot.slane %v9077_v3, 7 }
 0x361   : > { %v9099_v41 = vsel %vm543_vm0, %v2857_v58, %v2861_v52 }
 0x362   : > { %v9084_v38 = vsel %vm543_vm0, %v2849_v17, %v2853_v1  ;;  %v2901_v53 = vsel %vm543_vm0, %v2853_v1, %v2857_v58 }
 0x363   : > { %3043 = vrot.lane.b32.xlu1 %v9084_v38, %s5333_s30  ;;  %v9093_v24 = vsel %vm5682_vm3, %v2901_v53, 0.0 }
 0x364   : > { %3045 = vrot.lane.b32.xlu0 %v9093_v24, %s5333_s30 }
 0x366   : > { %v4898_v37 = vpop.f32.mrb[4].mxu0 }
 0x367   : > { %v4918_v28 = vpop.f32.mrb[0].mxu1  ;;  %v2521_v22 = vpop.f32.mrb[5].mxu0  ;;  %v2777_v50 = vadd.f32 %v4898_v37, %v2736_v10  ;;  %3047 = vrot.lane.b32.xlu1 %v9099_v41, %s5333_s30 }
 0x368   : > { %v2570_v44 = vpop.f32.mrb[1].mxu1  ;;  %v2769_v23 = vadd.f32 %v2736_v10, %v2521_v22  ;;  %v4899_v34 = vpop.f32.mrb[6].mxu0  ;;  %v2762_v36 = vadd.f32 %v4918_v28, %v2740_v39 }
 0x369   : > { %v2781_v49 = vadd.f32 %v4899_v34, %v2736_v10  ;;  %v4919_v21 = vpop.f32.mrb[2].mxu1  ;;  %v2524_v25 = vpop.f32.mrb[7].mxu0  ;;  %v2809_v43 = vmax.f32 %v2777_v50, 0.0  ;;  %v2754_v45 = vadd.f32 %v2740_v39, %v2570_v44 }
 0x36a   : > { %v2801_v56 = vmax.f32 %v2769_v23, 0.0  ;;  %v2773_v29 = vadd.f32 %v2736_v10, %v2524_v25  ;;  %v2573_v32 = vpop.f32.mrb[3].mxu1  ;;  %v2766_v47 = vadd.f32 %v4919_v21, %v2740_v39  ;;  %v2794_v62 = vmax.f32 %v2762_v36, 0.0 }
 0x36b   : > { %v2813_v19 = vmax.f32 %v2781_v49, 0.0  ;;  %v2758_v42 = vadd.f32 %v2740_v39, %v2573_v32  ;;  %v9113_v26 = vmin.f32 %v2809_v43, 6.0  ;;  %v2786_v27 = vmax.f32 %v2754_v45, 0.0 }
 0x36c   : > { %v9105_v33 = vmin.f32 %v2801_v56, 6.0  ;;  %v2805_v7 = vmax.f32 %v2773_v29, 0.0  ;;  %v2798_v46 = vmax.f32 %v2766_v47, 0.0  ;;  %v9154_v1 = vmin.f32 %v2794_v62, 6.0 }
 0x36d   : > { %v9107_v57 = vmin.f32 %v2813_v19, 6.0  ;;  %v2790_v11 = vmax.f32 %v2758_v42, 0.0  ;;  %13727 = vst [vmem:[#allocation83_spill] sm:$0xff] %v9113_v26  ;;  %v9134_v6 = vmin.f32 %v2786_v27, 6.0  ;;  %v2873_v31 = vrot.slane %v9113_v26, 7  ;;  %v13733_v42 = vld [vmem:[#allocation119_spill] sm:$0xff] }
 0x36e   : > { %v9109_v14 = vmin.f32 %v2805_v7, 6.0  ;;  %v2865_v16 = vrot.slane %v9105_v33, 7  ;;  %v9137_v2 = vmin.f32 %v2798_v46, 6.0  ;;  %13731 = vst [vmem:[#allocation76_spill] sm:$0xff] %v9154_v1  ;;  %v2858_v49 = vrot.slane %v9154_v1, 7 }
 0x36f   : > { %v2877_v51 = vrot.slane %v9107_v57, 7  ;;  %v9118_v10 = vmin.f32 %v2790_v11, 6.0  ;;  %v2850_v58 = vrot.slane %v9134_v6, 7  ;;  %v2744_v43 = vrot.slane %v9067_v4, %v13733_v42 }
 0x370   : > { %v2869_v18 = vrot.slane %v9109_v14, 7  ;;  %v2893_v55 = vsel %vm543_vm0, %v2861_v52, %v2865_v16  ;;  %13729 = vst [vmem:[#allocation84_spill] sm:$0xff] %v9137_v2  ;;  %v2862_v22 = vrot.slane %v9137_v2, 7 }
 0x371   : > { %v2909_v20 = vsel %vm543_vm0, %v2877_v51, %v2849_v17  ;;  %v9141_v40 = vsel %vm5662_vm2, %v2893_v55, 0.0  ;;  %v9145_v15 = vsel %vm543_vm0, %v2873_v31, %v2877_v51  ;;  %v2854_v30 = vrot.slane %v9118_v10, 7 }
 0x372   : > { %v9122_v54 = vsel %vm5621_vm1, %v2909_v20, 0.0  ;;  %v9126_v9 = vsel %vm543_vm0, %v2865_v16, %v2869_v18  ;;  %v2885_v17 = vsel %vm543_vm0, %v2869_v18, %v2873_v31  ;;  %v9173_v32 = vsel %vm543_vm0, %v2858_v49, %v2862_v22 }
 0x373   : > { %3041 = vrot.lane.b32.xlu0 %v9122_v54, %s5333_s30  ;;  %3051 = vrot.lane.b32.xlu1 %v9126_v9, %s5333_s30  ;;  %v9159_v52 = vsel %vm543_vm0, %v2850_v58, %v2854_v30  ;;  %v9163_v28 = vsel %vm5697_vm4, %v2885_v17, 0.0 }
 0x377   : > { %3049 = vrot.lane.b32.xlu0 %v9141_v40, %s5333_s30  ;;  %3055 = vrot.lane.b32.xlu1 %v9145_v15, %s5333_s30 }
 0x379   : > { %v4922_v53 = vpop.f32.mrb[4].mxu1 }
 0x37a   : > { %v2586_v50 = vpop.f32.mrb[5].mxu1  ;;  %v2778_v44 = vadd.f32 %v4922_v53, %v2740_v39 }
 0x37b   : > { %3059 = vrot.lane.b32.xlu1 %v9159_v52, %s5333_s30  ;;  %3053 = vrot.lane.b32.xlu0 %v9163_v28, %s5333_s30  ;;  %v2770_v23 = vadd.f32 %v2740_v39, %v2586_v50  ;;  %v4923_v34 = vpop.f32.mrb[6].mxu1 }
 0x37c   : > { %v2782_v21 = vadd.f32 %v4923_v34, %v2740_v39  ;;  %v2589_v25 = vpop.f32.mrb[7].mxu1  ;;  %v2810_v45 = vmax.f32 %v2778_v44, 0.0 }
 0x37d   : > { %v2802_v56 = vmax.f32 %v2770_v23, 0.0  ;;  %v2774_v29 = vadd.f32 %v2740_v39, %v2589_v25  ;;  %v2902_v25 = vsel %vm543_vm0, %v2854_v30, %v2858_v49 }
 0x37e   : > { %v2814_v19 = vmax.f32 %v2782_v21, 0.0  ;;  %v9186_v20 = vmin.f32 %v2810_v45, 6.0 }
 0x37f   : > { %3063 = vrot.lane.b32.xlu1 %v9173_v32, %s5333_s30  ;;  %v9179_v7 = vmin.f32 %v2802_v56, 6.0  ;;  %v2806_v47 = vmax.f32 %v2774_v29, 0.0 }
 0x380   : > { %v9181_v11 = vmin.f32 %v2814_v19, 6.0  ;;  %13735 = vst [vmem:[#allocation77_spill] sm:$0xff] %v9186_v20  ;;  %v2874_v29 = vrot.slane %v9186_v20, 7 }
 0x381   : > { %v4942_v51 = vpop.f32.mrb[8].mxu0  ;;  %v9183_v16 = vmin.f32 %v2806_v47, 6.0  ;;  %v2866_v55 = vrot.slane %v9179_v7, 7 }
 0x382   : > { %v2635_v39 = vpop.f32.mrb[9].mxu0  ;;  %v2878_v18 = vrot.slane %v9181_v11, 7  ;;  %v2763_v31 = vadd.f32 %v4942_v51, %v2744_v43 }
 0x383   : > { %13734 = vst [vmem:[#allocation85_spill] sm:$0xff] %v9183_v16  ;;  %v2755_v36 = vadd.f32 %v2744_v43, %v2635_v39  ;;  %v4943_v27 = vpop.f32.mrb[10].mxu0  ;;  %v2870_v62 = vrot.slane %v9183_v16, 7 }
 0x384   : > { %v2638_v46 = vpop.f32.mrb[11].mxu0  ;;  %v2767_v17 = vadd.f32 %v4943_v27, %v2744_v43  ;;  %v2910_v50 = vsel %vm543_vm0, %v2878_v18, %v2850_v58  ;;  %v2795_v19 = vmax.f32 %v2763_v31, 0.0  ;;  %v9213_v27 = vsel %vm543_vm0, %v2874_v29, %v2878_v18 }
 0x385   : > { %v2759_v53 = vadd.f32 %v2744_v43, %v2638_v46  ;;  %v9194_v44 = vsel %vm5621_vm1, %v2910_v50, 0.0  ;;  %v9198_v23 = vsel %vm543_vm0, %v2866_v55, %v2870_v62  ;;  %v2787_v34 = vmax.f32 %v2755_v36, 0.0  ;;  %13738 = vst [vmem:[#allocation184_spill] sm:$0xff] %v9213_v27 }
 0x386   : > { %13736 = vst [vmem:[#allocation86_spill] sm:$0xff] %v9194_v44  ;;  %13737 = vst [vmem:[#allocation148_spill] sm:$0xff] %v9198_v23  ;;  %3057 = vrot.lane.b32.xlu0 %v9194_v44, %s5333_s30  ;;  %3067 = vrot.lane.b32.xlu1 %v9198_v23, %s5333_s30  ;;  %v2799_v45 = vmax.f32 %v2767_v17, 0.0  ;;  %v9209_v36 = vsel %vm5682_vm3, %v2902_v25, 0.0  ;;  %v2894_v31 = vsel %vm543_vm0, %v2862_v22, %v2866_v55  ;;  %v9225_v18 = vmin.f32 %v2795_v19, 6.0 }
 0x387   : > { %v2791_v21 = vmax.f32 %v2759_v53, 0.0  ;;  %v4966_v58 = vpop.f32.mrb[8].mxu1  ;;  %v9215_v53 = vmin.f32 %v2787_v34, 6.0  ;;  %v9233_v0 = vsel %vm5662_vm2, %v2894_v31, 0.0  ;;  %v2886_v63 = vsel %vm543_vm0, %v2870_v62, %v2874_v29 }
 0x388   : > { %v2700_v56 = vpop.f32.mrb[9].mxu1  ;;  %13741 = vst [vmem:[#allocation30_spill] sm:$0xff] %v9225_v18  ;;  %v9227_v59 = vmin.f32 %v2799_v45, 6.0  ;;  %13744 = vst [vmem:[#allocation31_spill] sm:$0xff] %v9233_v0 }
 0x389   : > { %v4946_v47 = vpop.f32.mrb[12].mxu0  ;;  %v4967_v51 = vpop.f32.mrb[10].mxu1  ;;  %13739 = vst [vmem:[#allocation69_spill] sm:$0xff] %v9215_v53  ;;  %v9217_v30 = vmin.f32 %v2791_v21, 6.0  ;;  %v13743_v21 = vld [vmem:[#allocation126_spill] sm:$0xff]  ;;  %v2851_v19 = vrot.slane %v9215_v53, 7 }
 0x38a   : > { %v2651_v39 = vpop.f32.mrb[13].mxu0  ;;  %v2703_v46 = vpop.f32.mrb[11].mxu1  ;;  %3061 = vrot.lane.b32.xlu0 %v9209_v36, %s5333_s30  ;;  %3071 = vrot.lane.b32.xlu1 %v9213_v27, %s5333_s30  ;;  %13742 = vst [vmem:[#allocation180_spill] sm:$0xff] %v9227_v59  ;;  %v2779_v48 = vadd.f32 %v4946_v47, %v2744_v43  ;;  %v2863_v29 = vrot.slane %v9227_v59, 7 }
 0x38b   : > { %13740 = vst [vmem:[#allocation173_spill] sm:$0xff] %v9217_v30  ;;  %v2771_v49 = vadd.f32 %v2744_v43, %v2651_v39  ;;  %v4947_v50 = vpop.f32.mrb[14].mxu0  ;;  %v2748_v39 = vrot.slane %v9067_v4, %v13743_v21  ;;  %v2855_v45 = vrot.slane %v9217_v30, 7  ;;  %v2859_v21 = vrot.slane %v9225_v18, 7 }
 0x38c   : > { %v2783_v17 = vadd.f32 %v4947_v50, %v2744_v43  ;;  %v2654_v25 = vpop.f32.mrb[15].mxu0 }
 0x38d   : > { %v2775_v34 = vadd.f32 %v2744_v43, %v2654_v25  ;;  %v2803_v22 = vmax.f32 %v2771_v49, 0.0  ;;  %v2760_v31 = vadd.f32 %v2748_v39, %v2703_v46  ;;  %v2811_v49 = vmax.f32 %v2779_v48, 0.0 }
 0x38e   : > { %v2815_v42 = vmax.f32 %v2783_v17, 0.0  ;;  %3065 = vrot.lane.b32.xlu0 %v9233_v0, %s5333_s30  ;;  %v9247_v17 = vsel %vm543_vm0, %v2851_v19, %v2855_v45  ;;  %v2756_v25 = vadd.f32 %v2748_v39, %v2700_v56  ;;  %v2768_v48 = vadd.f32 %v4967_v51, %v2748_v39 }
 0x38f   : > { %v2807_v55 = vmax.f32 %v2775_v34, 0.0  ;;  %v4970_v50 = vpop.f32.mrb[12].mxu1  ;;  %13747 = vst [vmem:[#allocation162_spill] sm:$0xff] %v9247_v17  ;;  %v9252_v34 = vsel %vm5697_vm4, %v2886_v63, 0.0  ;;  %3075 = vrot.lane.b32.xlu1 %v9247_v17, %s5333_s30  ;;  %v2792_v56 = vmax.f32 %v2760_v31, 0.0  ;;  %v9264_v63 = vsel %vm543_vm0, %v2859_v21, %v2863_v29 }
 0x390   : > { %v9241_v4 = vmin.f32 %v2815_v42, 6.0  ;;  %v2716_v43 = vpop.f32.mrb[13].mxu1  ;;  %13748 = vst [vmem:[#allocation160_spill] sm:$0xff] %v9252_v34  ;;  %13750 = vst [vmem:[#allocation52_spill] sm:$0xff] %v9264_v63  ;;  %v2764_v20 = vadd.f32 %v4966_v58, %v2748_v39  ;;  %v2788_v30 = vmax.f32 %v2756_v25, 0.0  ;;  %v9275_v51 = vmin.f32 %v2811_v49, 6.0 }
 0x391   : > { %v9243_v47 = vmin.f32 %v2807_v55, 6.0  ;;  %v4971_v62 = vpop.f32.mrb[14].mxu1  ;;  %v9256_v55 = vmin.f32 %v2803_v22, 6.0  ;;  %v2800_v58 = vmax.f32 %v2768_v48, 0.0  ;;  %v9282_v25 = vmin.f32 %v2792_v56, 6.0 }
 0x392   : > { %13745 = vst [vmem:[#allocation64_spill] sm:$0xff] %v9241_v4  ;;  %v2719_v42 = vpop.f32.mrb[15].mxu1  ;;  %3069 = vrot.lane.b32.xlu0 %v9252_v34, %s5333_s30  ;;  %v2784_v46 = vadd.f32 %v4971_v62, %v2748_v39  ;;  %v2879_v53 = vrot.slane %v9241_v4, 7  ;;  %13752 = vst [vmem:[#allocation48_spill] sm:$0xff] %v9275_v51  ;;  %v9288_v49 = vmin.f32 %v2788_v30, 6.0 }
 0x393   : > { %13746 = vst [vmem:[#allocation34_spill] sm:$0xff] %v9243_v47  ;;  %13749 = vst [vmem:[#allocation87_spill] sm:$0xff] %v9256_v55  ;;  %v2871_v22 = vrot.slane %v9243_v47, 7  ;;  %3079 = vrot.lane.b32.xlu1 %v9264_v63, %s5333_s30  ;;  %v2867_v4 = vrot.slane %v9256_v55, 7  ;;  %v2776_v18 = vadd.f32 %v2748_v39, %v2719_v42  ;;  %v9303_v30 = vmin.f32 %v2800_v58, 6.0 }
 0x394   : > { %v2911_v59 = vsel %vm543_vm0, %v2879_v53, %v2851_v19  ;;  %v2816_v31 = vmax.f32 %v2784_v46, 0.0  ;;  %v2903_v19 = vsel %vm543_vm0, %v2855_v45, %v2859_v21  ;;  %13753 = vst [vmem:[#allocation124_spill] sm:$0xff] %v9282_v25  ;;  %13755 = vst [vmem:[#allocation37_spill] sm:$0xff] %v9288_v49  ;;  %v2772_v21 = vadd.f32 %v2748_v39, %v2716_v43 }
 0x395   : > { %v9273_v62 = vsel %vm5621_vm1, %v2911_v59, 0.0  ;;  %v9286_v47 = vsel %vm543_vm0, %v2867_v4, %v2871_v22  ;;  %v2796_v59 = vmax.f32 %v2764_v20, 0.0  ;;  %v9292_v46 = vsel %vm5682_vm3, %v2903_v19, 0.0  ;;  %13758 = vst [vmem:[#allocation114_spill] sm:$0xff] %v9303_v30 }
 0x396   : > { %13751 = vst [vmem:[#allocation99_spill] sm:$0xff] %v9273_v62  ;;  %3073 = vrot.lane.b32.xlu0 %v9273_v62, %s5333_s30  ;;  %13754 = vst [vmem:[#allocation79_spill] sm:$0xff] %v9286_v47  ;;  %v9296_v45 = vmin.f32 %v2816_v31, 6.0  ;;  %v2895_v42 = vsel %vm543_vm0, %v2863_v29, %v2867_v4  ;;  %v2875_v20 = vrot.slane %v9275_v51, 7  ;;  %v2808_v48 = vmax.f32 %v2776_v18, 0.0 }
 0x397   : > { %13756 = vst [vmem:[#allocation80_spill] sm:$0xff] %v9292_v46  ;;  %3083 = vrot.lane.b32.xlu1 %v9286_v47, %s5333_s30  ;;  %v2856_v19 = vrot.slane %v9282_v25, 7  ;;  %v9310_v43 = vmin.f32 %v2796_v59, 6.0  ;;  %v2780_v31 = vadd.f32 %v4970_v50, %v2748_v39  ;;  %v9314_v55 = vsel %vm5662_vm2, %v2895_v42, 0.0 }
 0x398   : > { %13757 = vst [vmem:[#allocation194_spill] sm:$0xff] %v9296_v45  ;;  %v9307_v56 = vsel %vm543_vm0, %v2875_v20, %v2879_v53  ;;  %13761 = vst [vmem:[#allocation22_spill] sm:$0xff] %v9314_v55  ;;  %v2804_v4 = vmax.f32 %v2772_v21, 0.0  ;;  %v2852_v18 = vrot.slane %v9288_v49, 7  ;;  %v2887_v53 = vsel %vm543_vm0, %v2871_v22, %v2875_v20 }
 0x399   : > { %13759 = vst [vmem:[#allocation202_spill] sm:$0xff] %v9307_v56  ;;  %13760 = vst [vmem:[#allocation203_spill] sm:$0xff] %v9310_v43  ;;  %v2880_v29 = vrot.slane %v9296_v45, 7  ;;  %v9324_v58 = vmin.f32 %v2808_v48, 6.0  ;;  %v2864_v50 = vrot.slane %v9303_v30, 7  ;;  %v9335_v59 = vsel %vm5697_vm4, %v2887_v53, 0.0 }
 0x39a   : > { %3077 = vrot.lane.b32.xlu0 %v9292_v46, %s5333_s30  ;;  %v9328_v39 = vsel %vm543_vm0, %v2852_v18, %v2856_v19  ;;  %13764 = vst [vmem:[#allocation91_spill] sm:$0xff] %v9335_v59  ;;  %v2812_v21 = vmax.f32 %v2780_v31, 0.0  ;;  %v9337_v42 = vmin.f32 %v2804_v4, 6.0  ;;  %v2860_v22 = vrot.slane %v9310_v43, 7 }
 0x39b   : > { %3087 = vrot.lane.b32.xlu1 %v9307_v56, %s5333_s30  ;;  %13762 = vst [vmem:[#allocation128_spill] sm:$0xff] %v9324_v58  ;;  %13763 = vst [vmem:[#allocation131_spill] sm:$0xff] %v9328_v39  ;;  %v2912_v20 = vsel %vm543_vm0, %v2880_v29, %v2852_v18  ;;  %v2872_v45 = vrot.slane %v9324_v58, 7 }
 0x39c   : > { %13765 = vst [vmem:[#allocation195_spill] sm:$0xff] %v9337_v42  ;;  %v9346_v48 = vsel %vm543_vm0, %v2860_v22, %v2864_v50  ;;  %v9353_v31 = vsel %vm5621_vm1, %v2912_v20, 0.0  ;;  %v9355_v4 = vmin.f32 %v2812_v21, 6.0  ;;  %v2868_v18 = vrot.slane %v9337_v42, 7 }
 0x39d   : > { %13766 = vst [vmem:[#allocation100_spill] sm:$0xff] %v9346_v48  ;;  %13767 = vst [vmem:[#allocation35_spill] sm:$0xff] %v9353_v31  ;;  %v2904_v53 = vsel %vm543_vm0, %v2856_v19, %v2860_v22 }
 0x39e   : > { %3081 = vrot.lane.b32.xlu0 %v9314_v55, %s5333_s30  ;;  %13768 = vst [vmem:[#allocation41_spill] sm:$0xff] %v9355_v4  ;;  %v9364_v43 = vsel %vm543_vm0, %v2868_v18, %v2872_v45  ;;  %v9370_v12 = vsel %vm5682_vm3, %v2904_v53, 0.0  ;;  %v2876_v21 = vrot.slane %v9355_v4, 7  ;;  %v2896_v20 = vsel %vm543_vm0, %v2864_v50, %v2868_v18 }
 0x39f   : > { %3091 = vrot.lane.b32.xlu1 %v9328_v39, %s5333_s30  ;;  %13769 = vst [vmem:[#allocation113_spill] sm:$0xff] %v9364_v43  ;;  %13770 = vst [vmem:[#allocation144_spill] sm:$0xff] %v9370_v12  ;;  %v9385_v5 = vsel %vm5662_vm2, %v2896_v20, 0.0 }
 0x3a0   : > { %v9379_v19 = vsel %vm543_vm0, %v2876_v21, %v2880_v29  ;;  %13772 = vst [vmem:[#allocation93_spill] sm:$0xff] %v9385_v5  ;;  %v2888_v22 = vsel %vm543_vm0, %v2872_v45, %v2876_v21 }
 0x3a1   : > { %13771 = vst [vmem:[#allocation198_spill] sm:$0xff] %v9379_v19  ;;  %v9395_v29 = vsel %vm5697_vm4, %v2888_v22, 0.0 }
 0x3a2   : > { %3085 = vrot.lane.b32.xlu0 %v9335_v59, %s5333_s30  ;;  %13773 = vst [vmem:[#allocation120_spill] sm:$0xff] %v9395_v29 }
 0x3a3   : > { %3095 = vrot.lane.b32.xlu1 %v9346_v48, %s5333_s30 }
 0x3a6   : > { %3089 = vrot.lane.b32.xlu0 %v9353_v31, %s5333_s30 }
 0x3a7   : > { %3099 = vrot.lane.b32.xlu1 %v9364_v43, %s5333_s30 }
 0x3aa   : > { %3093 = vrot.lane.b32.xlu0 %v9370_v12, %s5333_s30 }
 0x3ab   : > { %3103 = vrot.lane.b32.xlu1 %v9379_v19, %s5333_s30 }
 0x3ae   : > { %3097 = vrot.lane.b32.xlu0 %v9385_v5, %s5333_s30 }
 0x3af   : > { %3171 = vrot.lane.b32.xlu1 %v9084_v38, %s5334_s9 }
 0x3b2   : > { %3101 = vrot.lane.b32.xlu0 %v9395_v29, %s5333_s30 }
 0x3b3   : > { %3175 = vrot.lane.b32.xlu1 %v9099_v41, %s5334_s9 }
 0x3b6   : > { %3169 = vrot.lane.b32.xlu0 %v9122_v54, %s5334_s9 }
 0x3b7   : > { %3179 = vrot.lane.b32.xlu1 %v9126_v9, %s5334_s9 }
 0x3ba   : > { %3173 = vrot.lane.b32.xlu0 %v9093_v24, %s5334_s9 }
 0x3bb   : > { %3183 = vrot.lane.b32.xlu1 %v9145_v15, %s5334_s9 }
 0x3be   : > { %3177 = vrot.lane.b32.xlu0 %v9141_v40, %s5334_s9 }
 0x3bf   : > { %3187 = vrot.lane.b32.xlu1 %v9159_v52, %s5334_s9 }
 0x3c2   : > { %3181 = vrot.lane.b32.xlu0 %v9163_v28, %s5334_s9 }
 0x3c3   : > { %3191 = vrot.lane.b32.xlu1 %v9173_v32, %s5334_s9 }
 0x3c6   : > { %3185 = vrot.lane.b32.xlu0 %v9194_v44, %s5334_s9  ;;  %v13880_v44 = vld [vmem:[#allocation126_spill] sm:$0xff] }
 0x3c7   : > { %3195 = vrot.lane.b32.xlu1 %v9198_v23, %s5334_s9  ;;  %v13877_v23 = vrot.slane %v9179_v7, 1 }
 0x3ca   : > { %3189 = vrot.lane.b32.xlu0 %v9209_v36, %s5334_s9 }
 0x3cb   : > { %3199 = vrot.lane.b32.xlu1 %v9213_v27, %s5334_s9 }
 0x3ce   : > { %3193 = vrot.lane.b32.xlu0 %v9233_v0, %s5334_s9  ;;  %v13875_v0 = vld [vmem:[#allocation117_spill] sm:$0xff] }
 0x3cf   : > { %3203 = vrot.lane.b32.xlu1 %v9247_v17, %s5334_s9 }
 0x3d2   : > { %3197 = vrot.lane.b32.xlu0 %v9252_v34, %s5334_s9 }
 0x3d3   : > { %3207 = vrot.lane.b32.xlu1 %v9264_v63, %s5334_s9  ;;  %v13872_v63 = vld [vmem:[#allocation111_spill] sm:$0xff] }
 0x3d5   : > { %v9439_v35 = vpop.permute.xlu1 %3043 }
 0x3d6   : > { %3201 = vrot.lane.b32.xlu0 %v9273_v62, %s5334_s9  ;;  %13774 = vst [vmem:[#allocation125_spill] sm:$0xff] %v9439_v35  ;;  %v9449_v45 = vpop.permute.xlu0 %3045  ;;  %v13802_v35 = vld [vmem:[#allocation69_spill] sm:$0xff] }
 0x3d7   : > { %3211 = vrot.lane.b32.xlu1 %v9286_v47, %s5334_s9  ;;  %13776 = vst [vmem:[#allocation129_spill] sm:$0xff] %v9449_v45  ;;  %v2950_v47 = vrot.slane %v9118_v10, 1 }
 0x3d9   : > { %v9445_v37 = vpop.permute.xlu1 %3047 }
 0x3da   : > { %3205 = vrot.lane.b32.xlu0 %v9292_v46, %s5334_s9  ;;  %13775 = vst [vmem:[#allocation187_spill] sm:$0xff] %v9445_v37  ;;  %v13798_v37 = vld [vmem:[#allocation77_spill] sm:$0xff] }
 0x3db   : > { %3215 = vrot.lane.b32.xlu1 %v9307_v56, %s5334_s9  ;;  %v4386_v46 = vld [vmem:[#allocation8 + $0x7] ss:$8 sm:$0xf] }
 0x3dc   : > { %v9811_v34 = vrot.slane %v4386_v46, %v13872_v63 }
 0x3de   : > { %3209 = vrot.lane.b32.xlu0 %v9314_v55, %s5334_s9 }
 0x3df   : > { %3219 = vrot.lane.b32.xlu1 %v9328_v39, %s5334_s9 }
 0x3e2   : > { %3213 = vrot.lane.b32.xlu0 %v9335_v59, %s5334_s9 }
 0x3e3   : > { %3223 = vrot.lane.b32.xlu1 %v9346_v48, %s5334_s9 }
 0x3e5   : > { %v9453_v50 = vpop.permute.xlu1 %3051  ;;  %v9459_v18 = vpop.permute.xlu0 %3041 }
 0x3e6   : > { %13777 = vst [vmem:[#allocation196_spill] sm:$0xff] %v9453_v50  ;;  %3217 = vrot.lane.b32.xlu0 %v9353_v31, %s5334_s9  ;;  %13778 = vst [vmem:[#allocation43_spill] sm:$0xff] %v9459_v18 }
 0x3e7   : > { %3227 = vrot.lane.b32.xlu1 %v9364_v43, %s5334_s9 }
 0x3e9   : > { %v9461_v53 = vpop.permute.xlu1 %3055  ;;  %v9467_v21 = vpop.permute.xlu0 %3049 }
 0x3ea   : > { %13779 = vst [vmem:[#allocation130_spill] sm:$0xff] %v9461_v53  ;;  %3221 = vrot.lane.b32.xlu0 %v9370_v12, %s5334_s9  ;;  %13780 = vst [vmem:[#allocation199_spill] sm:$0xff] %v9467_v21 }
 0x3eb   : > { %3231 = vrot.lane.b32.xlu1 %v9379_v19, %s5334_s9 }
 0x3ed   : > { %v9469_v20 = vpop.permute.xlu1 %3059  ;;  %v9479_v22 = vpop.permute.xlu0 %3053 }
 0x3ee   : > { %13781 = vst [vmem:[#allocation200_spill] sm:$0xff] %v9469_v20  ;;  %3225 = vrot.lane.b32.xlu0 %v9385_v5, %s5334_s9  ;;  %13782 = vst [vmem:[#allocation81_spill] sm:$0xff] %v9479_v22  ;;  %v13810_v5 = vld [vmem:[#allocation87_spill] sm:$0xff] }
 0x3ef   : > { %3527 = vrot.lane.b32.xlu1 %v9077_v3, %s5333_s30 }
 0x3f1   : > { %v9481_v53 = vpop.permute.xlu1 %3063 }
 0x3f2   : > { %3229 = vrot.lane.b32.xlu0 %v9395_v29, %s5334_s9  ;;  %13783 = vst [vmem:[#allocation197_spill] sm:$0xff] %v9481_v53  ;;  %v13806_v29 = vld [vmem:[#allocation30_spill] sm:$0xff] }
 0x3f3   : > { %3531 = vrot.lane.b32.xlu1 %v9075_v61, %s5333_s30 }
 0x3f6   : > { %3525 = vrot.lane.b32.xlu0 %v9073_v60, %s5333_s30 }
 0x3f7   : > { %3535 = vrot.lane.b32.xlu1 %v9109_v14, %s5333_s30 }
 0x3f8   : > { %v9487_v21 = vpop.permute.xlu0 %3057  ;;  %v9489_v45 = vpop.permute.xlu1 %3067 }
 0x3f9   : > { %13784 = vst [vmem:[#allocation201_spill] sm:$0xff] %v9487_v21  ;;  %13785 = vst [vmem:[#allocation46_spill] sm:$0xff] %v9489_v45 }
 0x3fa   : > { %3529 = vrot.lane.b32.xlu0 %v9071_v8, %s5333_s30 }
 0x3fb   : > { %3539 = vrot.lane.b32.xlu1 %v9107_v57, %s5333_s30 }
 0x3fc   : > { %v9495_v50 = vpop.permute.xlu0 %3061  ;;  %v9499_v22 = vpop.permute.xlu1 %3071 }
 0x3fd   : > { %13786 = vst [vmem:[#allocation82_spill] sm:$0xff] %v9495_v50  ;;  %13787 = vst [vmem:[#allocation75_spill] sm:$0xff] %v9499_v22 }
 0x3fe   : > { %3533 = vrot.lane.b32.xlu0 %v9105_v33, %s5333_s30 }
 0x3ff   : > { %3543 = vrot.lane.b32.xlu1 %v9118_v10, %s5333_s30 }
 0x400   : > { %v9503_v18 = vpop.permute.xlu0 %3065 }
 0x401   : > { %13788 = vst [vmem:[#allocation49_spill] sm:$0xff] %v9503_v18  ;;  %v9509_v45 = vpop.permute.xlu1 %3075 }
 0x402   : > { %3537 = vrot.lane.b32.xlu0 %v9113_v26, %s5333_s30  ;;  %13789 = vst [vmem:[#allocation73_spill] sm:$0xff] %v9509_v45 }
 0x403   : > { %3547 = vrot.lane.b32.xlu1 %v9137_v2, %s5333_s30 }
 0x404   : > { %v9511_v21 = vpop.permute.xlu0 %3069 }
 0x405   : > { %13790 = vst [vmem:[#allocation74_spill] sm:$0xff] %v9511_v21  ;;  %v9517_v22 = vpop.permute.xlu1 %3079 }
 0x406   : > { %3541 = vrot.lane.b32.xlu0 %v9134_v6, %s5333_s30  ;;  %13791 = vst [vmem:[#allocation150_spill] sm:$0xff] %v9517_v22 }
 0x407   : > { %3551 = vrot.lane.b32.xlu1 %v9183_v16, %s5333_s30 }
 0x408   : > { %v9519_v50 = vpop.permute.xlu0 %3073 }
 0x409   : > { %13792 = vst [vmem:[#allocation88_spill] sm:$0xff] %v9519_v50  ;;  %v9525_v18 = vpop.permute.xlu1 %3083  ;;  %v13797_v50 = vld [vmem:[#allocation173_spill] sm:$0xff] }
 0x40a   : > { %3545 = vrot.lane.b32.xlu0 %v9154_v1, %s5333_s30  ;;  %13793 = vst [vmem:[#allocation89_spill] sm:$0xff] %v9525_v18 }
 0x40b   : > { %3555 = vrot.lane.b32.xlu1 %v9181_v11, %s5333_s30 }
 0x40c   : > { %v9527_v45 = vpop.permute.xlu0 %3077 }
 0x40d   : > { %13794 = vst [vmem:[#allocation51_spill] sm:$0xff] %v9527_v45  ;;  %v9533_v21 = vpop.permute.xlu1 %3087  ;;  %v13801_v45 = vld [vmem:[#allocation180_spill] sm:$0xff] }
 0x40e   : > { %3549 = vrot.lane.b32.xlu0 %v9179_v7, %s5333_s30  ;;  %13795 = vst [vmem:[#allocation90_spill] sm:$0xff] %v9533_v21 }
 0x40f   : > { %3559 = vrot.lane.b32.xlu1 %v13797_v50, %s5333_s30 }
 0x410   : > { %v9535_v22 = vpop.permute.xlu0 %3081 }
 0x411   : > { %13796 = vst [vmem:[#allocation92_spill] sm:$0xff] %v9535_v22  ;;  %v9541_v53 = vpop.permute.xlu1 %3091  ;;  %v13805_v22 = vld [vmem:[#allocation34_spill] sm:$0xff] }
 0x412   : > { %3553 = vrot.lane.b32.xlu0 %v13798_v37, %s5333_s30  ;;  %13799 = vst [vmem:[#allocation94_spill] sm:$0xff] %v9541_v53 }
 0x413   : > { %3563 = vrot.lane.b32.xlu1 %v13801_v45, %s5333_s30 }
 0x414   : > { %v9543_v18 = vpop.permute.xlu0 %3085 }
 0x415   : > { %13800 = vst [vmem:[#allocation95_spill] sm:$0xff] %v9543_v18  ;;  %v9549_v20 = vpop.permute.xlu1 %3095  ;;  %v13809_v18 = vld [vmem:[#allocation64_spill] sm:$0xff] }
 0x416   : > { %3557 = vrot.lane.b32.xlu0 %v13802_v35, %s5333_s30  ;;  %13803 = vst [vmem:[#allocation96_spill] sm:$0xff] %v9549_v20 }
 0x417   : > { %3567 = vrot.lane.b32.xlu1 %v13805_v22, %s5333_s30 }
 0x418   : > { %v9551_v21 = vpop.permute.xlu0 %3089 }
 0x419   : > { %13804 = vst [vmem:[#allocation155_spill] sm:$0xff] %v9551_v21  ;;  %v9557_v19 = vpop.permute.xlu1 %3099 }
 0x41a   : > { %3561 = vrot.lane.b32.xlu0 %v13806_v29, %s5333_s30  ;;  %13807 = vst [vmem:[#allocation159_spill] sm:$0xff] %v9557_v19 }
 0x41b   : > { %3571 = vrot.lane.b32.xlu1 %v13809_v18, %s5333_s30 }
 0x41c   : > { %v9559_v53 = vpop.permute.xlu0 %3093 }
 0x41d   : > { %13808 = vst [vmem:[#allocation152_spill] sm:$0xff] %v9559_v53  ;;  %v9565_v12 = vpop.permute.xlu1 %3103 }
 0x41e   : > { %3565 = vrot.lane.b32.xlu0 %v13810_v5, %s5333_s30  ;;  %13811 = vst [vmem:[#allocation21_spill] sm:$0xff] %v9565_v12 }
 0x41f   : > { %3575 = vrot.lane.b32.xlu1 %v9282_v25, %s5333_s30 }
 0x420   : > { %v9567_v20 = vpop.permute.xlu0 %3097 }
 0x421   : > { %13812 = vst [vmem:[#allocation97_spill] sm:$0xff] %v9567_v20  ;;  %v9573_v21 = vpop.permute.xlu1 %3171  ;;  %v13817_v20 = vld [vmem:[#allocation203_spill] sm:$0xff] }
 0x422   : > { %3569 = vrot.lane.b32.xlu0 %v9275_v51, %s5333_s30  ;;  %13813 = vst [vmem:[#allocation98_spill] sm:$0xff] %v9573_v21 }
 0x423   : > { %3579 = vrot.lane.b32.xlu1 %v9303_v30, %s5333_s30 }
 0x424   : > { %v9575_v19 = vpop.permute.xlu0 %3101 }
 0x425   : > { %13814 = vst [vmem:[#allocation25_spill] sm:$0xff] %v9575_v19  ;;  %v9581_v53 = vpop.permute.xlu1 %3175  ;;  %v13820_v19 = vld [vmem:[#allocation194_spill] sm:$0xff] }
 0x426   : > { %3573 = vrot.lane.b32.xlu0 %v9288_v49, %s5333_s30  ;;  %13815 = vst [vmem:[#allocation164_spill] sm:$0xff] %v9581_v53 }
 0x427   : > { %3583 = vrot.lane.b32.xlu1 %v9324_v58, %s5333_s30 }
 0x428   : > { %v9583_v12 = vpop.permute.xlu0 %3169 }
 0x429   : > { %13816 = vst [vmem:[#allocation108_spill] sm:$0xff] %v9583_v12  ;;  %v9589_v43 = vpop.permute.xlu1 %3179 }
 0x42a   : > { %3577 = vrot.lane.b32.xlu0 %v13817_v20, %s5333_s30  ;;  %13818 = vst [vmem:[#allocation45_spill] sm:$0xff] %v9589_v43 }
 0x42b   : > { %3587 = vrot.lane.b32.xlu1 %v13820_v19, %s5333_s30 }
 0x42c   : > { %v9591_v21 = vpop.permute.xlu0 %3173 }
 0x42d   : > { %13819 = vst [vmem:[#allocation169_spill] sm:$0xff] %v9591_v21  ;;  %v9597_v31 = vpop.permute.xlu1 %3183 }
 0x42e   : > { %3581 = vrot.lane.b32.xlu0 %v9337_v42, %s5333_s30  ;;  %13821 = vst [vmem:[#allocation157_spill] sm:$0xff] %v9597_v31 }
 0x42f   : > { %3655 = vrot.lane.b32.xlu1 %v9077_v3, %s5334_s9 }
 0x430   : > { %v9599_v53 = vpop.permute.xlu0 %3177 }
 0x431   : > { %13822 = vst [vmem:[#allocation57_spill] sm:$0xff] %v9599_v53  ;;  %v9605_v12 = vpop.permute.xlu1 %3187 }
 0x432   : > { %3585 = vrot.lane.b32.xlu0 %v9355_v4, %s5333_s30  ;;  %13823 = vst [vmem:[#allocation71_spill] sm:$0xff] %v9605_v12 }
 0x433   : > { %3659 = vrot.lane.b32.xlu1 %v9075_v61, %s5334_s9 }
 0x434   : > { %v9607_v43 = vpop.permute.xlu0 %3181 }
 0x435   : > { %13824 = vst [vmem:[#allocation101_spill] sm:$0xff] %v9607_v43  ;;  %v9613_v21 = vpop.permute.xlu1 %3191 }
 0x436   : > { %3653 = vrot.lane.b32.xlu0 %v9073_v60, %s5334_s9  ;;  %13825 = vst [vmem:[#allocation142_spill] sm:$0xff] %v9613_v21 }
 0x437   : > { %3663 = vrot.lane.b32.xlu1 %v9109_v14, %s5334_s9 }
 0x438   : > { %v9615_v31 = vpop.permute.xlu0 %3185 }
 0x439   : > { %13826 = vst [vmem:[#allocation146_spill] sm:$0xff] %v9615_v31  ;;  %v9621_v53 = vpop.permute.xlu1 %3195 }
 0x43a   : > { %3657 = vrot.lane.b32.xlu0 %v9071_v8, %s5334_s9  ;;  %13827 = vst [vmem:[#allocation105_spill] sm:$0xff] %v9621_v53 }
 0x43b   : > { %3667 = vrot.lane.b32.xlu1 %v9107_v57, %s5334_s9 }
 0x43c   : > { %v9623_v12 = vpop.permute.xlu0 %3189 }
 0x43d   : > { %13828 = vst [vmem:[#allocation66_spill] sm:$0xff] %v9623_v12  ;;  %v9629_v43 = vpop.permute.xlu1 %3199 }
 0x43e   : > { %3661 = vrot.lane.b32.xlu0 %v9105_v33, %s5334_s9  ;;  %13829 = vst [vmem:[#allocation103_spill] sm:$0xff] %v9629_v43 }
 0x43f   : > { %3671 = vrot.lane.b32.xlu1 %v9118_v10, %s5334_s9 }
 0x440   : > { %v9631_v21 = vpop.permute.xlu0 %3193 }
 0x441   : > { %13830 = vst [vmem:[#allocation138_spill] sm:$0xff] %v9631_v21  ;;  %v9637_v31 = vpop.permute.xlu1 %3203 }
 0x442   : > { %3665 = vrot.lane.b32.xlu0 %v9113_v26, %s5334_s9  ;;  %13831 = vst [vmem:[#allocation170_spill] sm:$0xff] %v9637_v31 }
 0x443   : > { %3675 = vrot.lane.b32.xlu1 %v9137_v2, %s5334_s9 }
 0x444   : > { %v9639_v53 = vpop.permute.xlu0 %3197 }
 0x445   : > { %13832 = vst [vmem:[#allocation102_spill] sm:$0xff] %v9639_v53  ;;  %v9645_v12 = vpop.permute.xlu1 %3207 }
 0x446   : > { %3669 = vrot.lane.b32.xlu0 %v9134_v6, %s5334_s9  ;;  %13833 = vst [vmem:[#allocation140_spill] sm:$0xff] %v9645_v12 }
 0x447   : > { %3679 = vrot.lane.b32.xlu1 %v9183_v16, %s5334_s9 }
 0x448   : > { %v9647_v43 = vpop.permute.xlu0 %3201 }
 0x449   : > { %13834 = vst [vmem:[#allocation68_spill] sm:$0xff] %v9647_v43  ;;  %v9653_v21 = vpop.permute.xlu1 %3211 }
 0x44a   : > { %3673 = vrot.lane.b32.xlu0 %v9154_v1, %s5334_s9  ;;  %13835 = vst [vmem:[#allocation72_spill] sm:$0xff] %v9653_v21 }
 0x44b   : > { %3683 = vrot.lane.b32.xlu1 %v9181_v11, %s5334_s9 }
 0x44c   : > { %v9655_v31 = vpop.permute.xlu0 %3205 }
 0x44d   : > { %13836 = vst [vmem:[#allocation145_spill] sm:$0xff] %v9655_v31  ;;  %v9661_v53 = vpop.permute.xlu1 %3215 }
 0x44e   : > { %3677 = vrot.lane.b32.xlu0 %v9179_v7, %s5334_s9  ;;  %13837 = vst [vmem:[#allocation109_spill] sm:$0xff] %v9661_v53 }
 0x44f   : > { %3687 = vrot.lane.b32.xlu1 %v13797_v50, %s5334_s9 }
 0x450   : > { %v9663_v12 = vpop.permute.xlu0 %3209 }
 0x451   : > { %13838 = vst [vmem:[#allocation132_spill] sm:$0xff] %v9663_v12  ;;  %v9669_v43 = vpop.permute.xlu1 %3219 }
 0x452   : > { %3681 = vrot.lane.b32.xlu0 %v13798_v37, %s5334_s9  ;;  %13839 = vst [vmem:[#allocation136_spill] sm:$0xff] %v9669_v43 }
 0x453   : > { %3691 = vrot.lane.b32.xlu1 %v13801_v45, %s5334_s9 }
 0x454   : > { %v9671_v21 = vpop.permute.xlu0 %3213 }
 0x455   : > { %13840 = vst [vmem:[#allocation112_spill] sm:$0xff] %v9671_v21  ;;  %v9677_v31 = vpop.permute.xlu1 %3223 }
 0x456   : > { %3685 = vrot.lane.b32.xlu0 %v13802_v35, %s5334_s9  ;;  %13841 = vst [vmem:[#allocation28_spill] sm:$0xff] %v9677_v31  ;;  %v3869_v35 = vld [vmem:[#allocation8 + $0x4] ss:$8 sm:$0xf] }
 0x457   : > { %3695 = vrot.lane.b32.xlu1 %v13805_v22, %s5334_s9  ;;  %v13878_v22 = vld [vmem:[#allocation119_spill] sm:$0xff] }
 0x458   : > { %v9679_v53 = vpop.permute.xlu0 %3217 }
 0x459   : > { %13842 = vst [vmem:[#allocation127_spill] sm:$0xff] %v9679_v53  ;;  %v9685_v12 = vpop.permute.xlu1 %3227 }
 0x45a   : > { %3689 = vrot.lane.b32.xlu0 %v13806_v29, %s5334_s9  ;;  %13843 = vst [vmem:[#allocation104_spill] sm:$0xff] %v9685_v12 }
 0x45b   : > { %3699 = vrot.lane.b32.xlu1 %v13809_v18, %s5334_s9 }
 0x45c   : > { %v9687_v43 = vpop.permute.xlu0 %3221 }
 0x45d   : > { %13844 = vst [vmem:[#allocation178_spill] sm:$0xff] %v9687_v43  ;;  %v9693_v21 = vpop.permute.xlu1 %3231 }
 0x45e   : > { %3693 = vrot.lane.b32.xlu0 %v13810_v5, %s5334_s9  ;;  %13845 = vst [vmem:[#allocation107_spill] sm:$0xff] %v9693_v21 }
 0x45f   : > { %3703 = vrot.lane.b32.xlu1 %v9282_v25, %s5334_s9  ;;  %v2965_v25 = vrot.slane %v9109_v14, 1 }
 0x460   : > { %v9695_v31 = vpop.permute.xlu0 %3225 }
 0x461   : > { %13846 = vst [vmem:[#allocation141_spill] sm:$0xff] %v9695_v31  ;;  %v9701_v53 = vpop.permute.xlu1 %3527  ;;  %v2949_v31 = vrot.slane %v9077_v3, 1 }
 0x462   : > { %3697 = vrot.lane.b32.xlu0 %v9275_v51, %s5334_s9  ;;  %13847 = vst [vmem:[#allocation166_spill] sm:$0xff] %v9701_v53 }
 0x463   : > { %3707 = vrot.lane.b32.xlu1 %v9303_v30, %s5334_s9 }
 0x464   : > { %v9703_v12 = vpop.permute.xlu0 %3229 }
 0x465   : > { %13848 = vst [vmem:[#allocation172_spill] sm:$0xff] %v9703_v12  ;;  %v9709_v43 = vpop.permute.xlu1 %3531  ;;  %v2953_v12 = vrot.slane %v9071_v8, 1 }
 0x466   : > { %3701 = vrot.lane.b32.xlu0 %v9288_v49, %s5334_s9  ;;  %13849 = vst [vmem:[#allocation61_spill] sm:$0xff] %v9709_v43 }
 0x467   : > { %3711 = vrot.lane.b32.xlu1 %v9324_v58, %s5334_s9  ;;  %v2997_v43 = vsel %vm656_vm5, %v2949_v31, %v2953_v12 }
 0x468   : > { %v9711_v21 = vpop.permute.xlu0 %3525 }
 0x469   : > { %13850 = vst [vmem:[#allocation171_spill] sm:$0xff] %v9711_v21  ;;  %v9718_v53 = vpop.permute.xlu1 %3535  ;;  %v2961_v21 = vrot.slane %v9105_v33, 1 }
 0x46a   : > { %3705 = vrot.lane.b32.xlu0 %v13817_v20, %s5334_s9  ;;  %13851 = vst [vmem:[#allocation65_spill] sm:$0xff] %v9718_v53  ;;  %v2957_v20 = vrot.slane %v9075_v61, 1 }
 0x46b   : > { %3715 = vrot.lane.b32.xlu1 %v13820_v19, %s5334_s9 }
 0x46c   : > { %v9721_v30 = vpop.permute.xlu0 %3529  ;;  %v2989_v19 = vsel %vm656_vm5, %v2957_v20, %v2961_v21 }
 0x46d   : > { %13852 = vst [vmem:[#allocation27_spill] sm:$0xff] %v9721_v30  ;;  %v9730_v49 = vpop.permute.xlu1 %3539  ;;  %v9737_v30 = vsel %vm6306_vm6, %v2997_v43, 0.0  ;;  %v9754_v59 = vsel %vm6330_vm7, %v2989_v19, 0.0 }
 0x46e   : > { %3709 = vrot.lane.b32.xlu0 %v9337_v42, %s5334_s9  ;;  %13853 = vst [vmem:[#allocation33_spill] sm:$0xff] %v9730_v49  ;;  %v2945_v42 = vrot.slane %v9073_v60, 1  ;;  %13859 = vst [vmem:[#allocation29_spill] sm:$0xff] %v9754_v59 }
 0x46f   : > { %4044 = vrot.lane.b32.xlu1 %v9737_v30, %s5333_s30 }
 0x470   : > { %v9733_v53 = vpop.permute.xlu0 %3533  ;;  %v9760_v39 = vsel %vm656_vm5, %v2945_v42, %v2949_v31  ;;  %v9779_v31 = vsel %vm656_vm5, %v2953_v12, %v2957_v20 }
 0x471   : > { %13854 = vst [vmem:[#allocation143_spill] sm:$0xff] %v9733_v53  ;;  %v9746_v49 = vpop.permute.xlu1 %3543  ;;  %v2969_v53 = vrot.slane %v9113_v26, 1  ;;  %13860 = vst [vmem:[#allocation183_spill] sm:$0xff] %v9760_v39  ;;  %v9867_v26 = vrot.slane %v4386_v46, %v13880_v44 }
 0x472   : > { %3713 = vrot.lane.b32.xlu0 %v9355_v4, %s5334_s9  ;;  %13856 = vst [vmem:[#allocation182_spill] sm:$0xff] %v9746_v49  ;;  %v2973_v4 = vrot.slane %v9107_v57, 1  ;;  %13865 = vst [vmem:[#allocation62_spill] sm:$0xff] %v9779_v31 }
 0x473   : > { %4048 = vrot.lane.b32.xlu1 %v9754_v59, %s5333_s30  ;;  %v2981_v49 = vsel %vm656_vm5, %v2965_v25, %v2969_v53  ;;  %13886 = vst [vmem:[#allocation149_spill] sm:$0xff] %v9867_v26  ;;  %v2974_v26 = vrot.slane %v9181_v11, 1 }
 0x474   : > { %v9750_v48 = vpop.permute.xlu0 %3537  ;;  %v9773_v18 = vsel %vm6364_vm8, %v2981_v49, 0.0  ;;  %v3005_v55 = vsel %vm656_vm5, %v2973_v4, %v2945_v42  ;;  %v2954_v49 = vrot.slane %v9154_v1, 1  ;;  %v9799_v42 = vsel %vm656_vm5, %v2961_v21, %v2965_v25 }
 0x475   : > { %13857 = vst [vmem:[#allocation177_spill] sm:$0xff] %v9750_v48  ;;  %v9767_v48 = vpop.permute.xlu1 %3547  ;;  %13864 = vst [vmem:[#allocation54_spill] sm:$0xff] %v9773_v18  ;;  %v9793_v12 = vsel %vm6415_vm9, %v3005_v55, 0.0  ;;  %v2958_v55 = vrot.slane %v9137_v2, 1  ;;  %v9843_v2 = vrot.slane %v4386_v46, %v13875_v0 }
 0x476   : > { %4042 = vrot.lane.b32.xlu0 %v9760_v39, %s5333_s30  ;;  %13861 = vst [vmem:[#allocation36_spill] sm:$0xff] %v9767_v48  ;;  %v3352_v48 = vld [vmem:[#allocation8 + $0x1] ss:$8 sm:$0xf]  ;;  %13869 = vst [vmem:[#allocation38_spill] sm:$0xff] %v9793_v12  ;;  %v2998_v20 = vsel %vm656_vm5, %v2950_v47, %v2954_v49 }
 0x477   : > { %4052 = vrot.lane.b32.xlu1 %v9773_v18, %s5333_s30  ;;  %13870 = vst [vmem:[#allocation147_spill] sm:$0xff] %v9799_v42  ;;  %v3357_v17 = vrot.slane %v3352_v48, %v13872_v63  ;;  %v9817_v21 = vsel %vm6306_vm6, %v2998_v20, 0.0  ;;  %v9823_v27 = vrot.slane %v3352_v48, %v13875_v0  ;;  %v2966_v20 = vrot.slane %v9183_v16, 1 }
 0x478   : > { %v9769_v56 = vpop.permute.xlu0 %3541  ;;  %13874 = vst [vmem:[#allocation39_spill] sm:$0xff] %v9817_v21  ;;  %v9840_v1 = vrot.slane %v3352_v48, %v13880_v44  ;;  %v9874_v16 = vrot.slane %v3869_v35, %v13878_v22 }
 0x479   : > { %13862 = vst [vmem:[#allocation67_spill] sm:$0xff] %v9769_v56  ;;  %v9786_v56 = vpop.permute.xlu1 %3551 }
 0x47a   : > { %4046 = vrot.lane.b32.xlu0 %v9779_v31, %s5333_s30  ;;  %13866 = vst [vmem:[#allocation174_spill] sm:$0xff] %v9786_v56  ;;  %v9820_v56 = vrot.slane %v3869_v35, %v13872_v63  ;;  %v9837_v63 = vrot.slane %v3352_v48, %v13878_v22  ;;  %13881 = vst [vmem:[#allocation121_spill] sm:$0xff] %v9840_v1  ;;  %v9858_v48 = vrot.slane %v3869_v35, %v13880_v44 }
 0x47b   : > { %4056 = vrot.lane.b32.xlu1 %v9793_v12, %s5333_s30 }
 0x47c   : > { %v9789_v62 = vpop.permute.xlu0 %3545  ;;  %13879 = vst [vmem:[#allocation176_spill] sm:$0xff] %v9837_v63  ;;  %v9855_v63 = vrot.slane %v4386_v46, %v13878_v22  ;;  %13883 = vst [vmem:[#allocation186_spill] sm:$0xff] %v9858_v48 }
 0x47d   : > { %13867 = vst [vmem:[#allocation122_spill] sm:$0xff] %v9789_v62  ;;  %v9806_v62 = vpop.permute.xlu1 %3555 }
 0x47e   : > { %4050 = vrot.lane.b32.xlu0 %v9799_v42, %s5333_s30  ;;  %13871 = vst [vmem:[#allocation58_spill] sm:$0xff] %v9806_v62  ;;  %v9829_v62 = vsel %vm656_vm5, %v2969_v53, %v2973_v4  ;;  %v9848_v4 = vrot.slane %v3869_v35, %v13875_v0  ;;  %v9892_v35 = vmul.f32 %v3357_v17, %v9084_v38 }
 0x47f   : > { %4060 = vrot.lane.b32.xlu1 %v9817_v21, %s5333_s30  ;;  %13876 = vst [vmem:[#allocation179_spill] sm:$0xff] %v9829_v62  ;;  %v9914_v38 = vmul.f32 %v9811_v34, %v9737_v30 }
 0x480   : > { %v9813_v25 = vpop.permute.xlu0 %3549  ;;  %13891 = vst [vmem:[#allocation118_spill] sm:$0xff] %v9892_v35 }
 0x481   : > { %13873 = vst [vmem:[#allocation133_spill] sm:$0xff] %v9813_v25  ;;  %v2990_v25 = vsel %vm656_vm5, %v2958_v55, %v13877_v23  ;;  %v9850_v53 = vpop.permute.xlu1 %3559  ;;  %v2946_v23 = vrot.slane %v9134_v6, 1  ;;  %13896 = vst [vmem:[#allocation53_spill] sm:$0xff] %v9914_v38 }
 0x482   : > { %4054 = vrot.lane.b32.xlu0 %v9829_v62, %s5333_s30  ;;  %13882 = vst [vmem:[#allocation188_spill] sm:$0xff] %v9850_v53  ;;  %v9864_v58 = vsel %vm6330_vm7, %v2990_v25, 0.0  ;;  %v9871_v53 = vmul.f32 %v9820_v56, %v9071_v8  ;;  %v13889_v25 = vrot.slane %v13798_v37, 1  ;;  %v9889_v8 = vmul.f32 %v9820_v56, %v9073_v60 }
 0x483   : > { %13885 = vst [vmem:[#allocation156_spill] sm:$0xff] %v9864_v58  ;;  %4064 = vrot.lane.b32.xlu1 %v9864_v58, %s5333_s30  ;;  %v9908_v60 = vmul.f32 %v3357_v17, %v9093_v24  ;;  %v9930_v24 = vmul.f32 %v3357_v17, %v9141_v40  ;;  %v3006_v40 = vsel %vm656_vm5, %v2974_v26, %v2946_v23 }
 0x484   : > { %v9860_v1 = vpop.permute.xlu0 %3553  ;;  %13887 = vst [vmem:[#allocation134_spill] sm:$0xff] %v9871_v53  ;;  %v2982_v46 = vsel %vm656_vm5, %v2966_v20, %v13889_v25  ;;  %13890 = vst [vmem:[#allocation153_spill] sm:$0xff] %v9889_v8  ;;  %v9895_v53 = vmul.f32 %v3357_v17, %v9099_v41  ;;  %v9905_v25 = vmul.f32 %v9820_v56, %v9075_v61  ;;  %v9910_v8 = vld [vmem:[#allocation8] ss:$8 sm:$0xf] }
 0x485   : > { %13884 = vst [vmem:[#allocation189_spill] sm:$0xff] %v9860_v1  ;;  %v9880_v1 = vsel %vm656_vm5, %v2946_v23, %v2950_v47  ;;  %v9901_v47 = vmul.f32 %v9820_v56, %v9077_v3  ;;  %13895 = vst [vmem:[#allocation106_spill] sm:$0xff] %v9908_v60  ;;  %v9918_v41 = vmul.f32 %v9811_v34, %v9760_v39 }
 0x486   : > { %13888 = vst [vmem:[#allocation116_spill] sm:$0xff] %v9880_v1  ;;  %13892 = vst [vmem:[#allocation26_spill] sm:$0xff] %v9895_v53  ;;  %4058 = vrot.lane.b32.xlu0 %v9880_v1, %s5333_s30  ;;  %v9922_v3 = vmul.f32 %v9811_v34, %v9779_v31  ;;  %v9927_v61 = vmul.f32 %v3357_v17, %v9122_v54  ;;  %v9942_v60 = vmul.f32 %v3357_v17, %v9126_v9  ;;  %v13953_v53 = vld [vmem:[#allocation69_spill] sm:$0xff] }
 0x487   : > { %13893 = vst [vmem:[#allocation42_spill] sm:$0xff] %v9901_v47  ;;  %13894 = vst [vmem:[#allocation151_spill] sm:$0xff] %v9905_v25  ;;  %v9924_v47 = vpop.permute.xlu1 %3563  ;;  %v9933_v25 = vmul.f32 %v3357_v17, %v9145_v15  ;;  %v9948_v54 = vsel %vm656_vm5, %v2954_v49, %v2958_v55  ;;  %v2951_v15 = vrot.slane %v13797_v50, 1  ;;  %v9962_v9 = vmul.f32 %v9823_v27, %v9173_v32 }
 0x488   : > { %13897 = vst [vmem:[#allocation161_spill] sm:$0xff] %v9918_v41  ;;  %13898 = vst [vmem:[#allocation23_spill] sm:$0xff] %v9922_v3  ;;  %v9935_v38 = vpop.permute.xlu0 %3557  ;;  %v9939_v41 = vsel %vm6364_vm8, %v2982_v46, 0.0  ;;  %v9955_v3 = vmul.f32 %v9823_v27, %v9159_v52  ;;  %v9958_v46 = vmul.f32 %v3357_v17, %v9163_v28  ;;  %v9966_v49 = vrot.slane %v9910_v8, %v13875_v0 }
 0x489   : > { %13899 = vst [vmem:[#allocation56_spill] sm:$0xff] %v9924_v47  ;;  %13900 = vst [vmem:[#allocation163_spill] sm:$0xff] %v9927_v61  ;;  %4068 = vrot.lane.b32.xlu1 %v9939_v41, %s5333_s30  ;;  %v9972_v55 = vmul.f32 %v9823_v27, %v9209_v36  ;;  %v9976_v52 = vmul.f32 %v9811_v34, %v9754_v59  ;;  %v9980_v28 = vmul.f32 %v9811_v34, %v9773_v18  ;;  %v13999_v59 = vld [vmem:[#allocation128_spill] sm:$0xff] }
 0x48a   : > { %13901 = vst [vmem:[#allocation55_spill] sm:$0xff] %v9930_v24  ;;  %13902 = vst [vmem:[#allocation190_spill] sm:$0xff] %v9933_v25  ;;  %4062 = vrot.lane.b32.xlu0 %v9948_v54, %s5333_s30  ;;  %v9987_v23 = vmul.f32 %v9811_v34, %v9799_v42  ;;  %v9991_v36 = vmul.f32 %v9811_v34, %v9829_v62  ;;  %v10005_v17 = vmul.f32 %v9811_v34, %v9793_v12  ;;  %v13955_v62 = vld [vmem:[#allocation99_spill] sm:$0xff] }
 0x48b   : > { %13903 = vst [vmem:[#allocation158_spill] sm:$0xff] %v9935_v38  ;;  %13904 = vst [vmem:[#allocation59_spill] sm:$0xff] %v9939_v41  ;;  %v9982_v32 = vpop.permute.xlu1 %3567  ;;  %v10022_v34 = vmul.f32 %v9843_v2, %v9817_v21  ;;  %v13944_v21 = vld [vmem:[#allocation31_spill] sm:$0xff] }
 0x48c   : > { %13905 = vst [vmem:[#allocation154_spill] sm:$0xff] %v9942_v60  ;;  %13906 = vst [vmem:[#allocation24_spill] sm:$0xff] %v9948_v54  ;;  %v9993_v47 = vpop.permute.xlu0 %3561  ;;  %v10098_v38 = vmul.f32 %v9823_v27, %v13944_v21  ;;  %v13948_v60 = vld [vmem:[#allocation176_spill] sm:$0xff]  ;;  %v2947_v21 = vrot.slane %v13953_v53, 1  ;;  %v13973_v25 = vld [vmem:[#allocation91_spill] sm:$0xff] }
 0x48d   : > { %13907 = vst [vmem:[#allocation60_spill] sm:$0xff] %v9958_v46  ;;  %13908 = vst [vmem:[#allocation191_spill] sm:$0xff] %v9976_v52  ;;  %v9997_v52 = vsel %vm6415_vm9, %v3006_v40, 0.0  ;;  %v13919_v40 = vrot.slane %v13806_v29, 1  ;;  %v13963_v46 = vld [vmem:[#allocation22_spill] sm:$0xff] }
 0x48e   : > { %13909 = vst [vmem:[#allocation192_spill] sm:$0xff] %v9980_v28  ;;  %13910 = vst [vmem:[#allocation135_spill] sm:$0xff] %v9982_v32  ;;  %v10001_v28 = vmul.f32 %v9820_v56, %v9109_v14  ;;  %4072 = vrot.lane.b32.xlu1 %v9997_v52, %s5333_s30  ;;  %v10043_v14 = vmul.f32 %v9820_v56, %v9105_v33  ;;  %v10065_v33 = vmul.f32 %v9848_v4, %v9134_v6 }
 0x48f   : > { %13911 = vst [vmem:[#allocation193_spill] sm:$0xff] %v9987_v23  ;;  %13912 = vst [vmem:[#allocation44_spill] sm:$0xff] %v9991_v36  ;;  %v13917_v23 = vrot.slane %v9179_v7, 1  ;;  %v13940_v6 = vrot.slane %v13810_v5, 1  ;;  %v10138_v35 = vmul.f32 %v13948_v60, %v13963_v46  ;;  %v13970_v46 = vld [vmem:[#allocation131_spill] sm:$0xff] }
 0x490   : > { %13913 = vst [vmem:[#allocation167_spill] sm:$0xff] %v9993_v47  ;;  %13914 = vst [vmem:[#allocation181_spill] sm:$0xff] %v9997_v52  ;;  %v2999_v47 = vsel %vm656_vm5, %v2951_v15, %v13919_v40  ;;  %v2959_v40 = vrot.slane %v13801_v45, 1  ;;  %v10053_v32 = vpop.permute.xlu0 %3565 }
 0x491   : > { %13915 = vst [vmem:[#allocation175_spill] sm:$0xff] %v10001_v28  ;;  %13916 = vst [vmem:[#allocation32_spill] sm:$0xff] %v10005_v17  ;;  %v10013_v36 = vsel %vm656_vm5, %v13917_v23, %v2966_v20  ;;  %v10026_v17 = vmul.f32 %v9843_v2, %v9880_v1  ;;  %v10030_v28 = vmul.f32 %v9843_v2, %v9948_v54  ;;  %v10038_v23 = vpop.permute.xlu1 %3571  ;;  %v10057_v54 = vsel %vm6306_vm6, %v2999_v47, 0.0 }
 0x492   : > { %13918 = vst [vmem:[#allocation40_spill] sm:$0xff] %v10013_v36  ;;  %13920 = vst [vmem:[#allocation185_spill] sm:$0xff] %v10022_v34  ;;  %4066 = vrot.lane.b32.xlu0 %v10013_v36, %s5333_s30  ;;  %v10036_v20 = vmul.f32 %v9820_v56, %v9107_v57  ;;  %4076 = vrot.lane.b32.xlu1 %v10057_v54, %s5333_s30  ;;  %v13938_v47 = vrot.slane %v13798_v37, 1 }
 0x493   : > { %13921 = vst [vmem:[#allocation165_spill] sm:$0xff] %v10026_v17  ;;  %13922 = vst [vmem:[#allocation70_spill] sm:$0xff] %v10030_v28  ;;  %v10047_v17 = vmul.f32 %v9848_v4, %v9118_v10  ;;  %v13927_v28 = vld [vmem:[#allocation83_spill] sm:$0xff]  ;;  %v13935_v10 = vld [vmem:[#allocation76_spill] sm:$0xff] }
 0x494   : > { %13923 = vst [vmem:[#allocation63_spill] sm:$0xff] %v10036_v20  ;;  %13924 = vst [vmem:[#allocation50_spill] sm:$0xff] %v10038_v23  ;;  %v10051_v34 = vmul.f32 %v9820_v56, %v13927_v28  ;;  %v13932_v23 = vld [vmem:[#allocation84_spill] sm:$0xff]  ;;  %v13937_v56 = vld [vmem:[#allocation86_spill] sm:$0xff] }
 0x495   : > { %13925 = vst [vmem:[#allocation47_spill] sm:$0xff] %v10043_v14  ;;  %13926 = vst [vmem:[#allocation168_spill] sm:$0xff] %v10047_v17  ;;  %v10061_v1 = vmul.f32 %v9848_v4, %v13932_v23  ;;  %v10069_v14 = vmul.f32 %v9848_v4, %v13935_v10  ;;  %v10073_v28 = vmul.f32 %v9823_v27, %v13937_v56  ;;  %v13941_v10 = vld [vmem:[#allocation34_spill] sm:$0xff]  ;;  %v13943_v17 = vld [vmem:[#allocation184_spill] sm:$0xff] }
 0x496   : > { %13928 = vst [vmem:[#allocation16_spill] sm:$0xff] %v10051_v34  ;;  %13929 = vst [vmem:[#allocation19_spill] sm:$0xff] %v10053_v32  ;;  %v10081_v23 = vsel %vm656_vm5, %v13938_v47, %v2974_v26  ;;  %v2991_v32 = vsel %vm656_vm5, %v2959_v40, %v13940_v6  ;;  %v10094_v24 = vmul.f32 %v9823_v27, %v13943_v17  ;;  %v13945_v26 = vld [vmem:[#allocation160_spill] sm:$0xff]  ;;  %v13947_v6 = vld [vmem:[#allocation162_spill] sm:$0xff]  ;;  %v10114_v17 = vpop.permute.xlu1 %3575 }
 0x497   : > { %13931 = vst [vmem:[#allocation17_spill] sm:$0xff] %v10057_v54  ;;  %13933 = vst [vmem:[#allocation18_spill] sm:$0xff] %v10061_v1  ;;  %v13942_v1 = vld [vmem:[#allocation148_spill] sm:$0xff]  ;;  %v10102_v47 = vmul.f32 %v9823_v27, %v13945_v26  ;;  %4070 = vrot.lane.b32.xlu0 %v10081_v23, %s5333_s30  ;;  %v10108_v61 = vmul.f32 %v13948_v60, %v13947_v6  ;;  %v13959_v6 = vld [vmem:[#allocation79_spill] sm:$0xff] }
 0x498   : > { %13934 = vst [vmem:[#allocation20_spill] sm:$0xff] %v10065_v33  ;;  %13936 = vst [vmem:[#allocation173_spill] sm:$0xff] %v10069_v14  ;;  %v2967_v14 = vrot.slane %v13941_v10, 1  ;;  %v10090_v56 = vmul.f32 %v9823_v27, %v13942_v1  ;;  %v13950_v1 = vld [vmem:[#allocation52_spill] sm:$0xff]  ;;  %v10120_v27 = vmul.f32 %v13948_v60, %v13955_v62  ;;  %v10128_v42 = vmul.f32 %v13948_v60, %v13959_v6 }
 0x499   : > { %13939 = vst [vmem:[#allocation77_spill] sm:$0xff] %v10081_v23  ;;  %13946 = vst [vmem:[#allocation180_spill] sm:$0xff] %v10102_v47  ;;  %v10112_v33 = vmul.f32 %v13948_v60, %v13950_v1  ;;  %v13954_v34 = vld [vmem:[#allocation48_spill] sm:$0xff]  ;;  %v10130_v1 = vpop.permute.xlu0 %3569  ;;  %v10144_v62 = vsel %vm656_vm5, %v2947_v21, %v2951_v15  ;;  %v14009_v47 = vld [vmem:[#allocation37_spill] sm:$0xff] }
 0x49a   : > { %13949 = vst [vmem:[#allocation30_spill] sm:$0xff] %v10108_v61  ;;  %13952 = vst [vmem:[#allocation115_spill] sm:$0xff] %v10114_v17  ;;  %v13957_v26 = vld [vmem:[#allocation80_spill] sm:$0xff]  ;;  %v10134_v17 = vsel %vm6330_vm7, %v2991_v32, 0.0  ;;  %v13968_v32 = vld [vmem:[#allocation202_spill] sm:$0xff]  ;;  %v2948_v61 = vrot.slane %v14009_v47, 1 }
 0x49b   : > { %13951 = vst [vmem:[#allocation87_spill] sm:$0xff] %v10112_v33  ;;  %13956 = vst [vmem:[#allocation123_spill] sm:$0xff] %v10120_v27  ;;  %v10124_v20 = vmul.f32 %v13948_v60, %v13957_v26  ;;  %4080 = vrot.lane.b32.xlu1 %v10134_v17, %s5333_s30  ;;  %v13966_v26 = vrot.slane %v13954_v34, 1  ;;  %v10153_v31 = vmul.f32 %v13948_v60, %v13968_v32  ;;  %v13975_v15 = vld [vmem:[#allocation100_spill] sm:$0xff]  ;;  %4074 = vrot.lane.b32.xlu0 %v10144_v62, %s5333_s30  ;;  %v13979_v32 = vld [vmem:[#allocation113_spill] sm:$0xff] }
 0x49c   : > { %13960 = vst [vmem:[#allocation83_spill] sm:$0xff] %v10128_v42  ;;  %13961 = vst [vmem:[#allocation110_spill] sm:$0xff] %v10130_v1  ;;  %v13967_v1 = vld [vmem:[#allocation64_spill] sm:$0xff]  ;;  %v14000_v27 = vld [vmem:[#allocation194_spill] sm:$0xff] }
 0x49d   : > { %13958 = vst [vmem:[#allocation137_spill] sm:$0xff] %v10124_v20  ;;  %13962 = vst [vmem:[#allocation84_spill] sm:$0xff] %v10134_v17  ;;  %v2983_v6 = vsel %vm656_vm5, %v2967_v14, %v13966_v26  ;;  %v2975_v12 = vrot.slane %v13967_v1, 1  ;;  %v10161_v20 = vmul.f32 %v13948_v60, %v13973_v25  ;;  %v13977_v26 = vld [vmem:[#allocation35_spill] sm:$0xff]  ;;  %v13983_v25 = vld [vmem:[#allocation93_spill] sm:$0xff]  ;;  %v2976_v33 = vrot.slane %v14000_v27, 1 }
 0x49e   : > { %13964 = vst [vmem:[#allocation76_spill] sm:$0xff] %v10138_v35  ;;  %13965 = vst [vmem:[#allocation86_spill] sm:$0xff] %v10144_v62  ;;  %v13971_v35 = vld [vmem:[#allocation121_spill] sm:$0xff] }
 0x49f   : > { %13969 = vst [vmem:[#allocation34_spill] sm:$0xff] %v10153_v31  ;;  %v10157_v18 = vmul.f32 %v13971_v35, %v13970_v46  ;;  %13974 = vst [vmem:[#allocation184_spill] sm:$0xff] %v10161_v20  ;;  %v10165_v39 = vmul.f32 %v13971_v35, %v13975_v15  ;;  %v10171_v42 = vmul.f32 %v13971_v35, %v13977_v26  ;;  %v13981_v46 = vld [vmem:[#allocation144_spill] sm:$0xff]  ;;  %v10185_v15 = vpop.permute.xlu1 %3579 }
 0x4a0   : > { %v10175_v31 = vmul.f32 %v13971_v35, %v13979_v32  ;;  %v10183_v60 = vmul.f32 %v13971_v35, %v13983_v25  ;;  %13985 = vst [vmem:[#allocation69_spill] sm:$0xff] %v10185_v15  ;;  %v10193_v26 = vrot.slane %v9910_v8, %v13878_v22  ;;  %v13988_v32 = vld [vmem:[#allocation111_spill] sm:$0xff]  ;;  %v10203_v25 = vsel %vm6364_vm8, %v2983_v6, 0.0  ;;  %v13996_v6 = vld [vmem:[#allocation120_spill] sm:$0xff] }
 0x4a1   : > { %13972 = vst [vmem:[#allocation148_spill] sm:$0xff] %v10157_v18  ;;  %13976 = vst [vmem:[#allocation31_spill] sm:$0xff] %v10165_v39  ;;  %v10179_v18 = vmul.f32 %v13971_v35, %v13981_v46  ;;  %v13986_v39 = vld [vmem:[#allocation198_spill] sm:$0xff]  ;;  %v10199_v46 = vpop.permute.xlu0 %3573  ;;  %v10207_v15 = vrot.slane %v9910_v8, %v13880_v44  ;;  %4084 = vrot.lane.b32.xlu1 %v10203_v25, %s5333_s30 }
 0x4a2   : > { %13978 = vst [vmem:[#allocation160_spill] sm:$0xff] %v10171_v42  ;;  %13980 = vst [vmem:[#allocation162_spill] sm:$0xff] %v10175_v31  ;;  %v10189_v20 = vmul.f32 %v13971_v35, %v13986_v39  ;;  %v10197_v31 = vrot.slane %v9910_v8, %v13988_v32  ;;  %v13993_v39 = vrot.slane %v13806_v29, 1  ;;  %v10222_v42 = vmul.f32 %v13971_v35, %v13996_v6  ;;  %v13998_v8 = vld [vmem:[#allocation195_spill] sm:$0xff] }
 0x4a3   : > { %13982 = vst [vmem:[#allocation176_spill] sm:$0xff] %v10179_v18  ;;  %13984 = vst [vmem:[#allocation52_spill] sm:$0xff] %v10183_v60  ;;  %v10239_v35 = vmul.f32 %v9843_v2, %v10013_v36  ;;  %v14005_v6 = vld [vmem:[#allocation203_spill] sm:$0xff]  ;;  %v10255_v36 = vmul.f32 %v9843_v2, %v9939_v41 }
 0x4a4   : > { %13987 = vst [vmem:[#allocation48_spill] sm:$0xff] %v10189_v20  ;;  %13989 = vst [vmem:[#allocation99_spill] sm:$0xff] %v10197_v31  ;;  %v10215_v60 = vsel %vm656_vm5, %v13993_v39, %v2959_v40  ;;  %v13995_v20 = vld [vmem:[#allocation124_spill] sm:$0xff]  ;;  %v2968_v31 = vrot.slane %v13999_v59, 1  ;;  %v10231_v40 = vmul.f32 %v9843_v2, %v9864_v58  ;;  %v10241_v39 = vpop.permute.xlu1 %3583  ;;  %v14008_v58 = vld [vmem:[#allocation114_spill] sm:$0xff] }
 0x4a5   : > { %13990 = vst [vmem:[#allocation80_spill] sm:$0xff] %v10199_v46  ;;  %13991 = vst [vmem:[#allocation79_spill] sm:$0xff] %v10203_v25  ;;  %v3007_v46 = vsel %vm656_vm5, %v2975_v12, %v2947_v21  ;;  %v2952_v18 = vrot.slane %v13995_v20, 1  ;;  %4078 = vrot.lane.b32.xlu0 %v10215_v60, %s5333_s30  ;;  %v10235_v21 = vmul.f32 %v9843_v2, %v9997_v52  ;;  %v14010_v52 = vld [vmem:[#allocation41_spill] sm:$0xff] }
 0x4a6   : > { %13992 = vst [vmem:[#allocation22_spill] sm:$0xff] %v10207_v15  ;;  %13994 = vst [vmem:[#allocation64_spill] sm:$0xff] %v10215_v60  ;;  %v2964_v15 = vrot.slane %v13998_v8, 1  ;;  %v2956_v8 = vrot.slane %v14005_v6, 1  ;;  %v10248_v59 = vsel %vm6415_vm9, %v3007_v46, 0.0  ;;  %v14013_v46 = vrot.slane %v13810_v5, 1 }
 0x4a7   : > { %13997 = vst [vmem:[#allocation202_spill] sm:$0xff] %v10222_v42  ;;  %14001 = vst [vmem:[#allocation131_spill] sm:$0xff] %v10231_v40  ;;  %v10244_v42 = vpop.permute.xlu0 %3577  ;;  %v2960_v40 = vrot.slane %v14008_v58, 1  ;;  %4088 = vrot.lane.b32.xlu1 %v10248_v59, %s5333_s30  ;;  %v10273_v58 = vmul.f32 %v9855_v63, %v10057_v54  ;;  %v10329_v57 = vsel %vm656_vm5, %v2948_v61, %v2952_v18  ;;  %v14075_v54 = vld [vmem:[#allocation73_spill] sm:$0xff] }
 0x4a8   : > { %14002 = vst [vmem:[#allocation121_spill] sm:$0xff] %v10235_v21  ;;  %14003 = vst [vmem:[#allocation91_spill] sm:$0xff] %v10239_v35  ;;  %v2972_v21 = vrot.slane %v14010_v52, 1  ;;  %v10259_v35 = vmul.f32 %v9843_v2, %v10081_v23  ;;  %v10267_v6 = vsel %vm656_vm5, %v14013_v46, %v2967_v14  ;;  %v3000_v47 = vsel %vm656_vm5, %v2952_v18, %v2956_v8 }
 0x4a9   : > { %14004 = vst [vmem:[#allocation100_spill] sm:$0xff] %v10241_v39  ;;  %14006 = vst [vmem:[#allocation35_spill] sm:$0xff] %v10244_v42  ;;  %4082 = vrot.lane.b32.xlu0 %v10267_v6, %s5333_s30  ;;  %v2992_v2 = vsel %vm656_vm5, %v2960_v40, %v2964_v15  ;;  %v3008_v14 = vsel %vm656_vm5, %v2976_v33, %v2948_v61  ;;  %v10285_v46 = vmul.f32 %v9855_v63, %v10134_v17  ;;  %v10299_v39 = vpop.permute.xlu1 %3587  ;;  %v14032_v61 = vld [vmem:[#allocation149_spill] sm:$0xff] }
 0x4aa   : > { %14007 = vst [vmem:[#allocation113_spill] sm:$0xff] %v10248_v59  ;;  %14011 = vst [vmem:[#allocation144_spill] sm:$0xff] %v10255_v36  ;;  %v10289_v36 = vmul.f32 %v9855_v63, %v10144_v62  ;;  %v10297_v42 = vmul.f32 %v9858_v48, %v14000_v27  ;;  %v10303_v23 = vmul.f32 %v9855_v63, %v10203_v25 }
 0x4ab   : > { %14012 = vst [vmem:[#allocation93_spill] sm:$0xff] %v10259_v35  ;;  %14014 = vst [vmem:[#allocation198_spill] sm:$0xff] %v10267_v6  ;;  %v2984_v35 = vsel %vm656_vm5, %v2968_v31, %v2972_v21  ;;  %v10305_v17 = vpop.permute.xlu0 %3581  ;;  %v10319_v27 = vsel %vm656_vm5, %v2956_v8, %v2960_v40  ;;  %v10341_v8 = vmul.f32 %v9855_v63, %v10267_v6 }
 0x4ac   : > { %14015 = vst [vmem:[#allocation124_spill] sm:$0xff] %v10273_v58  ;;  %14016 = vst [vmem:[#allocation120_spill] sm:$0xff] %v10285_v46  ;;  %v10293_v58 = vmul.f32 %v9855_v63, %v10215_v60  ;;  %v10309_v46 = vsel %vm6306_vm6, %v3000_v47, 0.0  ;;  %v10333_v47 = vsel %vm6364_vm8, %v2984_v35, 0.0  ;;  %v10347_v18 = vmul.f32 %v9858_v48, %v14010_v52  ;;  %v14069_v60 = vld [vmem:[#allocation130_spill] sm:$0xff] }
 0x4ad   : > { %14017 = vst [vmem:[#allocation194_spill] sm:$0xff] %v10289_v36  ;;  %14019 = vst [vmem:[#allocation204_spill] sm:$0xff] %v10297_v42  ;;  %v14023_v36 = vrot.slane %v13954_v34, 1  ;;  %4092 = vrot.lane.b32.xlu1 %v10309_v46, %s5333_s30  ;;  %v10351_v43 = vsel %vm656_vm5, %v2964_v15, %v2968_v31  ;;  %v10355_v51 = vsel %vm656_vm5, %v2972_v21, %v2976_v33  ;;  %v10369_v35 = vpop.permute.xlu1 %3655 }
 0x4ae   : > { %14018 = vst [vmem:[#allocation41_spill] sm:$0xff] %v10293_v58  ;;  %14020 = vst [vmem:[#allocation205_spill] sm:$0xff] %v10299_v39  ;;  %v10359_v19 = vmul.f32 %v9855_v63, %v10248_v59  ;;  %v10363_v40 = vmul.f32 %v14032_v61, %v10309_v46  ;;  %v10373_v31 = vmul.f32 %v14032_v61, %v10319_v27  ;;  %v14068_v59 = vld [vmem:[#allocation75_spill] sm:$0xff] }
 0x4af   : > { %14021 = vst [vmem:[#allocation206_spill] sm:$0xff] %v10303_v23  ;;  %14022 = vst [vmem:[#allocation207_spill] sm:$0xff] %v10305_v17  ;;  %v10315_v58 = vsel %vm656_vm5, %v14023_v36, %v2975_v12  ;;  %v10325_v23 = vsel %vm6330_vm7, %v2992_v2, 0.0  ;;  %v10337_v12 = vsel %vm6415_vm9, %v3008_v14, 0.0  ;;  %v10375_v13 = vpop.permute.xlu0 %3585  ;;  %v10383_v15 = vmul.f32 %v14032_v61, %v10329_v57  ;;  %v14058_v17 = vld [vmem:[#allocation187_spill] sm:$0xff] }
 0x4b0   : > { %14024 = vst [vmem:[#allocation208_spill] sm:$0xff] %v10315_v58  ;;  %14025 = vst [vmem:[#allocation209_spill] sm:$0xff] %v10319_v27  ;;  %v3439_v36 = vld [vmem:[#allocation8 + $0x2] ss:$8 sm:$0xf]  ;;  %4086 = vrot.lane.b32.xlu0 %v10315_v58, %s5333_s30  ;;  %v10367_v52 = vmul.f32 %v9855_v63, %v10315_v58  ;;  %v10379_v33 = vmul.f32 %v14032_v61, %v10325_v23  ;;  %v10387_v63 = vmul.f32 %v14032_v61, %v10333_v47 }
 0x4b1   : > { %14026 = vst [vmem:[#allocation210_spill] sm:$0xff] %v10333_v47  ;;  %14027 = vst [vmem:[#allocation211_spill] sm:$0xff] %v10337_v12  ;;  %v10391_v21 = vmul.f32 %v14032_v61, %v10337_v12  ;;  %v10394_v2 = vrot.slane %v3439_v36, %v13988_v32  ;;  %4096 = vrot.lane.b32.xlu1 %v10325_v23, %s5333_s30  ;;  %v10400_v14 = vmul.f32 %v14032_v61, %v10351_v43  ;;  %v14067_v58 = vld [vmem:[#allocation129_spill] sm:$0xff] }
 0x4b2   : > { %14028 = vst [vmem:[#allocation212_spill] sm:$0xff] %v10341_v8  ;;  %14029 = vst [vmem:[#allocation213_spill] sm:$0xff] %v10347_v18  ;;  %v14044_v8 = vld [vmem:[#allocation85_spill] sm:$0xff]  ;;  %v10491_v25 = vmul.f32 %v9874_v16, %v13810_v5  ;;  %v10495_v18 = vmul.f32 %v9874_v16, %v13954_v34 }
 0x4b3   : > { %14030 = vst [vmem:[#allocation214_spill] sm:$0xff] %v10355_v51  ;;  %14031 = vst [vmem:[#allocation215_spill] sm:$0xff] %v10359_v19  ;;  %v10408_v19 = vmul.f32 %v9848_v4, %v14044_v8  ;;  %v10426_v8 = vmul.f32 %v9874_v16, %v13797_v50  ;;  %v14057_v50 = vld [vmem:[#allocation197_spill] sm:$0xff] }
 0x4b4   : > { %14033 = vst [vmem:[#allocation149_spill] sm:$0xff] %v10363_v40  ;;  %14034 = vst [vmem:[#allocation216_spill] sm:$0xff] %v10367_v52  ;;  %v10404_v52 = vmul.f32 %v14032_v61, %v10355_v51  ;;  %4090 = vrot.lane.b32.xlu0 %v10329_v57, %s5333_s30  ;;  %v10422_v61 = vmul.f32 %v9848_v4, %v9179_v7  ;;  %v10436_v40 = vmul.f32 %v9848_v4, %v13798_v37  ;;  %v10454_v37 = vpop.permute.xlu0 %3653 }
 0x4b5   : > { %14035 = vst [vmem:[#allocation217_spill] sm:$0xff] %v10369_v35  ;;  %14036 = vst [vmem:[#allocation218_spill] sm:$0xff] %v10373_v31  ;;  %v14046_v31 = vld [vmem:[#allocation200_spill] sm:$0xff]  ;;  %v10444_v7 = vmul.f32 %v9874_v16, %v13953_v53  ;;  %4100 = vrot.lane.b32.xlu1 %v10333_v47, %s5333_s30 }
 0x4b6   : > { %14037 = vst [vmem:[#allocation219_spill] sm:$0xff] %v10375_v13  ;;  %14038 = vst [vmem:[#allocation220_spill] sm:$0xff] %v10379_v33  ;;  %v10418_v33 = vmul.f32 %v9848_v4, %v9181_v11  ;;  %v10440_v11 = vmul.f32 %v9874_v16, %v13801_v45  ;;  %v10458_v45 = vmul.f32 %v9874_v16, %v13941_v10 }
 0x4b7   : > { %14039 = vst [vmem:[#allocation221_spill] sm:$0xff] %v10383_v15  ;;  %14040 = vst [vmem:[#allocation222_spill] sm:$0xff] %v10387_v63  ;;  %v10462_v4 = vmul.f32 %v9874_v16, %v13806_v29  ;;  %v3128_v10 = vsel %vm801_vm10, %v14069_v60, %v14068_v59  ;;  %v14070_v29 = vld [vmem:[#allocation49_spill] sm:$0xff] }
 0x4b8   : > { %14041 = vst [vmem:[#allocation223_spill] sm:$0xff] %v10391_v21  ;;  %14042 = vst [vmem:[#allocation224_spill] sm:$0xff] %v10400_v14  ;;  %v14047_v21 = vld [vmem:[#allocation125_spill] sm:$0xff]  ;;  %v10432_v14 = vmul.f32 %v9858_v48, %v13995_v20  ;;  %v14060_v20 = vld [vmem:[#allocation43_spill] sm:$0xff]  ;;  %4094 = vrot.lane.b32.xlu0 %v10319_v27, %s5333_s30  ;;  %v3348_v34 = vmul.f32 %v9966_v49, %v3128_v10  ;;  %v10517_v41 = vpop.permute.xlu0 %3657  ;;  %v10524_v27 = vrot.slane %v3439_v36, %v13878_v22 }
 0x4b9   : > { %14043 = vst [vmem:[#allocation225_spill] sm:$0xff] %v10404_v52  ;;  %14045 = vst [vmem:[#allocation85_spill] sm:$0xff] %v10408_v19  ;;  %v3122_v15 = vsel %vm801_vm10, %v14047_v21, %v14046_v31  ;;  %v10428_v52 = vpop.permute.xlu1 %3659  ;;  %v14064_v48 = vld [vmem:[#allocation46_spill] sm:$0xff]  ;;  %4104 = vrot.lane.b32.xlu1 %v10337_v12, %s5333_s30 }
 0x4ba   : > { %14049 = vst [vmem:[#allocation200_spill] sm:$0xff] %v10418_v33  ;;  %14050 = vst [vmem:[#allocation125_spill] sm:$0xff] %v10422_v61  ;;  %v3124_v61 = vsel %vm801_vm10, %v14058_v17, %v14057_v50  ;;  %v14059_v33 = vld [vmem:[#allocation201_spill] sm:$0xff]  ;;  %v3324_v53 = vmul.f32 %v9966_v49, %v3122_v15  ;;  %v14066_v19 = vld [vmem:[#allocation82_spill] sm:$0xff] }
 0x4bb   : > { %14051 = vst [vmem:[#allocation139_spill] sm:$0xff] %v10426_v8  ;;  %14052 = vst [vmem:[#allocation226_spill] sm:$0xff] %v10428_v52  ;;  %v3123_v6 = vsel %vm801_vm10, %v14067_v58, %v14066_v19  ;;  %v14071_v15 = vld [vmem:[#allocation199_spill] sm:$0xff]  ;;  %v3332_v62 = vmul.f32 %v9966_v49, %v3124_v61  ;;  %v14078_v61 = vld [vmem:[#allocation74_spill] sm:$0xff] }
 0x4bc   : > { %14053 = vst [vmem:[#allocation227_spill] sm:$0xff] %v10432_v14  ;;  %14054 = vst [vmem:[#allocation228_spill] sm:$0xff] %v10436_v40  ;;  %v3121_v14 = vsel %vm801_vm10, %v14060_v20, %v14059_v33  ;;  %v14084_v10 = vld [vmem:[#allocation150_spill] sm:$0xff]  ;;  %4098 = vrot.lane.b32.xlu0 %v10351_v43, %s5333_s30 }
 0x4bd   : > { %14055 = vst [vmem:[#allocation229_spill] sm:$0xff] %v10440_v11  ;;  %14056 = vst [vmem:[#allocation230_spill] sm:$0xff] %v10444_v7  ;;  %v14065_v11 = vld [vmem:[#allocation196_spill] sm:$0xff]  ;;  %v3320_v42 = vmul.f32 %v9966_v49, %v3121_v14  ;;  %v3114_v7 = vsel %vm801_vm10, %v14046_v31, %v14075_v54  ;;  %v10508_v5 = vpop.permute.xlu1 %3663  ;;  %v14079_v14 = vld [vmem:[#allocation81_spill] sm:$0xff]  ;;  %v10520_v31 = vadd.f32 %v9955_v3, %v3324_v53  ;;  %4172 = vrot.lane.b32.xlu1 %v9737_v30, %s5334_s9 }
 0x4be   : > { %14061 = vst [vmem:[#allocation197_spill] sm:$0xff] %v10454_v37  ;;  %14062 = vst [vmem:[#allocation187_spill] sm:$0xff] %v10458_v45  ;;  %v3126_v40 = vsel %vm801_vm10, %v14065_v11, %v14064_v48  ;;  %v10487_v45 = vmul.f32 %v9874_v16, %v13967_v1  ;;  %v10504_v1 = vrot.slane %v3439_v36, %v13875_v0  ;;  %v14085_v3 = vld [vmem:[#allocation88_spill] sm:$0xff] }
 0x4bf   : > { %14063 = vst [vmem:[#allocation201_spill] sm:$0xff] %v10462_v4  ;;  %v3125_v4 = vsel %vm801_vm10, %v14071_v15, %v14070_v29  ;;  %14073 = vst [vmem:[#allocation46_spill] sm:$0xff] %v10491_v25  ;;  %v3340_v25 = vmul.f32 %v9966_v49, %v3126_v40  ;;  %v3328_v16 = vmul.f32 %v9966_v49, %v3123_v6 }
 0x4c0   : > { %14072 = vst [vmem:[#allocation43_spill] sm:$0xff] %v10487_v45  ;;  %14074 = vst [vmem:[#allocation196_spill] sm:$0xff] %v10495_v18  ;;  %v10506_v45 = vld [vmem:[#allocation8 + $0x3] ss:$8 sm:$0xf]  ;;  %v3127_v18 = vsel %vm801_vm10, %v14079_v14, %v14078_v61  ;;  %v3336_v8 = vmul.f32 %v9966_v49, %v3125_v4  ;;  %v10527_v40 = vrot.slane %v3439_v36, %v13880_v44  ;;  %4102 = vrot.lane.b32.xlu0 %v10355_v51, %s5333_s30 }
 0x4c1   : > { %14076 = vst [vmem:[#allocation82_spill] sm:$0xff] %v10504_v1  ;;  %14077 = vst [vmem:[#allocation129_spill] sm:$0xff] %v10508_v5  ;;  %v3325_v6 = vmul.f32 %v10193_v26, %v3114_v7  ;;  %v3116_v47 = vsel %vm801_vm10, %v14057_v50, %v14084_v10  ;;  %v3113_v4 = vsel %vm801_vm10, %v14059_v33, %v14085_v3  ;;  %v10558_v12 = vpop.permute.xlu1 %3667 }
 0x4c2   : > { %14080 = vst [vmem:[#allocation75_spill] sm:$0xff] %v10517_v41  ;;  %14081 = vst [vmem:[#allocation130_spill] sm:$0xff] %v10520_v31  ;;  %v10542_v53 = vrot.slane %v10506_v45, %v13875_v0  ;;  %v10547_v36 = vadd.f32 %v9962_v9, %v3332_v62  ;;  %v3344_v7 = vmul.f32 %v9966_v49, %v3127_v18  ;;  %v14087_v31 = vld [vmem:[#allocation89_spill] sm:$0xff] }
 0x4c3   : > { %14082 = vst [vmem:[#allocation49_spill] sm:$0xff] %v10524_v27  ;;  %14083 = vst [vmem:[#allocation199_spill] sm:$0xff] %v10527_v40  ;;  %v3118_v50 = vsel %vm801_vm10, %v14064_v48, %v14087_v31  ;;  %v14088_v40 = vld [vmem:[#allocation21_spill] sm:$0xff]  ;;  %v10561_v27 = vadd.f32 %v10073_v28, %v3320_v42  ;;  %v10564_v9 = vadd.f32 %v10090_v56, %v3340_v25  ;;  %v10572_v48 = vpop.permute.xlu0 %3661  ;;  %v14093_v42 = vld [vmem:[#allocation51_spill] sm:$0xff] }
 0x4c4   : > { %14086 = vst [vmem:[#allocation73_spill] sm:$0xff] %v10547_v36  ;;  %v3136_v33 = vsel %vm801_vm10, %v14088_v40, %v14069_v60  ;;  %v10567_v49 = vadd.f32 %v9972_v55, %v3328_v16  ;;  %v10570_v62 = vadd.f32 %v10094_v24, %v3348_v34  ;;  %v10575_v18 = vadd.f32 %v10098_v38, %v3336_v8  ;;  %v14094_v55 = vld [vmem:[#allocation30_spill] sm:$0xff]  ;;  %v14098_v8 = vld [vmem:[#allocation92_spill] sm:$0xff] }
 0x4c5   : > { %14089 = vst [vmem:[#allocation74_spill] sm:$0xff] %v10564_v9  ;;  %v3333_v60 = vmul.f32 %v10193_v26, %v3116_v47  ;;  %v3321_v36 = vmul.f32 %v10193_v26, %v3113_v4  ;;  %v3115_v28 = vsel %vm801_vm10, %v14066_v19, %v14093_v42  ;;  %v10586_v24 = vadd.f32 %v14094_v55, %v3325_v6  ;;  %v14096_v47 = vld [vmem:[#allocation180_spill] sm:$0xff]  ;;  %v14099_v16 = vld [vmem:[#allocation90_spill] sm:$0xff]  ;;  %v14100_v6 = vld [vmem:[#allocation33_spill] sm:$0xff] }
 0x4c6   : > { %14090 = vst [vmem:[#allocation81_spill] sm:$0xff] %v10567_v49  ;;  %14091 = vst [vmem:[#allocation150_spill] sm:$0xff] %v10570_v62  ;;  %v3341_v56 = vmul.f32 %v10193_v26, %v3118_v50  ;;  %v3165_v38 = vsel %vm503_vm11, %v3136_v33, 0.0  ;;  %v10593_v25 = vrot.slane %v10506_v45, %v13878_v22  ;;  %v10598_v19 = vadd.f32 %v14096_v47, %v3344_v7  ;;  %v10612_v50 = vpop.permute.xlu1 %3671  ;;  %v14101_v33 = vld [vmem:[#allocation25_spill] sm:$0xff]  ;;  %v14107_v62 = vld [vmem:[#allocation123_spill] sm:$0xff] }
 0x4c7   : > { %14092 = vst [vmem:[#allocation88_spill] sm:$0xff] %v10575_v18  ;;  %v3117_v30 = vsel %vm801_vm10, %v14070_v29, %v14098_v8  ;;  %v3120_v34 = vsel %vm801_vm10, %v14068_v59, %v14099_v16  ;;  %v3620_v4 = vsel %vm801_vm10, %v10299_v39, %v14100_v6  ;;  %v3329_v7 = vmul.f32 %v10193_v26, %v3115_v28  ;;  %v14102_v29 = vld [vmem:[#allocation103_spill] sm:$0xff]  ;;  %v14103_v47 = vld [vmem:[#allocation157_spill] sm:$0xff]  ;;  %v10629_v6 = vpop.permute.xlu0 %3665 }
 0x4c8   : > { %14095 = vst [vmem:[#allocation89_spill] sm:$0xff] %v10593_v25  ;;  %14097 = vst [vmem:[#allocation21_spill] sm:$0xff] %v10598_v19  ;;  %v3135_v55 = vsel %vm801_vm10, %v14101_v33, %v14079_v14  ;;  %v3256_v19 = vsel %vm938_vm12, %v14103_v47, %v14102_v29  ;;  %v10627_v59 = vsel %vm938_vm12, %v10369_v35, %v10612_v50  ;;  %v14105_v18 = vld [vmem:[#allocation87_spill] sm:$0xff]  ;;  %v14108_v14 = vld [vmem:[#allocation94_spill] sm:$0xff] }
 0x4c9   : > { %14104 = vst [vmem:[#allocation51_spill] sm:$0xff] %v10627_v59  ;;  %v10632_v28 = vadd.f32 %v14105_v18, %v3333_v60  ;;  %v10635_v49 = vadd.f32 %v14107_v62, %v3321_v36  ;;  %v3130_v9 = vsel %vm801_vm10, %v14108_v14, %v14047_v21  ;;  %v14109_v29 = vld [vmem:[#allocation99_spill] sm:$0xff]  ;;  %v14110_v47 = vld [vmem:[#allocation29_spill] sm:$0xff]  ;;  %v3337_v51 = vmul.f32 %v10193_v26, %v3117_v30 }
 0x4ca   : > { %v3347_v39 = vmul.f32 %v14109_v29, %v3165_v38  ;;  %4176 = vrot.lane.b32.xlu1 %v14110_v47, %s5334_s9  ;;  %v14111_v35 = vld [vmem:[#allocation83_spill] sm:$0xff]  ;;  %v3349_v18 = vmul.f32 %v10193_v26, %v3120_v34  ;;  %v3649_v36 = vsel %vm503_vm11, %v3620_v4, 0.0  ;;  %v3106_v21 = vsel %vm801_vm10, %v14075_v54, %v14108_v14  ;;  %v10664_v38 = vpop.permute.xlu1 %3675  ;;  %v14115_v30 = vld [vmem:[#allocation137_spill] sm:$0xff]  ;;  %v14119_v14 = vld [vmem:[#allocation190_spill] sm:$0xff] }
 0x4cb   : > { %14106 = vst [vmem:[#allocation30_spill] sm:$0xff] %v10632_v28  ;;  %v10645_v59 = vadd.f32 %v14111_v35, %v3341_v56  ;;  %v14113_v62 = vld [vmem:[#allocation183_spill] sm:$0xff]  ;;  %v3161_v60 = vsel %vm503_vm11, %v3135_v55, 0.0  ;;  %v3489_v35 = vmul.f32 %v10394_v2, %v3256_v19  ;;  %v10662_v56 = vrot.slane %v10506_v45, %v13988_v32  ;;  %v14117_v47 = vld [vmem:[#allocation177_spill] sm:$0xff]  ;;  %v10681_v55 = vpop.permute.xlu0 %3669 }
 0x4cc   : > { %4170 = vrot.lane.b32.xlu0 %v14113_v62, %s5334_s9  ;;  %v10667_v34 = vadd.f32 %v14115_v30, %v3329_v7  ;;  %v3141_v4 = vsel %vm503_vm11, %v3130_v9, 0.0  ;;  %v3619_v54 = vsel %vm801_vm10, %v10375_v13, %v14117_v47  ;;  %v10679_v19 = vsel %vm938_vm12, %v10428_v52, %v10664_v38  ;;  %v14120_v7 = vld [vmem:[#allocation102_spill] sm:$0xff]  ;;  %v14121_v30 = vld [vmem:[#allocation101_spill] sm:$0xff] }
 0x4cd   : > { %14112 = vst [vmem:[#allocation180_spill] sm:$0xff] %v10645_v59  ;;  %14114 = vst [vmem:[#allocation92_spill] sm:$0xff] %v10662_v56  ;;  %v3434_v62 = vadd.f32 %v14119_v14, %v3347_v39  ;;  %v3255_v9 = vsel %vm938_vm12, %v14121_v30, %v14120_v7  ;;  %v10693_v47 = vsel %vm938_vm12, %v10454_v37, %v10681_v55  ;;  %v14123_v59 = vld [vmem:[#allocation54_spill] sm:$0xff]  ;;  %v14130_v30 = vld [vmem:[#allocation95_spill] sm:$0xff] }
 0x4ce   : > { %14116 = vst [vmem:[#allocation90_spill] sm:$0xff] %v10667_v34  ;;  %14118 = vst [vmem:[#allocation25_spill] sm:$0xff] %v10679_v19  ;;  %v3832_v34 = vmul.f32 %v10662_v56, %v3649_v36  ;;  %4180 = vrot.lane.b32.xlu1 %v14123_v59, %s5334_s9  ;;  %v14124_v19 = vld [vmem:[#allocation76_spill] sm:$0xff]  ;;  %v14126_v39 = vld [vmem:[#allocation34_spill] sm:$0xff]  ;;  %v3343_v7 = vmul.f32 %v14109_v29, %v3161_v60  ;;  %v3645_v59 = vsel %vm503_vm11, %v3619_v54, 0.0 }
 0x4cf   : > { %14122 = vst [vmem:[#allocation87_spill] sm:$0xff] %v10693_v47  ;;  %v10698_v28 = vadd.f32 %v14124_v19, %v3337_v51  ;;  %v10701_v14 = vadd.f32 %v14126_v39, %v3349_v18  ;;  %v14128_v13 = vld [vmem:[#allocation22_spill] sm:$0xff]  ;;  %v3119_v47 = vsel %vm801_vm10, %v14078_v61, %v14130_v30  ;;  %v3521_v37 = vadd.f32 %v3489_v35, %v3434_v62  ;;  %v10717_v18 = vpop.permute.xlu1 %3679  ;;  %v14132_v60 = vld [vmem:[#allocation96_spill] sm:$0xff]  ;;  %v10733_v35 = vpop.permute.xlu0 %3673 }
 0x4d0   : > { %v3326_v52 = vmul.f32 %v14128_v13, %v3106_v21  ;;  %v14129_v36 = vld [vmem:[#allocation62_spill] sm:$0xff]  ;;  %v10713_v51 = vrot.slane %v10506_v45, %v13880_v44  ;;  %v3323_v21 = vmul.f32 %v14109_v29, %v3141_v4  ;;  %v3132_v19 = vsel %vm801_vm10, %v14132_v60, %v14058_v17  ;;  %v14134_v54 = vld [vmem:[#allocation68_spill] sm:$0xff] }
 0x4d1   : > { %14125 = vst [vmem:[#allocation123_spill] sm:$0xff] %v10698_v28  ;;  %14127 = vst [vmem:[#allocation94_spill] sm:$0xff] %v10701_v14  ;;  %4174 = vrot.lane.b32.xlu0 %v14129_v36, %s5334_s9  ;;  %v3485_v39 = vmul.f32 %v10394_v2, %v3255_v9  ;;  %v10725_v61 = vld [vmem:[#allocation8 + $0x5] ss:$8 sm:$0xf]  ;;  %v10731_v45 = vsel %vm938_vm12, %v10508_v5, %v10717_v18  ;;  %v3108_v4 = vsel %vm801_vm10, %v14084_v10, %v14132_v60 }
 0x4d2   : > { %14131 = vst [vmem:[#allocation99_spill] sm:$0xff] %v10713_v51  ;;  %14133 = vst [vmem:[#allocation29_spill] sm:$0xff] %v10731_v45  ;;  %v14135_v62 = vld [vmem:[#allocation146_spill] sm:$0xff]  ;;  %v3864_v9 = vadd.f32 %v3832_v34, %v3521_v37  ;;  %v10747_v36 = vsel %vm938_vm12, %v10517_v41, %v10733_v35  ;;  %v14138_v28 = vld [vmem:[#allocation148_spill] sm:$0xff]  ;;  %v3345_v10 = vmul.f32 %v10193_v26, %v3119_v47  ;;  %v3149_v34 = vsel %vm503_vm11, %v3132_v19, 0.0 }
 0x4d3   : > { %v3241_v17 = vsel %vm938_vm12, %v14135_v62, %v14134_v54  ;;  %14136 = vst [vmem:[#allocation83_spill] sm:$0xff] %v10747_v36  ;;  %v14137_v45 = vld [vmem:[#allocation38_spill] sm:$0xff]  ;;  %v10752_v14 = vadd.f32 %v14138_v28, %v3326_v52  ;;  %v14140_v60 = vld [vmem:[#allocation60_spill] sm:$0xff]  ;;  %v3828_v5 = vmul.f32 %v10662_v56, %v3645_v59  ;;  %v14141_v37 = vld [vmem:[#allocation147_spill] sm:$0xff]  ;;  %v10771_v28 = vrot.slane %v10725_v61, %v13988_v32  ;;  %v10773_v47 = vpop.permute.xlu1 %3683 }
 0x4d4   : > { %4184 = vrot.lane.b32.xlu1 %v14137_v45, %s5334_s9  ;;  %v3430_v44 = vadd.f32 %v14140_v60, %v3343_v7  ;;  %v14142_v36 = vld [vmem:[#allocation155_spill] sm:$0xff]  ;;  %v3334_v7 = vmul.f32 %v14128_v13, %v3108_v4  ;;  %v3462_v19 = vmul.f32 %v10504_v1, %v3241_v17  ;;  %v10781_v60 = vpop.permute.xlu0 %3677 }
 0x4d5   : > { %14139 = vst [vmem:[#allocation183_spill] sm:$0xff] %v10752_v14  ;;  %4178 = vrot.lane.b32.xlu0 %v14141_v37, %s5334_s9  ;;  %v3129_v45 = vsel %vm801_vm10, %v14142_v36, %v14060_v20  ;;  %v14143_v41 = vld [vmem:[#allocation67_spill] sm:$0xff]  ;;  %14145 = vst [vmem:[#allocation137_spill] sm:$0xff] %v10771_v28  ;;  %v3740_v20 = vsel %vm938_vm12, %v10558_v12, %v10773_v47  ;;  %v3105_v37 = vsel %vm801_vm10, %v14085_v3, %v14142_v36 }
 0x4d6   : > { %v14144_v52 = vld [vmem:[#allocation171_spill] sm:$0xff]  ;;  %v3517_v59 = vadd.f32 %v3485_v39, %v3430_v44  ;;  %v4006_v56 = vmul.f32 %v10771_v28, %v3740_v20  ;;  %v10793_v44 = vsel %vm938_vm12, %v10572_v48, %v10781_v60  ;;  %v3137_v39 = vsel %vm503_vm11, %v3129_v45, 0.0 }
 0x4d7   : > { %v3605_v26 = vsel %vm801_vm10, %v14144_v52, %v14143_v41  ;;  %v14146_v52 = vld [vmem:[#allocation63_spill] sm:$0xff]  ;;  %14147 = vst [vmem:[#allocation190_spill] sm:$0xff] %v10793_v44  ;;  %v14151_v44 = vld [vmem:[#allocation184_spill] sm:$0xff]  ;;  %v10815_v1 = vpop.permute.xlu1 %3687 }
 0x4d8   : > { %v3951_v32 = vadd.f32 %v14146_v52, %v3864_v9  ;;  %4220 = vrot.lane.b32.xlu1 %v10309_v46, %s5334_s9  ;;  %v14148_v4 = vld [vmem:[#allocation159_spill] sm:$0xff]  ;;  %v3805_v17 = vmul.f32 %v10542_v53, %v3605_v26  ;;  %v3860_v9 = vadd.f32 %v3828_v5, %v3517_v59  ;;  %v14150_v52 = vld [vmem:[#allocation118_spill] sm:$0xff]  ;;  %v10810_v14 = vadd.f32 %v14151_v44, %v3345_v10  ;;  %v10829_v10 = vpop.permute.xlu0 %3681 }
 0x4d9   : > { %v3134_v3 = vsel %vm801_vm10, %v14148_v4, %v14065_v11  ;;  %v14149_v36 = vld [vmem:[#allocation179_spill] sm:$0xff]  ;;  %v10807_v20 = vadd.f32 %v14150_v52, %v3323_v21  ;;  %v3331_v46 = vmul.f32 %v14109_v29, %v3149_v34  ;;  %v3322_v11 = vmul.f32 %v14128_v13, %v3105_v37  ;;  %v14161_v52 = vld [vmem:[#allocation170_spill] sm:$0xff] }
 0x4da   : > { %4182 = vrot.lane.b32.xlu0 %v14149_v36, %s5334_s9  ;;  %14152 = vst [vmem:[#allocation54_spill] sm:$0xff] %v10810_v14  ;;  %v10813_v45 = vadd.f32 %v4006_v56, %v3951_v32  ;;  %v3110_v5 = vsel %vm801_vm10, %v14087_v31, %v14148_v4  ;;  %v3494_v26 = vadd.f32 %v3462_v19, %v10561_v27  ;;  %v14154_v32 = vld [vmem:[#allocation31_spill] sm:$0xff]  ;;  %v3157_v59 = vsel %vm503_vm11, %v3134_v3, 0.0  ;;  %v14156_v31 = vld [vmem:[#allocation152_spill] sm:$0xff] }
 0x4db   : > { %v10827_v21 = vsel %vm938_vm12, %v10612_v50, %v10815_v1  ;;  %v10832_v56 = vadd.f32 %v14154_v32, %v3334_v7  ;;  %v3319_v34 = vmul.f32 %v14109_v29, %v3137_v39  ;;  %v3739_v27 = vsel %vm938_vm12, %v10629_v6, %v10829_v10  ;;  %v14157_v19 = vld [vmem:[#allocation16_spill] sm:$0xff]  ;;  %v14158_v39 = vld [vmem:[#allocation26_spill] sm:$0xff] }
 0x4dc   : > { %14153 = vst [vmem:[#allocation76_spill] sm:$0xff] %v10813_v45  ;;  %4224 = vrot.lane.b32.xlu1 %v10325_v23, %s5334_s9  ;;  %v3131_v50 = vsel %vm801_vm10, %v14156_v31, %v14067_v58  ;;  %v3837_v7 = vadd.f32 %v3805_v17, %v3494_v26  ;;  %v3947_v37 = vadd.f32 %v14157_v19, %v3860_v9  ;;  %v14159_v58 = vld [vmem:[#allocation97_spill] sm:$0xff]  ;;  %v10863_v9 = vpop.permute.xlu1 %3691  ;;  %v14160_v36 = vld [vmem:[#allocation136_spill] sm:$0xff] }
 0x4dd   : > { %14155 = vst [vmem:[#allocation34_spill] sm:$0xff] %v10832_v56  ;;  %v4002_v44 = vmul.f32 %v10771_v28, %v3739_v27  ;;  %v10852_v4 = vadd.f32 %v14158_v39, %v3331_v46  ;;  %v3342_v3 = vmul.f32 %v14128_v13, %v3110_v5  ;;  %v3107_v23 = vsel %vm801_vm10, %v14093_v42, %v14156_v31  ;;  %v14165_v19 = vld [vmem:[#allocation188_spill] sm:$0xff]  ;;  %v14168_v39 = vld [vmem:[#allocation209_spill] sm:$0xff] }
 0x4de   : > { %4218 = vrot.lane.b32.xlu0 %v10329_v57, %s5334_s9  ;;  %v3133_v17 = vsel %vm801_vm10, %v14159_v58, %v14071_v15  ;;  %v3234_v57 = vsel %vm938_vm12, %v14161_v52, %v14160_v36  ;;  %v10871_v46 = vrot.slane %v10725_v61, %v13875_v0  ;;  %v10879_v42 = vsel %vm938_vm12, %v10664_v38, %v10863_v9  ;;  %v10881_v15 = vpop.permute.xlu0 %3685  ;;  %v14164_v38 = vld [vmem:[#allocation210_spill] sm:$0xff]  ;;  %v14203_v28 = vld [vmem:[#allocation169_spill] sm:$0xff] }
 0x4df   : > { %v10873_v5 = vadd.f32 %v4002_v44, %v3947_v37  ;;  %14163 = vst [vmem:[#allocation62_spill] sm:$0xff] %v10879_v42  ;;  %v3339_v26 = vmul.f32 %v14109_v29, %v3157_v59  ;;  %v3145_v32 = vsel %vm503_vm11, %v3131_v50, 0.0  ;;  %v3112_v27 = vsel %vm801_vm10, %v14099_v16, %v14088_v40  ;;  %v14166_v50 = vld [vmem:[#allocation182_spill] sm:$0xff]  ;;  %v14167_v44 = vld [vmem:[#allocation20_spill] sm:$0xff]  ;;  %v14214_v0 = vld [vmem:[#allocation205_spill] sm:$0xff] }
 0x4e0   : > { %v3725_v31 = vsel %vm938_vm12, %v10681_v55, %v10881_v15  ;;  %4228 = vrot.lane.b32.xlu1 %v14164_v38, %s5334_s9  ;;  %v3109_v59 = vsel %vm801_vm10, %v14098_v8, %v14159_v58  ;;  %v3598_v37 = vsel %vm801_vm10, %v14166_v50, %v14165_v19  ;;  %v3924_v40 = vadd.f32 %v14167_v44, %v3837_v7  ;;  %v14169_v55 = vld [vmem:[#allocation160_spill] sm:$0xff]  ;;  %v14171_v58 = vld [vmem:[#allocation49_spill] sm:$0xff]  ;;  %v10915_v45 = vpop.permute.xlu1 %3695  ;;  %v14174_v44 = vld [vmem:[#allocation127_spill] sm:$0xff] }
 0x4e1   : > { %14162 = vst [vmem:[#allocation22_spill] sm:$0xff] %v10873_v5  ;;  %v3979_v16 = vmul.f32 %v10871_v46, %v3725_v31  ;;  %v10909_v5 = vadd.f32 %v14169_v55, %v3322_v11  ;;  %v3330_v38 = vmul.f32 %v14128_v13, %v3107_v23  ;;  %v3153_v8 = vsel %vm503_vm11, %v3133_v17, 0.0  ;;  %v14179_v55 = vld [vmem:[#allocation162_spill] sm:$0xff] }
 0x4e2   : > { %4222 = vrot.lane.b32.xlu0 %v14168_v39, %s5334_s9  ;;  %v3467_v56 = vmul.f32 %v14171_v58, %v3234_v57  ;;  %v3327_v19 = vmul.f32 %v14109_v29, %v3145_v32  ;;  %v3350_v7 = vmul.f32 %v14128_v13, %v3112_v27  ;;  %v10925_v11 = vsel %vm938_vm12, %v10717_v18, %v10915_v45  ;;  %v10927_v23 = vpop.permute.xlu0 %3689  ;;  %v14176_v18 = vld [vmem:[#allocation211_spill] sm:$0xff] }
 0x4e3   : > { %14170 = vst [vmem:[#allocation95_spill] sm:$0xff] %v10909_v5  ;;  %v10919_v31 = vadd.f32 %v3979_v16, %v3924_v40  ;;  %14173 = vst [vmem:[#allocation68_spill] sm:$0xff] %v10925_v11  ;;  %v3338_v17 = vmul.f32 %v14128_v13, %v3109_v59  ;;  %v3233_v57 = vsel %vm938_vm12, %v14134_v54, %v14174_v44  ;;  %v14177_v40 = vld [vmem:[#allocation163_spill] sm:$0xff]  ;;  %v14178_v59 = vld [vmem:[#allocation154_spill] sm:$0xff] }
 0x4e4   : > { %v3810_v32 = vmul.f32 %v10593_v25, %v3598_v37  ;;  %v10939_v27 = vsel %vm938_vm12, %v10733_v35, %v10927_v23  ;;  %4232 = vrot.lane.b32.xlu1 %v14176_v18, %s5334_s9  ;;  %v10944_v16 = vadd.f32 %v14177_v40, %v3319_v34  ;;  %v10947_v39 = vadd.f32 %v14178_v59, %v3339_v26  ;;  %v14181_v37 = vld [vmem:[#allocation176_spill] sm:$0xff]  ;;  %v14183_v26 = vld [vmem:[#allocation158_spill] sm:$0xff]  ;;  %v10967_v40 = vpop.permute.xlu1 %3699 }
 0x4e5   : > { %14172 = vst [vmem:[#allocation96_spill] sm:$0xff] %v10919_v31  ;;  %14175 = vst [vmem:[#allocation146_spill] sm:$0xff] %v10939_v27  ;;  %v10950_v5 = vadd.f32 %v14179_v55, %v3342_v3  ;;  %v3335_v54 = vmul.f32 %v14109_v29, %v3153_v8  ;;  %v10956_v35 = vadd.f32 %v14181_v37, %v3330_v38  ;;  %v14184_v29 = vld [vmem:[#allocation106_spill] sm:$0xff]  ;;  %v14192_v37 = vld [vmem:[#allocation71_spill] sm:$0xff] }
 0x4e6   : > { %4226 = vrot.lane.b32.xlu0 %v10351_v43, %s5334_s9  ;;  %v3111_v34 = vsel %vm801_vm10, %v14130_v30, %v14101_v33  ;;  %v3499_v18 = vadd.f32 %v3467_v56, %v10586_v24  ;;  %v3597_v3 = vsel %vm801_vm10, %v14143_v41, %v14183_v26  ;;  %v3414_v8 = vadd.f32 %v14184_v29, %v3327_v19  ;;  %v14185_v43 = vld [vmem:[#allocation48_spill] sm:$0xff]  ;;  %v10980_v24 = vpop.permute.xlu0 %3693  ;;  %v14194_v29 = vld [vmem:[#allocation214_spill] sm:$0xff]  ;;  %v14206_v27 = vld [vmem:[#allocation139_spill] sm:$0xff] }
 0x4e7   : > { %14180 = vst [vmem:[#allocation38_spill] sm:$0xff] %v10950_v5  ;;  %14182 = vst [vmem:[#allocation148_spill] sm:$0xff] %v10956_v35  ;;  %v10971_v59 = vadd.f32 %v14185_v43, %v3350_v7  ;;  %v3463_v38 = vmul.f32 %v14171_v58, %v3233_v57  ;;  %v10978_v33 = vsel %vm938_vm12, %v10773_v47, %v10967_v40  ;;  %v14187_v30 = vld [vmem:[#allocation52_spill] sm:$0xff]  ;;  %v14190_v7 = vld [vmem:[#allocation39_spill] sm:$0xff] }
 0x4e8   : > { %14186 = vst [vmem:[#allocation60_spill] sm:$0xff] %v10978_v33  ;;  %v10983_v56 = vadd.f32 %v14187_v30, %v3338_v17  ;;  %v3842_v41 = vadd.f32 %v3810_v32, %v3499_v18  ;;  %v10989_v19 = vsel %vm938_vm12, %v10781_v60, %v10980_v24  ;;  %4188 = vrot.lane.b32.xlu1 %v14190_v7, %s5334_s9  ;;  %v14191_v47 = vld [vmem:[#allocation55_spill] sm:$0xff]  ;;  %v14193_v32 = vld [vmem:[#allocation98_spill] sm:$0xff]  ;;  %v14196_v30 = vld [vmem:[#allocation164_spill] sm:$0xff]  ;;  %v3704_v5 = vpop.permute.xlu1 %3703 }
 0x4e9   : > { %14189 = vst [vmem:[#allocation155_spill] sm:$0xff] %v10989_v19  ;;  %v10995_v57 = vrot.slane %v10725_v61, %v13878_v22  ;;  %v10998_v55 = vadd.f32 %v14191_v47, %v3335_v54  ;;  %v3346_v17 = vmul.f32 %v14128_v13, %v3111_v34  ;;  %v3250_v18 = vsel %vm938_vm12, %v14193_v32, %v14192_v37  ;;  %v14195_v43 = vld [vmem:[#allocation142_spill] sm:$0xff]  ;;  %v14197_v54 = vld [vmem:[#allocation108_spill] sm:$0xff]  ;;  %v14198_v34 = vld [vmem:[#allocation105_spill] sm:$0xff] }
 0x4ea   : > { %14188 = vst [vmem:[#allocation147_spill] sm:$0xff] %v10983_v56  ;;  %v3806_v60 = vmul.f32 %v10593_v25, %v3597_v3  ;;  %4230 = vrot.lane.b32.xlu0 %v14194_v29, %s5334_s9  ;;  %v3252_v7 = vsel %vm938_vm12, %v14196_v30, %v14195_v43  ;;  %v3249_v13 = vsel %vm938_vm12, %v14197_v54, %v14135_v62  ;;  %v14199_v47 = vld [vmem:[#allocation45_spill] sm:$0xff]  ;;  %v14201_v3 = vld [vmem:[#allocation107_spill] sm:$0xff]  ;;  %v14202_v26 = vld [vmem:[#allocation66_spill] sm:$0xff]  ;;  %v11037_v25 = vpop.permute.xlu0 %3697 }
 0x4eb   : > { %v3254_v56 = vsel %vm938_vm12, %v14199_v47, %v14198_v34  ;;  %v14200_v35 = vld [vmem:[#allocation157_spill] sm:$0xff]  ;;  %v3251_v14 = vsel %vm938_vm12, %v14203_v28, %v14202_v26  ;;  %v3495_v19 = vadd.f32 %v3463_v38, %v10635_v49  ;;  %v3718_v62 = vsel %vm938_vm12, %v10815_v1, %v3704_v5  ;;  %v14208_v1 = vld [vmem:[#allocation156_spill] sm:$0xff] }
 0x4ec   : > { %v3264_v29 = vsel %vm938_vm12, %v14201_v3, %v14200_v35  ;;  %v14204_v33 = vld [vmem:[#allocation217_spill] sm:$0xff]  ;;  %v3465_v35 = vmul.f32 %v10394_v2, %v3250_v18  ;;  %v3929_v11 = vadd.f32 %v14206_v27, %v3842_v41  ;;  %v3984_v22 = vmul.f32 %v10995_v57, %v3718_v62  ;;  %4192 = vrot.lane.b32.xlu1 %v14208_v1, %s5334_s9  ;;  %v14210_v27 = vld [vmem:[#allocation116_spill] sm:$0xff] }
 0x4ed   : > { %v11035_v31 = vsel %vm938_vm12, %v3704_v5, %v14204_v33  ;;  %v11046_v49 = vsel %vm938_vm12, %v10829_v10, %v11037_v25  ;;  %v3473_v5 = vmul.f32 %v10394_v2, %v3252_v7  ;;  %v3461_v38 = vmul.f32 %v10394_v2, %v3249_v13  ;;  %v14211_v10 = vld [vmem:[#allocation101_spill] sm:$0xff]  ;;  %v3708_v7 = vpop.permute.xlu1 %3707  ;;  %v14213_v13 = vld [vmem:[#allocation202_spill] sm:$0xff]  ;;  %v14297_v33 = vld [vmem:[#allocation180_spill] sm:$0xff] }
 0x4ee   : > { %14205 = vst [vmem:[#allocation67_spill] sm:$0xff] %v11035_v31  ;;  %14207 = vst [vmem:[#allocation63_spill] sm:$0xff] %v11046_v49  ;;  %v3296_v18 = vsel %vm510_vm13, %v3264_v29, 0.0  ;;  %v3838_v31 = vadd.f32 %v3806_v60, %v3495_v19  ;;  %4186 = vrot.lane.b32.xlu0 %v14210_v27, %s5334_s9  ;;  %v3481_v41 = vmul.f32 %v10394_v2, %v3254_v56  ;;  %v14212_v49 = vld [vmem:[#allocation172_spill] sm:$0xff]  ;;  %v14215_v29 = vld [vmem:[#allocation50_spill] sm:$0xff] }
 0x4ef   : > { %v3469_v62 = vmul.f32 %v10394_v2, %v3251_v14  ;;  %v3263_v1 = vsel %vm938_vm12, %v14212_v49, %v14211_v10  ;;  %v11062_v42 = vadd.f32 %v3984_v22, %v3929_v11  ;;  %v3433_v28 = vadd.f32 %v14213_v13, %v3346_v17  ;;  %v14216_v14 = vld [vmem:[#allocation226_spill] sm:$0xff]  ;;  %v3702_v22 = vpop.permute.xlu0 %3701  ;;  %v14218_v17 = vld [vmem:[#allocation199_spill] sm:$0xff]  ;;  %v14219_v10 = vld [vmem:[#allocation197_spill] sm:$0xff] }
 0x4f0   : > { %v3596_v19 = vsel %vm801_vm10, %v14215_v29, %v14214_v0  ;;  %v11072_v56 = vsel %vm938_vm12, %v10863_v9, %v3708_v7  ;;  %v11077_v60 = vsel %vm938_vm12, %v3708_v7, %v14216_v14  ;;  %v11080_v11 = vadd.f32 %v3465_v35, %v10807_v20  ;;  %v14221_v13 = vld [vmem:[#allocation59_spill] sm:$0xff]  ;;  %v14223_v35 = vld [vmem:[#allocation230_spill] sm:$0xff] }
 0x4f1   : > { %14217 = vst [vmem:[#allocation159_spill] sm:$0xff] %v11077_v60  ;;  %v3492_v27 = vmul.f32 %v14218_v17, %v3296_v18  ;;  %v3717_v0 = vsel %vm938_vm12, %v10881_v15, %v3702_v22  ;;  %v11089_v9 = vsel %vm938_vm12, %v3702_v22, %v14219_v10  ;;  %4196 = vrot.lane.b32.xlu1 %v14221_v13, %s5334_s9  ;;  %v3292_v20 = vsel %vm510_vm13, %v3263_v1, 0.0  ;;  %v14224_v15 = vld [vmem:[#allocation24_spill] sm:$0xff]  ;;  %v14228_v13 = vld [vmem:[#allocation219_spill] sm:$0xff]  ;;  %v14229_v1 = vld [vmem:[#allocation110_spill] sm:$0xff] }
 0x4f2   : > { %14220 = vst [vmem:[#allocation179_spill] sm:$0xff] %v11089_v9  ;;  %v11094_v7 = vadd.f32 %v3473_v5, %v10852_v4  ;;  %v3925_v18 = vadd.f32 %v14223_v35, %v3838_v31  ;;  %v3980_v14 = vmul.f32 %v10995_v57, %v3717_v0  ;;  %4190 = vrot.lane.b32.xlu0 %v14224_v15, %s5334_s9  ;;  %v3712_v5 = vpop.permute.xlu1 %3711 }
 0x4f3   : > { %v11103_v60 = vadd.f32 %v3461_v38, %v10944_v16  ;;  %v11106_v22 = vadd.f32 %v3481_v41, %v10947_v39  ;;  %v11108_v10 = vadd.f32 %v3469_v62, %v3414_v8  ;;  %v3835_v4 = vmul.f32 %v10713_v51, %v3596_v19  ;;  %v14230_v38 = vld [vmem:[#allocation129_spill] sm:$0xff]  ;;  %v3706_v8 = vpop.permute.xlu0 %3705  ;;  %v14232_v41 = vld [vmem:[#allocation138_spill] sm:$0xff] }
 0x4f4   : > { %14222 = vst [vmem:[#allocation118_spill] sm:$0xff] %v11094_v7  ;;  %v3595_v31 = vsel %vm801_vm10, %v14229_v1, %v14228_v13  ;;  %v11115_v0 = vadd.f32 %v3980_v14, %v3925_v18  ;;  %v11120_v16 = vsel %vm938_vm12, %v10915_v45, %v3712_v5  ;;  %v11125_v39 = vsel %vm938_vm12, %v3712_v5, %v14230_v38  ;;  %v14233_v62 = vld [vmem:[#allocation57_spill] sm:$0xff]  ;;  %v14235_v5 = vld [vmem:[#allocation140_spill] sm:$0xff] }
 0x4f5   : > { %14225 = vst [vmem:[#allocation184_spill] sm:$0xff] %v11103_v60  ;;  %14226 = vst [vmem:[#allocation31_spill] sm:$0xff] %v11106_v22  ;;  %v3253_v19 = vsel %vm938_vm12, %v14233_v62, %v14232_v41  ;;  %v3488_v35 = vmul.f32 %v14218_v17, %v3292_v20  ;;  %v3524_v18 = vadd.f32 %v3492_v27, %v10971_v59  ;;  %v14234_v14 = vld [vmem:[#allocation181_spill] sm:$0xff]  ;;  %v14236_v13 = vld [vmem:[#allocation72_spill] sm:$0xff] }
 0x4f6   : > { %14227 = vst [vmem:[#allocation152_spill] sm:$0xff] %v11108_v10  ;;  %14231 = vst [vmem:[#allocation16_spill] sm:$0xff] %v11125_v39  ;;  %v11136_v45 = vsel %vm938_vm12, %v10927_v23, %v3706_v8  ;;  %4200 = vrot.lane.b32.xlu1 %v14234_v14, %s5334_s9  ;;  %v3242_v15 = vsel %vm938_vm12, %v14192_v37, %v14161_v52  ;;  %v3244_v20 = vsel %vm938_vm12, %v14195_v43, %v14235_v5  ;;  %v14237_v23 = vld [vmem:[#allocation75_spill] sm:$0xff]  ;;  %v14239_v38 = vld [vmem:[#allocation40_spill] sm:$0xff]  ;;  %v3716_v10 = vpop.permute.xlu1 %3715 }
 0x4f7   : > { %v3246_v59 = vsel %vm938_vm12, %v14198_v34, %v14236_v13  ;;  %v11155_v27 = vsel %vm938_vm12, %v3706_v8, %v14237_v23  ;;  %4194 = vrot.lane.b32.xlu0 %v14239_v38, %s5334_s9  ;;  %v14240_v14 = vld [vmem:[#allocation145_spill] sm:$0xff]  ;;  %v14242_v43 = vld [vmem:[#allocation103_spill] sm:$0xff]  ;;  %v3867_v9 = vadd.f32 %v3835_v4, %v3524_v18  ;;  %v3831_v34 = vmul.f32 %v10713_v51, %v3595_v31  ;;  %v14243_v22 = vld [vmem:[#allocation132_spill] sm:$0xff]  ;;  %v3710_v31 = vpop.permute.xlu0 %3709 }
 0x4f8   : > { %14238 = vst [vmem:[#allocation26_spill] sm:$0xff] %v11155_v27  ;;  %v3243_v52 = vsel %vm938_vm12, %v14202_v26, %v14240_v14  ;;  %v14241_v37 = vld [vmem:[#allocation109_spill] sm:$0xff]  ;;  %v3245_v8 = vsel %vm938_vm12, %v14232_v41, %v14243_v22  ;;  %v3258_v23 = vsel %vm938_vm12, %v14160_v36, %v14193_v32  ;;  %v14244_v26 = vld [vmem:[#allocation126_spill] sm:$0xff]  ;;  %v11183_v4 = vsel %vm938_vm12, %v10967_v40, %v3716_v10 }
 0x4f9   : > { %v3248_v39 = vsel %vm938_vm12, %v14242_v43, %v14241_v37  ;;  %v11178_v38 = vrot.slane %v10725_v61, %v14244_v26  ;;  %14246 = vst [vmem:[#allocation136_spill] sm:$0xff] %v11183_v4  ;;  %v3520_v18 = vadd.f32 %v3488_v35, %v3433_v28  ;;  %v3748_v41 = vsel %vm938_vm12, %v3716_v10, %v10558_v12  ;;  %v14249_v36 = vld [vmem:[#allocation17_spill] sm:$0xff]  ;;  %v14250_v28 = vld [vmem:[#allocation82_spill] sm:$0xff] }
 0x4fa   : > { %v11191_v43 = vsel %vm938_vm12, %v10980_v24, %v3710_v31  ;;  %v11196_v61 = vsel %vm938_vm12, %v3710_v31, %v10572_v48  ;;  %4204 = vrot.lane.b32.xlu1 %v14249_v36, %s5334_s9  ;;  %v3477_v40 = vmul.f32 %v10394_v2, %v3253_v19  ;;  %v3466_v32 = vmul.f32 %v14250_v28, %v3242_v15  ;;  %v14251_v24 = vld [vmem:[#allocation77_spill] sm:$0xff]  ;;  %v14252_v48 = vld [vmem:[#allocation204_spill] sm:$0xff]  ;;  %v11211_v27 = vpop.permute.xlu1 %4044  ;;  %v14255_v26 = vld [vmem:[#allocation102_spill] sm:$0xff] }
 0x4fb   : > { %14245 = vst [vmem:[#allocation97_spill] sm:$0xff] %v11178_v38  ;;  %14247 = vst [vmem:[#allocation170_spill] sm:$0xff] %v11191_v43  ;;  %v3474_v35 = vmul.f32 %v14250_v28, %v3244_v20  ;;  %v3780_v12 = vsel %vm510_vm13, %v3748_v41, 0.0  ;;  %4198 = vrot.lane.b32.xlu0 %v14251_v24, %s5334_s9  ;;  %v3272_v10 = vsel %vm510_vm13, %v3258_v23, 0.0  ;;  %v3954_v31 = vadd.f32 %v14252_v48, %v3867_v9  ;;  %v3714_v41 = vpop.permute.xlu0 %3713  ;;  %v14254_v24 = vld [vmem:[#allocation112_spill] sm:$0xff]  ;;  %v14266_v51 = vld [vmem:[#allocation166_spill] sm:$0xff] }
 0x4fc   : > { %14248 = vst [vmem:[#allocation210_spill] sm:$0xff] %v11196_v61  ;;  %v3863_v61 = vadd.f32 %v3831_v34, %v3520_v18  ;;  %v4009_v36 = vmul.f32 %v11178_v38, %v3780_v12  ;;  %14253 = vst [vmem:[#allocation182_spill] sm:$0xff] %v11211_v27  ;;  %v3482_v2 = vmul.f32 %v14250_v28, %v3246_v59  ;;  %v14285_v62 = vld [vmem:[#allocation178_spill] sm:$0xff]  ;;  %v14291_v7 = vld [vmem:[#allocation33_spill] sm:$0xff] }
 0x4fd   : > { %v3470_v19 = vmul.f32 %v14250_v28, %v3243_v52  ;;  %v3490_v15 = vmul.f32 %v14250_v28, %v3248_v39  ;;  %v3478_v20 = vmul.f32 %v14250_v28, %v3245_v8  ;;  %v3247_v23 = vsel %vm938_vm12, %v14255_v26, %v14254_v24  ;;  %v14258_v39 = vld [vmem:[#allocation84_spill] sm:$0xff]  ;;  %v14290_v60 = vld [vmem:[#allocation58_spill] sm:$0xff]  ;;  %v14308_v43 = vld [vmem:[#allocation189_spill] sm:$0xff] }
 0x4fe   : > { %v11221_v9 = vadd.f32 %v4009_v36, %v3954_v31  ;;  %v11226_v34 = vsel %vm938_vm12, %v11037_v25, %v3714_v41  ;;  %v3747_v59 = vsel %vm938_vm12, %v3714_v41, %v10629_v6  ;;  %4208 = vrot.lane.b32.xlu1 %v14258_v39, %s5334_s9  ;;  %v3468_v52 = vmul.f32 %v14218_v17, %v3272_v10  ;;  %v14259_v8 = vld [vmem:[#allocation28_spill] sm:$0xff]  ;;  %v14260_v6 = vld [vmem:[#allocation86_spill] sm:$0xff]  ;;  %v14263_v31 = vld [vmem:[#allocation213_spill] sm:$0xff]  ;;  %v11252_v41 = vpop.permute.xlu1 %4048 }
 0x4ff   : > { %14257 = vst [vmem:[#allocation209_spill] sm:$0xff] %v11226_v34  ;;  %v3236_v26 = vsel %vm938_vm12, %v14235_v5, %v14259_v8  ;;  %v3260_v25 = vsel %vm938_vm12, %v14259_v8, %v14196_v30  ;;  %v3776_v18 = vsel %vm510_vm13, %v3747_v59, 0.0  ;;  %4202 = vrot.lane.b32.xlu0 %v14260_v6, %s5334_s9  ;;  %v11247_v12 = vadd.f32 %v3477_v40, %v10998_v55  ;;  %v14262_v10 = vld [vmem:[#allocation130_spill] sm:$0xff]  ;;  %v14264_v39 = vld [vmem:[#allocation73_spill] sm:$0xff]  ;;  %v11261_v40 = vpop.permute.xlu0 %4042  ;;  %v14293_v34 = vld [vmem:[#allocation143_spill] sm:$0xff] }
 0x500   : > { %14256 = vst [vmem:[#allocation20_spill] sm:$0xff] %v11221_v9  ;;  %v3498_v48 = vadd.f32 %v3466_v32, %v14262_v10  ;;  %v3950_v36 = vadd.f32 %v14263_v31, %v3863_v61  ;;  %v4005_v5 = vmul.f32 %v11178_v38, %v3776_v18  ;;  %v3506_v9 = vadd.f32 %v3474_v35, %v14264_v39  ;;  %v14265_v30 = vld [vmem:[#allocation74_spill] sm:$0xff]  ;;  %v14271_v10 = vld [vmem:[#allocation88_spill] sm:$0xff]  ;;  %v14272_v39 = vld [vmem:[#allocation183_spill] sm:$0xff] }
 0x501   : > { %14261 = vst [vmem:[#allocation160_spill] sm:$0xff] %v11247_v12  ;;  %v3514_v8 = vadd.f32 %v3482_v2, %v14265_v30  ;;  %v3486_v59 = vmul.f32 %v14250_v28, %v3247_v23  ;;  %v3606_v55 = vsel %vm801_vm10, %v14266_v51, %v14166_v50  ;;  %v3280_v61 = vsel %vm510_vm13, %v3260_v25, 0.0  ;;  %v14268_v28 = vld [vmem:[#allocation79_spill] sm:$0xff]  ;;  %v14269_v23 = vld [vmem:[#allocation81_spill] sm:$0xff]  ;;  %v14270_v50 = vld [vmem:[#allocation150_spill] sm:$0xff] }
 0x502   : > { %v3475_v32 = vmul.f32 %v14171_v58, %v3236_v26  ;;  %v3257_v35 = vsel %vm938_vm12, %v14174_v44, %v14197_v54  ;;  %v11270_v2 = vadd.f32 %v4005_v5, %v3950_v36  ;;  %4212 = vrot.lane.b32.xlu1 %v14268_v28, %s5334_s9  ;;  %v3502_v18 = vadd.f32 %v3470_v19, %v14269_v23  ;;  %v14274_v26 = vld [vmem:[#allocation64_spill] sm:$0xff]  ;;  %v14276_v54 = vld [vmem:[#allocation61_spill] sm:$0xff]  ;;  %v14277_v5 = vld [vmem:[#allocation174_spill] sm:$0xff]  ;;  %v11295_v23 = vpop.permute.xlu1 %4052 }
 0x503   : > { %v3522_v6 = vadd.f32 %v3490_v15, %v14270_v50  ;;  %v3510_v31 = vadd.f32 %v3478_v20, %v14271_v10  ;;  %v11278_v25 = vadd.f32 %v3468_v52, %v14272_v39  ;;  %4206 = vrot.lane.b32.xlu0 %v14274_v26, %s5334_s9  ;;  %v3809_v30 = vmul.f32 %v10542_v53, %v3606_v55  ;;  %v14275_v44 = vld [vmem:[#allocation36_spill] sm:$0xff]  ;;  %v14278_v28 = vld [vmem:[#allocation65_spill] sm:$0xff]  ;;  %v14279_v15 = vld [vmem:[#allocation122_spill] sm:$0xff]  ;;  %v11309_v38 = vpop.permute.xlu0 %4046 }
 0x504   : > { %14267 = vst [vmem:[#allocation49_spill] sm:$0xff] %v11270_v2  ;;  %v3608_v36 = vsel %vm801_vm10, %v14276_v54, %v14275_v44  ;;  %v3610_v19 = vsel %vm801_vm10, %v14278_v28, %v14277_v5  ;;  %v14280_v20 = vld [vmem:[#allocation27_spill] sm:$0xff]  ;;  %v14281_v50 = vld [vmem:[#allocation21_spill] sm:$0xff]  ;;  %v11301_v55 = vmul.f32 %v14218_v17, %v3280_v61  ;;  %v3268_v39 = vsel %vm510_vm13, %v3257_v35, 0.0  ;;  %v14283_v26 = vld [vmem:[#allocation104_spill] sm:$0xff] }
 0x505   : > { %14273 = vst [vmem:[#allocation127_spill] sm:$0xff] %v11278_v25  ;;  %v3607_v52 = vsel %vm801_vm10, %v14280_v20, %v14279_v15  ;;  %v11298_v10 = vadd.f32 %v3486_v59, %v14281_v50  ;;  %v3238_v2 = vsel %vm938_vm12, %v14236_v13, %v14283_v26  ;;  %v14284_v25 = vld [vmem:[#allocation30_spill] sm:$0xff]  ;;  %v3235_v59 = vsel %vm938_vm12, %v14240_v14, %v14285_v62  ;;  %v14286_v35 = vld [vmem:[#allocation141_spill] sm:$0xff] }
 0x506   : > { %14282 = vst [vmem:[#allocation211_spill] sm:$0xff] %v11301_v55  ;;  %v11312_v12 = vadd.f32 %v3475_v32, %v14284_v25  ;;  %v3240_v61 = vsel %vm938_vm12, %v14241_v37, %v14201_v3  ;;  %v3237_v13 = vsel %vm938_vm12, %v14243_v22, %v14286_v35  ;;  %v14287_v50 = vld [vmem:[#allocation113_spill] sm:$0xff]  ;;  %v3262_v32 = vsel %vm938_vm12, %v14283_v26, %v14199_v47  ;;  %v14288_v3 = vld [vmem:[#allocation198_spill] sm:$0xff] }
 0x507   : > { %4216 = vrot.lane.b32.xlu1 %v14287_v50, %s5334_s9  ;;  %v3817_v14 = vmul.f32 %v10542_v53, %v3608_v36  ;;  %v3825_v25 = vmul.f32 %v10542_v53, %v3610_v19  ;;  %v3813_v55 = vmul.f32 %v10542_v53, %v3607_v52  ;;  %4210 = vrot.lane.b32.xlu0 %v14288_v3, %s5334_s9  ;;  %v11337_v37 = vld [vmem:[#allocation8 + $0x6] ss:$8 sm:$0xf]  ;;  %v11347_v36 = vpop.permute.xlu1 %4056 }
 0x508   : > { %v11340_v22 = vmul.f32 %v14218_v17, %v3268_v39  ;;  %v3483_v50 = vmul.f32 %v14171_v58, %v3238_v2  ;;  %v3841_v35 = vadd.f32 %v3809_v30, %v3498_v48  ;;  %v3612_v47 = vsel %vm801_vm10, %v14291_v7, %v14290_v60  ;;  %v14292_v3 = vld [vmem:[#allocation133_spill] sm:$0xff]  ;;  %v11356_v2 = vpop.permute.xlu0 %4050 }
 0x509   : > { %v3471_v19 = vmul.f32 %v14171_v58, %v3235_v59  ;;  %v3491_v52 = vmul.f32 %v14171_v58, %v3240_v61  ;;  %v3479_v26 = vmul.f32 %v14171_v58, %v3237_v13  ;;  %v3609_v39 = vsel %vm801_vm10, %v14293_v34, %v14292_v3  ;;  %v14295_v59 = vld [vmem:[#allocation117_spill] sm:$0xff] }
 0x50a   : > { %14289 = vst [vmem:[#allocation163_spill] sm:$0xff] %v11340_v22  ;;  %v11360_v48 = vsel %vm510_vm13, %v3262_v32, 0.0  ;;  %v3239_v7 = vsel %vm938_vm12, %v14254_v24, %v14212_v49  ;;  %v3983_v30 = vmul.f32 %v10871_v46, %v10827_v21  ;;  %v11370_v61 = vrot.slane %v11337_v37, %v14295_v59  ;;  %v14296_v32 = vld [vmem:[#allocation208_spill] sm:$0xff]  ;;  %v14298_v20 = vld [vmem:[#allocation169_spill] sm:$0xff] }
 0x50b   : > { %14294 = vst [vmem:[#allocation154_spill] sm:$0xff] %v11360_v48  ;;  %v3849_v13 = vadd.f32 %v3817_v14, %v3506_v9  ;;  %v3857_v22 = vadd.f32 %v3825_v25, %v3514_v8  ;;  %v3845_v17 = vadd.f32 %v3813_v55, %v3502_v18  ;;  %v3833_v34 = vmul.f32 %v10542_v53, %v3612_v47  ;;  %v14300_v24 = vld [vmem:[#allocation168_spill] sm:$0xff]  ;;  %v11384_v9 = vpop.permute.xlu1 %4060  ;;  %v14301_v8 = vld [vmem:[#allocation90_spill] sm:$0xff]  ;;  %v14303_v25 = vld [vmem:[#allocation123_spill] sm:$0xff] }
 0x50c   : > { %4214 = vrot.lane.b32.xlu0 %v14296_v32, %s5334_s9  ;;  %v3515_v48 = vadd.f32 %v3483_v50, %v14297_v33  ;;  %v11380_v49 = vsel %vm938_vm12, %v14285_v62, %v14298_v20  ;;  %v3821_v21 = vmul.f32 %v10542_v53, %v3609_v39  ;;  %v3928_v59 = vadd.f32 %v14300_v24, %v3841_v35  ;;  %v14302_v55 = vld [vmem:[#allocation94_spill] sm:$0xff]  ;;  %v11397_v62 = vpop.permute.xlu0 %4054  ;;  %s5249_s9 = scalar_lea.vmem %s12363_s12, 4096 }
 0x50d   : > { %14299 = vst [vmem:[#allocation162_spill] sm:$0xff] %v11380_v49  ;;  %v3503_v18 = vadd.f32 %v3471_v19, %v14301_v8  ;;  %v11388_v14 = vadd.f32 %v3491_v52, %v14302_v55  ;;  %v11391_v47 = vadd.f32 %v3479_v26, %v14303_v25  ;;  %v4123_v33 = vsel %vm801_vm10, %v11211_v27, %v11384_v9  ;;  %v14304_v50 = vld [vmem:[#allocation62_spill] sm:$0xff]  ;;  %v14306_v26 = vld [vmem:[#allocation85_spill] sm:$0xff]  ;;  %p5250_p10 = scmp.ne.s32.totalorder %s12363_s12, %s5249_s9  ;;  %p5257_p1 = scmp.lt.s32.totalorder %s5255_s19, %s5249_s9 }
 0x50e   : > { %v3487_v20 = vmul.f32 %v14171_v58, %v3239_v7  ;;  %v4015_v35 = vadd.f32 %v3983_v30, %v3928_v59  ;;  %v3991_v39 = vmul.f32 %v10871_v46, %v14304_v50  ;;  %v4326_v19 = vmul.f32 %v11370_v61, %v4123_v33  ;;  %v14305_v32 = vld [vmem:[#allocation18_spill] sm:$0xff]  ;;  %v14307_v55 = vld [vmem:[#allocation173_spill] sm:$0xff]  ;;  %v14311_v30 = vld [vmem:[#allocation119_spill] sm:$0xff] }
 0x50f   : > { %v3865_v52 = vadd.f32 %v3833_v34, %v3522_v6  ;;  %v3936_v24 = vadd.f32 %v14305_v32, %v3849_v13  ;;  %v3944_v8 = vadd.f32 %v14306_v26, %v3857_v22  ;;  %v3932_v25 = vadd.f32 %v14307_v55, %v3845_v17  ;;  %v14309_v27 = vld [vmem:[#allocation177_spill] sm:$0xff]  ;;  %v11412_v7 = vpop.permute.xlu1 %4064  ;;  %v14312_v34 = vld [vmem:[#allocation56_spill] sm:$0xff]  ;;  %v14313_v17 = vld [vmem:[#allocation135_spill] sm:$0xff]  ;;  %p5251_p3 = pnand %p5250_p10, %p5525_p5  ;;  %p5258_p2 = por %p5257_p1, %p5256_p12 }
 0x510   : > { %v3853_v49 = vadd.f32 %v3821_v21, %v3510_v31  ;;  %v3611_v4 = vsel %vm801_vm10, %v14309_v27, %v14308_v43  ;;  %v11410_v58 = vadd.f32 %v4326_v19, %v4015_v35  ;;  %v11416_v59 = vrot.slane %v11337_v37, %v14311_v30  ;;  %v14314_v22 = vld [vmem:[#allocation167_spill] sm:$0xff]  ;;  %v11434_v21 = vpop.permute.xlu0 %4058  ;;  %v14315_v35 = vld [vmem:[#allocation68_spill] sm:$0xff]  ;;  %v14316_v19 = vld [vmem:[#allocation146_spill] sm:$0xff] }
 0x511   : > { %v3600_v6 = vsel %vm801_vm10, %v14275_v44, %v14312_v34  ;;  %v3602_v31 = vsel %vm801_vm10, %v14277_v5, %v14313_v17  ;;  %v3599_v27 = vsel %vm801_vm10, %v14279_v15, %v14314_v22  ;;  %v4125_v13 = vsel %vm801_vm10, %v11252_v41, %v11412_v7  ;;  %v14317_v26 = vld [vmem:[#allocation200_spill] sm:$0xff]  ;;  %v14319_v30 = vld [vmem:[#allocation125_spill] sm:$0xff]  ;;  %p5252_p7 = pneg %p5251_p3 }
 0x512   : > { %14310 = vst [vmem:[#allocation176_spill] sm:$0xff] %v11410_v58  ;;  %v4023_v33 = vadd.f32 %v3991_v39, %v3936_v24  ;;  %v3999_v44 = vmul.f32 %v10871_v46, %v14315_v35  ;;  %v4334_v50 = vmul.f32 %v11370_v61, %v4125_v13  ;;  %v4122_v5 = vsel %vm801_vm10, %v11261_v40, %v11434_v21  ;;  %v14318_v39 = vld [vmem:[#allocation89_spill] sm:$0xff] }
 0x513   : > { %v3829_v15 = vmul.f32 %v10542_v53, %v3611_v4  ;;  %v3987_v32 = vmul.f32 %v10871_v46, %v14316_v19  ;;  %v3952_v55 = vadd.f32 %v14317_v26, %v3865_v52  ;;  %v4322_v58 = vmul.f32 %v11370_v61, %v4122_v5  ;;  %v11453_v17 = vpop.permute.xlu1 %4068  ;;  %v14320_v4 = vld [vmem:[#allocation96_spill] sm:$0xff]  ;;  %v14324_v26 = vld [vmem:[#allocation19_spill] sm:$0xff]  ;;  %p5259_p4 = pnand %p5258_p2, %p5252_p7 }
 0x514   : > { %v3818_v24 = vmul.f32 %v14318_v39, %v3600_v6  ;;  %v3826_v35 = vmul.f32 %v14318_v39, %v3602_v31  ;;  %v3940_v13 = vadd.f32 %v14319_v30, %v3853_v49  ;;  %v11451_v22 = vadd.f32 %v4334_v50, %v4023_v33  ;;  %v11467_v49 = vpop.permute.xlu0 %4062  ;;  %v14322_v31 = vld [vmem:[#allocation60_spill] sm:$0xff]  ;;  %v14323_v50 = vld [vmem:[#allocation155_spill] sm:$0xff] }
 0x515   : > { %v3814_v34 = vmul.f32 %v14318_v39, %v3599_v27  ;;  %v3604_v53 = vsel %vm801_vm10, %v14290_v60, %v14215_v29  ;;  %v11461_v52 = vadd.f32 %v4322_v58, %v14320_v4  ;;  %v4127_v6 = vsel %vm801_vm10, %v11295_v23, %v11453_v17 }
 0x516   : > { %v4031_v30 = vadd.f32 %v3999_v44, %v3944_v8  ;;  %v4007_v33 = vmul.f32 %v10871_v46, %v14322_v31  ;;  %v4342_v27 = vmul.f32 %v11370_v61, %v4127_v6  ;;  %v4124_v29 = vsel %vm801_vm10, %v11309_v38, %v11467_v49 }
 0x517   : > { %14321 = vst [vmem:[#allocation106_spill] sm:$0xff] %v11461_v52  ;;  %v3861_v60 = vadd.f32 %v3829_v15, %v11298_v10  ;;  %v4019_v58 = vadd.f32 %v3987_v32, %v3932_v25  ;;  %v3995_v5 = vmul.f32 %v10871_v46, %v14323_v50  ;;  %v4330_v19 = vmul.f32 %v11370_v61, %v4124_v29  ;;  %v11487_v31 = vpop.permute.xlu1 %4072  ;;  %v14326_v15 = vld [vmem:[#allocation115_spill] sm:$0xff]  ;;  %v14328_v29 = vld [vmem:[#allocation54_spill] sm:$0xff]  ;;  %v14329_v50 = vld [vmem:[#allocation228_spill] sm:$0xff] }
 0x518   : > { %v3850_v8 = vadd.f32 %v3818_v24, %v11312_v12  ;;  %v3858_v44 = vadd.f32 %v3826_v35, %v3515_v48  ;;  %v3601_v4 = vsel %vm801_vm10, %v14292_v3, %v14324_v26  ;;  %v11485_v6 = vadd.f32 %v4342_v27, %v4031_v30  ;;  %v11496_v48 = vpop.permute.xlu0 %4066 }
 0x519   : > { %v3846_v52 = vadd.f32 %v3814_v34, %v3503_v18  ;;  %v3834_v10 = vmul.f32 %v14318_v39, %v3604_v53  ;;  %v11490_v25 = vadd.f32 %v4330_v19, %v4019_v58  ;;  %v4129_v12 = vsel %vm801_vm10, %v11347_v36, %v11487_v31  ;;  %v14327_v53 = vld [vmem:[#allocation63_spill] sm:$0xff] }
 0x51a   : > { %v3614_v3 = vsel %vm801_vm10, %v14326_v15, %v14266_v51  ;;  %v4039_v32 = vadd.f32 %v4007_v33, %v3952_v55  ;;  %v4350_v24 = vmul.f32 %v11370_v61, %v4129_v12  ;;  %v4126_v18 = vsel %vm801_vm10, %v11356_v2, %v11496_v48  ;;  %v14330_v55 = vld [vmem:[#allocation229_spill] sm:$0xff] }
 0x51b   : > { %14325 = vst [vmem:[#allocation48_spill] sm:$0xff] %v11490_v25  ;;  %v3822_v34 = vmul.f32 %v14318_v39, %v3601_v4  ;;  %v4027_v35 = vadd.f32 %v3995_v5, %v3940_v13  ;;  %v4003_v30 = vmul.f32 %v10871_v46, %v14327_v53  ;;  %v4338_v27 = vmul.f32 %v11370_v61, %v4126_v18  ;;  %v11516_v12 = vpop.permute.xlu1 %4076  ;;  %v14331_v4 = vld [vmem:[#allocation187_spill] sm:$0xff]  ;;  %v14333_v53 = vld [vmem:[#allocation92_spill] sm:$0xff] }
 0x51c   : > { %v3519_v58 = vadd.f32 %v3487_v20, %v14328_v29  ;;  %v3948_v51 = vadd.f32 %v14329_v50, %v3861_v60  ;;  %v3937_v33 = vadd.f32 %v14330_v55, %v3850_v8  ;;  %v11514_v19 = vadd.f32 %v4350_v24, %v4039_v32  ;;  %v11527_v20 = vpop.permute.xlu0 %4070  ;;  %v14332_v8 = vld [vmem:[#allocation201_spill] sm:$0xff]  ;;  %v14334_v50 = vld [vmem:[#allocation111_spill] sm:$0xff] }
 0x51d   : > { %v3625_v25 = vsel %vm503_vm11, %v3614_v3, 0.0  ;;  %v3945_v13 = vadd.f32 %v14331_v4, %v3858_v44  ;;  %v11521_v5 = vadd.f32 %v4338_v27, %v4027_v35  ;;  %v4115_v46 = vsel %vm801_vm10, %v11384_v9, %v11516_v12 }
 0x51e   : > { %v3992_v60 = vmul.f32 %v10995_v57, %v11072_v56  ;;  %v3933_v32 = vadd.f32 %v14332_v8, %v3846_v52  ;;  %v4327_v24 = vmul.f32 %v11416_v59, %v4115_v46  ;;  %v4128_v44 = vsel %vm801_vm10, %v11397_v62, %v11527_v20  ;;  %v14339_v8 = vld [vmem:[#allocation43_spill] sm:$0xff] }
 0x51f   : > { %v3866_v3 = vadd.f32 %v3834_v10, %v11388_v14  ;;  %v3854_v18 = vadd.f32 %v3822_v34, %v11391_v47  ;;  %v4035_v35 = vadd.f32 %v4003_v30, %v3948_v51  ;;  %v4346_v9 = vmul.f32 %v11370_v61, %v4128_v44  ;;  %v11548_v29 = vpop.permute.xlu1 %4080  ;;  %v14335_v47 = vld [vmem:[#allocation69_spill] sm:$0xff]  ;;  %v14336_v10 = vld [vmem:[#allocation171_spill] sm:$0xff] }
 0x520   : > { %v3808_v27 = vmul.f32 %v14333_v53, %v3625_v25  ;;  %v3603_v56 = vsel %vm801_vm10, %v14308_v43, %v14229_v1  ;;  %v11546_v52 = vadd.f32 %v4327_v24, %v11062_v42  ;;  %v11552_v14 = vrot.slane %v11337_v37, %v14334_v50  ;;  %v14337_v25 = vld [vmem:[#allocation80_spill] sm:$0xff]  ;;  %v11568_v43 = vpop.permute.xlu0 %4074 }
 0x521   : > { %v3616_v61 = vsel %vm801_vm10, %v14335_v47, %v14276_v54  ;;  %v3613_v34 = vsel %vm801_vm10, %v14337_v25, %v14336_v10  ;;  %v11562_v1 = vadd.f32 %v4346_v9, %v4035_v35  ;;  %v4117_v42 = vsel %vm801_vm10, %v11412_v7, %v11548_v29 }
 0x522   : > { %v4024_v30 = vadd.f32 %v3992_v60, %v3937_v33  ;;  %v4000_v51 = vmul.f32 %v10995_v57, %v11120_v16  ;;  %v4335_v54 = vmul.f32 %v11416_v59, %v4117_v42  ;;  %v4114_v55 = vsel %vm801_vm10, %v11434_v21, %v11568_v43  ;;  %v14340_v60 = vld [vmem:[#allocation46_spill] sm:$0xff] }
 0x523   : > { %14338 = vst [vmem:[#allocation52_spill] sm:$0xff] %v11562_v1  ;;  %v3830_v4 = vmul.f32 %v14318_v39, %v3603_v56  ;;  %v3988_v46 = vmul.f32 %v10995_v57, %v11136_v45  ;;  %v3953_v7 = vadd.f32 %v14339_v8, %v3866_v3  ;;  %v4323_v24 = vmul.f32 %v11416_v59, %v4114_v55  ;;  %v11588_v9 = vpop.permute.xlu1 %4084  ;;  %v14342_v45 = vld [vmem:[#allocation100_spill] sm:$0xff]  ;;  %v14345_v42 = vld [vmem:[#allocation170_spill] sm:$0xff]  ;;  %v14347_v55 = vld [vmem:[#allocation35_spill] sm:$0xff] }
 0x524   : > { %v3840_v33 = vadd.f32 %v3808_v27, %v11080_v11  ;;  %v3633_v16 = vsel %vm503_vm11, %v3616_v61, 0.0  ;;  %v3941_v44 = vadd.f32 %v14340_v60, %v3854_v18  ;;  %v11586_v35 = vadd.f32 %v4335_v54, %v4024_v30  ;;  %v11603_v18 = vpop.permute.xlu0 %4078  ;;  %v14344_v56 = vld [vmem:[#allocation136_spill] sm:$0xff] }
 0x525   : > { %v3621_v21 = vsel %vm503_vm11, %v3613_v34, 0.0  ;;  %v3618_v39 = vsel %vm801_vm10, %v14342_v45, %v14278_v28  ;;  %v11597_v3 = vadd.f32 %v4323_v24, %v11115_v0  ;;  %v4119_v11 = vsel %vm801_vm10, %v11453_v17, %v11588_v9 }
 0x526   : > { %14341 = vst [vmem:[#allocation39_spill] sm:$0xff] %v11586_v35  ;;  %v4032_v27 = vadd.f32 %v4000_v51, %v3945_v13  ;;  %v4008_v61 = vmul.f32 %v10995_v57, %v14344_v56  ;;  %v4343_v10 = vmul.f32 %v11416_v59, %v4119_v11  ;;  %v4116_v28 = vsel %vm801_vm10, %v11467_v49, %v11603_v18  ;;  %v14346_v51 = vld [vmem:[#allocation27_spill] sm:$0xff]  ;;  %v14352_v11 = vld [vmem:[#allocation137_spill] sm:$0xff] }
 0x527   : > { %14343 = vst [vmem:[#allocation55_spill] sm:$0xff] %v11597_v3  ;;  %v3862_v0 = vadd.f32 %v3830_v4, %v3519_v58  ;;  %v4020_v34 = vadd.f32 %v3988_v46, %v3933_v32  ;;  %v3996_v30 = vmul.f32 %v10995_v57, %v14345_v42  ;;  %v4331_v17 = vmul.f32 %v11416_v59, %v4116_v28  ;;  %v11623_v60 = vpop.permute.xlu1 %4088  ;;  %v14349_v58 = vld [vmem:[#allocation42_spill] sm:$0xff]  ;;  %v14404_v35 = vld [vmem:[#allocation97_spill] sm:$0xff] }
 0x528   : > { %v3816_v54 = vmul.f32 %v14333_v53, %v3633_v16  ;;  %v3804_v13 = vmul.f32 %v14333_v53, %v3621_v21  ;;  %v3615_v8 = vsel %vm801_vm10, %v14347_v55, %v14346_v51  ;;  %v11621_v24 = vadd.f32 %v4343_v10, %v4032_v27  ;;  %v11634_v16 = vpop.permute.xlu0 %4082  ;;  %v14351_v21 = vld [vmem:[#allocation51_spill] sm:$0xff] }
 0x529   : > { %v3641_v49 = vsel %vm503_vm11, %v3618_v39, 0.0  ;;  %v3927_v32 = vadd.f32 %v14349_v58, %v3840_v33  ;;  %v11628_v4 = vadd.f32 %v4331_v17, %v4020_v34  ;;  %v4121_v46 = vsel %vm801_vm10, %v11487_v31, %v11623_v60  ;;  %v14353_v34 = vld [vmem:[#allocation209_spill] sm:$0xff]  ;;  %v14354_v17 = vld [vmem:[#allocation118_spill] sm:$0xff]  ;;  %v14355_v58 = vld [vmem:[#allocation184_spill] sm:$0xff] }
 0x52a   : > { %14348 = vst [vmem:[#allocation71_spill] sm:$0xff] %v11621_v24  ;;  %v3982_v27 = vmul.f32 %v14352_v11, %v14351_v21  ;;  %v4040_v56 = vadd.f32 %v4008_v61, %v3953_v7  ;;  %v4351_v10 = vmul.f32 %v11416_v59, %v4121_v46  ;;  %v4118_v33 = vsel %vm801_vm10, %v11496_v48, %v11634_v16  ;;  %v14356_v61 = vld [vmem:[#allocation196_spill] sm:$0xff]  ;;  %v14358_v24 = vld [vmem:[#allocation143_spill] sm:$0xff] }
 0x52b   : > { %14350 = vst [vmem:[#allocation98_spill] sm:$0xff] %v11628_v4  ;;  %v3629_v39 = vsel %vm503_vm11, %v3615_v8, 0.0  ;;  %v4028_v28 = vadd.f32 %v3996_v30, %v3941_v44  ;;  %v4004_v31 = vmul.f32 %v10995_v57, %v14353_v34  ;;  %v4339_v42 = vmul.f32 %v11416_v59, %v4118_v33  ;;  %v11653_v4 = vpop.permute.xlu1 %4092  ;;  %v14359_v8 = vld [vmem:[#allocation207_spill] sm:$0xff]  ;;  %v14361_v30 = vld [vmem:[#allocation182_spill] sm:$0xff] }
 0x52c   : > { %v3848_v51 = vadd.f32 %v3816_v54, %v14354_v17  ;;  %v3836_v7 = vadd.f32 %v3804_v13, %v14355_v58  ;;  %v3949_v46 = vadd.f32 %v14356_v61, %v3862_v0  ;;  %v11651_v21 = vadd.f32 %v4351_v10, %v4040_v56  ;;  %v11666_v13 = vpop.permute.xlu0 %4086  ;;  %v14362_v10 = vld [vmem:[#allocation25_spill] sm:$0xff]  ;;  %v14363_v17 = vld [vmem:[#allocation154_spill] sm:$0xff]  ;;  %v14364_v58 = vld [vmem:[#allocation199_spill] sm:$0xff] }
 0x52d   : > { %v3824_v48 = vmul.f32 %v14333_v53, %v3641_v49  ;;  %v3617_v44 = vsel %vm801_vm10, %v14359_v8, %v14358_v24  ;;  %v11660_v57 = vadd.f32 %v4339_v42, %v4028_v28  ;;  %v4131_v54 = vsel %vm801_vm10, %v11653_v4, %v14361_v30 }
 0x52e   : > { %14357 = vst [vmem:[#allocation214_spill] sm:$0xff] %v11651_v21  ;;  %v3812_v0 = vmul.f32 %v14333_v53, %v3629_v39  ;;  %v4014_v56 = vadd.f32 %v3982_v27, %v3927_v32  ;;  %v4142_v49 = vsel %vm503_vm11, %v4131_v54, 0.0  ;;  %v4120_v24 = vsel %vm801_vm10, %v11527_v20, %v11666_v13  ;;  %v14365_v32 = vld [vmem:[#allocation162_spill] sm:$0xff]  ;;  %v14367_v20 = vld [vmem:[#allocation151_spill] sm:$0xff]  ;;  %v14373_v21 = vld [vmem:[#allocation153_spill] sm:$0xff] }
 0x52f   : > { %14360 = vst [vmem:[#allocation142_spill] sm:$0xff] %v11660_v57  ;;  %v3990_v33 = vmul.f32 %v14352_v11, %v14362_v10  ;;  %v4036_v28 = vadd.f32 %v4004_v31, %v3949_v46  ;;  %v4325_v34 = vmul.f32 %v11552_v14, %v4142_v49  ;;  %v4347_v42 = vmul.f32 %v11416_v59, %v4120_v24  ;;  %v11689_v57 = vpop.permute.xlu1 %4096  ;;  %v14368_v31 = vld [vmem:[#allocation87_spill] sm:$0xff] }
 0x530   : > { %v11681_v39 = vmul.f32 %v14364_v58, %v14363_v17  ;;  %v3276_v61 = vsel %vm510_vm13, %v14365_v32, 0.0  ;;  %v3637_v30 = vsel %vm503_vm11, %v3617_v44, 0.0  ;;  %v3935_v54 = vadd.f32 %v14367_v20, %v3848_v51  ;;  %v11701_v10 = vpop.permute.xlu0 %4090  ;;  %v14370_v17 = vld [vmem:[#allocation57_spill] sm:$0xff]  ;;  %v14372_v32 = vld [vmem:[#allocation31_spill] sm:$0xff] }
 0x531   : > { %v3978_v46 = vmul.f32 %v14352_v11, %v14368_v31  ;;  %v11693_v49 = vadd.f32 %v4325_v34, %v4014_v56  ;;  %v11695_v59 = vadd.f32 %v4347_v42, %v4036_v28  ;;  %v4133_v24 = vsel %vm801_vm10, %v11689_v57, %v11252_v41  ;;  %v14371_v44 = vld [vmem:[#allocation141_spill] sm:$0xff]  ;;  %v14374_v28 = vld [vmem:[#allocation152_spill] sm:$0xff] }
 0x532   : > { %v3261_v51 = vsel %vm938_vm12, %v14371_v44, %v14370_v17  ;;  %v3856_v20 = vadd.f32 %v3824_v48, %v14372_v32  ;;  %v3923_v31 = vadd.f32 %v14373_v21, %v3836_v7  ;;  %v4150_v56 = vsel %vm503_vm11, %v4133_v24, 0.0  ;;  %v14375_v48 = vld [vmem:[#allocation29_spill] sm:$0xff] }
 0x533   : > { %14369 = vst [vmem:[#allocation164_spill] sm:$0xff] %v11695_v59  ;;  %v3844_v34 = vadd.f32 %v3812_v0, %v14374_v28  ;;  %v4022_v42 = vadd.f32 %v3990_v33, %v3935_v54  ;;  %v4333_v59 = vmul.f32 %v11552_v14, %v4150_v56  ;;  %v4130_v41 = vsel %vm801_vm10, %v11701_v10, %v11261_v40  ;;  %v11723_v24 = vpop.permute.xlu1 %4100  ;;  %v14376_v33 = vld [vmem:[#allocation83_spill] sm:$0xff] }
 0x534   : > { %v3472_v3 = vmul.f32 %v14364_v58, %v3276_v61  ;;  %v3820_v17 = vmul.f32 %v14333_v53, %v3637_v30  ;;  %v3998_v7 = vmul.f32 %v14352_v11, %v14375_v48  ;;  %v4138_v21 = vsel %vm503_vm11, %v4130_v41, 0.0  ;;  %v11730_v32 = vpop.permute.xlu0 %4094  ;;  %v14377_v61 = vld [vmem:[#allocation188_spill] sm:$0xff]  ;;  %v14378_v56 = vld [vmem:[#allocation175_spill] sm:$0xff] }
 0x535   : > { %v4010_v0 = vadd.f32 %v3978_v46, %v3923_v31  ;;  %v3986_v54 = vmul.f32 %v14352_v11, %v14376_v33  ;;  %v11727_v44 = vadd.f32 %v4333_v59, %v4022_v42  ;;  %v4321_v40 = vmul.f32 %v11552_v14, %v4138_v21  ;;  %v14379_v59 = vld [vmem:[#allocation134_spill] sm:$0xff] }
 0x536   : > { %v3284_v53 = vsel %vm510_vm13, %v3261_v51, 0.0  ;;  %v3590_v30 = vsel %vm801_vm10, %v14377_v61, %v14326_v15  ;;  %v3943_v28 = vadd.f32 %v14378_v56, %v3856_v20  ;;  %v4135_v46 = vsel %vm801_vm10, %v11723_v24, %v11295_v23  ;;  %v14380_v15 = vld [vmem:[#allocation160_spill] sm:$0xff]  ;;  %v14382_v56 = vld [vmem:[#allocation190_spill] sm:$0xff] }
 0x537   : > { %v3931_v31 = vadd.f32 %v14379_v59, %v3844_v34  ;;  %v11744_v42 = vadd.f32 %v4321_v40, %v4010_v0  ;;  %v4158_v41 = vsel %vm503_vm11, %v4135_v46, 0.0  ;;  %v4132_v51 = vsel %vm801_vm10, %v11730_v32, %v11309_v38  ;;  %v11756_v33 = vpop.permute.xlu1 %4104  ;;  %v14381_v34 = vld [vmem:[#allocation56_spill] sm:$0xff] }
 0x538   : > { %v3852_v48 = vadd.f32 %v3820_v17, %v14380_v15  ;;  %v4030_v20 = vadd.f32 %v3998_v7, %v3943_v28  ;;  %v4341_v21 = vmul.f32 %v11552_v14, %v4158_v41  ;;  %v4146_v23 = vsel %vm503_vm11, %v4132_v51, 0.0  ;;  %v11767_v17 = vpop.permute.xlu0 %4098  ;;  %v14386_v15 = vld [vmem:[#allocation47_spill] sm:$0xff] }
 0x539   : > { %v3592_v0 = vsel %vm801_vm10, %v14381_v34, %v14335_v47  ;;  %v4018_v40 = vadd.f32 %v3986_v54, %v3931_v31  ;;  %v4329_v61 = vmul.f32 %v11552_v14, %v4146_v23  ;;  %v4137_v38 = vsel %vm801_vm10, %v11756_v33, %v11347_v36  ;;  %v14383_v54 = vld [vmem:[#allocation99_spill] sm:$0xff]  ;;  %v14384_v31 = vld [vmem:[#allocation158_spill] sm:$0xff] }
 0x53a   : > { %v3480_v7 = vmul.f32 %v14364_v58, %v3284_v53  ;;  %v3994_v28 = vmul.f32 %v14352_v11, %v14382_v56  ;;  %v11772_v46 = vadd.f32 %v4341_v21, %v4030_v20  ;;  %v4166_v47 = vsel %vm503_vm11, %v4137_v38, 0.0  ;;  %v14385_v11 = vld [vmem:[#allocation135_spill] sm:$0xff]  ;;  %v14389_v56 = vld [vmem:[#allocation34_spill] sm:$0xff] }
 0x53b   : > { %v3811_v59 = vmul.f32 %v14383_v54, %v3590_v30  ;;  %v3589_v41 = vsel %vm801_vm10, %v14384_v31, %v14337_v25  ;;  %v11781_v36 = vadd.f32 %v4329_v61, %v4018_v40  ;;  %v4349_v51 = vmul.f32 %v11552_v14, %v4166_v47  ;;  %v11794_v21 = vpop.permute.xlu1 %4172  ;;  %v14387_v25 = vld [vmem:[#allocation167_spill] sm:$0xff] }
 0x53c   : > { %v3819_v58 = vmul.f32 %v14383_v54, %v3592_v0  ;;  %v3594_v53 = vsel %vm801_vm10, %v14385_v11, %v14342_v45  ;;  %v3939_v20 = vadd.f32 %v14386_v15, %v3852_v48  ;;  %v4134_v30 = vsel %vm801_vm10, %v11767_v17, %v11356_v2  ;;  %v14388_v45 = vld [vmem:[#allocation76_spill] sm:$0xff]  ;;  %v11809_v40 = vpop.permute.xlu0 %4102  ;;  %v14391_v47 = vld [vmem:[#allocation95_spill] sm:$0xff] }
 0x53d   : > { %v3591_v23 = vsel %vm801_vm10, %v14387_v25, %v14347_v55  ;;  %v3593_v34 = vsel %vm801_vm10, %v14324_v26, %v14359_v8  ;;  %v11805_v0 = vadd.f32 %v4349_v51, %v14388_v45  ;;  %v4154_v48 = vsel %vm503_vm11, %v4134_v30, 0.0  ;;  %v14390_v26 = vld [vmem:[#allocation211_spill] sm:$0xff]  ;;  %v14394_v25 = vld [vmem:[#allocation38_spill] sm:$0xff] }
 0x53e   : > { %v3807_v2 = vmul.f32 %v14383_v54, %v3589_v41  ;;  %v4026_v61 = vadd.f32 %v3994_v28, %v3939_v20  ;;  %v4337_v38 = vmul.f32 %v11552_v14, %v4154_v48  ;;  %v4136_v55 = vsel %vm801_vm10, %v11809_v40, %v11397_v62  ;;  %v14392_v31 = vld [vmem:[#allocation163_spill] sm:$0xff]  ;;  %v14395_v48 = vld [vmem:[#allocation148_spill] sm:$0xff] }
 0x53f   : > { %v3508_v8 = vadd.f32 %v14390_v26, %v14389_v56  ;;  %v3496_v51 = vadd.f32 %v14392_v31, %v14391_v47  ;;  %v3827_v11 = vmul.f32 %v14383_v54, %v3594_v53  ;;  %v4162_v15 = vsel %vm503_vm11, %v4136_v55, 0.0  ;;  %v11829_v62 = vpop.permute.xlu1 %4176  ;;  %v14396_v26 = vld [vmem:[#allocation147_spill] sm:$0xff] }
 0x540   : > { %v3815_v28 = vmul.f32 %v14383_v54, %v3591_v23  ;;  %v3823_v41 = vmul.f32 %v14383_v54, %v3593_v34  ;;  %v11826_v20 = vadd.f32 %v4337_v38, %v4026_v61  ;;  %v4345_v30 = vmul.f32 %v11552_v14, %v4162_v15  ;;  %v14397_v47 = vld [vmem:[#allocation67_spill] sm:$0xff]  ;;  %v11838_v23 = vpop.permute.xlu0 %4170  ;;  %v14399_v14 = vld [vmem:[#allocation22_spill] sm:$0xff] }
 0x541   : > { %v3516_v45 = vadd.f32 %v11681_v39, %v14394_v25  ;;  %v3504_v56 = vadd.f32 %v3472_v3, %v14395_v48  ;;  %v3512_v53 = vadd.f32 %v3480_v7, %v14396_v26  ;;  %v3756_v55 = vsel %vm510_vm13, %v14397_v47, 0.0  ;;  %v14398_v54 = vld [vmem:[#allocation127_spill] sm:$0xff]  ;;  %v14401_v39 = vld [vmem:[#allocation186_spill] sm:$0xff]  ;;  %v14402_v3 = vld [vmem:[#allocation37_spill] sm:$0xff] }
 0x542   : > { %14393 = vst [vmem:[#allocation108_spill] sm:$0xff] %v11826_v20  ;;  %v3843_v34 = vadd.f32 %v3811_v59, %v14398_v54  ;;  %v3851_v61 = vadd.f32 %v3819_v58, %v3508_v8  ;;  %v3839_v38 = vadd.f32 %v3807_v2, %v3496_v51  ;;  %v11842_v31 = vadd.f32 %v4345_v30, %v14399_v14  ;;  %v14400_v20 = vld [vmem:[#allocation114_spill] sm:$0xff]  ;;  %v14405_v8 = vld [vmem:[#allocation159_spill] sm:$0xff] }
 0x543   : > { %v3859_v15 = vadd.f32 %v3827_v11, %v3516_v45  ;;  %v3906_v25 = vmul.f32 %v14401_v39, %v14400_v20  ;;  %v3894_v7 = vmul.f32 %v14401_v39, %v14402_v3  ;;  %v14403_v48 = vld [vmem:[#allocation126_spill] sm:$0xff]  ;;  %v3847_v47 = vadd.f32 %v3815_v28, %v3504_v56  ;;  %v11857_v2 = vpop.permute.xlu1 %4180  ;;  %v14406_v11 = vld [vmem:[#allocation128_spill] sm:$0xff]  ;;  %v14409_v56 = vld [vmem:[#allocation227_spill] sm:$0xff] }
 0x544   : > { %v11850_v26 = vrot.slane %v11337_v37, %v14403_v48  ;;  %v3855_v1 = vadd.f32 %v3823_v41, %v3512_v53  ;;  %v3985_v59 = vmul.f32 %v14404_v35, %v3756_v55  ;;  %v4107_v58 = vsel %vm801_vm10, %v11516_v12, %v11653_v4  ;;  %v14407_v37 = vld [vmem:[#allocation203_spill] sm:$0xff]  ;;  %v11868_v45 = vpop.permute.xlu0 %4174  ;;  %v14411_v3 = vld [vmem:[#allocation16_spill] sm:$0xff] }
 0x545   : > { %v3764_v51 = vsel %vm510_vm13, %v14405_v8, 0.0  ;;  %v3914_v20 = vmul.f32 %v14401_v39, %v14406_v11  ;;  %v3902_v28 = vmul.f32 %v14401_v39, %v14407_v37  ;;  %v14408_v41 = vld [vmem:[#allocation195_spill] sm:$0xff]  ;;  %v3930_v53 = vadd.f32 %v14409_v56, %v3843_v34 }
 0x546   : > { %v3910_v30 = vmul.f32 %v14401_v39, %v14408_v41  ;;  %v3938_v12 = vadd.f32 %v3906_v25, %v3851_v61  ;;  %v3926_v4 = vadd.f32 %v3894_v7, %v3839_v38  ;;  %v14410_v55 = vld [vmem:[#allocation179_spill] sm:$0xff]  ;;  %v3772_v8 = vsel %vm510_vm13, %v14411_v3, 0.0 }
 0x547   : > { %v3752_v54 = vsel %vm510_vm13, %v14410_v55, 0.0  ;;  %v3946_v14 = vadd.f32 %v3914_v20, %v3859_v15  ;;  %v4328_v11 = vmul.f32 %v11850_v26, %v4107_v58  ;;  %v4109_v39 = vsel %vm801_vm10, %v11548_v29, %v11689_v57  ;;  %v4473_v37 = vld [vmem:[#allocation8 + $0x20] ss:$8 sm:$0xf]  ;;  %v11883_v7 = vpop.permute.xlu1 %4184 }
 0x548   : > { %v4017_v34 = vadd.f32 %v3985_v59, %v3930_v53  ;;  %v3993_v61 = vmul.f32 %v14404_v35, %v3764_v51  ;;  %v3934_v38 = vadd.f32 %v3902_v28, %v3847_v47  ;;  %v3942_v25 = vadd.f32 %v3910_v30, %v3855_v1  ;;  %v11888_v15 = vld [vmem:[%s12416_s6] sm:$0xf]  ;;  %v14412_v20 = vld [vmem:[#allocation26_spill] sm:$0xff]  ;;  %v11902_v57 = vpop.permute.xlu0 %4178 }
 0x549   : > { %v3981_v58 = vmul.f32 %v14404_v35, %v3752_v54  ;;  %v3760_v41 = vsel %vm510_vm13, %v14412_v20, 0.0  ;;  %v4106_v29 = vsel %vm801_vm10, %v11568_v43, %v11701_v10  ;;  %v4111_v1 = vsel %vm801_vm10, %v11588_v9, %v11723_v24  ;;  %v14413_v59 = vld [vmem:[#allocation210_spill] sm:$0xff]  ;;  %v14415_v20 = vld [vmem:[#allocation117_spill] sm:$0xff] }
 0x54a   : > { %v4001_v47 = vmul.f32 %v14404_v35, %v3772_v8  ;;  %v3768_v51 = vsel %vm510_vm13, %v14413_v59, 0.0  ;;  %v4336_v28 = vmul.f32 %v11850_v26, %v4109_v39  ;;  %v11910_v30 = vrot.slane %v4473_v37, %v14403_v48 }
 0x54b   : > { %v4360_v56 = vadd.f32 %v4328_v11, %v4017_v34  ;;  %v4108_v43 = vsel %vm801_vm10, %v11603_v18, %v11730_v32  ;;  %v11918_v9 = vrot.slane %v11888_v15, %v14403_v48  ;;  %v11921_v10 = vrot.slane %v4473_v37, %v14334_v50  ;;  %v11926_v3 = vpop.permute.xlu1 %4220 }
 0x54c   : > { %v4025_v24 = vadd.f32 %v3993_v61, %v3938_v12  ;;  %v3989_v53 = vmul.f32 %v14404_v35, %v3760_v41  ;;  %v4324_v55 = vmul.f32 %v11850_v26, %v4106_v29  ;;  %v4344_v54 = vmul.f32 %v11850_v26, %v4111_v1  ;;  %v11933_v32 = vpop.permute.xlu0 %4182  ;;  %v14414_v61 = vld [vmem:[#allocation149_spill] sm:$0xff]  ;;  %v14416_v29 = vld [vmem:[#allocation119_spill] sm:$0xff] }
 0x54d   : > { %v4013_v8 = vadd.f32 %v3981_v58, %v3926_v4  ;;  %v3997_v11 = vmul.f32 %v14404_v35, %v3768_v51  ;;  %v4259_v18 = vsel %vm938_vm12, %v11926_v3, %v11794_v21  ;;  %v11937_v48 = vrot.slane %v11888_v15, %v14334_v50 }
 0x54e   : > { %v4033_v12 = vadd.f32 %v4001_v47, %v3946_v14  ;;  %v4368_v39 = vadd.f32 %v4336_v28, %v4025_v24  ;;  %v4332_v34 = vmul.f32 %v11850_v26, %v4108_v43  ;;  %v4273_v4 = vsel %vm510_vm13, %v4259_v18, 0.0  ;;  %v14417_v24 = vld [vmem:[#allocation220_spill] sm:$0xff]  ;;  %v14419_v18 = vld [vmem:[#allocation222_spill] sm:$0xff] }
 0x54f   : > { %v4447_v35 = vadd.f32 %v14414_v61, %v4360_v56  ;;  %v4502_v58 = vmul.f32 %v11910_v30, %v4273_v4  ;;  %v11945_v41 = vrot.slane %v4473_v37, %v14415_v20  ;;  %v11948_v1 = vrot.slane %v4473_v37, %v14416_v29  ;;  %v11954_v47 = vpop.permute.xlu1 %4224 }
 0x550   : > { %v4021_v59 = vadd.f32 %v3989_v53, %v3934_v38  ;;  %v4356_v50 = vadd.f32 %v4324_v55, %v4013_v8  ;;  %v4376_v51 = vadd.f32 %v4344_v54, %v4033_v12  ;;  %v4113_v14 = vsel %vm801_vm10, %v11623_v60, %v11756_v33  ;;  %v11964_v38 = vpop.permute.xlu0 %4218  ;;  %v14418_v8 = vld [vmem:[#allocation221_spill] sm:$0xff] }
 0x551   : > { %v4029_v28 = vadd.f32 %v3997_v11, %v3942_v25  ;;  %v4110_v56 = vsel %vm801_vm10, %v11634_v16, %v11767_v17  ;;  %v4534_v43 = vadd.f32 %v4502_v58, %v4447_v35  ;;  %v4261_v37 = vsel %vm938_vm12, %v11954_v47, %v11829_v62  ;;  %v5103_v35 = vld [vmem:[%s5582_s1 + $0x38] sm:$0xff] }
 0x552   : > { %v4455_v53 = vadd.f32 %v14417_v24, %v4368_v39  ;;  %v4364_v60 = vadd.f32 %v4332_v34, %v4021_v59  ;;  %v4281_v33 = vsel %vm510_vm13, %v4261_v37, 0.0  ;;  %v4258_v16 = vsel %vm938_vm12, %v11964_v38, %v11838_v23 }
 0x553   : > { %v4352_v17 = vmul.f32 %v11850_v26, %v4113_v14  ;;  %v4588_v25 = vadd.f32 %v11918_v9, %v4534_v43  ;;  %v4510_v55 = vmul.f32 %v11910_v30, %v4281_v33  ;;  %v4269_v54 = vsel %vm510_vm13, %v4258_v16, 0.0  ;;  %v11982_v4 = vpop.permute.xlu1 %4228  ;;  %v14420_v14 = vld [vmem:[#allocation218_spill] sm:$0xff] }
 0x554   : > { %v4443_v11 = vadd.f32 %v14418_v8, %v4356_v50  ;;  %v4463_v12 = vadd.f32 %v14419_v18, %v4376_v51  ;;  %v4340_v39 = vmul.f32 %v11850_v26, %v4110_v56  ;;  %v4498_v34 = vmul.f32 %v11910_v30, %v4269_v54  ;;  %v11993_v51 = vpop.permute.xlu0 %4222  ;;  %v5104_v8 = vld [vmem:[%s5582_s1 + $0x78] sm:$0xff] }
 0x555   : > { %v4112_v61 = vsel %vm801_vm10, %v11666_v13, %v11809_v40  ;;  %v4620_v58 = vadd.f32 %v5103_v35, %v4588_v25  ;;  %v4542_v59 = vadd.f32 %v4510_v55, %v4455_v53  ;;  %v4263_v50 = vsel %vm938_vm12, %v11982_v4, %v11857_v2  ;;  %v14421_v40 = vld [vmem:[#allocation20_spill] sm:$0xff] }
 0x556   : > { %v4451_v56 = vadd.f32 %v14420_v14, %v4364_v60  ;;  %v4530_v43 = vadd.f32 %v4498_v34, %v4443_v11  ;;  %v4289_v37 = vsel %vm510_vm13, %v4263_v50, 0.0  ;;  %v4260_v13 = vsel %vm938_vm12, %v11993_v51, %v11868_v45 }
 0x557   : > { %v4384_v24 = vadd.f32 %v4352_v17, %v14421_v40  ;;  %4652 = vst [vmem:[%s12005_s16 + $0x38] sm:$0xff] %v4620_v58  ;;  %v4596_v53 = vadd.f32 %v11918_v9, %v4542_v59  ;;  %v4518_v60 = vmul.f32 %v11910_v30, %v4289_v37  ;;  %v4277_v33 = vsel %vm510_vm13, %v4260_v13, 0.0  ;;  %v12015_v54 = vpop.permute.xlu1 %4232  ;;  %v14422_v59 = vld [vmem:[#allocation223_spill] sm:$0xff]  ;;  %v14424_v13 = vld [vmem:[#allocation49_spill] sm:$0xff] }
 0x558   : > { %v4372_v16 = vadd.f32 %v4340_v39, %v4029_v28  ;;  %v4348_v25 = vmul.f32 %v11850_v26, %v4112_v61  ;;  %v4584_v55 = vadd.f32 %v11918_v9, %v4530_v43  ;;  %v4506_v17 = vmul.f32 %v11910_v30, %v4277_v33  ;;  %v12022_v35 = vpop.permute.xlu0 %4226  ;;  %v5105_v28 = vld [vmem:[%s5582_s1 + $0x18] sm:$0xff] }
 0x559   : > { %v4628_v11 = vadd.f32 %v5104_v8, %v4596_v53  ;;  %v4550_v18 = vadd.f32 %v4518_v60, %v4463_v12  ;;  %v4265_v34 = vsel %vm938_vm12, %v12015_v54, %v11883_v7  ;;  %v12026_v26 = vrot.slane %v11888_v15, %v14415_v20  ;;  %v5106_v33 = vld [vmem:[%s5582_s1 + $0xb8] sm:$0xff]  ;;  %v14425_v8 = vld [vmem:[#allocation53_spill] sm:$0xff] }
 0x55a   : > { %v4616_v39 = vadd.f32 %v5105_v28, %v4584_v55  ;;  %v4538_v61 = vadd.f32 %v4506_v17, %v4451_v56  ;;  %v4297_v58 = vsel %vm510_vm13, %v4265_v34, 0.0  ;;  %v4262_v12 = vsel %vm938_vm12, %v12022_v35, %v11902_v57  ;;  %v14423_v56 = vld [vmem:[#allocation224_spill] sm:$0xff] }
 0x55b   : > { %v4471_v50 = vadd.f32 %v14422_v59, %v4384_v24  ;;  %4660 = vst [vmem:[%s12005_s16 + $0x78] sm:$0xff] %v4628_v11  ;;  %v4604_v14 = vadd.f32 %v11918_v9, %v4550_v18  ;;  %v4526_v20 = vmul.f32 %v11910_v30, %v4297_v58  ;;  %v4285_v43 = vsel %vm510_vm13, %v4262_v12, 0.0  ;;  %v12046_v24 = vpop.permute.xlu1 %4188  ;;  %v5107_v18 = vld [vmem:[%s5582_s1 + $0x58] sm:$0xff]  ;;  %v14426_v58 = vld [vmem:[#allocation176_spill] sm:$0xff]  ;;  %v14427_v12 = vld [vmem:[#allocation185_spill] sm:$0xff] }
 0x55c   : > { %v4459_v37 = vadd.f32 %v14423_v56, %v4372_v16  ;;  %v4380_v40 = vadd.f32 %v4348_v25, %v14424_v13  ;;  %4648 = vst [vmem:[%s12005_s16 + $0x18] sm:$0xff] %v4616_v39  ;;  %v4592_v53 = vadd.f32 %v11918_v9, %v4538_v61  ;;  %v4514_v60 = vmul.f32 %v11910_v30, %v4285_v43  ;;  %v12055_v25 = vpop.permute.xlu0 %4230  ;;  %v5108_v13 = vld [vmem:[%s5582_s1 + $0xf8] sm:$0xff] }
 0x55d   : > { %v4636_v55 = vadd.f32 %v5106_v33, %v4604_v14  ;;  %v4558_v17 = vadd.f32 %v4526_v20, %v4471_v50  ;;  %v4444_v11 = vadd.f32 %v14425_v8, %v11693_v49  ;;  %v4251_v16 = vsel %vm938_vm12, %v11794_v21, %v12046_v24  ;;  %v14428_v14 = vld [vmem:[#allocation225_spill] sm:$0xff] }
 0x55e   : > { %v4624_v34 = vadd.f32 %v5107_v18, %v4592_v53  ;;  %v4546_v28 = vadd.f32 %v4514_v60, %v4459_v37  ;;  %v4499_v39 = vmul.f32 %v11921_v10, %v4251_v16  ;;  %v4264_v61 = vsel %vm938_vm12, %v12055_v25, %v11933_v32  ;;  %v14429_v60 = vld [vmem:[#allocation191_spill] sm:$0xff] }
 0x55f   : > { %4668 = vst [vmem:[%s12005_s16 + $0xb8] sm:$0xff] %v4636_v55  ;;  %v4612_v49 = vadd.f32 %v11918_v9, %v4558_v17  ;;  %v4293_v21 = vsel %vm510_vm13, %v4264_v61, 0.0  ;;  %v12069_v59 = vadd.f32 %v14427_v12, %v14426_v58  ;;  %v12073_v50 = vrot.slane %v11888_v15, %v14416_v29  ;;  %v12079_v27 = vpop.permute.xlu1 %4192 }
 0x560   : > { %v4467_v20 = vadd.f32 %v14428_v14, %v4380_v40  ;;  %4656 = vst [vmem:[%s12005_s16 + $0x58] sm:$0xff] %v4624_v34  ;;  %v4600_v43 = vadd.f32 %v11918_v9, %v4546_v28  ;;  %v4531_v56 = vadd.f32 %v4499_v39, %v4444_v11  ;;  %v4522_v37 = vmul.f32 %v11910_v30, %v4293_v21  ;;  %v12088_v29 = vpop.permute.xlu0 %4186  ;;  %v14430_v40 = vld [vmem:[#allocation131_spill] sm:$0xff]  ;;  %v14432_v34 = vld [vmem:[#allocation106_spill] sm:$0xff]  ;;  %v14434_v39 = vld [vmem:[#allocation144_spill] sm:$0xff] }
 0x561   : > { %v4644_v53 = vadd.f32 %v5108_v13, %v4612_v49  ;;  %v4452_v33 = vadd.f32 %v14429_v60, %v11727_v44  ;;  %v4253_v15 = vsel %vm938_vm12, %v11829_v62, %v12079_v27  ;;  %v12092_v55 = vadd.f32 %v14430_v40, %v11451_v22  ;;  %v5109_v30 = vld [vmem:[%s5582_s1 + $0x98] sm:$0xff]  ;;  %v14431_v44 = vld [vmem:[#allocation161_spill] sm:$0xff]  ;;  %v5110_v49 = vld [vmem:[%s5582_s1 + $0x20] sm:$0xff] }
 0x562   : > { %v4632_v17 = vadd.f32 %v5109_v30, %v4600_v43  ;;  %v4585_v8 = vadd.f32 %v11937_v48, %v4531_v56  ;;  %v4554_v11 = vadd.f32 %v4522_v37, %v4467_v20  ;;  %v4507_v16 = vmul.f32 %v11921_v10, %v4253_v15  ;;  %v14433_v22 = vld [vmem:[#allocation165_spill] sm:$0xff]  ;;  %v14436_v56 = vld [vmem:[#allocation48_spill] sm:$0xff]  ;;  %v14437_v37 = vld [vmem:[#allocation70_spill] sm:$0xff] }
 0x563   : > { %4676 = vst [vmem:[%s12005_s16 + $0xf8] sm:$0xff] %v4644_v53  ;;  %v4440_v18 = vadd.f32 %v14431_v44, %v11744_v42  ;;  %v4250_v62 = vsel %vm938_vm12, %v11838_v23, %v12088_v29  ;;  %v12106_v28 = vadd.f32 %v14433_v22, %v14432_v34  ;;  %v12110_v61 = vadd.f32 %v14434_v39, %v11485_v6  ;;  %v12116_v14 = vpop.permute.xlu1 %4196  ;;  %v14435_v23 = vld [vmem:[#allocation192_spill] sm:$0xff]  ;;  %v14438_v13 = vld [vmem:[#allocation121_spill] sm:$0xff]  ;;  %v5111_v60 = vld [vmem:[%s5582_s1 + $0xd8] sm:$0xff] }
 0x564   : > { %4664 = vst [vmem:[%s12005_s16 + $0x98] sm:$0xff] %v4632_v17  ;;  %v4617_v21 = vadd.f32 %v5110_v49, %v4585_v8  ;;  %v4608_v42 = vadd.f32 %v11918_v9, %v4554_v11  ;;  %v4539_v58 = vadd.f32 %v4507_v16, %v4452_v33  ;;  %v4495_v12 = vmul.f32 %v11921_v10, %v4250_v62  ;;  %v12124_v43 = vpop.permute.xlu0 %4190  ;;  %v14441_v11 = vld [vmem:[#allocation91_spill] sm:$0xff]  ;;  %v5112_v44 = vld [vmem:[%s5582_s1 + $0x60] sm:$0xff] }
 0x565   : > { %v4460_v20 = vadd.f32 %v14435_v23, %v11772_v46  ;;  %v4255_v6 = vsel %vm938_vm12, %v11857_v2, %v12116_v14  ;;  %v12128_v9 = vadd.f32 %v14437_v37, %v14436_v56  ;;  %v12132_v53 = vadd.f32 %v14438_v13, %v11514_v19  ;;  %v14439_v2 = vld [vmem:[#allocation23_spill] sm:$0xff]  ;;  %v14440_v19 = vld [vmem:[#allocation124_spill] sm:$0xff] }
 0x566   : > { %4649 = vst [vmem:[%s12005_s16 + $0x20] sm:$0xff] %v4617_v21  ;;  %v4640_v33 = vadd.f32 %v5111_v60, %v4608_v42  ;;  %v4593_v46 = vadd.f32 %v11937_v48, %v4539_v58  ;;  %v4527_v15 = vadd.f32 %v4495_v12, %v4440_v18  ;;  %v4515_v40 = vmul.f32 %v11921_v10, %v4255_v6  ;;  %v14443_v49 = vld [vmem:[#allocation39_spill] sm:$0xff]  ;;  %v14444_v21 = vld [vmem:[#allocation120_spill] sm:$0xff]  ;;  %v14446_v12 = vld [vmem:[#allocation93_spill] sm:$0xff] }
 0x567   : > { %v4448_v30 = vadd.f32 %v14439_v2, %v11781_v36  ;;  %v4252_v17 = vsel %vm938_vm12, %v11868_v45, %v12124_v43  ;;  %v4446_v8 = vadd.f32 %v14440_v19, %v11546_v52  ;;  %v12148_v16 = vadd.f32 %v14441_v11, %v11521_v5  ;;  %v14442_v45 = vld [vmem:[#allocation32_spill] sm:$0xff]  ;;  %v14451_v2 = vld [vmem:[#allocation71_spill] sm:$0xff] }
 0x568   : > { %4672 = vst [vmem:[%s12005_s16 + $0xd8] sm:$0xff] %v4640_v33  ;;  %v4625_v18 = vadd.f32 %v5112_v44, %v4593_v46  ;;  %v4581_v62 = vadd.f32 %v11937_v48, %v4527_v15  ;;  %v4547_v36 = vadd.f32 %v4515_v40, %v4460_v20  ;;  %v4503_v34 = vmul.f32 %v11921_v10, %v4252_v17  ;;  %v12154_v22 = vpop.permute.xlu1 %4200  ;;  %v14445_v58 = vld [vmem:[#allocation52_spill] sm:$0xff]  ;;  %v14449_v46 = vld [vmem:[#allocation55_spill] sm:$0xff]  ;;  %v14450_v15 = vld [vmem:[#allocation194_spill] sm:$0xff] }
 0x569   : > { %v4468_v39 = vadd.f32 %v14442_v45, %v11805_v0  ;;  %v4257_v5 = vsel %vm938_vm12, %v11883_v7, %v12154_v22  ;;  %v12162_v52 = vpop.permute.xlu0 %4194  ;;  %v12166_v42 = vadd.f32 %v14444_v21, %v14443_v49  ;;  %v12170_v23 = vadd.f32 %v14446_v12, %v14445_v58  ;;  %v5113_v20 = vld [vmem:[%s5582_s1] sm:$0xff]  ;;  %v14448_v7 = vld [vmem:[#allocation193_spill] sm:$0xff]  ;;  %v14452_v17 = vld [vmem:[#allocation206_spill] sm:$0xff] }
 0x56a   : > { %4657 = vst [vmem:[%s12005_s16 + $0x60] sm:$0xff] %v4625_v18  ;;  %v4613_v6 = vadd.f32 %v5113_v20, %v4581_v62  ;;  %v4601_v0 = vadd.f32 %v11937_v48, %v4547_v36  ;;  %v4535_v56 = vadd.f32 %v4503_v34, %v4448_v30  ;;  %v4523_v37 = vmul.f32 %v11921_v10, %v4257_v5  ;;  %v14447_v13 = vld [vmem:[#allocation108_spill] sm:$0xff]  ;;  %v14453_v5 = vld [vmem:[#allocation98_spill] sm:$0xff]  ;;  %v14454_v49 = vld [vmem:[#allocation41_spill] sm:$0xff] }
 0x56b   : > { %v4456_v60 = vadd.f32 %v14448_v7, %v14447_v13  ;;  %v4254_v33 = vsel %vm938_vm12, %v11902_v57, %v12162_v52  ;;  %v12184_v40 = vadd.f32 %v14450_v15, %v14449_v46  ;;  %v12188_v19 = vadd.f32 %v14452_v17, %v14451_v2  ;;  %v5114_v30 = vld [vmem:[%s5582_s1 + $0xa0] sm:$0xff]  ;;  %v14456_v58 = vld [vmem:[#allocation215_spill] sm:$0xff] }
 0x56c   : > { %4645 = vst [vmem:[%s12005_s16] sm:$0xff] %v4613_v6  ;;  %v4633_v11 = vadd.f32 %v5114_v30, %v4601_v0  ;;  %v4589_v44 = vadd.f32 %v11937_v48, %v4535_v56  ;;  %v4555_v18 = vadd.f32 %v4523_v37, %v4468_v39  ;;  %v4511_v62 = vmul.f32 %v11921_v10, %v4254_v33  ;;  %v4205_v36 = vpop.permute.xlu1 %4204  ;;  %v14455_v39 = vld [vmem:[#allocation214_spill] sm:$0xff]  ;;  %v5115_v20 = vld [vmem:[%s5582_s1 + $0x40] sm:$0xff] }
 0x56d   : > { %v4235_v57 = vsel %vm938_vm12, %v4205_v36, %v11926_v3  ;;  %v4243_v34 = vsel %vm938_vm12, %v12046_v24, %v4205_v36  ;;  %v12200_v45 = vpop.permute.xlu0 %4198  ;;  %v12204_v21 = vadd.f32 %v14454_v49, %v14453_v5  ;;  %v12208_v12 = vadd.f32 %v14456_v58, %v14455_v39  ;;  %v14457_v37 = vld [vmem:[#allocation44_spill] sm:$0xff]  ;;  %v14458_v33 = vld [vmem:[#allocation142_spill] sm:$0xff] }
 0x56e   : > { %4665 = vst [vmem:[%s12005_s16 + $0xa0] sm:$0xff] %v4633_v11  ;;  %v4621_v6 = vadd.f32 %v5115_v20, %v4589_v44  ;;  %v4609_v3 = vadd.f32 %v11937_v48, %v4555_v18  ;;  %v4543_v0 = vadd.f32 %v4511_v62, %v4456_v60  ;;  %v4500_v56 = vmul.f32 %v11945_v41, %v4243_v34  ;;  %v14459_v46 = vld [vmem:[#allocation212_spill] sm:$0xff]  ;;  %v5118_v20 = vld [vmem:[%s5582_s1 + $0x28] sm:$0xff] }
 0x56f   : > { %v4501_v24 = vmul.f32 %v11948_v1, %v4235_v57  ;;  %v4464_v13 = vadd.f32 %v14457_v37, %v11842_v31  ;;  %v4256_v7 = vsel %vm938_vm12, %v11933_v32, %v12200_v45  ;;  %v12223_v15 = vadd.f32 %v14459_v46, %v14458_v33  ;;  %v5116_v60 = vld [vmem:[%s5582_s1 + $0xe0] sm:$0xff]  ;;  %v5119_v37 = vld [vmem:[%s5582_s1 + $0x30] sm:$0xff] }
 0x570   : > { %4653 = vst [vmem:[%s12005_s16 + $0x40] sm:$0xff] %v4621_v6  ;;  %v4641_v2 = vadd.f32 %v5116_v60, %v4609_v3  ;;  %v4597_v17 = vadd.f32 %v11937_v48, %v4543_v0  ;;  %v4532_v30 = vadd.f32 %v4500_v56, %v12069_v59  ;;  %v4519_v11 = vmul.f32 %v11921_v10, %v4256_v7  ;;  %v4209_v31 = vpop.permute.xlu1 %4208  ;;  %v14460_v36 = vld [vmem:[#allocation164_spill] sm:$0xff] }
 0x571   : > { %v4533_v44 = vadd.f32 %v4501_v24, %v4446_v8  ;;  %v4237_v32 = vsel %vm938_vm12, %v4209_v31, %v11954_v47  ;;  %v4245_v18 = vsel %vm938_vm12, %v12079_v27, %v4209_v31  ;;  %v4203_v62 = vpop.permute.xlu0 %4202  ;;  %v14461_v57 = vld [vmem:[#allocation216_spill] sm:$0xff] }
 0x572   : > { %v12238_v34 = vadd.f32 %v14461_v57, %v14460_v36  ;;  %4673 = vst [vmem:[%s12005_s16 + $0xe0] sm:$0xff] %v4641_v2  ;;  %v5117_v59 = vld [vmem:[%s5582_s1 + $0x80] sm:$0xff]  ;;  %v4586_v8 = vadd.f32 %v12026_v26, %v4532_v30  ;;  %v4551_v5 = vadd.f32 %v4519_v11, %v4464_v13  ;;  %v4508_v49 = vmul.f32 %v11945_v41, %v4245_v18  ;;  %v5121_v11 = vld [vmem:[%s5582_s1 + $0x68] sm:$0xff] }
 0x573   : > { %v4629_v10 = vadd.f32 %v5117_v59, %v4597_v17  ;;  %v4587_v47 = vadd.f32 %v12073_v50, %v4533_v44  ;;  %v4509_v39 = vmul.f32 %v11948_v1, %v4237_v32  ;;  %v4234_v27 = vsel %vm938_vm12, %v4203_v62, %v11964_v38  ;;  %v5122_v32 = vld [vmem:[%s5582_s1 + $0x70] sm:$0xff] }
 0x574   : > { %v4242_v58 = vsel %vm938_vm12, %v12088_v29, %v4203_v62  ;;  %v4618_v6 = vadd.f32 %v5118_v20, %v4586_v8  ;;  %v4605_v3 = vadd.f32 %v11937_v48, %v4551_v5  ;;  %v4540_v0 = vadd.f32 %v4508_v49, %v12092_v55  ;;  %v4213_v24 = vpop.permute.xlu1 %4212  ;;  %v5120_v48 = vld [vmem:[%s5582_s1 + $0xc0] sm:$0xff]  ;;  %v5124_v49 = vld [vmem:[%s5582_s1 + $0x10] sm:$0xff] }
 0x575   : > { %4661 = vst [vmem:[%s12005_s16 + $0x80] sm:$0xff] %v4629_v10  ;;  %v4496_v56 = vmul.f32 %v11945_v41, %v4242_v58  ;;  %v4619_v13 = vadd.f32 %v5119_v37, %v4587_v47  ;;  %v4541_v38 = vadd.f32 %v4509_v39, %v12166_v42  ;;  %v4497_v7 = vmul.f32 %v11948_v1, %v4234_v27  ;;  %v4207_v33 = vpop.permute.xlu0 %4206  ;;  %v5123_v10 = vld [vmem:[%s5582_s1 + $0x8] sm:$0xff] }
 0x576   : > { %v4239_v29 = vsel %vm938_vm12, %v4213_v24, %v11982_v4  ;;  %4650 = vst [vmem:[%s12005_s16 + $0x28] sm:$0xff] %v4618_v6  ;;  %v4637_v46 = vadd.f32 %v5120_v48, %v4605_v3  ;;  %v4594_v55 = vadd.f32 %v12026_v26, %v4540_v0  ;;  %v4247_v42 = vsel %vm938_vm12, %v12116_v14, %v4213_v24  ;;  %v5125_v6 = vld [vmem:[%s5582_s1 + $0xa8] sm:$0xff]  ;;  %v5126_v0 = vld [vmem:[%s5582_s1 + $0xb0] sm:$0xff] }
 0x577   : > { %v4528_v60 = vadd.f32 %v4496_v56, %v12106_v28  ;;  %4651 = vst [vmem:[%s12005_s16 + $0x30] sm:$0xff] %v4619_v13  ;;  %v4595_v2 = vadd.f32 %v12073_v50, %v4541_v38  ;;  %v4529_v17 = vadd.f32 %v4497_v7, %v12184_v40  ;;  %v4516_v4 = vmul.f32 %v11945_v41, %v4247_v42  ;;  %v5129_v42 = vld [vmem:[%s5582_s1 + $0xe8] sm:$0xff] }
 0x578   : > { %v4517_v30 = vmul.f32 %v11948_v1, %v4239_v29  ;;  %4669 = vst [vmem:[%s12005_s16 + $0xc0] sm:$0xff] %v4637_v46  ;;  %v4626_v31 = vadd.f32 %v5121_v11, %v4594_v55  ;;  %v4236_v14 = vsel %vm938_vm12, %v4207_v33, %v11993_v51  ;;  %v4244_v40 = vsel %vm938_vm12, %v12124_v43, %v4207_v33  ;;  %v5127_v29 = vld [vmem:[%s5582_s1 + $0x48] sm:$0xff]  ;;  %v5128_v33 = vld [vmem:[%s5582_s1 + $0x50] sm:$0xff] }
 0x579   : > { %v4582_v28 = vadd.f32 %v12026_v26, %v4528_v60  ;;  %v4217_v44 = vpop.permute.xlu1 %4216  ;;  %v4627_v18 = vadd.f32 %v5122_v32, %v4595_v2  ;;  %v4583_v62 = vadd.f32 %v12073_v50, %v4529_v17  ;;  %v4548_v36 = vadd.f32 %v4516_v4, %v12110_v61  ;;  %v4211_v59 = vpop.permute.xlu0 %4210  ;;  %v5130_v17 = vld [vmem:[%s5582_s1 + $0xf0] sm:$0xff] }
 0x57a   : > { %v4549_v57 = vadd.f32 %v4517_v30, %v12188_v19  ;;  %4658 = vst [vmem:[%s12005_s16 + $0x68] sm:$0xff] %v4626_v31  ;;  %v4504_v8 = vmul.f32 %v11945_v41, %v4244_v40  ;;  %v4505_v43 = vmul.f32 %v11948_v1, %v4236_v14  ;;  %v4241_v5 = vsel %vm938_vm12, %v4217_v44, %v12015_v54  ;;  %v5132_v31 = vld [vmem:[%s5582_s1 + $0x90] sm:$0xff] }
 0x57b   : > { %v4614_v51 = vadd.f32 %v5123_v10, %v4582_v28  ;;  %4659 = vst [vmem:[%s12005_s16 + $0x70] sm:$0xff] %v4627_v18  ;;  %v4615_v61 = vadd.f32 %v5124_v49, %v4583_v62  ;;  %v4602_v19 = vadd.f32 %v12026_v26, %v4548_v36  ;;  %v4249_v39 = vsel %vm938_vm12, %v12154_v22, %v4217_v44  ;;  %v5134_v44 = vld [vmem:[%s5582_s1 + $0xd0] sm:$0xff] }
 0x57c   : > { %v4603_v47 = vadd.f32 %v12073_v50, %v4549_v57  ;;  %v4536_v27 = vadd.f32 %v4504_v8, %v12128_v9  ;;  %v4537_v58 = vadd.f32 %v4505_v43, %v12204_v21  ;;  %v4524_v54 = vmul.f32 %v11945_v41, %v4249_v39 }
 0x57d   : > { %4646 = vst [vmem:[%s12005_s16 + $0x8] sm:$0xff] %v4614_v51  ;;  %v4525_v20 = vmul.f32 %v11948_v1, %v4241_v5  ;;  %4647 = vst [vmem:[%s12005_s16 + $0x10] sm:$0xff] %v4615_v61  ;;  %v4634_v3 = vadd.f32 %v5125_v6, %v4602_v19  ;;  %v4238_v22 = vsel %vm938_vm12, %v4211_v59, %v12022_v35 }
 0x57e   : > { %v4635_v56 = vadd.f32 %v5126_v0, %v4603_v47  ;;  %v4246_v9 = vsel %vm938_vm12, %v12162_v52, %v4211_v59  ;;  %v4215_v21 = vpop.permute.xlu0 %4214  ;;  %v4590_v24 = vadd.f32 %v12026_v26, %v4536_v27  ;;  %v4591_v37 = vadd.f32 %v12073_v50, %v4537_v58 }
 0x57f   : > { %v4556_v13 = vadd.f32 %v4524_v54, %v12132_v53  ;;  %v4557_v38 = vadd.f32 %v4525_v20, %v12208_v12  ;;  %4666 = vst [vmem:[%s12005_s16 + $0xa8] sm:$0xff] %v4634_v3  ;;  %v4512_v7 = vmul.f32 %v11945_v41, %v4246_v9  ;;  %v4513_v35 = vmul.f32 %v11948_v1, %v4238_v22 }
 0x580   : > { %4667 = vst [vmem:[%s12005_s16 + $0xb0] sm:$0xff] %v4635_v56  ;;  %v4240_v52 = vsel %vm938_vm12, %v4215_v21, %v12055_v25  ;;  %v4248_v53 = vsel %vm938_vm12, %v12200_v45, %v4215_v21  ;;  %v4622_v12 = vadd.f32 %v5127_v29, %v4590_v24  ;;  %v4623_v48 = vadd.f32 %v5128_v33, %v4591_v37 }
 0x581   : > { %v4610_v46 = vadd.f32 %v12026_v26, %v4556_v13  ;;  %v4611_v55 = vadd.f32 %v12073_v50, %v4557_v38  ;;  %v4544_v60 = vadd.f32 %v4512_v7, %v12148_v16  ;;  %v4545_v25 = vadd.f32 %v4513_v35, %v12223_v15 }
 0x582   : > { %v4520_v63 = vmul.f32 %v11945_v41, %v4248_v53  ;;  %v4521_v45 = vmul.f32 %v11948_v1, %v4240_v52  ;;  %4654 = vst [vmem:[%s12005_s16 + $0x48] sm:$0xff] %v4622_v12  ;;  %4655 = vst [vmem:[%s12005_s16 + $0x50] sm:$0xff] %v4623_v48  ;;  %v5131_v1 = vld [vmem:[%s5582_s1 + $0x88] sm:$0xff] }
 0x583   : > { %v4642_v2 = vadd.f32 %v5129_v42, %v4610_v46  ;;  %v4643_v4 = vadd.f32 %v5130_v17, %v4611_v55  ;;  %v4598_v30 = vadd.f32 %v12026_v26, %v4544_v60  ;;  %v4599_v16 = vadd.f32 %v12073_v50, %v4545_v25 }
 0x584   : > { %v4552_v15 = vadd.f32 %v4520_v63, %v12170_v23  ;;  %v4553_v41 = vadd.f32 %v4521_v45, %v12238_v34  ;;  %v5133_v23 = vld [vmem:[%s5582_s1 + $0xc8] sm:$0xff] }
 0x585   : > { %4674 = vst [vmem:[%s12005_s16 + $0xe8] sm:$0xff] %v4642_v2  ;;  %4675 = vst [vmem:[%s12005_s16 + $0xf0] sm:$0xff] %v4643_v4  ;;  %v4630_v11 = vadd.f32 %v5131_v1, %v4598_v30  ;;  %v4631_v28 = vadd.f32 %v5132_v31, %v4599_v16 }
 0x586   : > { %v4606_v14 = vadd.f32 %v12026_v26, %v4552_v15  ;;  %v4607_v40 = vadd.f32 %v12073_v50, %v4553_v41 }
 0x587   : > { %4662 = vst [vmem:[%s12005_s16 + $0x88] sm:$0xff] %v4630_v11  ;;  %4663 = vst [vmem:[%s12005_s16 + $0x90] sm:$0xff] %v4631_v28 }
 0x588   : > { %v4638_v34 = vadd.f32 %v5133_v23, %v4606_v14  ;;  %v4639_v32 = vadd.f32 %v5134_v44, %v4607_v40 }
 0x58a   : > { %4670 = vst [vmem:[%s12005_s16 + $0xc8] sm:$0xff] %v4638_v34  ;;  %4671 = vst [vmem:[%s12005_s16 + $0xd0] sm:$0xff] %v4639_v32 }
 0x58b   : > { %5262 = shalt.err (!%p5259_p4)
}
 0x58c   : > { %s5263_s1 = scalar_lea.hbm %s12357_s22, 4096  ;;  %s5267_s23 = scalar_lea.hbm %s12417_s7, 8192 }
 0x58d   : > { %p5264_p9 = scmp.ne.s32.totalorder %s12357_s22, %s5263_s1  ;;  %p5268_p8 = scmp.lt.u32.totalorder %s12357_s22, %s12417_s7 }
 0x58e   : > { %p5269_p13 = scmp.lt.u32.totalorder %s5267_s23, %s5263_s1  ;;  %p5271_p10 = scmp.lt.u32.totalorder %s5263_s1, %s12357_s22 }
 0x58f   : > { %p5265_p0 = pnand %p5264_p9, %p5525_p5 }
 0x590   : > { %p5270_p6 = por %p5269_p13, %p5268_p8 }
 0x591   : > { %p5266_p11 = pneg %p5265_p0 }
 0x592   : > { %p5272_p3 = por %p5271_p10, %p5270_p6 }
 0x594   : > { %p5273_p7 = pnand %p5272_p3, %p5266_p11 }
 0x596   : > { %5276 = shalt.err (!%p5273_p7)
}
 0x597   : > { %s5336_s17 = smov 512  }
 0x598   : > { %4986 = dma.vmem_to_hbm [thread:$0]  (%p5525_p5), %s12363_s12, 4096, %s12357_s22, %s4678_s28, %s5336_s17, %s5336_s17, %s5333_s30  }
 0x599 PF: > { %s14462_s18 = sld [smem:[#allocation15_spill]]  ;;  %s4707_s9 = sand.u32 1, %s5311_s24  }
 0x59a   : > { %p14464_p1 = scmp.ge.s32.totalorder %s5323_s27, 2  ;;  %s4708_s29 = scalar_lea.sflag [#allocation4], %s4707_s9 }
 0x59f   : > { %p14463_p12 = scmp.ne.s32.totalorder %s14462_s18, 0 }
 0x5a1   : > { %p5003_p2 = pnand %p14464_p1, %p14463_p12 }
 0x5a3   : > { %5306 = dma.done.wait (!%p5003_p2), %s4708_s29, 4096  }
 0x5a4   : > { %5308 = vsyncadd (!%p5003_p2), %s4708_s29, 4294963200  ;;  %p22_p4 = scmp.ge.s32.totalorder %s5490_s21, 4   ;;  %s14465_s24 = smov %s5315_s25 }
 0x5a5   : > { %s14466_s25 = smov %s5319_s26  ;;  %s14467_s26 = smov %s5521_s13 }
 0x5a6   : > { %s14468_s27 = smov %s5490_s21  ;;  %24 = sbr.rel (!%p22_p4) target bundleno = 9 (0x9), region = 121 }
 0x5ad   :  { %4713 = vsyncpa [#allocation3], 1 }
 0x5ae   :  { %4715 = vsyncpa [#allocation3 + $0x1], 1 }
 0x5af   :  { %4716 = vsyncpa [#allocation6], 1 }
 0x5b0   :  { %4717 = vsyncpa [#allocation9], 1 }
 0x5b1   :  { %4718 = vsyncpa [#allocation4], 1 }
 0x5b2   :  { %4720 = vsyncpa [#allocation4 + $0x1], 1 }

</bundles_post_ra>
